<compile_context>
chip_gen: v5e
topology: v5e:2x2
jax: 0.10.0
libtpu: 0.0.40
codegen_flags: <defaults>
</compile_context>

<pallas_src>
import math

import jax
import jax.numpy as jnp
import numpy as np
from jax.experimental import pallas as pl
from jax.experimental.pallas import tpu as pltpu


# Column-chunk widths (per 2x2-pool quadrant), padded to multiples of 128 so
# all in-kernel slices are lane-aligned and static.
_C1Q = 384            # conv1: 4x4 pooled positions x 20 ch = 320 -> 384
_C2Q = 256            # conv2: 2x2 pooled positions x 40 ch = 160 -> 256
_K1 = 1024            # conv1 LHS: unpadded input 15*8*8 = 960 -> 1024 lanes
_K2 = _C1Q            # conv2 LHS width  (= h1 width)
_K3 = _C2Q            # linear LHS width (= h2 width)
_TM_MAX = 512         # batch tile, sized for v7x's 64 MiB VMEM


# ----------------------------- Pallas kernel ------------------------------

def _fused_forward_kernel(x_ref, w1_ref, b1_ref, w2_ref, b2_ref, w3_ref,
                          b3_ref, o_ref):
    """Whole NeuralNet forward for one batch tile.

    x_ref : (TM, 1024)      bf16  NCHW-flattened unpadded input (lane-padded)
    w1_ref: (1024, 4*_C1Q)  bf16  lowered conv1 GEMM weight (pad folded in)
    b1_ref: (1, _C1Q)       f32   conv1 bias replicated over pooled positions
    w2_ref: (_C1Q, 4*_C2Q)  bf16  lowered conv2 GEMM weight
    b2_ref: (1, _C2Q)       f32   conv2 bias replicated over pooled positions
    w3_ref: (1, _C2Q)       f32   Linear weight row, permuted to our layout
    b3_ref: (1, 1)          f32
    o_ref : (TM, 1)         f32
    Uses maxpool(relu(z + b)) == relu(max_q(z) + b) (bias constant per quadrant).
    The per-quadrant GEMM results are max-reduced incrementally so only one
    (TM, C) f32 block is live at a time.
    """
    x = x_ref[...]

    # conv1 (3x3, pad 1) + ReLU + 2x2 max-pool: 4 quadrant GEMMs + running max.
    h1 = jnp.dot(x, w1_ref[:, 0 * _C1Q:1 * _C1Q],
                 preferred_element_type=jnp.float32)
    for q in range(1, 4):
        zq = jnp.dot(x, w1_ref[:, q * _C1Q:(q + 1) * _C1Q],
                     preferred_element_type=jnp.float32)
        h1 = jnp.maximum(h1, zq)
    h1 = jnp.maximum(h1 + b1_ref[...], 0.0).astype(jnp.bfloat16)   # (TM, 384)

    # conv2 (5x5, pad 2) + ReLU + 2x2 max-pool.
    h2 = jnp.dot(h1, w2_ref[:, 0 * _C2Q:1 * _C2Q],
                 preferred_element_type=jnp.float32)
    for q in range(1, 4):
        zq = jnp.dot(h1, w2_ref[:, q * _C2Q:(q + 1) * _C2Q],
                     preferred_element_type=jnp.float32)
        h2 = jnp.maximum(h2, zq)
    h2 = jnp.maximum(h2 + b2_ref[...], 0.0)                        # (TM, 256)

    # Linear(160 -> 1) on the VPU/XLU: broadcast-multiply + lane reduction.
    o_ref[...] = (jnp.sum(h2 * w3_ref[...], axis=-1, keepdims=True)
                  + b3_ref[...])


# ---------------------- offline weight lowering (once) --------------------

def _build_conv1_gemm(w1):
    """(20,15,3,3) torch conv weight -> (1024, 4*_C1Q) lowered GEMM matrix.

    Rows: UNPADDED input, NCHW flatten (ci, ih, iw) over (15, 8, 8) = 960,
    zero-padded to 1024.  The conv's spatial zero-padding is folded in via the
    valid mask (out-of-range taps get zero weight).
    Cols: (quadrant a,b | pooled pos ph,pw | out-channel co), chunk pad to 384.
    """
    a, b, ph, pw, co, ci, dh, dw = np.meshgrid(
        np.arange(2), np.arange(2), np.arange(4), np.arange(4),
        np.arange(20), np.arange(15), np.arange(3), np.arange(3), indexing="ij")
    i = 2 * ph + a                      # conv output row in 0..7
    j = 2 * pw + b                      # conv output col in 0..7
    ih = i + dh - 1                     # unpadded input row (pad=1 folded in)
    iw = j + dw - 1
    valid = (ih >= 0) & (ih < 8) & (iw >= 0) & (iw < 8)
    rows = np.where(valid, (ci * 8 + ih) * 8 + iw, 0)               # < 960
    cols = (a * 2 + b) * _C1Q + (ph * 4 + pw) * 20 + co
    vals = jnp.where(jnp.asarray(valid.ravel()),
                     w1[co.ravel(), ci.ravel(), dh.ravel(), dw.ravel()], 0.0)
    mat = jnp.zeros((_K1, 4 * _C1Q), jnp.float32)
    mat = mat.at[rows.ravel(), cols.ravel()].add(vals)   # invalid entries add 0
    return mat.astype(jnp.bfloat16)


def _build_conv2_gemm(w2):
    """(40,20,5,5) torch conv weight -> (_C1Q, 4*_C2Q) lowered GEMM matrix.

    Rows: h1 column layout (input pos ih,iw in 4x4 | channel ci), padded to 384.
    Out-of-range 5x5 window taps (the conv padding) simply get zero weight.
    """
    a, b, ph, pw, co, ci, dh, dw = np.meshgrid(
        np.arange(2), np.arange(2), np.arange(2), np.arange(2),
        np.arange(40), np.arange(20), np.arange(5), np.arange(5), indexing="ij")
    i = 2 * ph + a                      # conv2 output row in 0..3
    j = 2 * pw + b
    ih = i + dh - 2                     # conv2 input (pooled conv1) row
    iw = j + dw - 2
    valid = (ih >= 0) & (ih < 4) & (iw >= 0) & (iw < 4)
    rows = np.where(valid, (ih * 4 + iw) * 20 + ci, 0)
    cols = (a * 2 + b) * _C2Q + (ph * 2 + pw) * 40 + co
    vals = jnp.where(jnp.asarray(valid.ravel()),
                     w2[co.ravel(), ci.ravel(), dh.ravel(), dw.ravel()], 0.0)
    mat = jnp.zeros((_K2, 4 * _C2Q), jnp.float32)
    mat = mat.at[rows.ravel(), cols.ravel()].add(vals)   # invalid entries add 0
    return mat.astype(jnp.bfloat16)


def _build_linear_row(w3):
    """(1,160) torch Linear weight -> (1, _C2Q) row permuted to our h2 layout."""
    ph, pw, co = np.meshgrid(np.arange(2), np.arange(2), np.arange(40),
                             indexing="ij")
    src = co * 4 + ph * 2 + pw          # torch NCHW flatten order
    dst = (ph * 2 + pw) * 40 + co       # our (position, channel) order
    row = jnp.zeros((1, _K3), jnp.float32)
    row = row.at[0, dst.ravel()].set(w3[0, src.ravel()])
    return row                           # tiny -> keep f32


def _replicate_bias(bias_row, n_pos, width):
    """(1,C) bias -> (1,width) replicated over pooled positions, zero tail pad."""
    rep = jnp.tile(bias_row.astype(jnp.float32), (1, n_pos))
    return jnp.pad(rep, ((0, 0), (0, width - rep.shape[1])))


def prepare_params(params):
    """One-time offline lowering of torch-layout params into GEMM operands."""
    return {
        "w1g": _build_conv1_gemm(params["w1"]),
        "b1r": _replicate_bias(params["b1"], 16, _C1Q),
        "w2g": _build_conv2_gemm(params["w2"]),
        "b2r": _replicate_bias(params["b2"], 4, _C2Q),
        "w3r": _build_linear_row(params["w3"]),
        "b3": params["b3"].astype(jnp.float32),
    }


def init_params(key):
    """Deterministic PyTorch-style uniform(-1/sqrt(fan_in), 1/sqrt(fan_in)) init."""
    ks = jax.random.split(key, 6)

    def u(k, shape, fan_in):
        bnd = 1.0 / math.sqrt(fan_in)
        return jax.random.uniform(k, shape, jnp.float32, minval=-bnd, maxval=bnd)

    return {
        "w1": u(ks[0], (20, 15, 3, 3), 15 * 3 * 3),   # conv1 weight (torch layout)
        "b1": u(ks[1], (1, 20), 15 * 3 * 3),
        "w2": u(ks[2], (40, 20, 5, 5), 20 * 5 * 5),   # conv2 weight (torch layout)
        "b2": u(ks[3], (1, 40), 20 * 5 * 5),
        "w3": u(ks[4], (1, 160), 160),                # Linear weight (out, in)
        "b3": u(ks[5], (1, 1), 160),
    }


# ------------------------------- forward ----------------------------------

def neural_net_forward(prep, x):
    """Forward pass.  x: NCHW (N, 15, 8, 8).  Returns y.squeeze() like the module."""
    if x.ndim == 3:                       # missing batch dim
        x = x[None]
    n = x.shape[0]

    # Pick a batch tile (multiple of 8, capped for v7x's 64 MiB VMEM) and pad
    # the batch to a multiple of it.
    n_pad = -(-n // 8) * 8
    tm = min(_TM_MAX, n_pad)
    n_pad = -(-n_pad // tm) * tm

    # Only input glue: batch pad + NCHW flatten (no spatial padding; the conv
    # padding is folded into w1g) + lane pad 960 -> 1024, cast to bf16.
    xp = jnp.pad(x.astype(jnp.float32), ((0, n_pad - n), (0, 0), (0, 0), (0, 0)))
    xflat = xp.reshape(n_pad, 15 * 8 * 8)
    xflat = jnp.pad(xflat, ((0, 0), (0, _K1 - 15 * 64))).astype(jnp.bfloat16)

    flops = 2 * n_pad * (_K1 * 4 * _C1Q + _K2 * 4 * _C2Q + _K3)
    bytes_accessed = (
        xflat.size * 2 + prep["w1g"].size * 2 + prep["w2g"].size * 2
        + (prep["b1r"].size + prep["b2r"].size + prep["w3r"].size
           + prep["b3"].size + n_pad) * 4)

    y = pl.pallas_call(
        _fused_forward_kernel,
        out_shape=jax.ShapeDtypeStruct((n_pad, 1), jnp.float32),
        grid_spec=pltpu.PrefetchScalarGridSpec(
            num_scalar_prefetch=0,
            grid=(n_pad // tm,),
            in_specs=[
                # Batch-tiled input: double-buffered DMA overlapped with MXU work.
                pl.BlockSpec((tm, _K1), lambda i: (i, 0)),
                # Weights / biases: constant index_map -> fetched once, VMEM-resident.
                pl.BlockSpec((_K1, 4 * _C1Q), lambda i: (0, 0)),
                pl.BlockSpec((1, _C1Q), lambda i: (0, 0)),
                pl.BlockSpec((_K2, 4 * _C2Q), lambda i: (0, 0)),
                pl.BlockSpec((1, _C2Q), lambda i: (0, 0)),
                pl.BlockSpec((1, _K3), lambda i: (0, 0)),
                pl.BlockSpec((1, 1), lambda i: (0, 0)),
            ],
            out_specs=pl.BlockSpec((tm, 1), lambda i: (i, 0)),
        ),
        compiler_params=pltpu.CompilerParams(
            dimension_semantics=("parallel",),      # shard batch tiles across TCs (v7x)
            vmem_limit_bytes=32 * 1024 * 1024,      # lift v5e's 16 MiB default
        ),
        cost_estimate=pl.CostEstimate(flops=flops, transcendentals=0,
                                      bytes_accessed=bytes_accessed),
    )(xflat, prep["w1g"], prep["b1r"], prep["w2g"], prep["b2r"],
      prep["w3r"], prep["b3"])

    return jnp.squeeze(y[:n])             # matches torch's y.squeeze()


# ------------------------- pure-JAX reference ------------------------------

def _reference_forward(params, x):
    """f32 reference matching the PyTorch module (for a tolerance check)."""
    def conv(h, w, b, pad):
        y = jax.lax.conv_general_dilated(
            h, w, window_strides=(1, 1), padding=[(pad, pad), (pad, pad)],
            dimension_numbers=("NCHW", "OIHW", "NCHW"))
        return y + b.reshape(1, -1, 1, 1)

    def pool(h):
        return jax.lax.reduce_window(h, -jnp.inf, jax.lax.max,
                                     (1, 1, 2, 2), (1, 1, 2, 2), "VALID")

    h = pool(jax.nn.relu(conv(x, params["w1"], params["b1"].reshape(-1), 1)))
    h = pool(jax.nn.relu(conv(h, params["w2"], params["b2"].reshape(-1), 2)))
    h = h.reshape(h.shape[0], -1)
    return jnp.squeeze(h @ params["w3"].T + params["b3"])


if __name__ == "__main__":
    key = jax.random.PRNGKey(0)
    kx, kp = jax.random.split(key)
    # Small deterministic example consistent with the module: (N=2, 15, 8, 8).
    x = jax.random.normal(kx, (2, 15, 8, 8), dtype=jnp.float32)
    params = init_params(kp)
    prep = prepare_params(params)         # one-time offline weight lowering

    y = jax.jit(neural_net_forward)(prep, x)
    y = jax.block_until_ready(y)
    assert y.shape == (2,) and y.dtype == jnp.float32
    assert bool(jnp.all(jnp.isfinite(y)))

    # bf16 GEMM operands -> tolerance check, not bit-exact equality.
    y_ref = np.asarray(_reference_forward(params, x))
    assert np.allclose(np.asarray(y), y_ref, rtol=5e-2, atol=5e-2), (y, y_ref)

    print("KERNEL_OK")
</pallas_src>

<mosaic_0001>
module attributes {stable_mosaic.version = 11 : i64} {
  func.func @_fused_forward_kernel(%arg0: i32, %arg1: memref<8x1024xbf16, #tpu.memory_space<vmem>>, %arg2: memref<1024x1536xbf16, #tpu.memory_space<vmem>>, %arg3: memref<1x384xf32, #tpu.memory_space<vmem>>, %arg4: memref<384x1024xbf16, #tpu.memory_space<vmem>>, %arg5: memref<1x256xf32, #tpu.memory_space<vmem>>, %arg6: memref<1x256xf32, #tpu.memory_space<vmem>>, %arg7: memref<1x1xf32, #tpu.memory_space<vmem>>, %arg8: memref<8x1xf32, #tpu.memory_space<vmem>>) attributes {dimension_semantics = [#tpu.dimension_semantics<parallel>], iteration_bounds = array<i64: 1>, scalar_prefetch = 0 : i64, scratch_operands = 0 : i64, tpu.core_type = #tpu.core_type<tc>, window_params = [{transform_indices = @transform_0, window_bounds = array<i64: 8, 1024>}, {pipeline_mode = #tpu.pipeline_mode<synchronous>, transform_indices = @transform_1, window_bounds = array<i64: 1024, 1536>}, {pipeline_mode = #tpu.pipeline_mode<synchronous>, transform_indices = @transform_2, window_bounds = array<i64: 1, 384>}, {pipeline_mode = #tpu.pipeline_mode<synchronous>, transform_indices = @transform_3, window_bounds = array<i64: 384, 1024>}, {pipeline_mode = #tpu.pipeline_mode<synchronous>, transform_indices = @transform_4, window_bounds = array<i64: 1, 256>}, {pipeline_mode = #tpu.pipeline_mode<synchronous>, transform_indices = @transform_5, window_bounds = array<i64: 1, 256>}, {pipeline_mode = #tpu.pipeline_mode<synchronous>, transform_indices = @transform_6, window_bounds = array<i64: 1, 1>}, {transform_indices = @transform_7, window_bounds = array<i64: 8, 1>}]} {
    %c0 = arith.constant 0 : index
    %c0_0 = arith.constant 0 : index
    %0 = vector.load %arg1[%c0, %c0_0] : memref<8x1024xbf16, #tpu.memory_space<vmem>>, vector<8x1024xbf16>
    %c0_1 = arith.constant 0 : index
    %c0_2 = arith.constant 0 : index
    %1 = vector.load %arg2[%c0_1, %c0_2] : memref<1024x1536xbf16, #tpu.memory_space<vmem>>, vector<1024x384xbf16>
    %cst = arith.constant dense<0.000000e+00> : vector<8x384xf32>
    %2 = tpu.matmul %0, %1, %cst {dimension_numbers = #tpu.dot_dimension_numbers<[1], [0], [0], [1], [0, 0, 1, 1], [], []>} : vector<8x1024xbf16>, vector<1024x384xbf16>, vector<8x384xf32> -> vector<8x384xf32>
    %c0_3 = arith.constant 0 : index
    %c384 = arith.constant 384 : index
    %3 = vector.load %arg2[%c0_3, %c384] : memref<1024x1536xbf16, #tpu.memory_space<vmem>>, vector<1024x384xbf16>
    %cst_4 = arith.constant dense<0.000000e+00> : vector<8x384xf32>
    %4 = tpu.matmul %0, %3, %cst_4 {dimension_numbers = #tpu.dot_dimension_numbers<[1], [0], [0], [1], [0, 0, 1, 1], [], []>} : vector<8x1024xbf16>, vector<1024x384xbf16>, vector<8x384xf32> -> vector<8x384xf32>
    %5 = arith.maximumf %2, %4 : vector<8x384xf32>
    %c0_5 = arith.constant 0 : index
    %c768 = arith.constant 768 : index
    %6 = vector.load %arg2[%c0_5, %c768] : memref<1024x1536xbf16, #tpu.memory_space<vmem>>, vector<1024x384xbf16>
    %cst_6 = arith.constant dense<0.000000e+00> : vector<8x384xf32>
    %7 = tpu.matmul %0, %6, %cst_6 {dimension_numbers = #tpu.dot_dimension_numbers<[1], [0], [0], [1], [0, 0, 1, 1], [], []>} : vector<8x1024xbf16>, vector<1024x384xbf16>, vector<8x384xf32> -> vector<8x384xf32>
    %8 = arith.maximumf %5, %7 : vector<8x384xf32>
    %c0_7 = arith.constant 0 : index
    %c1152 = arith.constant 1152 : index
    %9 = vector.load %arg2[%c0_7, %c1152] : memref<1024x1536xbf16, #tpu.memory_space<vmem>>, vector<1024x384xbf16>
    %cst_8 = arith.constant dense<0.000000e+00> : vector<8x384xf32>
    %10 = tpu.matmul %0, %9, %cst_8 {dimension_numbers = #tpu.dot_dimension_numbers<[1], [0], [0], [1], [0, 0, 1, 1], [], []>} : vector<8x1024xbf16>, vector<1024x384xbf16>, vector<8x384xf32> -> vector<8x384xf32>
    %11 = arith.maximumf %8, %10 : vector<8x384xf32>
    %c0_9 = arith.constant 0 : index
    %c0_10 = arith.constant 0 : index
    %12 = vector.load %arg3[%c0_9, %c0_10] : memref<1x384xf32, #tpu.memory_space<vmem>>, vector<1x384xf32>
    %13 = vector.broadcast %12 : vector<1x384xf32> to vector<8x384xf32>
    %14 = arith.addf %11, %13 : vector<8x384xf32>
    %cst_11 = arith.constant 0.000000e+00 : f32
    %15 = vector.broadcast %cst_11 : f32 to vector<8x384xf32>
    %16 = arith.maximumf %14, %15 : vector<8x384xf32>
    %17 = arith.truncf %16 : vector<8x384xf32> to vector<8x384xbf16>
    %c0_12 = arith.constant 0 : index
    %c0_13 = arith.constant 0 : index
    %18 = vector.load %arg4[%c0_12, %c0_13] : memref<384x1024xbf16, #tpu.memory_space<vmem>>, vector<384x256xbf16>
    %cst_14 = arith.constant dense<0.000000e+00> : vector<8x256xf32>
    %19 = tpu.matmul %17, %18, %cst_14 {dimension_numbers = #tpu.dot_dimension_numbers<[1], [0], [0], [1], [0, 0, 1, 1], [], []>} : vector<8x384xbf16>, vector<384x256xbf16>, vector<8x256xf32> -> vector<8x256xf32>
    %c0_15 = arith.constant 0 : index
    %c256 = arith.constant 256 : index
    %20 = vector.load %arg4[%c0_15, %c256] : memref<384x1024xbf16, #tpu.memory_space<vmem>>, vector<384x256xbf16>
    %cst_16 = arith.constant dense<0.000000e+00> : vector<8x256xf32>
    %21 = tpu.matmul %17, %20, %cst_16 {dimension_numbers = #tpu.dot_dimension_numbers<[1], [0], [0], [1], [0, 0, 1, 1], [], []>} : vector<8x384xbf16>, vector<384x256xbf16>, vector<8x256xf32> -> vector<8x256xf32>
    %22 = arith.maximumf %19, %21 : vector<8x256xf32>
    %c0_17 = arith.constant 0 : index
    %c512 = arith.constant 512 : index
    %23 = vector.load %arg4[%c0_17, %c512] : memref<384x1024xbf16, #tpu.memory_space<vmem>>, vector<384x256xbf16>
    %cst_18 = arith.constant dense<0.000000e+00> : vector<8x256xf32>
    %24 = tpu.matmul %17, %23, %cst_18 {dimension_numbers = #tpu.dot_dimension_numbers<[1], [0], [0], [1], [0, 0, 1, 1], [], []>} : vector<8x384xbf16>, vector<384x256xbf16>, vector<8x256xf32> -> vector<8x256xf32>
    %25 = arith.maximumf %22, %24 : vector<8x256xf32>
    %c0_19 = arith.constant 0 : index
    %c768_20 = arith.constant 768 : index
    %26 = vector.load %arg4[%c0_19, %c768_20] : memref<384x1024xbf16, #tpu.memory_space<vmem>>, vector<384x256xbf16>
    %cst_21 = arith.constant dense<0.000000e+00> : vector<8x256xf32>
    %27 = tpu.matmul %17, %26, %cst_21 {dimension_numbers = #tpu.dot_dimension_numbers<[1], [0], [0], [1], [0, 0, 1, 1], [], []>} : vector<8x384xbf16>, vector<384x256xbf16>, vector<8x256xf32> -> vector<8x256xf32>
    %28 = arith.maximumf %25, %27 : vector<8x256xf32>
    %c0_22 = arith.constant 0 : index
    %c0_23 = arith.constant 0 : index
    %29 = vector.load %arg5[%c0_22, %c0_23] : memref<1x256xf32, #tpu.memory_space<vmem>>, vector<1x256xf32>
    %30 = vector.broadcast %29 : vector<1x256xf32> to vector<8x256xf32>
    %31 = arith.addf %28, %30 : vector<8x256xf32>
    %cst_24 = arith.constant 0.000000e+00 : f32
    %32 = vector.broadcast %cst_24 : f32 to vector<8x256xf32>
    %33 = arith.maximumf %31, %32 : vector<8x256xf32>
    %c0_25 = arith.constant 0 : index
    %c0_26 = arith.constant 0 : index
    %34 = vector.load %arg6[%c0_25, %c0_26] : memref<1x256xf32, #tpu.memory_space<vmem>>, vector<1x256xf32>
    %35 = vector.broadcast %34 : vector<1x256xf32> to vector<8x256xf32>
    %36 = arith.mulf %33, %35 : vector<8x256xf32>
    %cst_27 = arith.constant dense<0.000000e+00> : vector<8xf32>
    %37 = vector.multi_reduction <add>, %36, %cst_27 [1] : vector<8x256xf32> to vector<8xf32>
    %38 = vector.shape_cast %37 : vector<8xf32> to vector<8x1xf32>
    %c0_28 = arith.constant 0 : index
    %c0_29 = arith.constant 0 : index
    %39 = vector.load %arg7[%c0_28, %c0_29] : memref<1x1xf32, #tpu.memory_space<vmem>>, vector<1x1xf32>
    %40 = vector.broadcast %39 : vector<1x1xf32> to vector<8x1xf32>
    %41 = arith.addf %38, %40 : vector<8x1xf32>
    %c0_30 = arith.constant 0 : index
    %c0_31 = arith.constant 0 : index
    %42 = vector.load %arg8[%c0_30, %c0_31] : memref<8x1xf32, #tpu.memory_space<vmem>>, vector<8x1xf32>
    tpu.vector_store %arg8[%c0_30, %c0_31], %41 {strides = array<i32>} : memref<8x1xf32, #tpu.memory_space<vmem>>, vector<8x1xf32>,
    return
  }
  func.func @transform_0(%arg0: i32) -> (i32, i32) {
    %c0_i32 = arith.constant 0 : i32
    %c0_i32_0 = arith.constant 0 : i32
    return %arg0, %c0_i32 : i32, i32
  }
  func.func @transform_1(%arg0: i32) -> (i32, i32) {
    %c0_i32 = arith.constant 0 : i32
    %c0_i32_0 = arith.constant 0 : i32
    %c0_i32_1 = arith.constant 0 : i32
    return %c0_i32, %c0_i32_0 : i32, i32
  }
  func.func @transform_2(%arg0: i32) -> (i32, i32) {
    %c0_i32 = arith.constant 0 : i32
    %c0_i32_0 = arith.constant 0 : i32
    %c0_i32_1 = arith.constant 0 : i32
    return %c0_i32, %c0_i32_0 : i32, i32
  }
  func.func @transform_3(%arg0: i32) -> (i32, i32) {
    %c0_i32 = arith.constant 0 : i32
    %c0_i32_0 = arith.constant 0 : i32
    %c0_i32_1 = arith.constant 0 : i32
    return %c0_i32, %c0_i32_0 : i32, i32
  }
  func.func @transform_4(%arg0: i32) -> (i32, i32) {
    %c0_i32 = arith.constant 0 : i32
    %c0_i32_0 = arith.constant 0 : i32
    %c0_i32_1 = arith.constant 0 : i32
    return %c0_i32, %c0_i32_0 : i32, i32
  }
  func.func @transform_5(%arg0: i32) -> (i32, i32) {
    %c0_i32 = arith.constant 0 : i32
    %c0_i32_0 = arith.constant 0 : i32
    %c0_i32_1 = arith.constant 0 : i32
    return %c0_i32, %c0_i32_0 : i32, i32
  }
  func.func @transform_6(%arg0: i32) -> (i32, i32) {
    %c0_i32 = arith.constant 0 : i32
    %c0_i32_0 = arith.constant 0 : i32
    %c0_i32_1 = arith.constant 0 : i32
    return %c0_i32, %c0_i32_0 : i32, i32
  }
  func.func @transform_7(%arg0: i32) -> (i32, i32) {
    %c0_i32 = arith.constant 0 : i32
    %c0_i32_0 = arith.constant 0 : i32
    return %arg0, %c0_i32 : i32, i32
  }
}

</mosaic_0001>

<bundles_post_ra>
// kernel: neural_net_forward.1
= control target key start
LH: loop header
LB: loop body
LE: loop exit
PB: predicated region body
PF: predicated region fallthrough
CT: control target
= control target key end

     0   :  { %s13304_s0 = inlined_call_operand.vmem [shape: bf16[8,1024], index: 0, kind: input, shape index: {}]   ;;  %s13305_s1 = inlined_call_operand.hbm [shape: bf16[1024,1536], index: 1, kind: input, shape index: {}]   ;;  %s13306_s2 = inlined_call_operand.hbm [shape: f32[1,384], index: 2, kind: input, shape index: {}]   ;;  %s13307_s3 = inlined_call_operand.hbm [shape: bf16[384,1024], index: 3, kind: input, shape index: {}]   ;;  %s13308_s4 = inlined_call_operand.hbm [shape: f32[1,256], index: 4, kind: input, shape index: {}]   ;;  %s13309_s5 = inlined_call_operand.hbm [shape: f32[1,256], index: 5, kind: input, shape index: {}]   ;;  %s13310_s6 = inlined_call_operand.<no memory space> [shape: f32[1,1], index: 6, kind: input, shape index: {}]   ;;  %s13311_s7 = inlined_call_operand.vmem [shape: f32[8,1], index: 7, kind: output, shape index: {}]  }
   0x1   :  { %v12_v0 = vstv %s13310_s6 }
   0x2   :  { %13 = vst [vmem:[#allocation2] sm:$0x1] %v12_v0 }
   0x3   :  { %14 = vsyncpa [#allocation4], 0 }
   0x4   :  { %15 = vsyncpa [#allocation6], 0  ;;  %s37_s28 = sshll.u32 %s13306_s2, 4  ;;  %s38_s28 = int_to_ptr.hbm [resolvable:$true] %s37_s28 }
   0x5   :  { %16 = vsyncpa [#allocation9], 0  ;;  %s12967_s29 = smov [#allocation5]   ;;  %s61_s10 = sshll.u32 %s13308_s4, 4  ;;  %s62_s10 = int_to_ptr.hbm [resolvable:$true] %s61_s10 }
   0x6   :  { %s39_s30 = sshll.u32 %s12967_s29, 4  ;;  %s12968_s11 = smov [#allocation8]   ;;  %s40_s30 = int_to_ptr.vmem [resolvable:$true] %s39_s30 }
   0x7   :  { %42 = dma.hbm_to_vmem [thread:$0]  %s38_s28, 48, %s40_s30, [#allocation6]  }
   0x8   :  { %s63_s6 = sshll.u32 %s12968_s11, 4  ;;  %s23_s14 = sshll.u32 %s13305_s1, 4  ;;  %s64_s6 = int_to_ptr.vmem [resolvable:$true] %s63_s6  ;;  %s24_s14 = int_to_ptr.hbm [resolvable:$true] %s23_s14 }
   0x9   :  { %66 = dma.hbm_to_vmem [thread:$0]  %s62_s10, 32, %s64_s6, [#allocation9]  }
   0xa   :  { %s12969_s2 = smov [#allocation3]   ;;  %s47_s18 = sshll.u32 %s13307_s3, 4  ;;  %s48_s18 = int_to_ptr.hbm [resolvable:$true] %s47_s18 }
   0xb   :  { %s25_s15 = sshll.u32 %s12969_s2, 4  ;;  %s12970_s19 = smov 768   ;;  %s26_s15 = int_to_ptr.vmem [resolvable:$true] %s25_s15 }
   0xc   :  { %s12971_s4 = smov 48   ;;  %s12972_s20 = smov [#allocation7]  }
   0xd   :  { %31 = dma.hbm_to_vmem [thread:$0]  %s24_s14, 98304, %s26_s15, [#allocation4], %s12970_s19, %s12970_s19, %s12971_s4  }
   0xe   :  { %s49_s21 = sshll.u32 %s12972_s20, 4  ;;  %s12973_s22 = smov 512   ;;  %s50_s21 = int_to_ptr.vmem [resolvable:$true] %s49_s21 }
   0xf   :  { %s12974_s23 = smov 32   ;;  %s72_s25 = sshll.u32 %s13309_s5, 4  ;;  %s73_s25 = int_to_ptr.hbm [resolvable:$true] %s72_s25 }
  0x10   :  { %55 = dma.hbm_to_vmem [thread:$0]  %s48_s18, 24576, %s50_s21, [#allocation6], %s12973_s22, %s12973_s22, %s12974_s23  }
  0x11   :  { %s12975_s26 = smov [#allocation10]  }
  0x12   :  { %s74_s27 = sshll.u32 %s12975_s26, 4  ;;  %s75_s27 = int_to_ptr.vmem [resolvable:$true] %s74_s27 }
  0x13   :  { %77 = dma.hbm_to_vmem [thread:$0]  %s73_s25, 32, %s75_s27, [#allocation9]  }
  0x14   :  { %12961 = dma.done.wait [#allocation4], 98304  }
  0x15   :  { %12962 = vsyncadd [#allocation4], 4294868992 }
  0x16   :  { %12963 = dma.done.wait [#allocation6], 24624  }
  0x17   :  { %12964 = vsyncadd [#allocation6], 4294942672 }
  0x18   :  { %12965 = dma.done.wait [#allocation9], 64  }
  0x19   :  { %12966 = vsyncadd [#allocation9], 4294967232  ;;  %v8117_v1 = vld [vmem:[#allocation3 + $0x2a0] sm:$0xf]  ;;  %v11893_v2 = vld [vmem:[#allocation3 + $0x2cc] sm:$0xf0] }
  0x1a   :  { %v8213_v3 = vld [vmem:[#allocation3 + $0x5a0] sm:$0xf]  ;;  %v8118_v4 = vor.u32 %v11893_v2, %v8117_v1  ;;  %v11917_v5 = vld [vmem:[#allocation3 + $0x5cc] sm:$0xf0]  ;;  %vm8022_vm0 = vcmask 7168  }
  0x1b   :  { %v8309_v6 = vld [vmem:[#allocation3 + $0x8a0] sm:$0xf]  ;;  %v11941_v7 = vld [vmem:[#allocation3 + $0x8cc] sm:$0xf0]  ;;  %v8214_v8 = vor.u32 %v11917_v5, %v8213_v3 }
  0x1c   :  { %v8310_v9 = vor.u32 %v11941_v7, %v8309_v6  ;;  %v8405_v10 = vld [vmem:[#allocation3 + $0xba0] sm:$0xf]  ;;  %v11965_v11 = vld [vmem:[#allocation3 + $0xbcc] sm:$0xf0]  ;;  %1412 = vmatpush.bf16.msra.mxu0 %v8118_v4 }
  0x1d   :  { %v8105_v12 = vld [vmem:[#allocation3 + $0x240] sm:$0xf]  ;;  %v8406_v13 = vor.u32 %v11965_v11, %v8405_v10  ;;  %v11890_v14 = vld [vmem:[#allocation3 + $0x26c] sm:$0xf0]  ;;  %1425 = vmatpush.bf16.msra.mxu1 %v8214_v8 }
  0x1e   :  { %v8201_v15 = vld [vmem:[#allocation3 + $0x540] sm:$0xf]  ;;  %v11914_v16 = vld [vmem:[#allocation3 + $0x56c] sm:$0xf0]  ;;  %1438 = vmatpush.bf16.msra.mxu2 %v8310_v9  ;;  %v8106_v17 = vor.u32 %v11890_v14, %v8105_v12 }
  0x1f   :  { %v8202_v18 = vor.u32 %v11914_v16, %v8201_v15  ;;  %v8297_v19 = vld [vmem:[#allocation3 + $0x840] sm:$0xf]  ;;  %v11938_v20 = vld [vmem:[#allocation3 + $0x86c] sm:$0xf0]  ;;  %1451 = vmatpush.bf16.msra.mxu3 %v8406_v13 }
  0x20   :  { %v8393_v21 = vld [vmem:[#allocation3 + $0xb40] sm:$0xf]  ;;  %v8298_v22 = vor.u32 %v11938_v20, %v8297_v19  ;;  %v11962_v23 = vld [vmem:[#allocation3 + $0xb6c] sm:$0xf0]  ;;  %1413 = vmatpush.bf16.msra.mxu0 %v8106_v17 }
  0x21   :  { %v8093_v24 = vld [vmem:[#allocation3 + $0x1e0] sm:$0xf]  ;;  %v11887_v25 = vld [vmem:[#allocation3 + $0x20c] sm:$0xf0]  ;;  %v8394_v26 = vor.u32 %v11962_v23, %v8393_v21  ;;  %1426 = vmatpush.bf16.msra.mxu1 %v8202_v18 }
  0x22   :  { %v8189_v27 = vld [vmem:[#allocation3 + $0x4e0] sm:$0xf]  ;;  %v11911_v28 = vld [vmem:[#allocation3 + $0x50c] sm:$0xf0]  ;;  %v8094_v30 = vor.u32 %v11887_v25, %v8093_v24  ;;  %1439 = vmatpush.bf16.msra.mxu2 %v8298_v22 }
  0x23   :  { %v8285_v29 = vld [vmem:[#allocation3 + $0x7e0] sm:$0xf]  ;;  %v11935_v31 = vld [vmem:[#allocation3 + $0x80c] sm:$0xf0]  ;;  %v8190_v34 = vor.u32 %v11911_v28, %v8189_v27  ;;  %1452 = vmatpush.bf16.msra.mxu3 %v8394_v26 }
  0x24   :  { %v8381_v32 = vld [vmem:[#allocation3 + $0xae0] sm:$0xf]  ;;  %v11959_v33 = vld [vmem:[#allocation3 + $0xb0c] sm:$0xf0]  ;;  %v8286_v35 = vor.u32 %v11935_v31, %v8285_v29  ;;  %1414 = vmatpush.bf16.msra.mxu0 %v8094_v30 }
  0x25   :  { %v8081_v36 = vld [vmem:[#allocation3 + $0x180] sm:$0xf]  ;;  %v11884_v37 = vld [vmem:[#allocation3 + $0x1ac] sm:$0xf0]  ;;  %v8382_v39 = vor.u32 %v11959_v33, %v8381_v32  ;;  %1427 = vmatpush.bf16.msra.mxu1 %v8190_v34 }
  0x26   :  { %v8177_v38 = vld [vmem:[#allocation3 + $0x480] sm:$0xf]  ;;  %v11908_v40 = vld [vmem:[#allocation3 + $0x4ac] sm:$0xf0]  ;;  %v8082_v45 = vor.u32 %v11884_v37, %v8081_v36  ;;  %1440 = vmatpush.bf16.msra.mxu2 %v8286_v35 }
  0x27   :  { %v8273_v41 = vld [vmem:[#allocation3 + $0x780] sm:$0xf]  ;;  %v11932_v42 = vld [vmem:[#allocation3 + $0x7ac] sm:$0xf0]  ;;  %v8178_v46 = vor.u32 %v11908_v40, %v8177_v38  ;;  %1453 = vmatpush.bf16.msra.mxu3 %v8382_v39 }
  0x28   :  { %v8369_v43 = vld [vmem:[#allocation3 + $0xa80] sm:$0xf]  ;;  %v11956_v44 = vld [vmem:[#allocation3 + $0xaac] sm:$0xf0]  ;;  %v8274_v47 = vor.u32 %v11932_v42, %v8273_v41  ;;  %1415 = vmatpush.bf16.msra.mxu0 %v8082_v45 }
  0x29   :  { %v8069_v48 = vld [vmem:[#allocation3 + $0x120] sm:$0xf]  ;;  %v11881_v49 = vld [vmem:[#allocation3 + $0x14c] sm:$0xf0]  ;;  %v8370_v51 = vor.u32 %v11956_v44, %v8369_v43  ;;  %1428 = vmatpush.bf16.msra.mxu1 %v8178_v46 }
  0x2a   :  { %v8165_v50 = vld [vmem:[#allocation3 + $0x420] sm:$0xf]  ;;  %v11905_v52 = vld [vmem:[#allocation3 + $0x44c] sm:$0xf0]  ;;  %v8070_v57 = vor.u32 %v11881_v49, %v8069_v48  ;;  %1441 = vmatpush.bf16.msra.mxu2 %v8274_v47 }
  0x2b   :  { %v8261_v53 = vld [vmem:[#allocation3 + $0x720] sm:$0xf]  ;;  %v11929_v54 = vld [vmem:[#allocation3 + $0x74c] sm:$0xf0]  ;;  %v8166_v58 = vor.u32 %v11905_v52, %v8165_v50  ;;  %1454 = vmatpush.bf16.msra.mxu3 %v8370_v51 }
  0x2c   :  { %v8357_v55 = vld [vmem:[#allocation3 + $0xa20] sm:$0xf]  ;;  %v11953_v56 = vld [vmem:[#allocation3 + $0xa4c] sm:$0xf0]  ;;  %v8262_v59 = vor.u32 %v11929_v54, %v8261_v53  ;;  %1416 = vmatpush.bf16.msra.mxu0 %v8070_v57 }
  0x2d   :  { %v8057_v60 = vld [vmem:[#allocation3 + $0xc0] sm:$0xf]  ;;  %v11878_v61 = vld [vmem:[#allocation3 + $0xec] sm:$0xf0]  ;;  %v8358_v63 = vor.u32 %v11953_v56, %v8357_v55  ;;  %1429 = vmatpush.bf16.msra.mxu1 %v8166_v58 }
  0x2e   :  { %v8153_v62 = vld [vmem:[#allocation3 + $0x3c0] sm:$0xf]  ;;  %v11902_v0 = vld [vmem:[#allocation3 + $0x3ec] sm:$0xf0]  ;;  %v8058_v5 = vor.u32 %v11878_v61, %v8057_v60  ;;  %1442 = vmatpush.bf16.msra.mxu2 %v8262_v59  ;;  %v101_v59 = vld [vmem:[%s13304_s0 + $0x8] sm:$0xff] }
  0x2f   :  { %v8249_v1 = vld [vmem:[#allocation3 + $0x6c0] sm:$0xf]  ;;  %v11926_v2 = vld [vmem:[#allocation3 + $0x6ec] sm:$0xf0]  ;;  %v8154_v6 = vor.u32 %v11902_v0, %v8153_v62  ;;  %1455 = vmatpush.bf16.msra.mxu3 %v8358_v63  ;;  %v366_v0 = vunpack.c.l.b16 %v101_v59 }
  0x30   :  { %v8345_v3 = vld [vmem:[#allocation3 + $0x9c0] sm:$0xf]  ;;  %v11950_v4 = vld [vmem:[#allocation3 + $0x9ec] sm:$0xf0]  ;;  %v8250_v7 = vor.u32 %v11926_v2, %v8249_v1  ;;  %1417 = vmatpush.bf16.msra.mxu0 %v8058_v5  ;;  %v367_v1 = vunpack.c.h.b16 %v101_v59 }
  0x31   :  { %v8045_v8 = vld [vmem:[#allocation3 + $0x60] sm:$0xf]  ;;  %v11875_v9 = vld [vmem:[#allocation3 + $0x8c] sm:$0xf0]  ;;  %v8346_v11 = vor.u32 %v11950_v4, %v8345_v3  ;;  %1430 = vmatpush.bf16.msra.mxu1 %v8154_v6  ;;  %v13037_v5 = vpack.c.b16 %v366_v0, %v366_v0 }
  0x32   :  { %v8141_v10 = vld [vmem:[#allocation3 + $0x360] sm:$0xf]  ;;  %v11899_v12 = vld [vmem:[#allocation3 + $0x38c] sm:$0xf0]  ;;  %v8046_v17 = vor.u32 %v11875_v9, %v8045_v8  ;;  %1443 = vmatpush.bf16.msra.mxu2 %v8250_v7  ;;  %v13042_v7 = vpack.c.b16 %v367_v1, %v367_v1 }
  0x33   :  { %v8237_v13 = vld [vmem:[#allocation3 + $0x660] sm:$0xf]  ;;  %v11923_v14 = vld [vmem:[#allocation3 + $0x68c] sm:$0xf0]  ;;  %v8142_v20 = vor.u32 %v11899_v12, %v8141_v10  ;;  %1456 = vmatpush.bf16.msra.mxu3 %v8346_v11 }
  0x34   :  { %v8333_v15 = vld [vmem:[#allocation3 + $0x960] sm:$0xf]  ;;  %v11947_v16 = vld [vmem:[#allocation3 + $0x98c] sm:$0xf0]  ;;  %v8238_v21 = vor.u32 %v11923_v14, %v8237_v13  ;;  %1418 = vmatpush.bf16.msra.mxu0 %v8046_v17 }
  0x35   :  { %v8033_v18 = vld [vmem:[#allocation3] sm:$0xf]  ;;  %v11872_v19 = vld [vmem:[#allocation3 + $0x2c] sm:$0xf0]  ;;  %v8334_v25 = vor.u32 %v11947_v16, %v8333_v15  ;;  %1431 = vmatpush.bf16.msra.mxu1 %v8142_v20 }
  0x36   :  { %v8129_v22 = vld [vmem:[#allocation3 + $0x300] sm:$0xf]  ;;  %v11896_v23 = vld [vmem:[#allocation3 + $0x32c] sm:$0xf0]  ;;  %v8034_v32 = vor.u32 %v11872_v19, %v8033_v18  ;;  %1444 = vmatpush.bf16.msra.mxu2 %v8238_v21 }
  0x37   :  { %v8225_v24 = vld [vmem:[#allocation3 + $0x600] sm:$0xf]  ;;  %v11920_v26 = vld [vmem:[#allocation3 + $0x62c] sm:$0xf0]  ;;  %v8130_v36 = vor.u32 %v11896_v23, %v8129_v22  ;;  %1457 = vmatpush.bf16.msra.mxu3 %v8334_v25 }
  0x38   :  { %v8321_v27 = vld [vmem:[#allocation3 + $0x900] sm:$0xf]  ;;  %v11944_v28 = vld [vmem:[#allocation3 + $0x92c] sm:$0xf0]  ;;  %v8226_v37 = vor.u32 %v11920_v26, %v8225_v24  ;;  %1419 = vmatpush.bf16.msra.mxu0 %v8034_v32 }
  0x39   :  { %v8501_v29 = vld [vmem:[#allocation3 + $0xea0] sm:$0xf]  ;;  %v11989_v30 = vld [vmem:[#allocation3 + $0xecc] sm:$0xf0]  ;;  %v8322_v40 = vor.u32 %v11944_v28, %v8321_v27  ;;  %1432 = vmatpush.bf16.msra.mxu1 %v8130_v36 }
  0x3a   :  { %v8597_v31 = vld [vmem:[#allocation3 + $0x11a0] sm:$0xf]  ;;  %v12013_v33 = vld [vmem:[#allocation3 + $0x11cc] sm:$0xf0]  ;;  %v8502_v41 = vor.u32 %v11989_v30, %v8501_v29  ;;  %1445 = vmatpush.bf16.msra.mxu2 %v8226_v37 }
  0x3b   :  { %v8693_v34 = vld [vmem:[#allocation3 + $0x14a0] sm:$0xf]  ;;  %v12037_v35 = vld [vmem:[#allocation3 + $0x14cc] sm:$0xf0]  ;;  %v8598_v42 = vor.u32 %v12013_v33, %v8597_v31  ;;  %1458 = vmatpush.bf16.msra.mxu3 %v8322_v40 }
  0x3c   :  { %v8789_v38 = vld [vmem:[#allocation3 + $0x17a0] sm:$0xf]  ;;  %v12061_v39 = vld [vmem:[#allocation3 + $0x17cc] sm:$0xf0]  ;;  %v8694_v43 = vor.u32 %v12037_v35, %v8693_v34  ;;  %1464 = vmatpush.bf16.msrb.mxu0 %v8502_v41 }
  0x3d   :  { %v8489_v44 = vld [vmem:[#allocation3 + $0xe40] sm:$0xf]  ;;  %v11986_v45 = vld [vmem:[#allocation3 + $0xe6c] sm:$0xf0]  ;;  %v8790_v47 = vor.u32 %v12061_v39, %v8789_v38  ;;  %1477 = vmatpush.bf16.msrb.mxu1 %v8598_v42  ;;  %1446 = vmatmul.bf16.vlgmr.msra.gmra.mxu2 %v13037_v5 }
  0x3e   :  { %v8585_v46 = vld [vmem:[#allocation3 + $0x1140] sm:$0xf]  ;;  %v12010_v48 = vld [vmem:[#allocation3 + $0x116c] sm:$0xf0]  ;;  %v8490_v53 = vor.u32 %v11986_v45, %v8489_v44  ;;  %1490 = vmatpush.bf16.msrb.mxu2 %v8694_v43  ;;  %1459 = vmatmul.bf16.vlgmr.msra.gmra.mxu3 %v13042_v7 }
  0x3f   :  { %v8681_v49 = vld [vmem:[#allocation3 + $0x1440] sm:$0xf]  ;;  %v12034_v50 = vld [vmem:[#allocation3 + $0x146c] sm:$0xf0]  ;;  %v8586_v55 = vor.u32 %v12010_v48, %v8585_v46  ;;  %1503 = vmatpush.bf16.msrb.mxu3 %v8790_v47 }
  0x40   :  { %v8777_v51 = vld [vmem:[#allocation3 + $0x1740] sm:$0xf]  ;;  %v12058_v52 = vld [vmem:[#allocation3 + $0x176c] sm:$0xf0]  ;;  %v8682_v56 = vor.u32 %v12034_v50, %v8681_v49  ;;  %1465 = vmatpush.bf16.msrb.mxu0 %v8490_v53 }
  0x41   :  { %v8477_v54 = vld [vmem:[#allocation3 + $0xde0] sm:$0xf]  ;;  %v11983_v57 = vld [vmem:[#allocation3 + $0xe0c] sm:$0xf0]  ;;  %v8778_v60 = vor.u32 %v12058_v52, %v8777_v51  ;;  %1478 = vmatpush.bf16.msrb.mxu1 %v8586_v55 }
  0x42   :  { %v8573_v58 = vld [vmem:[#allocation3 + $0x10e0] sm:$0xf]  ;;  %v12007_v61 = vld [vmem:[#allocation3 + $0x110c] sm:$0xf0]  ;;  %v8478_v4 = vor.u32 %v11983_v57, %v8477_v54  ;;  %1491 = vmatpush.bf16.msrb.mxu2 %v8682_v56 }
  0x43   :  { %v8669_v62 = vld [vmem:[#allocation3 + $0x13e0] sm:$0xf]  ;;  %v12031_v63 = vld [vmem:[#allocation3 + $0x140c] sm:$0xf0]  ;;  %v8574_v8 = vor.u32 %v12007_v61, %v8573_v58  ;;  %1504 = vmatpush.bf16.msrb.mxu3 %v8778_v60 }
  0x44   :  { %v8765_v2 = vld [vmem:[#allocation3 + $0x16e0] sm:$0xf]  ;;  %v12055_v3 = vld [vmem:[#allocation3 + $0x170c] sm:$0xf0]  ;;  %v8670_v9 = vor.u32 %v12031_v63, %v8669_v62  ;;  %1466 = vmatpush.bf16.msrb.mxu0 %v8478_v4  ;;  %v103_v4 = vld [vmem:[%s13304_s0 + $0x18] sm:$0xff] }
  0x45   :  { %v100_v6 = vld [vmem:[%s13304_s0] sm:$0xff]  ;;  %v11980_v11 = vld [vmem:[#allocation3 + $0xdac] sm:$0xf0]  ;;  %v8766_v15 = vor.u32 %v12055_v3, %v8765_v2  ;;  %1479 = vmatpush.bf16.msrb.mxu1 %v8574_v8 }
  0x46   :  { %v8465_v10 = vld [vmem:[#allocation3 + $0xd80] sm:$0xf]  ;;  %v364_v13 = vunpack.c.l.b16 %v100_v6  ;;  %v365_v14 = vunpack.c.h.b16 %v100_v6  ;;  %v12004_v16 = vld [vmem:[#allocation3 + $0x10ac] sm:$0xf0]  ;;  %1492 = vmatpush.bf16.msrb.mxu2 %v8670_v9 }
  0x47   :  { %v8561_v12 = vld [vmem:[#allocation3 + $0x1080] sm:$0xf]  ;;  %v12028_v18 = vld [vmem:[#allocation3 + $0x13ac] sm:$0xf0]  ;;  %v8466_v23 = vor.u32 %v11980_v11, %v8465_v10  ;;  %1505 = vmatpush.bf16.msrb.mxu3 %v8766_v15  ;;  %v11892_v11 = vld [vmem:[#allocation3 + $0x2a4] sm:$0xf] }
  0x48   :  { %v8657_v17 = vld [vmem:[#allocation3 + $0x1380] sm:$0xf]  ;;  %v12052_v20 = vld [vmem:[#allocation3 + $0x16ac] sm:$0xf0]  ;;  %v13045_v21 = vpack.c.b16 %v364_v13, %v364_v13  ;;  %v13048_v22 = vpack.c.b16 %v365_v14, %v365_v14  ;;  %v8562_v24 = vor.u32 %v12004_v16, %v8561_v12  ;;  %v8119_v12 = vld [vmem:[#allocation3 + $0x2d0] sm:$0xf0] }
  0x49   :  { %v8753_v19 = vld [vmem:[#allocation3 + $0x1680] sm:$0xf]  ;;  %v8658_v25 = vor.u32 %v12028_v18, %v8657_v17  ;;  %v11977_v27 = vld [vmem:[#allocation3 + $0xd4c] sm:$0xf0]  ;;  %1467 = vmatpush.bf16.msrb.mxu0 %v8466_v23  ;;  %v11916_v13 = vld [vmem:[#allocation3 + $0x5a4] sm:$0xf]  ;;  %v370_v18 = vunpack.c.l.b16 %v103_v4 }
  0x4a   :  { %v8453_v26 = vld [vmem:[#allocation3 + $0xd20] sm:$0xf]  ;;  %v8754_v29 = vor.u32 %v12052_v20, %v8753_v19  ;;  %v12001_v30 = vld [vmem:[#allocation3 + $0x104c] sm:$0xf0]  ;;  %1420 = vmatmul.bf16.vlgmr.msra.gmra.mxu0 %v13045_v21  ;;  %1433 = vmatmul.bf16.vlgmr.msra.gmra.mxu1 %v13048_v22  ;;  %v8215_v15 = vld [vmem:[#allocation3 + $0x5d0] sm:$0xf0] }
  0x4b   :  { %v8549_v28 = vld [vmem:[#allocation3 + $0x1020] sm:$0xf]  ;;  %v12025_v32 = vld [vmem:[#allocation3 + $0x134c] sm:$0xf0]  ;;  %v8454_v35 = vor.u32 %v11977_v27, %v8453_v26  ;;  %1480 = vmatpush.bf16.msrb.mxu1 %v8562_v24  ;;  %1493 = vmatpush.bf16.msrb.mxu2 %v8658_v25  ;;  %v11940_v16 = vld [vmem:[#allocation3 + $0x8a4] sm:$0xf]  ;;  %v371_v26 = vunpack.c.h.b16 %v103_v4 }
  0x4c   :  { %v8645_v31 = vld [vmem:[#allocation3 + $0x1320] sm:$0xf]  ;;  %v12049_v34 = vld [vmem:[#allocation3 + $0x164c] sm:$0xf0]  ;;  %v8550_v36 = vor.u32 %v12001_v30, %v8549_v28  ;;  %1506 = vmatpush.bf16.msrb.mxu3 %v8754_v29  ;;  %v8311_v17 = vld [vmem:[#allocation3 + $0x8d0] sm:$0xf0]  ;;  %v8122_v28 = vor.u32 %v11892_v11, %v8119_v12  ;;  %v8218_v30 = vor.u32 %v11916_v13, %v8215_v15 }
  0x4d   :  { %v8741_v33 = vld [vmem:[#allocation3 + $0x1620] sm:$0xf]  ;;  %v8646_v37 = vor.u32 %v12025_v32, %v8645_v31  ;;  %v11974_v39 = vld [vmem:[#allocation3 + $0xcec] sm:$0xf0]  ;;  %1468 = vmatpush.bf16.msrb.mxu0 %v8454_v35  ;;  %v11964_v23 = vld [vmem:[#allocation3 + $0xba4] sm:$0xf]  ;;  %v8314_v31 = vor.u32 %v11940_v16, %v8311_v17 }
  0x4e   :  { %v8441_v38 = vld [vmem:[#allocation3 + $0xcc0] sm:$0xf]  ;;  %v8742_v41 = vor.u32 %v12049_v34, %v8741_v33  ;;  %v11998_v42 = vld [vmem:[#allocation3 + $0xfec] sm:$0xf0]  ;;  %v8407_v24 = vld [vmem:[#allocation3 + $0xbd0] sm:$0xf0] }
  0x4f   :  { %v8537_v40 = vld [vmem:[#allocation3 + $0xfc0] sm:$0xf]  ;;  %v12022_v44 = vld [vmem:[#allocation3 + $0x12ec] sm:$0xf0]  ;;  %v8442_v47 = vor.u32 %v11974_v39, %v8441_v38  ;;  %1481 = vmatpush.bf16.msrb.mxu1 %v8550_v36  ;;  %1494 = vmatpush.bf16.msrb.mxu2 %v8646_v37  ;;  %v11889_v32 = vld [vmem:[#allocation3 + $0x244] sm:$0xf]  ;;  %v8410_v35 = vor.u32 %v11964_v23, %v8407_v24  ;;  %v13058_v39 = vpack.c.b16 %v370_v18, %v370_v18 }
  0x50   :  { %v8633_v43 = vld [vmem:[#allocation3 + $0x12c0] sm:$0xf]  ;;  %v12046_v46 = vld [vmem:[#allocation3 + $0x15ec] sm:$0xf0]  ;;  %v8538_v48 = vor.u32 %v11998_v42, %v8537_v40  ;;  %1507 = vmatpush.bf16.msrb.mxu3 %v8742_v41  ;;  %v8107_v33 = vld [vmem:[#allocation3 + $0x270] sm:$0xf0] }
  0x51   :  { %v8729_v45 = vld [vmem:[#allocation3 + $0x15c0] sm:$0xf]  ;;  %v8634_v49 = vor.u32 %v12022_v44, %v8633_v43  ;;  %v11971_v51 = vld [vmem:[#allocation3 + $0xc8c] sm:$0xf0]  ;;  %1469 = vmatpush.bf16.msrb.mxu0 %v8442_v47  ;;  %v11913_v34 = vld [vmem:[#allocation3 + $0x544] sm:$0xf]  ;;  %v13062_v43 = vpack.c.b16 %v371_v26, %v371_v26  ;;  %v8110_v44 = vor.u32 %v11889_v32, %v8107_v33 }
  0x52   :  { %v8429_v50 = vld [vmem:[#allocation3 + $0xc60] sm:$0xf]  ;;  %v8730_v53 = vor.u32 %v12046_v46, %v8729_v45  ;;  %v11995_v54 = vld [vmem:[#allocation3 + $0xf8c] sm:$0xf0]  ;;  %v8203_v36 = vld [vmem:[#allocation3 + $0x570] sm:$0xf0] }
  0x53   :  { %v8525_v52 = vld [vmem:[#allocation3 + $0xf60] sm:$0xf]  ;;  %v12019_v56 = vld [vmem:[#allocation3 + $0x128c] sm:$0xf0]  ;;  %v8430_v60 = vor.u32 %v11971_v51, %v8429_v50  ;;  %1482 = vmatpush.bf16.msrb.mxu1 %v8538_v48  ;;  %1495 = vmatpush.bf16.msrb.mxu2 %v8634_v49  ;;  %v11937_v37 = vld [vmem:[#allocation3 + $0x844] sm:$0xf]  ;;  %v8206_v46 = vor.u32 %v11913_v34, %v8203_v36 }
  0x54   :  { %v8621_v55 = vld [vmem:[#allocation3 + $0x1260] sm:$0xf]  ;;  %v12043_v58 = vld [vmem:[#allocation3 + $0x158c] sm:$0xf0]  ;;  %v8526_v0 = vor.u32 %v11995_v54, %v8525_v52  ;;  %1508 = vmatpush.bf16.msrb.mxu3 %v8730_v53  ;;  %v8299_v38 = vld [vmem:[#allocation3 + $0x870] sm:$0xf0] }
  0x55   :  { %v8717_v57 = vld [vmem:[#allocation3 + $0x1560] sm:$0xf]  ;;  %v11968_v61 = vld [vmem:[#allocation3 + $0xc2c] sm:$0xf0]  ;;  %v8622_v1 = vor.u32 %v12019_v56, %v8621_v55  ;;  %1470 = vmatpush.bf16.msrb.mxu0 %v8430_v60  ;;  %v11961_v40 = vld [vmem:[#allocation3 + $0xb44] sm:$0xf]  ;;  %v8302_v47 = vor.u32 %v11937_v37, %v8299_v38 }
  0x56   :  { %v8417_v59 = vld [vmem:[#allocation3 + $0xc00] sm:$0xf]  ;;  %v11992_v63 = vld [vmem:[#allocation3 + $0xf2c] sm:$0xf0]  ;;  %v8718_v6 = vor.u32 %v12043_v58, %v8717_v57  ;;  %v8395_v41 = vld [vmem:[#allocation3 + $0xb70] sm:$0xf0] }
  0x57   :  { %v8513_v62 = vld [vmem:[#allocation3 + $0xf00] sm:$0xf]  ;;  %v12016_v3 = vld [vmem:[#allocation3 + $0x122c] sm:$0xf0]  ;;  %v8418_v14 = vor.u32 %v11968_v61, %v8417_v59  ;;  %1483 = vmatpush.bf16.msrb.mxu1 %v8526_v0  ;;  %1496 = vmatpush.bf16.msrb.mxu2 %v8622_v1  ;;  %v11886_v48 = vld [vmem:[#allocation3 + $0x1e4] sm:$0xf]  ;;  %v8398_v51 = vor.u32 %v11961_v40, %v8395_v41 }
  0x58   :  { %v8609_v2 = vld [vmem:[#allocation3 + $0x1200] sm:$0xf]  ;;  %v12040_v9 = vld [vmem:[#allocation3 + $0x152c] sm:$0xf0]  ;;  %v8514_v19 = vor.u32 %v11992_v63, %v8513_v62  ;;  %1509 = vmatpush.bf16.msrb.mxu3 %v8718_v6  ;;  %v8095_v49 = vld [vmem:[#allocation3 + $0x210] sm:$0xf0] }
  0x59   :  { %v8705_v8 = vld [vmem:[#allocation3 + $0x1500] sm:$0xf]  ;;  %v102_v10 = vld [vmem:[%s13304_s0 + $0x10] sm:$0xff]  ;;  %v8610_v20 = vor.u32 %v12016_v3, %v8609_v2  ;;  %1471 = vmatpush.bf16.msrb.mxu0 %v8418_v14  ;;  %v11910_v50 = vld [vmem:[#allocation3 + $0x4e4] sm:$0xf]  ;;  %v8098_v57 = vor.u32 %v11886_v48, %v8095_v49 }
  0x5a   :  { %v368_v25 = vunpack.c.l.b16 %v102_v10  ;;  %v8706_v27 = vor.u32 %v12040_v9, %v8705_v8  ;;  %v369_v29 = vunpack.c.h.b16 %v102_v10  ;;  %v8191_v52 = vld [vmem:[#allocation3 + $0x510] sm:$0xf0]  ;;  %v11934_v53 = vld [vmem:[#allocation3 + $0x7e4] sm:$0xf] }
  0x5b   :  { %1484 = vmatpush.bf16.msrb.mxu1 %v8514_v19  ;;  %1497 = vmatpush.bf16.msrb.mxu2 %v8610_v20  ;;  %v8287_v54 = vld [vmem:[#allocation3 + $0x810] sm:$0xf0]  ;;  %v11958_v55 = vld [vmem:[#allocation3 + $0xae4] sm:$0xf]  ;;  %v8194_v58 = vor.u32 %v11910_v50, %v8191_v52 }
  0x5c   :  { %v13060_v42 = vpack.c.b16 %v368_v25, %v368_v25  ;;  %1510 = vmatpush.bf16.msrb.mxu3 %v8706_v27  ;;  %v13064_v45 = vpack.c.b16 %v369_v29, %v369_v29  ;;  %v8383_v56 = vld [vmem:[#allocation3 + $0xb10] sm:$0xf0]  ;;  %v8290_v59 = vor.u32 %v11934_v53, %v8287_v54  ;;  %v11883_v60 = vld [vmem:[#allocation3 + $0x184] sm:$0xf] }
  0x5d   :  { %1516 = vmatpush.bf16.msra.mxu0 %v8122_v28  ;;  %v8083_v61 = vld [vmem:[#allocation3 + $0x1b0] sm:$0xf0]  ;;  %v11907_v62 = vld [vmem:[#allocation3 + $0x484] sm:$0xf]  ;;  %v8386_v63 = vor.u32 %v11958_v55, %v8383_v56 }
  0x5e   :  { %1498 = vmatmul.bf16.vlgmr.msrb.gmra.mxu2 %v13058_v39  ;;  %1472 = vmatmul.bf16.vlgmr.msrb.gmra.mxu0 %v13060_v42  ;;  %v8179_v0 = vld [vmem:[#allocation3 + $0x4b0] sm:$0xf0]  ;;  %v11931_v1 = vld [vmem:[#allocation3 + $0x784] sm:$0xf]  ;;  %v8086_v6 = vor.u32 %v11883_v60, %v8083_v61 }
  0x5f   :  { %1529 = vmatpush.bf16.msra.mxu1 %v8218_v30  ;;  %1542 = vmatpush.bf16.msra.mxu2 %v8314_v31  ;;  %v8275_v2 = vld [vmem:[#allocation3 + $0x7b0] sm:$0xf0]  ;;  %v11955_v3 = vld [vmem:[#allocation3 + $0xa84] sm:$0xf]  ;;  %v8182_v8 = vor.u32 %v11907_v62, %v8179_v0 }
  0x60   :  { %1555 = vmatpush.bf16.msra.mxu3 %v8410_v35  ;;  %1485 = vmatmul.bf16.vlgmr.msrb.gmra.mxu1 %v13064_v45  ;;  %v8371_v4 = vld [vmem:[#allocation3 + $0xab0] sm:$0xf0]  ;;  %v8278_v9 = vor.u32 %v11931_v1, %v8275_v2  ;;  %v11880_v10 = vld [vmem:[#allocation3 + $0x124] sm:$0xf] }
  0x61   :  { %1511 = vmatmul.bf16.vlgmr.msrb.gmra.mxu3 %v13062_v43  ;;  %1517 = vmatpush.bf16.msra.mxu0 %v8110_v44  ;;  %v8071_v11 = vld [vmem:[#allocation3 + $0x150] sm:$0xf0]  ;;  %v11904_v12 = vld [vmem:[#allocation3 + $0x424] sm:$0xf]  ;;  %v8374_v13 = vor.u32 %v11955_v3, %v8371_v4 }
  0x62   :  { %v8167_v14 = vld [vmem:[#allocation3 + $0x450] sm:$0xf0]  ;;  %v11928_v15 = vld [vmem:[#allocation3 + $0x724] sm:$0xf]  ;;  %v8074_v19 = vor.u32 %v11880_v10, %v8071_v11 }
  0x63   :  { %1530 = vmatpush.bf16.msra.mxu1 %v8206_v46  ;;  %1543 = vmatpush.bf16.msra.mxu2 %v8302_v47  ;;  %v8263_v16 = vld [vmem:[#allocation3 + $0x750] sm:$0xf0]  ;;  %v11952_v17 = vld [vmem:[#allocation3 + $0xa24] sm:$0xf]  ;;  %v8170_v20 = vor.u32 %v11904_v12, %v8167_v14 }
  0x64   :  { %1556 = vmatpush.bf16.msra.mxu3 %v8398_v51  ;;  %v8359_v18 = vld [vmem:[#allocation3 + $0xa50] sm:$0xf0]  ;;  %v8266_v23 = vor.u32 %v11928_v15, %v8263_v16  ;;  %v11877_v24 = vld [vmem:[#allocation3 + $0xc4] sm:$0xf] }
  0x65   :  { %1518 = vmatpush.bf16.msra.mxu0 %v8098_v57  ;;  %v8059_v25 = vld [vmem:[#allocation3 + $0xf0] sm:$0xf0]  ;;  %v11901_v26 = vld [vmem:[#allocation3 + $0x3c4] sm:$0xf]  ;;  %v8362_v27 = vor.u32 %v11952_v17, %v8359_v18 }
  0x66   :  { %v8155_v28 = vld [vmem:[#allocation3 + $0x3f0] sm:$0xf0]  ;;  %v11925_v29 = vld [vmem:[#allocation3 + $0x6c4] sm:$0xf]  ;;  %v8062_v33 = vor.u32 %v11877_v24, %v8059_v25 }
  0x67   :  { %1531 = vmatpush.bf16.msra.mxu1 %v8194_v58  ;;  %1544 = vmatpush.bf16.msra.mxu2 %v8290_v59  ;;  %v8251_v30 = vld [vmem:[#allocation3 + $0x6f0] sm:$0xf0]  ;;  %v11949_v31 = vld [vmem:[#allocation3 + $0x9c4] sm:$0xf]  ;;  %v8158_v34 = vor.u32 %v11901_v26, %v8155_v28 }
  0x68   :  { %1557 = vmatpush.bf16.msra.mxu3 %v8386_v63  ;;  %v8347_v32 = vld [vmem:[#allocation3 + $0x9f0] sm:$0xf0]  ;;  %v8254_v35 = vor.u32 %v11925_v29, %v8251_v30  ;;  %v11874_v36 = vld [vmem:[#allocation3 + $0x64] sm:$0xf] }
  0x69   :  { %1519 = vmatpush.bf16.msra.mxu0 %v8086_v6  ;;  %v8047_v37 = vld [vmem:[#allocation3 + $0x90] sm:$0xf0]  ;;  %v11898_v38 = vld [vmem:[#allocation3 + $0x364] sm:$0xf]  ;;  %v8350_v40 = vor.u32 %v11949_v31, %v8347_v32 }
  0x6a   :  { %v8143_v41 = vld [vmem:[#allocation3 + $0x390] sm:$0xf0]  ;;  %v11922_v44 = vld [vmem:[#allocation3 + $0x664] sm:$0xf]  ;;  %v8050_v49 = vor.u32 %v11874_v36, %v8047_v37 }
  0x6b   :  { %1532 = vmatpush.bf16.msra.mxu1 %v8182_v8  ;;  %1545 = vmatpush.bf16.msra.mxu2 %v8278_v9  ;;  %v8239_v46 = vld [vmem:[#allocation3 + $0x690] sm:$0xf0]  ;;  %v11946_v47 = vld [vmem:[#allocation3 + $0x964] sm:$0xf]  ;;  %v8146_v52 = vor.u32 %v11898_v38, %v8143_v41 }
  0x6c   :  { %1558 = vmatpush.bf16.msra.mxu3 %v8374_v13  ;;  %v8335_v48 = vld [vmem:[#allocation3 + $0x990] sm:$0xf0]  ;;  %v11871_v50 = vld [vmem:[#allocation3 + $0x4] sm:$0xf]  ;;  %v8242_v53 = vor.u32 %v11922_v44, %v8239_v46 }
  0x6d   :  { %1520 = vmatpush.bf16.msra.mxu0 %v8074_v19  ;;  %v8035_v51 = vld [vmem:[#allocation3 + $0x30] sm:$0xf0]  ;;  %v11895_v54 = vld [vmem:[#allocation3 + $0x304] sm:$0xf]  ;;  %v8338_v57 = vor.u32 %v11946_v47, %v8335_v48 }
  0x6e   :  { %v8131_v55 = vld [vmem:[#allocation3 + $0x330] sm:$0xf0]  ;;  %v11919_v56 = vld [vmem:[#allocation3 + $0x604] sm:$0xf]  ;;  %v8038_v0 = vor.u32 %v11871_v50, %v8035_v51 }
  0x6f   :  { %1533 = vmatpush.bf16.msra.mxu1 %v8170_v20  ;;  %1546 = vmatpush.bf16.msra.mxu2 %v8266_v23  ;;  %v8227_v58 = vld [vmem:[#allocation3 + $0x630] sm:$0xf0]  ;;  %v11943_v59 = vld [vmem:[#allocation3 + $0x904] sm:$0xf]  ;;  %v8134_v4 = vor.u32 %v11895_v54, %v8131_v55 }
  0x70   :  { %1559 = vmatpush.bf16.msra.mxu3 %v8362_v27  ;;  %v8323_v60 = vld [vmem:[#allocation3 + $0x930] sm:$0xf0]  ;;  %v11988_v61 = vld [vmem:[#allocation3 + $0xea4] sm:$0xf]  ;;  %v8230_v6 = vor.u32 %v11919_v56, %v8227_v58 }
  0x71   :  { %1521 = vmatpush.bf16.msra.mxu0 %v8062_v33  ;;  %v8503_v62 = vld [vmem:[#allocation3 + $0xed0] sm:$0xf0]  ;;  %v12012_v63 = vld [vmem:[#allocation3 + $0x11a4] sm:$0xf]  ;;  %v8326_v10 = vor.u32 %v11943_v59, %v8323_v60 }
  0x72   :  { %v8599_v1 = vld [vmem:[#allocation3 + $0x11d0] sm:$0xf0]  ;;  %v12036_v2 = vld [vmem:[#allocation3 + $0x14a4] sm:$0xf]  ;;  %v8506_v11 = vor.u32 %v11988_v61, %v8503_v62 }
  0x73   :  { %1534 = vmatpush.bf16.msra.mxu1 %v8158_v34  ;;  %1547 = vmatpush.bf16.msra.mxu2 %v8254_v35  ;;  %v8695_v3 = vld [vmem:[#allocation3 + $0x14d0] sm:$0xf0]  ;;  %v12060_v8 = vld [vmem:[#allocation3 + $0x17a4] sm:$0xf]  ;;  %v8602_v12 = vor.u32 %v12012_v63, %v8599_v1 }
  0x74   :  { %1560 = vmatpush.bf16.msra.mxu3 %v8350_v40  ;;  %v8791_v9 = vld [vmem:[#allocation3 + $0x17d0] sm:$0xf0]  ;;  %v8698_v13 = vor.u32 %v12036_v2, %v8695_v3  ;;  %v11985_v14 = vld [vmem:[#allocation3 + $0xe44] sm:$0xf] }
  0x75   :  { %1522 = vmatpush.bf16.msra.mxu0 %v8050_v49  ;;  %v8491_v15 = vld [vmem:[#allocation3 + $0xe70] sm:$0xf0]  ;;  %v12009_v16 = vld [vmem:[#allocation3 + $0x1144] sm:$0xf]  ;;  %v8794_v17 = vor.u32 %v12060_v8, %v8791_v9 }
  0x76   :  { %v8587_v18 = vld [vmem:[#allocation3 + $0x1170] sm:$0xf0]  ;;  %v12033_v19 = vld [vmem:[#allocation3 + $0x1444] sm:$0xf]  ;;  %v8494_v25 = vor.u32 %v11985_v14, %v8491_v15 }
  0x77   :  { %1535 = vmatpush.bf16.msra.mxu1 %v8146_v52  ;;  %1548 = vmatpush.bf16.msra.mxu2 %v8242_v53  ;;  %v8683_v20 = vld [vmem:[#allocation3 + $0x1470] sm:$0xf0]  ;;  %v12057_v23 = vld [vmem:[#allocation3 + $0x1744] sm:$0xf]  ;;  %v8590_v26 = vor.u32 %v12009_v16, %v8587_v18 }
  0x78   :  { %1561 = vmatpush.bf16.msra.mxu3 %v8338_v57  ;;  %v8779_v24 = vld [vmem:[#allocation3 + $0x1770] sm:$0xf0]  ;;  %v8686_v27 = vor.u32 %v12033_v19, %v8683_v20  ;;  %v11982_v28 = vld [vmem:[#allocation3 + $0xde4] sm:$0xf] }
  0x79   :  { %1523 = vmatpush.bf16.msra.mxu0 %v8038_v0  ;;  %v8479_v29 = vld [vmem:[#allocation3 + $0xe10] sm:$0xf0]  ;;  %v12006_v30 = vld [vmem:[#allocation3 + $0x10e4] sm:$0xf]  ;;  %v8782_v31 = vor.u32 %v12057_v23, %v8779_v24 }
  0x7a   :  { %v8575_v32 = vld [vmem:[#allocation3 + $0x1110] sm:$0xf0]  ;;  %v12030_v33 = vld [vmem:[#allocation3 + $0x13e4] sm:$0xf]  ;;  %v8482_v37 = vor.u32 %v11982_v28, %v8479_v29 }
  0x7b   :  { %1536 = vmatpush.bf16.msra.mxu1 %v8134_v4  ;;  %1549 = vmatpush.bf16.msra.mxu2 %v8230_v6  ;;  %v8671_v34 = vld [vmem:[#allocation3 + $0x1410] sm:$0xf0]  ;;  %v12054_v35 = vld [vmem:[#allocation3 + $0x16e4] sm:$0xf]  ;;  %v8578_v38 = vor.u32 %v12006_v30, %v8575_v32 }
  0x7c   :  { %1562 = vmatpush.bf16.msra.mxu3 %v8326_v10  ;;  %v8767_v36 = vld [vmem:[#allocation3 + $0x1710] sm:$0xf0]  ;;  %1524 = vmatmul.bf16.vlgmr.msra.gmra.mxu0 %v13045_v21  ;;  %v8674_v40 = vor.u32 %v12030_v33, %v8671_v34  ;;  %v11979_v41 = vld [vmem:[#allocation3 + $0xd84] sm:$0xf] }
  0x7d   :  { %1568 = vmatpush.bf16.msrb.mxu0 %v8506_v11  ;;  %v8467_v44 = vld [vmem:[#allocation3 + $0xdb0] sm:$0xf0]  ;;  %v12003_v46 = vld [vmem:[#allocation3 + $0x1084] sm:$0xf]  ;;  %v8770_v47 = vor.u32 %v12054_v35, %v8767_v36 }
  0x7e   :  { %1550 = vmatmul.bf16.vlgmr.msra.gmra.mxu2 %v13037_v5  ;;  %1537 = vmatmul.bf16.vlgmr.msra.gmra.mxu1 %v13048_v22  ;;  %v8563_v48 = vld [vmem:[#allocation3 + $0x10b0] sm:$0xf0]  ;;  %v12027_v49 = vld [vmem:[#allocation3 + $0x1384] sm:$0xf]  ;;  %v8470_v53 = vor.u32 %v11979_v41, %v8467_v44  ;;  %v8125_v44 = vld [vmem:[#allocation3 + $0x2a8] sm:$0xf] }
  0x7f   :  { %1581 = vmatpush.bf16.msrb.mxu1 %v8602_v12  ;;  %1594 = vmatpush.bf16.msrb.mxu2 %v8698_v13  ;;  %v8659_v50 = vld [vmem:[#allocation3 + $0x13b0] sm:$0xf0]  ;;  %v12051_v51 = vld [vmem:[#allocation3 + $0x1684] sm:$0xf]  ;;  %v8566_v54 = vor.u32 %v12003_v46, %v8563_v48  ;;  %v11894_v46 = vld [vmem:[#allocation3 + $0x2d4] sm:$0xf0] }
  0x80   :  { %1607 = vmatpush.bf16.msrb.mxu3 %v8794_v17  ;;  %v8755_v52 = vld [vmem:[#allocation3 + $0x16b0] sm:$0xf0]  ;;  %v8662_v55 = vor.u32 %v12027_v49, %v8659_v50  ;;  %v11976_v56 = vld [vmem:[#allocation3 + $0xd24] sm:$0xf]  ;;  %v11918_v49 = vld [vmem:[#allocation3 + $0x5d4] sm:$0xf0] }
  0x81   :  { %1563 = vmatmul.bf16.vlgmr.msra.gmra.mxu3 %v13042_v7  ;;  %1569 = vmatpush.bf16.msrb.mxu0 %v8494_v25  ;;  %v8455_v57 = vld [vmem:[#allocation3 + $0xd50] sm:$0xf0]  ;;  %v12000_v58 = vld [vmem:[#allocation3 + $0x1024] sm:$0xf]  ;;  %v8758_v59 = vor.u32 %v12051_v51, %v8755_v52  ;;  %v8317_v50 = vld [vmem:[#allocation3 + $0x8a8] sm:$0xf] }
  0x82   :  { %v8551_v60 = vld [vmem:[#allocation3 + $0x1050] sm:$0xf0]  ;;  %v12024_v61 = vld [vmem:[#allocation3 + $0x1324] sm:$0xf]  ;;  %v8458_v1 = vor.u32 %v11976_v56, %v8455_v57  ;;  %v11942_v51 = vld [vmem:[#allocation3 + $0x8d4] sm:$0xf0]  ;;  %v8126_v57 = vor.u32 %v11894_v46, %v8125_v44 }
  0x83   :  { %1582 = vmatpush.bf16.msrb.mxu1 %v8590_v26  ;;  %1595 = vmatpush.bf16.msrb.mxu2 %v8686_v27  ;;  %v8647_v62 = vld [vmem:[#allocation3 + $0x1350] sm:$0xf0]  ;;  %v12048_v63 = vld [vmem:[#allocation3 + $0x1624] sm:$0xf]  ;;  %v8554_v2 = vor.u32 %v12000_v58, %v8551_v60  ;;  %v8113_v60 = vld [vmem:[#allocation3 + $0x248] sm:$0xf] }
  0x84   :  { %1608 = vmatpush.bf16.msrb.mxu3 %v8782_v31  ;;  %v8743_v0 = vld [vmem:[#allocation3 + $0x1650] sm:$0xf0]  ;;  %v8650_v3 = vor.u32 %v12024_v61, %v8647_v62  ;;  %v11973_v4 = vld [vmem:[#allocation3 + $0xcc4] sm:$0xf]  ;;  %v11891_v61 = vld [vmem:[#allocation3 + $0x274] sm:$0xf0] }
  0x85   :  { %1570 = vmatpush.bf16.msrb.mxu0 %v8482_v37  ;;  %v8443_v6 = vld [vmem:[#allocation3 + $0xcf0] sm:$0xf0]  ;;  %v11997_v8 = vld [vmem:[#allocation3 + $0xfc4] sm:$0xf]  ;;  %v8746_v9 = vor.u32 %v12048_v63, %v8743_v0  ;;  %v8209_v62 = vld [vmem:[#allocation3 + $0x548] sm:$0xf] }
  0x86   :  { %v8539_v10 = vld [vmem:[#allocation3 + $0xff0] sm:$0xf0]  ;;  %v12021_v11 = vld [vmem:[#allocation3 + $0x12c4] sm:$0xf]  ;;  %v8446_v15 = vor.u32 %v11973_v4, %v8443_v6  ;;  %v11915_v0 = vld [vmem:[#allocation3 + $0x574] sm:$0xf0]  ;;  %v8114_v6 = vor.u32 %v11891_v61, %v8113_v60 }
  0x87   :  { %1583 = vmatpush.bf16.msrb.mxu1 %v8578_v38  ;;  %1596 = vmatpush.bf16.msrb.mxu2 %v8674_v40  ;;  %v8635_v12 = vld [vmem:[#allocation3 + $0x12f0] sm:$0xf0]  ;;  %v12045_v13 = vld [vmem:[#allocation3 + $0x15c4] sm:$0xf]  ;;  %v8542_v16 = vor.u32 %v11997_v8, %v8539_v10  ;;  %v11963_v4 = vld [vmem:[#allocation3 + $0xb74] sm:$0xf0]  ;;  %v8210_v8 = vor.u32 %v11915_v0, %v8209_v62 }
  0x88   :  { %1609 = vmatpush.bf16.msrb.mxu3 %v8770_v47  ;;  %v8731_v14 = vld [vmem:[#allocation3 + $0x15f0] sm:$0xf0]  ;;  %v8638_v17 = vor.u32 %v12021_v11, %v8635_v12  ;;  %v11970_v18 = vld [vmem:[#allocation3 + $0xc64] sm:$0xf]  ;;  %v8221_v47 = vld [vmem:[#allocation3 + $0x5a8] sm:$0xf] }
  0x89   :  { %1571 = vmatpush.bf16.msrb.mxu0 %v8470_v53  ;;  %v8431_v19 = vld [vmem:[#allocation3 + $0xc90] sm:$0xf0]  ;;  %v11994_v20 = vld [vmem:[#allocation3 + $0xf64] sm:$0xf]  ;;  %v8734_v23 = vor.u32 %v12045_v13, %v8731_v14  ;;  %v8222_v58 = vor.u32 %v11918_v49, %v8221_v47  ;;  %v8101_v10 = vld [vmem:[#allocation3 + $0x1e8] sm:$0xf] }
  0x8a   :  { %v8527_v24 = vld [vmem:[#allocation3 + $0xf90] sm:$0xf0]  ;;  %v12018_v25 = vld [vmem:[#allocation3 + $0x1264] sm:$0xf]  ;;  %v8434_v29 = vor.u32 %v11970_v18, %v8431_v19  ;;  %v11888_v11 = vld [vmem:[#allocation3 + $0x214] sm:$0xf0] }
  0x8b   :  { %1584 = vmatpush.bf16.msrb.mxu1 %v8566_v54  ;;  %1597 = vmatpush.bf16.msrb.mxu2 %v8662_v55  ;;  %v8623_v26 = vld [vmem:[#allocation3 + $0x1290] sm:$0xf0]  ;;  %v12042_v27 = vld [vmem:[#allocation3 + $0x1564] sm:$0xf]  ;;  %v8530_v32 = vor.u32 %v11994_v20, %v8527_v24  ;;  %v8413_v54 = vld [vmem:[#allocation3 + $0xba8] sm:$0xf]  ;;  %v8102_v19 = vor.u32 %v11888_v11, %v8101_v10 }
  0x8c   :  { %1610 = vmatpush.bf16.msrb.mxu3 %v8758_v59  ;;  %v8719_v28 = vld [vmem:[#allocation3 + $0x1590] sm:$0xf0]  ;;  %v11967_v30 = vld [vmem:[#allocation3 + $0xc04] sm:$0xf]  ;;  %v8626_v33 = vor.u32 %v12018_v25, %v8623_v26  ;;  %v11966_v55 = vld [vmem:[#allocation3 + $0xbd4] sm:$0xf0]  ;;  %v8318_v59 = vor.u32 %v11942_v51, %v8317_v50 }
  0x8d   :  { %1572 = vmatpush.bf16.msrb.mxu0 %v8458_v1  ;;  %v8419_v31 = vld [vmem:[#allocation3 + $0xc30] sm:$0xf0]  ;;  %v11991_v34 = vld [vmem:[#allocation3 + $0xf04] sm:$0xf]  ;;  %v8722_v37 = vor.u32 %v12042_v27, %v8719_v28  ;;  %v8414_v63 = vor.u32 %v11966_v55, %v8413_v54  ;;  %v8305_v1 = vld [vmem:[#allocation3 + $0x848] sm:$0xf] }
  0x8e   :  { %v8515_v35 = vld [vmem:[#allocation3 + $0xf30] sm:$0xf0]  ;;  %v12015_v36 = vld [vmem:[#allocation3 + $0x1204] sm:$0xf]  ;;  %v8422_v48 = vor.u32 %v11967_v30, %v8419_v31  ;;  %v8197_v12 = vld [vmem:[#allocation3 + $0x4e8] sm:$0xf] }
  0x8f   :  { %1585 = vmatpush.bf16.msrb.mxu1 %v8554_v2  ;;  %1598 = vmatpush.bf16.msrb.mxu2 %v8650_v3  ;;  %v8611_v38 = vld [vmem:[#allocation3 + $0x1230] sm:$0xf0]  ;;  %v12039_v40 = vld [vmem:[#allocation3 + $0x1504] sm:$0xf]  ;;  %v8518_v52 = vor.u32 %v11991_v34, %v8515_v35  ;;  %v11939_v2 = vld [vmem:[#allocation3 + $0x874] sm:$0xf0] }
  0x90   :  { %1611 = vmatpush.bf16.msrb.mxu3 %v8746_v9  ;;  %v8707_v41 = vld [vmem:[#allocation3 + $0x1530] sm:$0xf0]  ;;  %v8614_v53 = vor.u32 %v12015_v36, %v8611_v38  ;;  %v8401_v3 = vld [vmem:[#allocation3 + $0xb48] sm:$0xf]  ;;  %v8306_v9 = vor.u32 %v11939_v2, %v8305_v1  ;;  %v11912_v14 = vld [vmem:[#allocation3 + $0x514] sm:$0xf0] }
  0x91   :  { %1573 = vmatpush.bf16.msrb.mxu0 %v8446_v15  ;;  %v8710_v56 = vor.u32 %v12039_v40, %v8707_v41  ;;  %v8402_v13 = vor.u32 %v11963_v4, %v8401_v3  ;;  %v8293_v15 = vld [vmem:[#allocation3 + $0x7e8] sm:$0xf]  ;;  %v11960_v18 = vld [vmem:[#allocation3 + $0xb14] sm:$0xf0]  ;;  %v8198_v20 = vor.u32 %v11912_v14, %v8197_v12 }
  0x92   :  { %v8089_v24 = vld [vmem:[#allocation3 + $0x188] sm:$0xf]  ;;  %v11885_v25 = vld [vmem:[#allocation3 + $0x1b4] sm:$0xf0] }
  0x93   :  { %1586 = vmatpush.bf16.msrb.mxu1 %v8542_v16  ;;  %1599 = vmatpush.bf16.msrb.mxu2 %v8638_v17  ;;  %v11936_v16 = vld [vmem:[#allocation3 + $0x814] sm:$0xf0]  ;;  %v8389_v17 = vld [vmem:[#allocation3 + $0xae8] sm:$0xf] }
  0x94   :  { %1612 = vmatpush.bf16.msrb.mxu3 %v8734_v23  ;;  %v8294_v23 = vor.u32 %v11936_v16, %v8293_v15  ;;  %v8185_v26 = vld [vmem:[#allocation3 + $0x488] sm:$0xf]  ;;  %v8390_v27 = vor.u32 %v11960_v18, %v8389_v17  ;;  %v11909_v28 = vld [vmem:[#allocation3 + $0x4b4] sm:$0xf0] }
  0x95   :  { %1574 = vmatpush.bf16.msrb.mxu0 %v8434_v29  ;;  %v8281_v29 = vld [vmem:[#allocation3 + $0x788] sm:$0xf]  ;;  %v11933_v30 = vld [vmem:[#allocation3 + $0x7b4] sm:$0xf0]  ;;  %v8186_v34 = vor.u32 %v11909_v28, %v8185_v26 }
  0x96   :  { %v8377_v31 = vld [vmem:[#allocation3 + $0xa88] sm:$0xf]  ;;  %v8282_v35 = vor.u32 %v11933_v30, %v8281_v29  ;;  %v11906_v41 = vld [vmem:[#allocation3 + $0x454] sm:$0xf0] }
  0x97   :  { %1587 = vmatpush.bf16.msrb.mxu1 %v8530_v32  ;;  %1600 = vmatpush.bf16.msrb.mxu2 %v8626_v33  ;;  %v11957_v32 = vld [vmem:[#allocation3 + $0xab4] sm:$0xf0]  ;;  %v8090_v33 = vor.u32 %v11885_v25, %v8089_v24  ;;  %v8077_v36 = vld [vmem:[#allocation3 + $0x128] sm:$0xf] }
  0x98   :  { %1613 = vmatpush.bf16.msrb.mxu3 %v8722_v37  ;;  %v11882_v37 = vld [vmem:[#allocation3 + $0x154] sm:$0xf0]  ;;  %v8173_v38 = vld [vmem:[#allocation3 + $0x428] sm:$0xf]  ;;  %v8378_v40 = vor.u32 %v11957_v32, %v8377_v31 }
  0x99   :  { %1575 = vmatpush.bf16.msrb.mxu0 %v8422_v48  ;;  %v8269_v44 = vld [vmem:[#allocation3 + $0x728] sm:$0xf]  ;;  %v11930_v46 = vld [vmem:[#allocation3 + $0x754] sm:$0xf0]  ;;  %v8078_v49 = vor.u32 %v11882_v37, %v8077_v36  ;;  %v8174_v50 = vor.u32 %v11906_v41, %v8173_v38 }
  0x9a   :  { %v8365_v47 = vld [vmem:[#allocation3 + $0xa28] sm:$0xf]  ;;  %v11954_v48 = vld [vmem:[#allocation3 + $0xa54] sm:$0xf0]  ;;  %v8270_v51 = vor.u32 %v11930_v46, %v8269_v44 }
  0x9b   :  { %1588 = vmatpush.bf16.msrb.mxu1 %v8518_v52  ;;  %1601 = vmatpush.bf16.msrb.mxu2 %v8614_v53  ;;  %v8065_v52 = vld [vmem:[#allocation3 + $0xc8] sm:$0xf]  ;;  %v11879_v53 = vld [vmem:[#allocation3 + $0xf4] sm:$0xf0]  ;;  %v8366_v55 = vor.u32 %v11954_v48, %v8365_v47 }
  0x9c   :  { %1614 = vmatpush.bf16.msrb.mxu3 %v8710_v56  ;;  %1576 = vmatmul.bf16.vlgmr.msrb.gmra.mxu0 %v13060_v42  ;;  %v8161_v54 = vld [vmem:[#allocation3 + $0x3c8] sm:$0xf]  ;;  %v11903_v56 = vld [vmem:[#allocation3 + $0x3f4] sm:$0xf0]  ;;  %v8066_v61 = vor.u32 %v11879_v53, %v8065_v52 }
  0x9d   :  { %1620 = vmatpush.bf16.msra.mxu0 %v8126_v57  ;;  %v8257_v57 = vld [vmem:[#allocation3 + $0x6c8] sm:$0xf]  ;;  %v11951_v60 = vld [vmem:[#allocation3 + $0x9f4] sm:$0xf0]  ;;  %v8162_v62 = vor.u32 %v11903_v56, %v8161_v54 }
  0x9e   :  { %1602 = vmatmul.bf16.vlgmr.msrb.gmra.mxu2 %v13058_v39  ;;  %1589 = vmatmul.bf16.vlgmr.msrb.gmra.mxu1 %v13064_v45  ;;  %v8053_v0 = vld [vmem:[#allocation3 + $0x68] sm:$0xf]  ;;  %v11876_v1 = vld [vmem:[#allocation3 + $0x94] sm:$0xf0] }
  0x9f   :  { %1633 = vmatpush.bf16.msra.mxu1 %v8222_v58  ;;  %1646 = vmatpush.bf16.msra.mxu2 %v8318_v59  ;;  %v11927_v58 = vld [vmem:[#allocation3 + $0x6f4] sm:$0xf0]  ;;  %v8353_v59 = vld [vmem:[#allocation3 + $0x9c8] sm:$0xf]  ;;  %v8054_v11 = vor.u32 %v11876_v1, %v8053_v0 }
  0xa0   :  { %1659 = vmatpush.bf16.msra.mxu3 %v8414_v63  ;;  %v8258_v63 = vor.u32 %v11927_v58, %v8257_v57  ;;  %v8149_v2 = vld [vmem:[#allocation3 + $0x368] sm:$0xf]  ;;  %v8354_v3 = vor.u32 %v11951_v60, %v8353_v59  ;;  %v11900_v4 = vld [vmem:[#allocation3 + $0x394] sm:$0xf0] }
  0xa1   :  { %1615 = vmatmul.bf16.vlgmr.msrb.gmra.mxu3 %v13062_v43  ;;  %1621 = vmatpush.bf16.msra.mxu0 %v8114_v6  ;;  %v8245_v6 = vld [vmem:[#allocation3 + $0x668] sm:$0xf]  ;;  %v11948_v10 = vld [vmem:[#allocation3 + $0x994] sm:$0xf0]  ;;  %v8150_v14 = vor.u32 %v11900_v4, %v8149_v2 }
  0xa2   :  { %v8041_v12 = vld [vmem:[#allocation3 + $0x8] sm:$0xf]  ;;  %v11897_v17 = vld [vmem:[#allocation3 + $0x334] sm:$0xf0] }
  0xa3   :  { %1634 = vmatpush.bf16.msra.mxu1 %v8210_v8  ;;  %1647 = vmatpush.bf16.msra.mxu2 %v8306_v9  ;;  %v11924_v8 = vld [vmem:[#allocation3 + $0x694] sm:$0xf0]  ;;  %v8341_v9 = vld [vmem:[#allocation3 + $0x968] sm:$0xf] }
  0xa4   :  { %1660 = vmatpush.bf16.msra.mxu3 %v8402_v13  ;;  %v11873_v13 = vld [vmem:[#allocation3 + $0x34] sm:$0xf0]  ;;  %v8246_v15 = vor.u32 %v11924_v8, %v8245_v6  ;;  %v8137_v16 = vld [vmem:[#allocation3 + $0x308] sm:$0xf] }
  0xa5   :  { %1622 = vmatpush.bf16.msra.mxu0 %v8102_v19  ;;  %v8233_v18 = vld [vmem:[#allocation3 + $0x608] sm:$0xf]  ;;  %v8342_v19 = vor.u32 %v11948_v10, %v8341_v9  ;;  %v11945_v24 = vld [vmem:[#allocation3 + $0x934] sm:$0xf0]  ;;  %v8042_v28 = vor.u32 %v11873_v13, %v8041_v12  ;;  %v8138_v32 = vor.u32 %v11897_v17, %v8137_v16 }
  0xa6   :  { %v8509_v25 = vld [vmem:[#allocation3 + $0xea8] sm:$0xf]  ;;  %v11990_v26 = vld [vmem:[#allocation3 + $0xed4] sm:$0xf0] }
  0xa7   :  { %1635 = vmatpush.bf16.msra.mxu1 %v8198_v20  ;;  %1648 = vmatpush.bf16.msra.mxu2 %v8294_v23  ;;  %v11921_v20 = vld [vmem:[#allocation3 + $0x634] sm:$0xf0]  ;;  %v8329_v23 = vld [vmem:[#allocation3 + $0x908] sm:$0xf]  ;;  %v8510_v37 = vor.u32 %v11990_v26, %v8509_v25 }
  0xa8   :  { %1661 = vmatpush.bf16.msra.mxu3 %v8390_v27  ;;  %v8605_v27 = vld [vmem:[#allocation3 + $0x11a8] sm:$0xf]  ;;  %v12014_v29 = vld [vmem:[#allocation3 + $0x11d4] sm:$0xf0]  ;;  %v8330_v36 = vor.u32 %v11945_v24, %v8329_v23 }
  0xa9   :  { %1623 = vmatpush.bf16.msra.mxu0 %v8090_v33  ;;  %v8701_v30 = vld [vmem:[#allocation3 + $0x14a8] sm:$0xf]  ;;  %v12038_v31 = vld [vmem:[#allocation3 + $0x14d4] sm:$0xf0]  ;;  %v8234_v33 = vor.u32 %v11921_v20, %v8233_v18  ;;  %v8606_v38 = vor.u32 %v12014_v29, %v8605_v27 }
  0xaa   :  { %v8497_v41 = vld [vmem:[#allocation3 + $0xe48] sm:$0xf]  ;;  %v11987_v44 = vld [vmem:[#allocation3 + $0xe74] sm:$0xf0] }
  0xab   :  { %1636 = vmatpush.bf16.msra.mxu1 %v8186_v34  ;;  %1649 = vmatpush.bf16.msra.mxu2 %v8282_v35  ;;  %v8797_v34 = vld [vmem:[#allocation3 + $0x17a8] sm:$0xf]  ;;  %v12062_v35 = vld [vmem:[#allocation3 + $0x17d4] sm:$0xf0]  ;;  %v8498_v53 = vor.u32 %v11987_v44, %v8497_v41 }
  0xac   :  { %1662 = vmatpush.bf16.msra.mxu3 %v8378_v40  ;;  %v8702_v40 = vor.u32 %v12038_v31, %v8701_v30  ;;  %v8593_v46 = vld [vmem:[#allocation3 + $0x1148] sm:$0xf]  ;;  %v8798_v47 = vor.u32 %v12062_v35, %v8797_v34  ;;  %v12011_v48 = vld [vmem:[#allocation3 + $0x1174] sm:$0xf0] }
  0xad   :  { %1624 = vmatpush.bf16.msra.mxu0 %v8078_v49  ;;  %v8689_v49 = vld [vmem:[#allocation3 + $0x1448] sm:$0xf]  ;;  %v12059_v52 = vld [vmem:[#allocation3 + $0x1774] sm:$0xf0]  ;;  %v8594_v54 = vor.u32 %v12011_v48, %v8593_v46 }
  0xae   :  { %v8485_v56 = vld [vmem:[#allocation3 + $0xde8] sm:$0xf]  ;;  %v11984_v57 = vld [vmem:[#allocation3 + $0xe14] sm:$0xf0] }
  0xaf   :  { %1637 = vmatpush.bf16.msra.mxu1 %v8174_v50  ;;  %1650 = vmatpush.bf16.msra.mxu2 %v8270_v51  ;;  %v12035_v50 = vld [vmem:[#allocation3 + $0x1474] sm:$0xf0]  ;;  %v8785_v51 = vld [vmem:[#allocation3 + $0x1748] sm:$0xf]  ;;  %v8486_v1 = vor.u32 %v11984_v57, %v8485_v56 }
  0xb0   :  { %1663 = vmatpush.bf16.msra.mxu3 %v8366_v55  ;;  %v8690_v55 = vor.u32 %v12035_v50, %v8689_v49  ;;  %v8581_v58 = vld [vmem:[#allocation3 + $0x10e8] sm:$0xf]  ;;  %v8786_v59 = vor.u32 %v12059_v52, %v8785_v51  ;;  %v12008_v60 = vld [vmem:[#allocation3 + $0x1114] sm:$0xf0] }
  0xb1   :  { %1625 = vmatpush.bf16.msra.mxu0 %v8066_v61  ;;  %v8677_v61 = vld [vmem:[#allocation3 + $0x13e8] sm:$0xf]  ;;  %v12056_v0 = vld [vmem:[#allocation3 + $0x1714] sm:$0xf0]  ;;  %v8582_v2 = vor.u32 %v12008_v60, %v8581_v58 }
  0xb2   :  { %v8473_v4 = vld [vmem:[#allocation3 + $0xd88] sm:$0xf]  ;;  %v11981_v6 = vld [vmem:[#allocation3 + $0xdb4] sm:$0xf0] }
  0xb3   :  { %1638 = vmatpush.bf16.msra.mxu1 %v8162_v62  ;;  %1651 = vmatpush.bf16.msra.mxu2 %v8258_v63  ;;  %v12032_v62 = vld [vmem:[#allocation3 + $0x1414] sm:$0xf0]  ;;  %v8773_v63 = vld [vmem:[#allocation3 + $0x16e8] sm:$0xf] }
  0xb4   :  { %1664 = vmatpush.bf16.msra.mxu3 %v8354_v3  ;;  %v8678_v3 = vor.u32 %v12032_v62, %v8677_v61  ;;  %v8569_v8 = vld [vmem:[#allocation3 + $0x1088] sm:$0xf]  ;;  %v8774_v9 = vor.u32 %v12056_v0, %v8773_v63  ;;  %v12005_v10 = vld [vmem:[#allocation3 + $0x10b4] sm:$0xf0] }
  0xb5   :  { %1626 = vmatpush.bf16.msra.mxu0 %v8054_v11  ;;  %v8665_v11 = vld [vmem:[#allocation3 + $0x1388] sm:$0xf]  ;;  %v12029_v12 = vld [vmem:[#allocation3 + $0x13b4] sm:$0xf0]  ;;  %v8570_v16 = vor.u32 %v12005_v10, %v8569_v8 }
  0xb6   :  { %v8761_v13 = vld [vmem:[#allocation3 + $0x1688] sm:$0xf]  ;;  %v8666_v17 = vor.u32 %v12029_v12, %v8665_v11  ;;  %v12002_v24 = vld [vmem:[#allocation3 + $0x1054] sm:$0xf0] }
  0xb7   :  { %1639 = vmatpush.bf16.msra.mxu1 %v8150_v14  ;;  %1652 = vmatpush.bf16.msra.mxu2 %v8246_v15  ;;  %v12053_v14 = vld [vmem:[#allocation3 + $0x16b4] sm:$0xf0]  ;;  %v8474_v15 = vor.u32 %v11981_v6, %v8473_v4  ;;  %v8461_v18 = vld [vmem:[#allocation3 + $0xd28] sm:$0xf] }
  0xb8   :  { %1665 = vmatpush.bf16.msra.mxu3 %v8342_v19  ;;  %v11978_v19 = vld [vmem:[#allocation3 + $0xd54] sm:$0xf0]  ;;  %v8557_v20 = vld [vmem:[#allocation3 + $0x1028] sm:$0xf]  ;;  %v8762_v23 = vor.u32 %v12053_v14, %v8761_v13  ;;  %v8885_v14 = vld [vmem:[#allocation3 + $0x2ac] sm:$0xf] }
  0xb9   :  { %1627 = vmatpush.bf16.msra.mxu0 %v8042_v28  ;;  %v8653_v25 = vld [vmem:[#allocation3 + $0x1328] sm:$0xf]  ;;  %v12026_v26 = vld [vmem:[#allocation3 + $0x1354] sm:$0xf0]  ;;  %v8462_v29 = vor.u32 %v11978_v19, %v8461_v18  ;;  %v8558_v30 = vor.u32 %v12002_v24, %v8557_v20  ;;  %v12109_v19 = vld [vmem:[#allocation3 + $0x5d8] sm:$0xf0] }
  0xba   :  { %v8749_v27 = vld [vmem:[#allocation3 + $0x1628] sm:$0xf]  ;;  %v12050_v28 = vld [vmem:[#allocation3 + $0x1654] sm:$0xf0]  ;;  %v8654_v31 = vor.u32 %v12026_v26, %v8653_v25  ;;  %v9077_v20 = vld [vmem:[#allocation3 + $0x8ac] sm:$0xf] }
  0xbb   :  { %1640 = vmatpush.bf16.msra.mxu1 %v8138_v32  ;;  %1653 = vmatpush.bf16.msra.mxu2 %v8234_v33  ;;  %v8449_v32 = vld [vmem:[#allocation3 + $0xcc8] sm:$0xf]  ;;  %v11975_v33 = vld [vmem:[#allocation3 + $0xcf4] sm:$0xf0]  ;;  %v8750_v35 = vor.u32 %v12050_v28, %v8749_v27  ;;  %v9173_v27 = vld [vmem:[#allocation3 + $0xbac] sm:$0xf] }
  0xbc   :  { %1666 = vmatpush.bf16.msra.mxu3 %v8330_v36  ;;  %1628 = vmatmul.bf16.vlgmr.msra.gmra.mxu0 %v13045_v21  ;;  %v8545_v34 = vld [vmem:[#allocation3 + $0xfc8] sm:$0xf]  ;;  %v11999_v36 = vld [vmem:[#allocation3 + $0xff4] sm:$0xf0]  ;;  %v8450_v46 = vor.u32 %v11975_v33, %v8449_v32  ;;  %v12157_v28 = vld [vmem:[#allocation3 + $0xbd8] sm:$0xf0] }
  0xbd   :  { %1672 = vmatpush.bf16.msrb.mxu0 %v8510_v37  ;;  %v8641_v37 = vld [vmem:[#allocation3 + $0x12c8] sm:$0xf]  ;;  %v12047_v41 = vld [vmem:[#allocation3 + $0x15f4] sm:$0xf0]  ;;  %v8546_v48 = vor.u32 %v11999_v36, %v8545_v34  ;;  %v12082_v36 = vld [vmem:[#allocation3 + $0x278] sm:$0xf0] }
  0xbe   :  { %1654 = vmatmul.bf16.vlgmr.msra.gmra.mxu2 %v13037_v5  ;;  %1641 = vmatmul.bf16.vlgmr.msra.gmra.mxu1 %v13048_v22  ;;  %v8437_v50 = vld [vmem:[#allocation3 + $0xc68] sm:$0xf]  ;;  %v11972_v51 = vld [vmem:[#allocation3 + $0xc94] sm:$0xf0] }
  0xbf   :  { %1685 = vmatpush.bf16.msrb.mxu1 %v8606_v38  ;;  %1698 = vmatpush.bf16.msrb.mxu2 %v8702_v40  ;;  %v12023_v38 = vld [vmem:[#allocation3 + $0x12f4] sm:$0xf0]  ;;  %v8737_v40 = vld [vmem:[#allocation3 + $0x15c8] sm:$0xf]  ;;  %v8438_v63 = vor.u32 %v11972_v51, %v8437_v50  ;;  %v8861_v51 = vld [vmem:[#allocation3 + $0x1ec] sm:$0xf] }
  0xc0   :  { %1711 = vmatpush.bf16.msrb.mxu3 %v8798_v47  ;;  %v8642_v49 = vor.u32 %v12023_v38, %v8641_v37  ;;  %v8533_v52 = vld [vmem:[#allocation3 + $0xf68] sm:$0xf]  ;;  %v11996_v56 = vld [vmem:[#allocation3 + $0xf94] sm:$0xf0]  ;;  %v8969_v37 = vld [vmem:[#allocation3 + $0x54c] sm:$0xf]  ;;  %v9174_v38 = vor.u32 %v12157_v28, %v9173_v27 }
  0xc1   :  { %1667 = vmatmul.bf16.vlgmr.msra.gmra.mxu3 %v13042_v7  ;;  %1673 = vmatpush.bf16.msrb.mxu0 %v8498_v53  ;;  %v8629_v57 = vld [vmem:[#allocation3 + $0x1268] sm:$0xf]  ;;  %v12020_v58 = vld [vmem:[#allocation3 + $0x1294] sm:$0xf0]  ;;  %v12145_v27 = vld [vmem:[#allocation3 + $0xa58] sm:$0xf0] }
  0xc2   :  { %v8725_v60 = vld [vmem:[#allocation3 + $0x1568] sm:$0xf]  ;;  %v12044_v61 = vld [vmem:[#allocation3 + $0x1594] sm:$0xf0] }
  0xc3   :  { %1686 = vmatpush.bf16.msrb.mxu1 %v8594_v54  ;;  %1699 = vmatpush.bf16.msrb.mxu2 %v8690_v55  ;;  %v1447_v54 = vpop.f32.mrf.mxu2  ;;  %v8738_v55 = vor.u32 %v12047_v41, %v8737_v40  ;;  %v8425_v0 = vld [vmem:[#allocation3 + $0xc08] sm:$0xf]  ;;  %v11993_v6 = vld [vmem:[#allocation3 + $0xf34] sm:$0xf0]  ;;  %v8726_v10 = vor.u32 %v12044_v61, %v8725_v60  ;;  %v12106_v40 = vld [vmem:[#allocation3 + $0x578] sm:$0xf0] }
  0xc4   :  { %1712 = vmatpush.bf16.msrb.mxu3 %v8786_v59  ;;  %v1460_v59 = vpop.f32.mrf.mxu3  ;;  %v8521_v4 = vld [vmem:[#allocation3 + $0xf08] sm:$0xf]  ;;  %v12017_v11 = vld [vmem:[#allocation3 + $0x1234] sm:$0xf0]  ;;  %v9065_v41 = vld [vmem:[#allocation3 + $0x84c] sm:$0xf] }
  0xc5   :  { %1674 = vmatpush.bf16.msrb.mxu0 %v8486_v1  ;;  %v11969_v1 = vld [vmem:[#allocation3 + $0xc34] sm:$0xf0]  ;;  %v8617_v8 = vld [vmem:[#allocation3 + $0x1208] sm:$0xf]  ;;  %v8522_v25 = vor.u32 %v11993_v6, %v8521_v4  ;;  %v9041_v4 = vld [vmem:[#allocation3 + $0x78c] sm:$0xf] }
  0xc6   :  { %v8713_v12 = vld [vmem:[#allocation3 + $0x1508] sm:$0xf]  ;;  %v12041_v13 = vld [vmem:[#allocation3 + $0x1534] sm:$0xf0]  ;;  %v8426_v18 = vor.u32 %v11969_v1, %v8425_v0  ;;  %v8618_v26 = vor.u32 %v12017_v11, %v8617_v8  ;;  %v12076_v0 = vld [vmem:[#allocation3 + $0x1b8] sm:$0xf0] }
  0xc7   :  { %1687 = vmatpush.bf16.msrb.mxu1 %v8582_v2  ;;  %1700 = vmatpush.bf16.msrb.mxu2 %v8678_v3  ;;  %v1421_v44 = vpop.f32.mrf.mxu0  ;;  %v1434_v47 = vpop.f32.mrf.mxu1  ;;  %v8534_v2 = vor.u32 %v11996_v56, %v8533_v52  ;;  %v8630_v3 = vor.u32 %v12020_v58, %v8629_v57  ;;  %v12079_v52 = vld [vmem:[#allocation3 + $0x218] sm:$0xf0]  ;;  %v9053_v56 = vld [vmem:[#allocation3 + $0x7ec] sm:$0xf] }
  0xc8   :  { %1713 = vmatpush.bf16.msrb.mxu3 %v8774_v9  ;;  %v1435_v53 = vadd.f32 %v1434_v47, %v1421_v44  ;;  %v12130_v44 = vld [vmem:[#allocation3 + $0x878] sm:$0xf0]  ;;  %v9149_v58 = vld [vmem:[#allocation3 + $0xaec] sm:$0xf]  ;;  %v8862_v60 = vor.u32 %v12079_v52, %v8861_v51 }
  0xc9   :  { %1675 = vmatpush.bf16.msrb.mxu0 %v8474_v15  ;;  %v12085_v15 = vld [vmem:[#allocation3 + $0x2d8] sm:$0xf0]  ;;  %v9066_v50 = vor.u32 %v12130_v44, %v9065_v41  ;;  %v8945_v1 = vld [vmem:[#allocation3 + $0x48c] sm:$0xf] }
  0xca   :  { %v1448_v62 = vadd.f32 %v1447_v54, %v1435_v53  ;;  %v12154_v47 = vld [vmem:[#allocation3 + $0xb78] sm:$0xf0]  ;;  %v8957_v53 = vld [vmem:[#allocation3 + $0x4ec] sm:$0xf] }
  0xcb   :  { %1688 = vmatpush.bf16.msrb.mxu1 %v8570_v16  ;;  %1701 = vmatpush.bf16.msrb.mxu2 %v8666_v17  ;;  %v8981_v16 = vld [vmem:[#allocation3 + $0x5ac] sm:$0xf]  ;;  %v12127_v57 = vld [vmem:[#allocation3 + $0x818] sm:$0xf0] }
  0xcc   :  { %1714 = vmatpush.bf16.msrb.mxu3 %v8762_v23  ;;  %v13082_v9 = vadd.f32 %v1460_v59, %v1448_v62  ;;  %v12133_v23 = vld [vmem:[#allocation3 + $0x8d8] sm:$0xf0]  ;;  %v1462_v32 = vpop.f32.mrf.mxu3  ;;  %v8982_v33 = vor.u32 %v12109_v19, %v8981_v16  ;;  %v9054_v62 = vor.u32 %v12127_v57, %v9053_v56  ;;  %v9137_v8 = vld [vmem:[#allocation3 + $0xa8c] sm:$0xf] }
  0xcd   :  { %1676 = vmatpush.bf16.msrb.mxu0 %v8462_v29  ;;  %v1449_v29 = vpop.f32.mrf.mxu2  ;;  %v9078_v34 = vor.u32 %v12133_v23, %v9077_v20  ;;  %v12151_v59 = vld [vmem:[#allocation3 + $0xb18] sm:$0xf0]  ;;  %v8825_v32 = vld [vmem:[#allocation3 + $0xcc] sm:$0xf] }
  0xce   :  { %v12124_v6 = vld [vmem:[#allocation3 + $0x7b8] sm:$0xf0]  ;;  %v9113_v44 = vld [vmem:[#allocation3 + $0x9cc] sm:$0xf] }
  0xcf   :  { %1689 = vmatpush.bf16.msrb.mxu1 %v8558_v30  ;;  %1702 = vmatpush.bf16.msrb.mxu2 %v8654_v31  ;;  %v1423_v17 = vpop.f32.mrf.mxu0  ;;  %v1436_v24 = vpop.f32.mrf.mxu1  ;;  %v8714_v30 = vor.u32 %v12041_v13, %v8713_v12  ;;  %v8886_v31 = vor.u32 %v12085_v15, %v8885_v14  ;;  %v9042_v14 = vor.u32 %v12124_v6, %v9041_v4  ;;  %v8837_v15 = vld [vmem:[#allocation3 + $0x12c] sm:$0xf]  ;;  %v12073_v16 = vld [vmem:[#allocation3 + $0x158] sm:$0xf0] }
  0xd0   :  { %1715 = vmatpush.bf16.msrb.mxu3 %v8750_v35  ;;  %v8873_v35 = vld [vmem:[#allocation3 + $0x24c] sm:$0xf]  ;;  %v12097_v23 = vld [vmem:[#allocation3 + $0x458] sm:$0xf0]  ;;  %v8838_v29 = vor.u32 %v12073_v16, %v8837_v15 }
  0xd1   :  { %1677 = vmatpush.bf16.msrb.mxu0 %v8450_v46  ;;  %v9161_v46 = vld [vmem:[#allocation3 + $0xb4c] sm:$0xf]  ;;  %v12091_v57 = vld [vmem:[#allocation3 + $0x398] sm:$0xf0] }
  0xd2   :  { %v9162_v54 = vor.u32 %v12154_v47, %v9161_v46  ;;  %v8933_v17 = vld [vmem:[#allocation3 + $0x42c] sm:$0xf]  ;;  %v12142_v46 = vld [vmem:[#allocation3 + $0x9f8] sm:$0xf0] }
  0xd3   :  { %1690 = vmatpush.bf16.msrb.mxu1 %v8546_v48  ;;  %1703 = vmatpush.bf16.msrb.mxu2 %v8642_v49  ;;  %v8874_v48 = vor.u32 %v12082_v36, %v8873_v35  ;;  %v8970_v49 = vor.u32 %v12106_v40, %v8969_v37  ;;  %v9029_v24 = vld [vmem:[#allocation3 + $0x72c] sm:$0xf]  ;;  %v12094_v36 = vld [vmem:[#allocation3 + $0x3f8] sm:$0xf0]  ;;  %v9114_v56 = vor.u32 %v12142_v46, %v9113_v44 }
  0xd4   :  { %1716 = vmatpush.bf16.msrb.mxu3 %v8738_v55  ;;  %v12103_v55 = vld [vmem:[#allocation3 + $0x518] sm:$0xf0]  ;;  %v9017_v37 = vld [vmem:[#allocation3 + $0x6cc] sm:$0xf] }
  0xd5   :  { %1678 = vmatpush.bf16.msrb.mxu0 %v8438_v63  ;;  %v8958_v61 = vor.u32 %v12103_v55, %v8957_v53  ;;  %v8849_v63 = vld [vmem:[#allocation3 + $0x18c] sm:$0xf]  ;;  %v12067_v53 = vld [vmem:[#allocation3 + $0x98] sm:$0xf0] }
  0xd6   :  { %v8850_v11 = vor.u32 %v12076_v0, %v8849_v63  ;;  %v8813_v52 = vld [vmem:[#allocation3 + $0x6c] sm:$0xf]  ;;  %v12064_v0 = vld [vmem:[#allocation3 + $0x38] sm:$0xf0] }
  0xd7   :  { %1691 = vmatpush.bf16.msrb.mxu1 %v8534_v2  ;;  %1704 = vmatpush.bf16.msrb.mxu2 %v8630_v3  ;;  %v9150_v2 = vor.u32 %v12151_v59, %v9149_v58  ;;  %v12100_v3 = vld [vmem:[#allocation3 + $0x4b8] sm:$0xf0]  ;;  %v9005_v58 = vld [vmem:[#allocation3 + $0x66c] sm:$0xf] }
  0xd8   :  { %1717 = vmatpush.bf16.msrb.mxu3 %v8726_v10  ;;  %v12148_v10 = vld [vmem:[#allocation3 + $0xab8] sm:$0xf0]  ;;  %v8946_v13 = vor.u32 %v12100_v3, %v8945_v1  ;;  %v8801_v63 = vld [vmem:[#allocation3 + $0xc] sm:$0xf] }
  0xd9   :  { %1679 = vmatpush.bf16.msrb.mxu0 %v8426_v18  ;;  %v9138_v20 = vor.u32 %v12148_v10, %v9137_v8  ;;  %v12115_v59 = vld [vmem:[#allocation3 + $0x698] sm:$0xf0]  ;;  %v8897_v3 = vld [vmem:[#allocation3 + $0x30c] sm:$0xf] }
  0xda   :  { %v12088_v4 = vld [vmem:[#allocation3 + $0x338] sm:$0xf0]  ;;  %v8993_v6 = vld [vmem:[#allocation3 + $0x60c] sm:$0xf] }
  0xdb   :  { %1692 = vmatpush.bf16.msrb.mxu1 %v8522_v25  ;;  %1705 = vmatpush.bf16.msrb.mxu2 %v8618_v26  ;;  %v1473_v12 = vpop.f32.mrf.mxu0  ;;  %v12121_v25 = vld [vmem:[#allocation3 + $0x758] sm:$0xf0]  ;;  %v9125_v26 = vld [vmem:[#allocation3 + $0xa2c] sm:$0xf] }
  0xdc   :  { %1718 = vmatpush.bf16.msrb.mxu3 %v8714_v30  ;;  %1680 = vmatmul.bf16.vlgmr.msrb.gmra.mxu0 %v13060_v42  ;;  %v1474_v18 = vadd.f32 %v1473_v12, %v13082_v9  ;;  %v8934_v30 = vor.u32 %v12097_v23, %v8933_v17  ;;  %v9126_v9 = vor.u32 %v12145_v27, %v9125_v26  ;;  %v9089_v12 = vld [vmem:[#allocation3 + $0x90c] sm:$0xf]  ;;  %v12181_v16 = vld [vmem:[#allocation3 + $0xed8] sm:$0xf0] }
  0xdd   :  { %3004 = vmatpush.bf16.msra.mxu0 %v8886_v31  ;;  %v1486_v19 = vpop.f32.mrf.mxu1  ;;  %v9030_v31 = vor.u32 %v12121_v25, %v9029_v24  ;;  %v9269_v15 = vld [vmem:[#allocation3 + $0xeac] sm:$0xf]  ;;  %v12229_v23 = vld [vmem:[#allocation3 + $0x14d8] sm:$0xf0]  ;;  %v8898_v24 = vor.u32 %v12088_v4, %v8897_v3 }
  0xde   :  { %1706 = vmatmul.bf16.vlgmr.msrb.gmra.mxu2 %v13058_v39  ;;  %1693 = vmatmul.bf16.vlgmr.msrb.gmra.mxu1 %v13064_v45  ;;  %v1487_v28 = vadd.f32 %v1486_v19, %v1474_v18  ;;  %v9365_v17 = vld [vmem:[#allocation3 + $0x11ac] sm:$0xf]  ;;  %v8802_v18 = vor.u32 %v12064_v0, %v8801_v63  ;;  %v12205_v19 = vld [vmem:[#allocation3 + $0x11d8] sm:$0xf0] }
  0xdf   :  { %3017 = vmatpush.bf16.msra.mxu1 %v8982_v33  ;;  %3030 = vmatpush.bf16.msra.mxu2 %v9078_v34  ;;  %v12070_v33 = vld [vmem:[#allocation3 + $0xf8] sm:$0xf0]  ;;  %v8921_v34 = vld [vmem:[#allocation3 + $0x3cc] sm:$0xf] }
  0xe0   :  { %3043 = vmatpush.bf16.msra.mxu3 %v9174_v38  ;;  %v12118_v38 = vld [vmem:[#allocation3 + $0x6f8] sm:$0xf0]  ;;  %v8826_v47 = vor.u32 %v12070_v33, %v8825_v32  ;;  %v9557_v26 = vld [vmem:[#allocation3 + $0x17ac] sm:$0xf] }
  0xe1   :  { %1719 = vmatmul.bf16.vlgmr.msrb.gmra.mxu3 %v13062_v43  ;;  %3005 = vmatpush.bf16.msra.mxu0 %v8874_v48  ;;  %v1499_v35 = vpop.f32.mrf.mxu2  ;;  %v9018_v51 = vor.u32 %v12118_v38, %v9017_v37  ;;  %v12253_v27 = vld [vmem:[#allocation3 + $0x17d8] sm:$0xf0]  ;;  %v9257_v32 = vld [vmem:[#allocation3 + $0xe4c] sm:$0xf] }
  0xe2   :  { %v1500_v40 = vadd.f32 %v1499_v35, %v1487_v28  ;;  %v12178_v33 = vld [vmem:[#allocation3 + $0xe78] sm:$0xf0]  ;;  %v9558_v35 = vor.u32 %v12253_v27, %v9557_v26  ;;  %v9545_v38 = vld [vmem:[#allocation3 + $0x174c] sm:$0xf] }
  0xe3   :  { %3018 = vmatpush.bf16.msra.mxu1 %v8970_v49  ;;  %3031 = vmatpush.bf16.msra.mxu2 %v9066_v50  ;;  %v1475_v49 = vpop.f32.mrf.mxu0  ;;  %v8922_v50 = vor.u32 %v12094_v36, %v8921_v34  ;;  %v9353_v34 = vld [vmem:[#allocation3 + $0x114c] sm:$0xf]  ;;  %v12226_v37 = vld [vmem:[#allocation3 + $0x1478] sm:$0xf0] }
  0xe4   :  { %3044 = vmatpush.bf16.msra.mxu3 %v9162_v54  ;;  %v1512_v41 = vpop.f32.mrf.mxu3  ;;  %v8909_v54 = vld [vmem:[#allocation3 + $0x36c] sm:$0xf]  ;;  %v12175_v49 = vld [vmem:[#allocation3 + $0xe18] sm:$0xf0] }
  0xe5   :  { %3006 = vmatpush.bf16.msra.mxu0 %v8862_v60  ;;  %v13089_v48 = vadd.f32 %v1512_v41, %v1500_v40  ;;  %v1488_v55 = vpop.f32.mrf.mxu1  ;;  %v9101_v60 = vld [vmem:[#allocation3 + $0x96c] sm:$0xf]  ;;  %v8910_v1 = vor.u32 %v12091_v57, %v8909_v54  ;;  %v12250_v40 = vld [vmem:[#allocation3 + $0x1778] sm:$0xf0]  ;;  %v9258_v41 = vor.u32 %v12178_v33, %v9257_v32 }
  0xe6   :  { %v9449_v36 = vld [vmem:[#allocation3 + $0x144c] sm:$0xf]  ;;  %v12223_v54 = vld [vmem:[#allocation3 + $0x1418] sm:$0xf0] }
  0xe7   :  { %3019 = vmatpush.bf16.msra.mxu1 %v8958_v61  ;;  %3032 = vmatpush.bf16.msra.mxu2 %v9054_v62  ;;  %v12139_v61 = vld [vmem:[#allocation3 + $0x998] sm:$0xf0]  ;;  %v8814_v62 = vor.u32 %v12067_v53, %v8813_v52  ;;  %v9450_v46 = vor.u32 %v12226_v37, %v9449_v36  ;;  %v9437_v53 = vld [vmem:[#allocation3 + $0x13ec] sm:$0xf] }
  0xe8   :  { %3045 = vmatpush.bf16.msra.mxu3 %v9150_v2  ;;  %v9006_v2 = vor.u32 %v12115_v59, %v9005_v58  ;;  %v9102_v10 = vor.u32 %v12139_v61, %v9101_v60  ;;  %v12199_v52 = vld [vmem:[#allocation3 + $0x1118] sm:$0xf0]  ;;  %v9533_v55 = vld [vmem:[#allocation3 + $0x16ec] sm:$0xf]  ;;  %v9438_v59 = vor.u32 %v12223_v54, %v9437_v53 }
  0xe9   :  { %3007 = vmatpush.bf16.msra.mxu0 %v8850_v11  ;;  %v1501_v8 = vpop.f32.mrf.mxu2  ;;  %v12112_v11 = vld [vmem:[#allocation3 + $0x638] sm:$0xf0]  ;;  %v9233_v60 = vld [vmem:[#allocation3 + $0xd8c] sm:$0xf] }
  0xea   :  { %v8994_v25 = vor.u32 %v12112_v11, %v8993_v6  ;;  %v12172_v61 = vld [vmem:[#allocation3 + $0xdb8] sm:$0xf0]  ;;  %v9521_v3 = vld [vmem:[#allocation3 + $0x168c] sm:$0xf] }
  0xeb   :  { %3020 = vmatpush.bf16.msra.mxu1 %v8946_v13  ;;  %3033 = vmatpush.bf16.msra.mxu2 %v9042_v14  ;;  %v12136_v13 = vld [vmem:[#allocation3 + $0x938] sm:$0xf0]  ;;  %v9234_v6 = vor.u32 %v12172_v61, %v9233_v60  ;;  %v9497_v37 = vld [vmem:[#allocation3 + $0x15cc] sm:$0xf] }
  0xec   :  { %3046 = vmatpush.bf16.msra.mxu3 %v9138_v20  ;;  %v1514_v14 = vpop.f32.mrf.mxu3  ;;  %v9461_v20 = vld [vmem:[#allocation3 + $0x14ac] sm:$0xf]  ;;  %v9090_v28 = vor.u32 %v12136_v13, %v9089_v12  ;;  %v12196_v0 = vld [vmem:[#allocation3 + $0x10b8] sm:$0xf0] }
  0xed   :  { %3008 = vmatpush.bf16.msra.mxu0 %v8838_v29  ;;  %v9270_v29 = vor.u32 %v12181_v16, %v9269_v15  ;;  %v12244_v4 = vld [vmem:[#allocation3 + $0x16b8] sm:$0xf0]  ;;  %v9221_v12 = vld [vmem:[#allocation3 + $0xd2c] sm:$0xf] }
  0xee   :  { %v12169_v13 = vld [vmem:[#allocation3 + $0xd58] sm:$0xf0]  ;;  %v9317_v14 = vld [vmem:[#allocation3 + $0x102c] sm:$0xf]  ;;  %v9522_v16 = vor.u32 %v12244_v4, %v9521_v3 }
  0xef   :  { %3021 = vmatpush.bf16.msra.mxu1 %v8934_v30  ;;  %3034 = vmatpush.bf16.msra.mxu2 %v9030_v31  ;;  %v9366_v30 = vor.u32 %v12205_v19, %v9365_v17  ;;  %v9462_v31 = vor.u32 %v12229_v23, %v9461_v20  ;;  %v12193_v17 = vld [vmem:[#allocation3 + $0x1058] sm:$0xf0]  ;;  %v9509_v23 = vld [vmem:[#allocation3 + $0x162c] sm:$0xf] }
  0xf0   :  { %3047 = vmatpush.bf16.msra.mxu3 %v9126_v9  ;;  %v12202_v9 = vld [vmem:[#allocation3 + $0x1178] sm:$0xf0]  ;;  %v9318_v26 = vor.u32 %v12193_v17, %v9317_v14  ;;  %v9185_v60 = vld [vmem:[#allocation3 + $0xc0c] sm:$0xf]  ;;  %v12108_v14 = vld [vmem:[#allocation3 + $0x5b0] sm:$0xf] }
  0xf1   :  { %3009 = vmatpush.bf16.msra.mxu0 %v8826_v47  ;;  %v9354_v44 = vor.u32 %v12202_v9, %v9353_v34  ;;  %v9245_v47 = vld [vmem:[#allocation3 + $0xdec] sm:$0xf]  ;;  %v12217_v19 = vld [vmem:[#allocation3 + $0x1358] sm:$0xf0]  ;;  %v12132_v17 = vld [vmem:[#allocation3 + $0x8b0] sm:$0xf] }
  0xf2   :  { %v9246_v57 = vor.u32 %v12175_v49, %v9245_v47  ;;  %v12190_v33 = vld [vmem:[#allocation3 + $0xff8] sm:$0xf0]  ;;  %v9401_v34 = vld [vmem:[#allocation3 + $0x12cc] sm:$0xf] }
  0xf3   :  { %3022 = vmatpush.bf16.msra.mxu1 %v8922_v50  ;;  %3035 = vmatpush.bf16.msra.mxu2 %v9018_v51  ;;  %v9341_v50 = vld [vmem:[#allocation3 + $0x10ec] sm:$0xf]  ;;  %v9546_v51 = vor.u32 %v12250_v40, %v9545_v38  ;;  %v12238_v38 = vld [vmem:[#allocation3 + $0x15f8] sm:$0xf0] }
  0xf4   :  { %3048 = vmatpush.bf16.msra.mxu3 %v9114_v56  ;;  %v12247_v56 = vld [vmem:[#allocation3 + $0x1718] sm:$0xf0]  ;;  %v9342_v58 = vor.u32 %v12199_v52, %v9341_v50  ;;  %v9197_v49 = vld [vmem:[#allocation3 + $0xc6c] sm:$0xf]  ;;  %v9498_v53 = vor.u32 %v12238_v38, %v9497_v37 }
  0xf5   :  { %3010 = vmatpush.bf16.msra.mxu0 %v8814_v62  ;;  %v9329_v62 = vld [vmem:[#allocation3 + $0x108c] sm:$0xf]  ;;  %v9534_v63 = vor.u32 %v12247_v56, %v9533_v55  ;;  %v12163_v50 = vld [vmem:[#allocation3 + $0xc98] sm:$0xf0] }
  0xf6   :  { %v12187_v54 = vld [vmem:[#allocation3 + $0xf98] sm:$0xf0]  ;;  %v9389_v55 = vld [vmem:[#allocation3 + $0x126c] sm:$0xf] }
  0xf7   :  { %3023 = vmatpush.bf16.msra.mxu1 %v8910_v1  ;;  %3036 = vmatpush.bf16.msra.mxu2 %v9006_v2  ;;  %v9425_v1 = vld [vmem:[#allocation3 + $0x138c] sm:$0xf]  ;;  %v12220_v2 = vld [vmem:[#allocation3 + $0x13b8] sm:$0xf0] }
  0xf8   :  { %3049 = vmatpush.bf16.msra.mxu3 %v9102_v10  ;;  %v9330_v10 = vor.u32 %v12196_v0, %v9329_v62  ;;  %v9426_v11 = vor.u32 %v12220_v2, %v9425_v1  ;;  %v12211_v56 = vld [vmem:[#allocation3 + $0x1298] sm:$0xf0]  ;;  %v9281_v0 = vld [vmem:[#allocation3 + $0xf0c] sm:$0xf] }
  0xf9   :  { %3011 = vmatpush.bf16.msra.mxu0 %v8802_v18  ;;  %v1525_v8 = vpop.f32.mrf.mxu0  ;;  %v9413_v18 = vld [vmem:[#allocation3 + $0x132c] sm:$0xf]  ;;  %v12160_v61 = vld [vmem:[#allocation3 + $0xc38] sm:$0xf0] }
  0xfa   :  { %v9414_v27 = vor.u32 %v12217_v19, %v9413_v18  ;;  %v12184_v1 = vld [vmem:[#allocation3 + $0xf38] sm:$0xf0]  ;;  %v9377_v2 = vld [vmem:[#allocation3 + $0x120c] sm:$0xf]  ;;  %v9079_v18 = vld [vmem:[#allocation3 + $0x8dc] sm:$0xf0] }
  0xfb   :  { %3024 = vmatpush.bf16.msra.mxu1 %v8898_v24  ;;  %3037 = vmatpush.bf16.msra.mxu2 %v8994_v25  ;;  %v1538_v15 = vpop.f32.mrf.mxu1  ;;  %v12241_v24 = vld [vmem:[#allocation3 + $0x1658] sm:$0xf0]  ;;  %v9222_v25 = vor.u32 %v12169_v13, %v9221_v12  ;;  %v12084_v12 = vld [vmem:[#allocation3 + $0x2b0] sm:$0xf]  ;;  %v8887_v13 = vld [vmem:[#allocation3 + $0x2dc] sm:$0xf0]  ;;  %v9282_v19 = vor.u32 %v12184_v1, %v9281_v0 }
  0xfc   :  { %3050 = vmatpush.bf16.msra.mxu3 %v9090_v28  ;;  %3012 = vmatmul.bf16.vlgmr.msra.gmra.mxu0 %v13045_v21  ;;  %v1539_v20 = vadd.f32 %v1538_v15, %v1525_v8  ;;  %v9209_v28 = vld [vmem:[#allocation3 + $0xccc] sm:$0xf]  ;;  %v9510_v32 = vor.u32 %v12241_v24, %v9509_v23  ;;  %v9186_v15 = vor.u32 %v12160_v61, %v9185_v60  ;;  %v12156_v23 = vld [vmem:[#allocation3 + $0xbb0] sm:$0xf]  ;;  %v9175_v24 = vld [vmem:[#allocation3 + $0xbdc] sm:$0xf0] }
  0xfd   :  { %3056 = vmatpush.bf16.msrb.mxu0 %v9270_v29  ;;  %v12166_v29 = vld [vmem:[#allocation3 + $0xcf8] sm:$0xf0]  ;;  %v9473_v8 = vld [vmem:[#allocation3 + $0x150c] sm:$0xf]  ;;  %v12099_v60 = vld [vmem:[#allocation3 + $0x490] sm:$0xf] }
  0xfe   :  { %3038 = vmatmul.bf16.vlgmr.msra.gmra.mxu2 %v13037_v5  ;;  %3025 = vmatmul.bf16.vlgmr.msra.gmra.mxu1 %v13048_v22  ;;  %v9210_v40 = vor.u32 %v12166_v29, %v9209_v28  ;;  %v9082_v28 = vor.u32 %v12132_v17, %v9079_v18  ;;  %v12081_v29 = vld [vmem:[#allocation3 + $0x250] sm:$0xf]  ;;  %v9043_v0 = vld [vmem:[#allocation3 + $0x7bc] sm:$0xf0] }
  0xff   :  { %3069 = vmatpush.bf16.msrb.mxu1 %v9366_v30  ;;  %3082 = vmatpush.bf16.msrb.mxu2 %v9462_v31  ;;  %v9305_v30 = vld [vmem:[#allocation3 + $0xfcc] sm:$0xf]  ;;  %v12147_v1 = vld [vmem:[#allocation3 + $0xa90] sm:$0xf]  ;;  %v9031_v18 = vld [vmem:[#allocation3 + $0x75c] sm:$0xf0] }
 0x100   :  { %3095 = vmatpush.bf16.msrb.mxu3 %v9558_v35  ;;  %v12214_v35 = vld [vmem:[#allocation3 + $0x12f8] sm:$0xf0]  ;;  %v12120_v17 = vld [vmem:[#allocation3 + $0x730] sm:$0xf] }
 0x101   :  { %3051 = vmatmul.bf16.vlgmr.msra.gmra.mxu3 %v13042_v7  ;;  %3057 = vmatpush.bf16.msrb.mxu0 %v9258_v41  ;;  %v1551_v31 = vpop.f32.mrf.mxu2  ;;  %v9402_v47 = vor.u32 %v12214_v35, %v9401_v34  ;;  %v12129_v34 = vld [vmem:[#allocation3 + $0x850] sm:$0xf]  ;;  %v9067_v35 = vld [vmem:[#allocation3 + $0x87c] sm:$0xf0] }
 0x102   :  { %v1552_v9 = vadd.f32 %v1551_v31, %v1539_v20  ;;  %v12105_v31 = vld [vmem:[#allocation3 + $0x550] sm:$0xf] }
 0x103   :  { %3070 = vmatpush.bf16.msrb.mxu1 %v9354_v44  ;;  %3083 = vmatpush.bf16.msrb.mxu2 %v9450_v46  ;;  %v1527_v44 = vpop.f32.mrf.mxu0  ;;  %v9306_v46 = vor.u32 %v12190_v33, %v9305_v30  ;;  %v1540_v52 = vpop.f32.mrf.mxu1  ;;  %v8875_v30 = vld [vmem:[#allocation3 + $0x27c] sm:$0xf0] }
 0x104   :  { %3096 = vmatpush.bf16.msrb.mxu3 %v9546_v51  ;;  %v1564_v36 = vpop.f32.mrf.mxu3  ;;  %v9293_v51 = vld [vmem:[#allocation3 + $0xf6c] sm:$0xf]  ;;  %v8971_v33 = vld [vmem:[#allocation3 + $0x57c] sm:$0xf0]  ;;  %v8878_v37 = vor.u32 %v12081_v29, %v8875_v30  ;;  %v12078_v44 = vld [vmem:[#allocation3 + $0x1f0] sm:$0xf] }
 0x105   :  { %3058 = vmatpush.bf16.msrb.mxu0 %v9246_v57  ;;  %v13095_v41 = vadd.f32 %v1564_v36, %v1552_v9  ;;  %v9485_v57 = vld [vmem:[#allocation3 + $0x156c] sm:$0xf]  ;;  %v9294_v62 = vor.u32 %v12187_v54, %v9293_v51  ;;  %v12153_v9 = vld [vmem:[#allocation3 + $0xb50] sm:$0xf]  ;;  %v9163_v36 = vld [vmem:[#allocation3 + $0xb7c] sm:$0xf0]  ;;  %v8974_v38 = vor.u32 %v12105_v31, %v8971_v33 }
 0x106   :  { %v12126_v51 = vld [vmem:[#allocation3 + $0x7f0] sm:$0xf]  ;;  %v9055_v52 = vld [vmem:[#allocation3 + $0x81c] sm:$0xf0] }
 0x107   :  { %3071 = vmatpush.bf16.msrb.mxu1 %v9342_v58  ;;  %3084 = vmatpush.bf16.msrb.mxu2 %v9438_v59  ;;  %v12235_v58 = vld [vmem:[#allocation3 + $0x1598] sm:$0xf0]  ;;  %v9198_v59 = vor.u32 %v12163_v50, %v9197_v49  ;;  %v9166_v49 = vor.u32 %v12153_v9, %v9163_v36  ;;  %v8959_v50 = vld [vmem:[#allocation3 + $0x51c] sm:$0xf0]  ;;  %v12093_v29 = vld [vmem:[#allocation3 + $0x3d0] sm:$0xf] }
 0x108   :  { %3097 = vmatpush.bf16.msrb.mxu3 %v9534_v63  ;;  %v9390_v63 = vor.u32 %v12211_v56, %v9389_v55  ;;  %v9486_v4 = vor.u32 %v12235_v58, %v9485_v57  ;;  %v9151_v54 = vld [vmem:[#allocation3 + $0xb1c] sm:$0xf0]  ;;  %v9058_v57 = vor.u32 %v12126_v51, %v9055_v52  ;;  %v12075_v58 = vld [vmem:[#allocation3 + $0x190] sm:$0xf] }
 0x109   :  { %3059 = vmatpush.bf16.msrb.mxu0 %v9234_v6  ;;  %v1553_v3 = vpop.f32.mrf.mxu2  ;;  %v12208_v6 = vld [vmem:[#allocation3 + $0x1238] sm:$0xf0]  ;;  %v8923_v31 = vld [vmem:[#allocation3 + $0x3fc] sm:$0xf0]  ;;  %v12141_v9 = vld [vmem:[#allocation3 + $0x9d0] sm:$0xf] }
 0x10a   :  { %v9378_v20 = vor.u32 %v12208_v6, %v9377_v2  ;;  %v9139_v2 = vld [vmem:[#allocation3 + $0xabc] sm:$0xf0] }
 0x10b   :  { %3072 = vmatpush.bf16.msrb.mxu1 %v9330_v10  ;;  %3085 = vmatpush.bf16.msrb.mxu2 %v9426_v11  ;;  %v12232_v10 = vld [vmem:[#allocation3 + $0x1538] sm:$0xf0]  ;;  %v9019_v33 = vld [vmem:[#allocation3 + $0x6fc] sm:$0xf0] }
 0x10c   :  { %3098 = vmatpush.bf16.msrb.mxu3 %v9522_v16  ;;  %v1566_v11 = vpop.f32.mrf.mxu3  ;;  %v8983_v16 = vld [vmem:[#allocation3 + $0x5dc] sm:$0xf0] }
 0x10d   :  { %3060 = vmatpush.bf16.msrb.mxu0 %v9222_v25  ;;  %v9474_v25 = vor.u32 %v12232_v10, %v9473_v8  ;;  %v12072_v10 = vld [vmem:[#allocation3 + $0x130] sm:$0xf]  ;;  %v8839_v11 = vld [vmem:[#allocation3 + $0x15c] sm:$0xf0] }
 0x10e   :  { %v9115_v36 = vld [vmem:[#allocation3 + $0x9fc] sm:$0xf0] }
 0x10f   :  { %3073 = vmatpush.bf16.msrb.mxu1 %v9318_v26  ;;  %3086 = vmatpush.bf16.msrb.mxu2 %v9414_v27  ;;  %v8890_v26 = vor.u32 %v12084_v12, %v8887_v13  ;;  %v8986_v27 = vor.u32 %v12108_v14, %v8983_v16  ;;  %v12096_v12 = vld [vmem:[#allocation3 + $0x430] sm:$0xf]  ;;  %v8935_v16 = vld [vmem:[#allocation3 + $0x45c] sm:$0xf0]  ;;  %v9118_v52 = vor.u32 %v12141_v9, %v9115_v36 }
 0x110   :  { %3099 = vmatpush.bf16.msrb.mxu3 %v9510_v32  ;;  %v9178_v32 = vor.u32 %v12156_v23, %v9175_v24  ;;  %v8842_v24 = vor.u32 %v12072_v10, %v8839_v11  ;;  %v12180_v11 = vld [vmem:[#allocation3 + $0xeb0] sm:$0xf] }
 0x111   :  { %3061 = vmatpush.bf16.msrb.mxu0 %v9210_v40  ;;  %v9070_v40 = vor.u32 %v12129_v34, %v9067_v35 }
 0x113   :  { %3074 = vmatpush.bf16.msrb.mxu1 %v9306_v46  ;;  %3087 = vmatpush.bf16.msrb.mxu2 %v9402_v47  ;;  %v8863_v46 = vld [vmem:[#allocation3 + $0x21c] sm:$0xf0]  ;;  %v12102_v47 = vld [vmem:[#allocation3 + $0x4f0] sm:$0xf] }
 0x114   :  { %3100 = vmatpush.bf16.msrb.mxu3 %v9498_v53  ;;  %v12150_v53 = vld [vmem:[#allocation3 + $0xaf0] sm:$0xf]  ;;  %v8866_v55 = vor.u32 %v12078_v44, %v8863_v46  ;;  %v8962_v56 = vor.u32 %v12102_v47, %v8959_v50  ;;  %v8926_v44 = vor.u32 %v12093_v29, %v8923_v31  ;;  %v9259_v29 = vld [vmem:[#allocation3 + $0xe7c] sm:$0xf0] }
 0x115   :  { %3062 = vmatpush.bf16.msrb.mxu0 %v9198_v59  ;;  %v8851_v59 = vld [vmem:[#allocation3 + $0x1bc] sm:$0xf0]  ;;  %v9154_v61 = vor.u32 %v12150_v53, %v9151_v54  ;;  %v12066_v47 = vld [vmem:[#allocation3 + $0x70] sm:$0xf] }
 0x116   :  { %v8854_v3 = vor.u32 %v12075_v58, %v8851_v59  ;;  %v12090_v50 = vld [vmem:[#allocation3 + $0x370] sm:$0xf]  ;;  %v8911_v53 = vld [vmem:[#allocation3 + $0x39c] sm:$0xf0] }
 0x117   :  { %3075 = vmatpush.bf16.msrb.mxu1 %v9294_v62  ;;  %3088 = vmatpush.bf16.msrb.mxu2 %v9390_v63  ;;  %v8947_v62 = vld [vmem:[#allocation3 + $0x4bc] sm:$0xf0]  ;;  %v12123_v63 = vld [vmem:[#allocation3 + $0x790] sm:$0xf] }
 0x118   :  { %3101 = vmatpush.bf16.msrb.mxu3 %v9486_v4  ;;  %v8950_v6 = vor.u32 %v12099_v60, %v8947_v62  ;;  %v9046_v8 = vor.u32 %v12123_v63, %v9043_v0  ;;  %v12114_v54 = vld [vmem:[#allocation3 + $0x670] sm:$0xf]  ;;  %v8803_v60 = vld [vmem:[#allocation3 + $0x3c] sm:$0xf0] }
 0x119   :  { %3063 = vmatpush.bf16.msrb.mxu0 %v9186_v15  ;;  %v1577_v4 = vpop.f32.mrf.mxu0  ;;  %v9142_v15 = vor.u32 %v12147_v1, %v9139_v2  ;;  %v12063_v59 = vld [vmem:[#allocation3 + $0x10] sm:$0xf]  ;;  %v8899_v0 = vld [vmem:[#allocation3 + $0x33c] sm:$0xf0] }
 0x11a   :  { %v1578_v13 = vadd.f32 %v1577_v4, %v13095_v41  ;;  %v12087_v63 = vld [vmem:[#allocation3 + $0x310] sm:$0xf]  ;;  %v8995_v4 = vld [vmem:[#allocation3 + $0x63c] sm:$0xf0] }
 0x11b   :  { %3076 = vmatpush.bf16.msrb.mxu1 %v9282_v19  ;;  %3089 = vmatpush.bf16.msrb.mxu2 %v9378_v20  ;;  %v1590_v14 = vpop.f32.mrf.mxu1  ;;  %v12144_v19 = vld [vmem:[#allocation3 + $0xa30] sm:$0xf]  ;;  %v9127_v20 = vld [vmem:[#allocation3 + $0xa5c] sm:$0xf0] }
 0x11c   :  { %3102 = vmatpush.bf16.msrb.mxu3 %v9474_v25  ;;  %3064 = vmatmul.bf16.vlgmr.msrb.gmra.mxu0 %v13060_v42  ;;  %v1591_v23 = vadd.f32 %v1590_v14, %v1578_v13  ;;  %v8938_v25 = vor.u32 %v12096_v12, %v8935_v16  ;;  %v9130_v41 = vor.u32 %v12144_v19, %v9127_v20  ;;  %v12111_v1 = vld [vmem:[#allocation3 + $0x610] sm:$0xf]  ;;  %v9271_v12 = vld [vmem:[#allocation3 + $0xedc] sm:$0xf0] }
 0x11d   :  { %3108 = vmatpush.bf16.msra.mxu0 %v8890_v26  ;;  %v9034_v26 = vor.u32 %v12120_v17, %v9031_v18  ;;  %v12204_v13 = vld [vmem:[#allocation3 + $0x11b0] sm:$0xf]  ;;  %v8806_v14 = vor.u32 %v12063_v59, %v8803_v60  ;;  %v9463_v17 = vld [vmem:[#allocation3 + $0x14dc] sm:$0xf0]  ;;  %v8902_v18 = vor.u32 %v12087_v63, %v8899_v0  ;;  %v8998_v19 = vor.u32 %v12111_v1, %v8995_v4 }
 0x11e   :  { %3090 = vmatmul.bf16.vlgmr.msrb.gmra.mxu2 %v13058_v39  ;;  %3077 = vmatmul.bf16.vlgmr.msrb.gmra.mxu1 %v13064_v45  ;;  %v12228_v16 = vld [vmem:[#allocation3 + $0x14b0] sm:$0xf]  ;;  %v9355_v31 = vld [vmem:[#allocation3 + $0x117c] sm:$0xf0] }
 0x11f   :  { %3121 = vmatpush.bf16.msra.mxu1 %v8986_v27  ;;  %3134 = vmatpush.bf16.msra.mxu2 %v9082_v28  ;;  %v12069_v27 = vld [vmem:[#allocation3 + $0xd0] sm:$0xf]  ;;  %v8827_v28 = vld [vmem:[#allocation3 + $0xfc] sm:$0xf0] }
 0x120   :  { %3147 = vmatpush.bf16.msra.mxu3 %v9178_v32  ;;  %v12117_v32 = vld [vmem:[#allocation3 + $0x6d0] sm:$0xf]  ;;  %v9427_v63 = vld [vmem:[#allocation3 + $0x13bc] sm:$0xf0] }
 0x121   :  { %3103 = vmatmul.bf16.vlgmr.msrb.gmra.mxu3 %v13062_v43  ;;  %3109 = vmatpush.bf16.msra.mxu0 %v8878_v37  ;;  %v1603_v30 = vpop.f32.mrf.mxu2  ;;  %v8830_v37 = vor.u32 %v12069_v27, %v8827_v28  ;;  %v9022_v46 = vor.u32 %v12117_v32, %v9019_v33  ;;  %v12252_v20 = vld [vmem:[#allocation3 + $0x17b0] sm:$0xf]  ;;  %v9466_v27 = vor.u32 %v12228_v16, %v9463_v17  ;;  %v9451_v33 = vld [vmem:[#allocation3 + $0x147c] sm:$0xf0] }
 0x122   :  { %v1604_v34 = vadd.f32 %v1603_v30, %v1591_v23  ;;  %v9559_v23 = vld [vmem:[#allocation3 + $0x17dc] sm:$0xf0]  ;;  %v12177_v28 = vld [vmem:[#allocation3 + $0xe50] sm:$0xf] }
 0x123   :  { %3122 = vmatpush.bf16.msra.mxu1 %v8974_v38  ;;  %3135 = vmatpush.bf16.msra.mxu2 %v9070_v40  ;;  %v1579_v40 = vpop.f32.mrf.mxu0  ;;  %v1592_v51 = vpop.f32.mrf.mxu1  ;;  %v12201_v30 = vld [vmem:[#allocation3 + $0x1150] sm:$0xf]  ;;  %v9262_v9 = vor.u32 %v12177_v28, %v9259_v29  ;;  %v9523_v1 = vld [vmem:[#allocation3 + $0x16bc] sm:$0xf0] }
 0x124   :  { %3148 = vmatpush.bf16.msra.mxu3 %v9166_v49  ;;  %v1616_v35 = vpop.f32.mrf.mxu3  ;;  %v8815_v49 = vld [vmem:[#allocation3 + $0x9c] sm:$0xf0]  ;;  %v12225_v32 = vld [vmem:[#allocation3 + $0x1450] sm:$0xf]  ;;  %v9358_v36 = vor.u32 %v12201_v30, %v9355_v31 }
 0x125   :  { %3110 = vmatpush.bf16.msra.mxu0 %v8866_v55  ;;  %v13102_v38 = vadd.f32 %v1616_v35, %v1604_v34  ;;  %v9007_v55 = vld [vmem:[#allocation3 + $0x69c] sm:$0xf0]  ;;  %v8818_v58 = vor.u32 %v12066_v47, %v8815_v49  ;;  %v12249_v34 = vld [vmem:[#allocation3 + $0x1750] sm:$0xf] }
 0x126   :  { %v9010_v62 = vor.u32 %v12114_v54, %v9007_v55  ;;  %v9547_v35 = vld [vmem:[#allocation3 + $0x177c] sm:$0xf0]  ;;  %v12174_v40 = vld [vmem:[#allocation3 + $0xdf0] sm:$0xf] }
 0x127   :  { %3123 = vmatpush.bf16.msra.mxu1 %v8962_v56  ;;  %3136 = vmatpush.bf16.msra.mxu2 %v9058_v57  ;;  %v12138_v56 = vld [vmem:[#allocation3 + $0x970] sm:$0xf]  ;;  %v9103_v57 = vld [vmem:[#allocation3 + $0x99c] sm:$0xf0]  ;;  %v9550_v47 = vor.u32 %v12249_v34, %v9547_v35 }
 0x128   :  { %3149 = vmatpush.bf16.msra.mxu3 %v9154_v61  ;;  %v8914_v61 = vor.u32 %v12090_v50, %v8911_v53  ;;  %v9343_v49 = vld [vmem:[#allocation3 + $0x111c] sm:$0xf0]  ;;  %v12222_v50 = vld [vmem:[#allocation3 + $0x13f0] sm:$0xf] }
 0x129   :  { %3111 = vmatpush.bf16.msra.mxu0 %v8854_v3  ;;  %v1605_v2 = vpop.f32.mrf.mxu2  ;;  %v9106_v3 = vor.u32 %v12138_v56, %v9103_v57  ;;  %v9439_v51 = vld [vmem:[#allocation3 + $0x141c] sm:$0xf0]  ;;  %v12171_v57 = vld [vmem:[#allocation3 + $0xd90] sm:$0xf] }
 0x12a   :  { %v9535_v53 = vld [vmem:[#allocation3 + $0x171c] sm:$0xf0]  ;;  %v9442_v56 = vor.u32 %v12222_v50, %v9439_v51  ;;  %v12195_v59 = vld [vmem:[#allocation3 + $0x1090] sm:$0xf] }
 0x12b   :  { %3124 = vmatpush.bf16.msra.mxu1 %v8950_v6  ;;  %3137 = vmatpush.bf16.msra.mxu2 %v9046_v8  ;;  %v12135_v6 = vld [vmem:[#allocation3 + $0x910] sm:$0xf]  ;;  %v9091_v8 = vld [vmem:[#allocation3 + $0x93c] sm:$0xf0] }
 0x12c   :  { %3150 = vmatpush.bf16.msra.mxu3 %v9142_v15  ;;  %v1618_v10 = vpop.f32.mrf.mxu3  ;;  %v9367_v15 = vld [vmem:[#allocation3 + $0x11dc] sm:$0xf0]  ;;  %v12243_v0 = vld [vmem:[#allocation3 + $0x1690] sm:$0xf] }
 0x12d   :  { %3112 = vmatpush.bf16.msra.mxu0 %v8842_v24  ;;  %v9094_v24 = vor.u32 %v12135_v6, %v9091_v8  ;;  %v12168_v8 = vld [vmem:[#allocation3 + $0xd30] sm:$0xf]  ;;  %v9223_v10 = vld [vmem:[#allocation3 + $0xd5c] sm:$0xf0] }
 0x12e   :  { %v9415_v16 = vld [vmem:[#allocation3 + $0x135c] sm:$0xf0]  ;;  %v12237_v34 = vld [vmem:[#allocation3 + $0x15d0] sm:$0xf] }
 0x12f   :  { %3125 = vmatpush.bf16.msra.mxu1 %v8938_v25  ;;  %3138 = vmatpush.bf16.msra.mxu2 %v9034_v26  ;;  %v9274_v25 = vor.u32 %v12180_v11, %v9271_v12  ;;  %v9370_v26 = vor.u32 %v12204_v13, %v9367_v15  ;;  %v12192_v11 = vld [vmem:[#allocation3 + $0x1030] sm:$0xf]  ;;  %v9526_v13 = vor.u32 %v12243_v0, %v9523_v1  ;;  %v9307_v30 = vld [vmem:[#allocation3 + $0xffc] sm:$0xf0] }
 0x130   :  { %3151 = vmatpush.bf16.msra.mxu3 %v9130_v41  ;;  %v9562_v41 = vor.u32 %v12252_v20, %v9559_v23  ;;  %v12216_v15 = vld [vmem:[#allocation3 + $0x1330] sm:$0xf]  ;;  %v9226_v20 = vor.u32 %v12168_v8, %v9223_v10  ;;  %v9403_v31 = vld [vmem:[#allocation3 + $0x12fc] sm:$0xf0]  ;;  %v8893_v10 = vld [vmem:[#allocation3 + $0x2b4] sm:$0xf] }
 0x131   :  { %3113 = vmatpush.bf16.msra.mxu0 %v8830_v37  ;;  %v9454_v37 = vor.u32 %v12225_v32, %v9451_v33  ;;  %v9499_v35 = vld [vmem:[#allocation3 + $0x15fc] sm:$0xf0]  ;;  %v12207_v0 = vld [vmem:[#allocation3 + $0x1210] sm:$0xf] }
 0x132   :  { %v9502_v51 = vor.u32 %v12237_v34, %v9499_v35  ;;  %v12155_v34 = vld [vmem:[#allocation3 + $0xb80] sm:$0xf0] }
 0x133   :  { %3126 = vmatpush.bf16.msra.mxu1 %v8926_v44  ;;  %3139 = vmatpush.bf16.msra.mxu2 %v9022_v46  ;;  %v9247_v44 = vld [vmem:[#allocation3 + $0xe1c] sm:$0xf0]  ;;  %v12198_v46 = vld [vmem:[#allocation3 + $0x10f0] sm:$0xf] }
 0x134   :  { %3152 = vmatpush.bf16.msra.mxu3 %v9118_v52  ;;  %v12246_v52 = vld [vmem:[#allocation3 + $0x16f0] sm:$0xf]  ;;  %v9250_v54 = vor.u32 %v12174_v40, %v9247_v44  ;;  %v9346_v55 = vor.u32 %v12198_v46, %v9343_v49 }
 0x135   :  { %3114 = vmatpush.bf16.msra.mxu0 %v8818_v58  ;;  %v9235_v58 = vld [vmem:[#allocation3 + $0xdbc] sm:$0xf0]  ;;  %v9538_v60 = vor.u32 %v12246_v52, %v9535_v53  ;;  %v12162_v46 = vld [vmem:[#allocation3 + $0xc70] sm:$0xf] }
 0x136   :  { %v9238_v2 = vor.u32 %v12171_v57, %v9235_v58  ;;  %v12186_v49 = vld [vmem:[#allocation3 + $0xf70] sm:$0xf]  ;;  %v9295_v52 = vld [vmem:[#allocation3 + $0xf9c] sm:$0xf0] }
 0x137   :  { %3127 = vmatpush.bf16.msra.mxu1 %v8914_v61  ;;  %3140 = vmatpush.bf16.msra.mxu2 %v9010_v62  ;;  %v9331_v61 = vld [vmem:[#allocation3 + $0x10bc] sm:$0xf0]  ;;  %v12219_v62 = vld [vmem:[#allocation3 + $0x1390] sm:$0xf] }
 0x138   :  { %3153 = vmatpush.bf16.msra.mxu3 %v9106_v3  ;;  %v9334_v4 = vor.u32 %v12195_v59, %v9331_v61  ;;  %v9430_v6 = vor.u32 %v12219_v62, %v9427_v63  ;;  %v12210_v53 = vld [vmem:[#allocation3 + $0x1270] sm:$0xf]  ;;  %v9187_v59 = vld [vmem:[#allocation3 + $0xc3c] sm:$0xf0] }
 0x139   :  { %3115 = vmatpush.bf16.msra.mxu0 %v8806_v14  ;;  %v1629_v3 = vpop.f32.mrf.mxu0  ;;  %v9319_v14 = vld [vmem:[#allocation3 + $0x105c] sm:$0xf0]  ;;  %v12159_v58 = vld [vmem:[#allocation3 + $0xc10] sm:$0xf] }
 0x13a   :  { %v9322_v23 = vor.u32 %v12192_v11, %v9319_v14  ;;  %v12183_v62 = vld [vmem:[#allocation3 + $0xf10] sm:$0xf]  ;;  %v9283_v63 = vld [vmem:[#allocation3 + $0xf3c] sm:$0xf0]  ;;  %v12086_v11 = vld [vmem:[#allocation3 + $0x2e0] sm:$0xf0] }
 0x13b   :  { %3128 = vmatpush.bf16.msra.mxu1 %v8902_v18  ;;  %3141 = vmatpush.bf16.msra.mxu2 %v8998_v19  ;;  %v1642_v12 = vpop.f32.mrf.mxu1  ;;  %v12240_v18 = vld [vmem:[#allocation3 + $0x1630] sm:$0xf]  ;;  %v9511_v19 = vld [vmem:[#allocation3 + $0x165c] sm:$0xf0]  ;;  %v12110_v14 = vld [vmem:[#allocation3 + $0x5e0] sm:$0xf0] }
 0x13c   :  { %3154 = vmatpush.bf16.msra.mxu3 %v9094_v24  ;;  %3116 = vmatmul.bf16.vlgmr.msra.gmra.mxu0 %v13045_v21  ;;  %v1643_v17 = vadd.f32 %v1642_v12, %v1629_v3  ;;  %v9418_v24 = vor.u32 %v12216_v15, %v9415_v16  ;;  %v9514_v29 = vor.u32 %v12240_v18, %v9511_v19  ;;  %v9379_v3 = vld [vmem:[#allocation3 + $0x123c] sm:$0xf0]  ;;  %v8989_v12 = vld [vmem:[#allocation3 + $0x5b4] sm:$0xf]  ;;  %v12134_v16 = vld [vmem:[#allocation3 + $0x8e0] sm:$0xf0] }
 0x13d   :  { %3160 = vmatpush.bf16.msrb.mxu0 %v9274_v25  ;;  %v12165_v25 = vld [vmem:[#allocation3 + $0xcd0] sm:$0xf]  ;;  %v9085_v15 = vld [vmem:[#allocation3 + $0x8b4] sm:$0xf]  ;;  %v9382_v18 = vor.u32 %v12207_v0, %v9379_v3 }
 0x13e   :  { %3142 = vmatmul.bf16.vlgmr.msra.gmra.mxu2 %v13037_v5  ;;  %3129 = vmatmul.bf16.vlgmr.msra.gmra.mxu1 %v13048_v22  ;;  %v9181_v19 = vld [vmem:[#allocation3 + $0xbb4] sm:$0xf] }
 0x13f   :  { %3173 = vmatpush.bf16.msrb.mxu1 %v9370_v26  ;;  %3186 = vmatpush.bf16.msrb.mxu2 %v9466_v27  ;;  %v9211_v26 = vld [vmem:[#allocation3 + $0xcfc] sm:$0xf0]  ;;  %v12189_v27 = vld [vmem:[#allocation3 + $0xfd0] sm:$0xf]  ;;  %v9145_v0 = vld [vmem:[#allocation3 + $0xa94] sm:$0xf] }
 0x140   :  { %3199 = vmatpush.bf16.msrb.mxu3 %v9562_v41  ;;  %v12213_v41 = vld [vmem:[#allocation3 + $0x12d0] sm:$0xf]  ;;  %v9310_v40 = vor.u32 %v12189_v27, %v9307_v30  ;;  %v8881_v27 = vld [vmem:[#allocation3 + $0x254] sm:$0xf] }
 0x141   :  { %3155 = vmatmul.bf16.vlgmr.msra.gmra.mxu3 %v13042_v7  ;;  %3161 = vmatpush.bf16.msrb.mxu0 %v9262_v9  ;;  %v1655_v28 = vpop.f32.mrf.mxu2  ;;  %v9214_v9 = vor.u32 %v12165_v25, %v9211_v26  ;;  %v9406_v44 = vor.u32 %v12213_v41, %v9403_v31  ;;  %v8990_v25 = vor.u32 %v12110_v14, %v8989_v12  ;;  %v12107_v41 = vld [vmem:[#allocation3 + $0x580] sm:$0xf0]  ;;  %v9073_v31 = vld [vmem:[#allocation3 + $0x854] sm:$0xf] }
 0x142   :  { %v1656_v32 = vadd.f32 %v1655_v28, %v1643_v17  ;;  %v9286_v17 = vor.u32 %v12183_v62, %v9283_v63  ;;  %v9086_v26 = vor.u32 %v12134_v16, %v9085_v15  ;;  %v12083_v28 = vld [vmem:[#allocation3 + $0x280] sm:$0xf0]  ;;  %v9049_v62 = vld [vmem:[#allocation3 + $0x794] sm:$0xf] }
 0x143   :  { %3174 = vmatpush.bf16.msrb.mxu1 %v9358_v36  ;;  %3187 = vmatpush.bf16.msrb.mxu2 %v9454_v37  ;;  %v1631_v37 = vpop.f32.mrf.mxu0  ;;  %v1644_v50 = vpop.f32.mrf.mxu1  ;;  %v8882_v35 = vor.u32 %v12083_v28, %v8881_v27  ;;  %v12125_v63 = vld [vmem:[#allocation3 + $0x7c0] sm:$0xf0]  ;;  %v9037_v16 = vld [vmem:[#allocation3 + $0x734] sm:$0xf] }
 0x144   :  { %3200 = vmatpush.bf16.msrb.mxu3 %v9550_v47  ;;  %v1668_v33 = vpop.f32.mrf.mxu3  ;;  %v9199_v47 = vld [vmem:[#allocation3 + $0xc9c] sm:$0xf0]  ;;  %v9061_v50 = vld [vmem:[#allocation3 + $0x7f4] sm:$0xf]  ;;  %v12098_v15 = vld [vmem:[#allocation3 + $0x460] sm:$0xf0] }
 0x145   :  { %3162 = vmatpush.bf16.msrb.mxu0 %v9250_v54  ;;  %v13108_v36 = vadd.f32 %v1668_v33, %v1656_v32  ;;  %v9391_v54 = vld [vmem:[#allocation3 + $0x129c] sm:$0xf0]  ;;  %v9202_v57 = vor.u32 %v12162_v46, %v9199_v47  ;;  %v12131_v32 = vld [vmem:[#allocation3 + $0x880] sm:$0xf0]  ;;  %v9169_v33 = vld [vmem:[#allocation3 + $0xb54] sm:$0xf] }
 0x146   :  { %v9394_v61 = vor.u32 %v12210_v53, %v9391_v54  ;;  %v9074_v37 = vor.u32 %v12131_v32, %v9073_v31  ;;  %v8965_v46 = vld [vmem:[#allocation3 + $0x4f4] sm:$0xf]  ;;  %v9170_v47 = vor.u32 %v12155_v34, %v9169_v33  ;;  %v12152_v53 = vld [vmem:[#allocation3 + $0xb20] sm:$0xf0] }
 0x147   :  { %3175 = vmatpush.bf16.msrb.mxu1 %v9346_v55  ;;  %3188 = vmatpush.bf16.msrb.mxu2 %v9442_v56  ;;  %v12234_v55 = vld [vmem:[#allocation3 + $0x1570] sm:$0xf]  ;;  %v9487_v56 = vld [vmem:[#allocation3 + $0x159c] sm:$0xf0]  ;;  %v12071_v27 = vld [vmem:[#allocation3 + $0x100] sm:$0xf0] }
 0x148   :  { %3201 = vmatpush.bf16.msrb.mxu3 %v9538_v60  ;;  %v9298_v60 = vor.u32 %v12186_v49, %v9295_v52  ;;  %v12104_v49 = vld [vmem:[#allocation3 + $0x520] sm:$0xf0]  ;;  %v9157_v52 = vld [vmem:[#allocation3 + $0xaf4] sm:$0xf] }
 0x149   :  { %3163 = vmatpush.bf16.msrb.mxu0 %v9238_v2  ;;  %v1657_v1 = vpop.f32.mrf.mxu2  ;;  %v9490_v2 = vor.u32 %v12234_v55, %v9487_v56  ;;  %v8966_v55 = vor.u32 %v12104_v49, %v8965_v46  ;;  %v8929_v28 = vld [vmem:[#allocation3 + $0x3d4] sm:$0xf]  ;;  %v12119_v31 = vld [vmem:[#allocation3 + $0x700] sm:$0xf0] }
 0x14a   :  { %v12149_v1 = vld [vmem:[#allocation3 + $0xac0] sm:$0xf0]  ;;  %v9121_v34 = vld [vmem:[#allocation3 + $0x9d4] sm:$0xf] }
 0x14b   :  { %3176 = vmatpush.bf16.msrb.mxu1 %v9334_v4  ;;  %3189 = vmatpush.bf16.msrb.mxu2 %v9430_v6  ;;  %v12231_v4 = vld [vmem:[#allocation3 + $0x1510] sm:$0xf]  ;;  %v9475_v6 = vld [vmem:[#allocation3 + $0x153c] sm:$0xf0]  ;;  %v9146_v14 = vor.u32 %v12149_v1, %v9145_v0  ;;  %v12068_v49 = vld [vmem:[#allocation3 + $0xa0] sm:$0xf0] }
 0x14c   :  { %3202 = vmatpush.bf16.msrb.mxu3 %v9526_v13  ;;  %v1670_v8 = vpop.f32.mrf.mxu3  ;;  %v9190_v13 = vor.u32 %v12159_v58, %v9187_v59  ;;  %v12077_v58 = vld [vmem:[#allocation3 + $0x1c0] sm:$0xf0]  ;;  %v8953_v59 = vld [vmem:[#allocation3 + $0x494] sm:$0xf] }
 0x14d   :  { %3164 = vmatpush.bf16.msrb.mxu0 %v9226_v20  ;;  %v12158_v20 = vld [vmem:[#allocation3 + $0xbe0] sm:$0xf0]  ;;  %v8845_v8 = vld [vmem:[#allocation3 + $0x134] sm:$0xf] }
 0x14e   :  { %v9182_v30 = vor.u32 %v12158_v20, %v9181_v19  ;;  %v12146_v19 = vld [vmem:[#allocation3 + $0xa60] sm:$0xf0]  ;;  %v9001_v1 = vld [vmem:[#allocation3 + $0x614] sm:$0xf] }
 0x14f   :  { %3177 = vmatpush.bf16.msrb.mxu1 %v9322_v23  ;;  %3190 = vmatpush.bf16.msrb.mxu2 %v9418_v24  ;;  %v9478_v23 = vor.u32 %v12231_v4, %v9475_v6  ;;  %v8894_v24 = vor.u32 %v12086_v11, %v8893_v10  ;;  %v9050_v6 = vor.u32 %v12125_v63, %v9049_v62  ;;  %v12074_v10 = vld [vmem:[#allocation3 + $0x160] sm:$0xf0]  ;;  %v8941_v11 = vld [vmem:[#allocation3 + $0x434] sm:$0xf] }
 0x150   :  { %3203 = vmatpush.bf16.msrb.mxu3 %v9514_v29  ;;  %v8977_v29 = vld [vmem:[#allocation3 + $0x554] sm:$0xf]  ;;  %v12089_v0 = vld [vmem:[#allocation3 + $0x340] sm:$0xf0] }
 0x151   :  { %3165 = vmatpush.bf16.msrb.mxu0 %v9214_v9  ;;  %v8978_v9 = vor.u32 %v12107_v41, %v8977_v29  ;;  %v9025_v41 = vld [vmem:[#allocation3 + $0x6d4] sm:$0xf] }
 0x152   :  { %v9026_v46 = vor.u32 %v12119_v31, %v9025_v41  ;;  %v8905_v63 = vld [vmem:[#allocation3 + $0x314] sm:$0xf]  ;;  %v12203_v41 = vld [vmem:[#allocation3 + $0x1180] sm:$0xf0] }
 0x153   :  { %3178 = vmatpush.bf16.msrb.mxu1 %v9310_v40  ;;  %3191 = vmatpush.bf16.msrb.mxu2 %v9406_v44  ;;  %v8869_v40 = vld [vmem:[#allocation3 + $0x1f4] sm:$0xf]  ;;  %v12080_v44 = vld [vmem:[#allocation3 + $0x220] sm:$0xf0] }
 0x154   :  { %3204 = vmatpush.bf16.msrb.mxu3 %v9502_v51  ;;  %v12128_v51 = vld [vmem:[#allocation3 + $0x820] sm:$0xf0]  ;;  %v8870_v54 = vor.u32 %v12080_v44, %v8869_v40  ;;  %v9457_v31 = vld [vmem:[#allocation3 + $0x1454] sm:$0xf] }
 0x155   :  { %3166 = vmatpush.bf16.msrb.mxu0 %v9202_v57  ;;  %v9062_v56 = vor.u32 %v12128_v51, %v9061_v50  ;;  %v8857_v57 = vld [vmem:[#allocation3 + $0x194] sm:$0xf] }
 0x156   :  { %v8917_v50 = vld [vmem:[#allocation3 + $0x374] sm:$0xf] }
 0x157   :  { %3179 = vmatpush.bf16.msrb.mxu1 %v9298_v60  ;;  %3192 = vmatpush.bf16.msrb.mxu2 %v9394_v61  ;;  %v9158_v60 = vor.u32 %v12152_v53, %v9157_v52  ;;  %v12101_v61 = vld [vmem:[#allocation3 + $0x4c0] sm:$0xf0] }
 0x158   :  { %3205 = vmatpush.bf16.msrb.mxu3 %v9490_v2  ;;  %v8858_v2 = vor.u32 %v12077_v58, %v8857_v57  ;;  %v8954_v4 = vor.u32 %v12101_v61, %v8953_v59  ;;  %v12092_v53 = vld [vmem:[#allocation3 + $0x3a0] sm:$0xf0]  ;;  %v8809_v59 = vld [vmem:[#allocation3 + $0x14] sm:$0xf] }
 0x159   :  { %3167 = vmatpush.bf16.msrb.mxu0 %v9190_v13  ;;  %v1681_v3 = vpop.f32.mrf.mxu0  ;;  %v12140_v57 = vld [vmem:[#allocation3 + $0x9a0] sm:$0xf0]  ;;  %v8918_v61 = vor.u32 %v12092_v53, %v8917_v50  ;;  %v9541_v53 = vld [vmem:[#allocation3 + $0x16f4] sm:$0xf] }
 0x15a   :  { %v1682_v12 = vadd.f32 %v1681_v3, %v13108_v36  ;;  %v12200_v50 = vld [vmem:[#allocation3 + $0x1120] sm:$0xf0] }
 0x15b   :  { %3180 = vmatpush.bf16.msrb.mxu1 %v9286_v17  ;;  %3193 = vmatpush.bf16.msrb.mxu2 %v9382_v18  ;;  %v1694_v13 = vpop.f32.mrf.mxu1  ;;  %v12122_v17 = vld [vmem:[#allocation3 + $0x760] sm:$0xf0]  ;;  %v9133_v18 = vld [vmem:[#allocation3 + $0xa34] sm:$0xf] }
 0x15c   :  { %3206 = vmatpush.bf16.msrb.mxu3 %v9478_v23  ;;  %3168 = vmatmul.bf16.vlgmr.msrb.gmra.mxu0 %v13060_v42  ;;  %v1695_v20 = vadd.f32 %v1694_v13, %v1682_v12  ;;  %v8846_v23 = vor.u32 %v12074_v10, %v8845_v8  ;;  %v9134_v36 = vor.u32 %v12146_v19, %v9133_v18  ;;  %v12137_v8 = vld [vmem:[#allocation3 + $0x940] sm:$0xf0]  ;;  %v9373_v13 = vld [vmem:[#allocation3 + $0x11b4] sm:$0xf] }
 0x15d   :  { %3212 = vmatpush.bf16.msra.mxu0 %v8894_v24  ;;  %v8942_v24 = vor.u32 %v12098_v15, %v8941_v11  ;;  %v9277_v11 = vld [vmem:[#allocation3 + $0xeb4] sm:$0xf]  ;;  %v12182_v12 = vld [vmem:[#allocation3 + $0xee0] sm:$0xf0]  ;;  %v8906_v18 = vor.u32 %v12089_v0, %v8905_v63 }
 0x15e   :  { %3194 = vmatmul.bf16.vlgmr.msrb.gmra.mxu2 %v13058_v39  ;;  %3181 = vmatmul.bf16.vlgmr.msrb.gmra.mxu1 %v13064_v45  ;;  %v12206_v15 = vld [vmem:[#allocation3 + $0x11e0] sm:$0xf0]  ;;  %v9433_v63 = vld [vmem:[#allocation3 + $0x1394] sm:$0xf] }
 0x15f   :  { %3225 = vmatpush.bf16.msra.mxu1 %v8990_v25  ;;  %3238 = vmatpush.bf16.msra.mxu2 %v9086_v26  ;;  %v9038_v25 = vor.u32 %v12122_v17, %v9037_v16  ;;  %v8833_v26 = vld [vmem:[#allocation3 + $0xd4] sm:$0xf]  ;;  %v12230_v17 = vld [vmem:[#allocation3 + $0x14e0] sm:$0xf0] }
 0x160   :  { %3251 = vmatpush.bf16.msra.mxu3 %v9182_v30  ;;  %v12095_v30 = vld [vmem:[#allocation3 + $0x400] sm:$0xf0]  ;;  %v9469_v16 = vld [vmem:[#allocation3 + $0x14b4] sm:$0xf] }
 0x161   :  { %3207 = vmatmul.bf16.vlgmr.msrb.gmra.mxu3 %v13062_v43  ;;  %3213 = vmatpush.bf16.msra.mxu0 %v8882_v35  ;;  %v1707_v29 = vpop.f32.mrf.mxu2  ;;  %v12143_v35 = vld [vmem:[#allocation3 + $0xa00] sm:$0xf0]  ;;  %v1683_v40 = vpop.f32.mrf.mxu0  ;;  %v8930_v44 = vor.u32 %v12095_v30, %v8929_v28  ;;  %v9265_v28 = vld [vmem:[#allocation3 + $0xe54] sm:$0xf] }
 0x162   :  { %v1708_v32 = vadd.f32 %v1707_v29, %v1695_v20  ;;  %v9122_v52 = vor.u32 %v12143_v35, %v9121_v34  ;;  %v9565_v20 = vld [vmem:[#allocation3 + $0x17b4] sm:$0xf]  ;;  %v12179_v29 = vld [vmem:[#allocation3 + $0xe80] sm:$0xf0] }
 0x163   :  { %3226 = vmatpush.bf16.msra.mxu1 %v8978_v9  ;;  %3239 = vmatpush.bf16.msra.mxu2 %v9074_v37  ;;  %v8834_v9 = vor.u32 %v12071_v27, %v8833_v26  ;;  %v1696_v51 = vpop.f32.mrf.mxu1  ;;  %v9374_v26 = vor.u32 %v12206_v15, %v9373_v13  ;;  %v9470_v27 = vor.u32 %v12230_v17, %v9469_v16  ;;  %v12251_v34 = vld [vmem:[#allocation3 + $0x1780] sm:$0xf0]  ;;  %v9421_v16 = vld [vmem:[#allocation3 + $0x1334] sm:$0xf] }
 0x164   :  { %3252 = vmatpush.bf16.msra.mxu3 %v9170_v47  ;;  %v1720_v33 = vpop.f32.mrf.mxu3  ;;  %v8821_v47 = vld [vmem:[#allocation3 + $0x74] sm:$0xf]  ;;  %v9266_v35 = vor.u32 %v12179_v29, %v9265_v28  ;;  %v12221_v0 = vld [vmem:[#allocation3 + $0x13c0] sm:$0xf0] }
 0x165   :  { %3214 = vmatpush.bf16.msra.mxu0 %v8870_v54  ;;  %v13115_v37 = vadd.f32 %v1720_v33, %v1708_v32  ;;  %v9013_v54 = vld [vmem:[#allocation3 + $0x674] sm:$0xf]  ;;  %v8822_v58 = vor.u32 %v12068_v49, %v8821_v47  ;;  %v12227_v32 = vld [vmem:[#allocation3 + $0x1480] sm:$0xf0] }
 0x166   :  { %v9553_v33 = vld [vmem:[#allocation3 + $0x1754] sm:$0xf]  ;;  %v9458_v40 = vor.u32 %v12227_v32, %v9457_v31  ;;  %v12194_v15 = vld [vmem:[#allocation3 + $0x1060] sm:$0xf0] }
 0x167   :  { %3227 = vmatpush.bf16.msra.mxu1 %v8966_v55  ;;  %3240 = vmatpush.bf16.msra.mxu2 %v9062_v56  ;;  %v12116_v55 = vld [vmem:[#allocation3 + $0x6a0] sm:$0xf0]  ;;  %v9109_v56 = vld [vmem:[#allocation3 + $0x974] sm:$0xf]  ;;  %v9554_v49 = vor.u32 %v12251_v34, %v9553_v33 }
 0x168   :  { %3253 = vmatpush.bf16.msra.mxu3 %v9158_v60  ;;  %v12065_v60 = vld [vmem:[#allocation3 + $0x40] sm:$0xf0]  ;;  %v9014_v62 = vor.u32 %v12116_v55, %v9013_v54  ;;  %v9110_v3 = vor.u32 %v12140_v57, %v9109_v56  ;;  %v9349_v47 = vld [vmem:[#allocation3 + $0x10f4] sm:$0xf] }
 0x169   :  { %3215 = vmatpush.bf16.msra.mxu0 %v8858_v2  ;;  %v1709_v2 = vpop.f32.mrf.mxu2  ;;  %v9445_v51 = vld [vmem:[#allocation3 + $0x13f4] sm:$0xf]  ;;  %v12248_v54 = vld [vmem:[#allocation3 + $0x1720] sm:$0xf0]  ;;  %v9350_v56 = vor.u32 %v12200_v50, %v9349_v47 }
 0x16a   :  { %v12245_v2 = vld [vmem:[#allocation3 + $0x16c0] sm:$0xf0]  ;;  %v9313_v28 = vld [vmem:[#allocation3 + $0xfd4] sm:$0xf] }
 0x16b   :  { %3228 = vmatpush.bf16.msra.mxu1 %v8954_v4  ;;  %3241 = vmatpush.bf16.msra.mxu2 %v9050_v6  ;;  %v12113_v4 = vld [vmem:[#allocation3 + $0x640] sm:$0xf0]  ;;  %v9097_v6 = vld [vmem:[#allocation3 + $0x914] sm:$0xf] }
 0x16c   :  { %3254 = vmatpush.bf16.msra.mxu3 %v9146_v14  ;;  %v1722_v10 = vpop.f32.mrf.mxu3  ;;  %v8810_v14 = vor.u32 %v12065_v60, %v8809_v59  ;;  %v9002_v19 = vor.u32 %v12113_v4, %v9001_v1  ;;  %v12173_v59 = vld [vmem:[#allocation3 + $0xdc0] sm:$0xf0]  ;;  %v9337_v60 = vld [vmem:[#allocation3 + $0x1094] sm:$0xf] }
 0x16d   :  { %3216 = vmatpush.bf16.msra.mxu0 %v8846_v23  ;;  %v12254_v23 = vld [vmem:[#allocation3 + $0x17e0] sm:$0xf0]  ;;  %v9529_v1 = vld [vmem:[#allocation3 + $0x1694] sm:$0xf] }
 0x16e   :  { %v9566_v30 = vor.u32 %v12254_v23, %v9565_v20  ;;  %v9229_v10 = vld [vmem:[#allocation3 + $0xd34] sm:$0xf]  ;;  %v12218_v17 = vld [vmem:[#allocation3 + $0x1360] sm:$0xf0] }
 0x16f   :  { %3229 = vmatpush.bf16.msra.mxu1 %v8942_v24  ;;  %3242 = vmatpush.bf16.msra.mxu2 %v9038_v25  ;;  %v9098_v24 = vor.u32 %v12137_v8, %v9097_v6  ;;  %v9278_v25 = vor.u32 %v12182_v12, %v9277_v11  ;;  %v9434_v8 = vor.u32 %v12221_v0, %v9433_v63  ;;  %v12170_v11 = vld [vmem:[#allocation3 + $0xd60] sm:$0xf0]  ;;  %v9325_v12 = vld [vmem:[#allocation3 + $0x1034] sm:$0xf] }
 0x170   :  { %3255 = vmatpush.bf16.msra.mxu3 %v9134_v36  ;;  %v9361_v36 = vld [vmem:[#allocation3 + $0x1154] sm:$0xf]  ;;  %v12242_v20 = vld [vmem:[#allocation3 + $0x1660] sm:$0xf0]  ;;  %v9230_v23 = vor.u32 %v12170_v11, %v9229_v10 }
 0x171   :  { %3217 = vmatpush.bf16.msra.mxu0 %v8834_v9  ;;  %v9362_v9 = vor.u32 %v12203_v41, %v9361_v36  ;;  %v9409_v41 = vld [vmem:[#allocation3 + $0x12d4] sm:$0xf]  ;;  %v12215_v31 = vld [vmem:[#allocation3 + $0x1300] sm:$0xf0] }
 0x172   :  { %v9505_v34 = vld [vmem:[#allocation3 + $0x15d4] sm:$0xf]  ;;  %v9410_v47 = vor.u32 %v12215_v31, %v9409_v41  ;;  %v12164_v50 = vld [vmem:[#allocation3 + $0xca0] sm:$0xf0]  ;;  %v12298_v31 = vld [vmem:[#allocation3 + $0x584] sm:$0xf0] }
 0x173   :  { %3230 = vmatpush.bf16.msra.mxu1 %v8930_v44  ;;  %3243 = vmatpush.bf16.msra.mxu2 %v9026_v46  ;;  %v9253_v44 = vld [vmem:[#allocation3 + $0xdf4] sm:$0xf]  ;;  %v12176_v46 = vld [vmem:[#allocation3 + $0xe20] sm:$0xf0] }
 0x174   :  { %3256 = vmatpush.bf16.msra.mxu3 %v9122_v52  ;;  %v12224_v52 = vld [vmem:[#allocation3 + $0x1420] sm:$0xf0]  ;;  %v9254_v55 = vor.u32 %v12176_v46, %v9253_v44  ;;  %v9289_v0 = vld [vmem:[#allocation3 + $0xf14] sm:$0xf] }
 0x175   :  { %3218 = vmatpush.bf16.msra.mxu0 %v8822_v58  ;;  %v9446_v57 = vor.u32 %v12224_v52, %v9445_v51  ;;  %v9241_v58 = vld [vmem:[#allocation3 + $0xd94] sm:$0xf]  ;;  %v12233_v10 = vld [vmem:[#allocation3 + $0x1540] sm:$0xf0] }
 0x176   :  { %v9301_v51 = vld [vmem:[#allocation3 + $0xf74] sm:$0xf] }
 0x177   :  { %3231 = vmatpush.bf16.msra.mxu1 %v8918_v61  ;;  %3244 = vmatpush.bf16.msra.mxu2 %v9014_v62  ;;  %v9542_v61 = vor.u32 %v12248_v54, %v9541_v53  ;;  %v12197_v62 = vld [vmem:[#allocation3 + $0x10c0] sm:$0xf0] }
 0x178   :  { %3257 = vmatpush.bf16.msra.mxu3 %v9110_v3  ;;  %v9242_v3 = vor.u32 %v12173_v59, %v9241_v58  ;;  %v9338_v6 = vor.u32 %v12197_v62, %v9337_v60  ;;  %v12188_v54 = vld [vmem:[#allocation3 + $0xfa0] sm:$0xf0]  ;;  %v9193_v60 = vld [vmem:[#allocation3 + $0xc14] sm:$0xf] }
 0x179   :  { %3219 = vmatpush.bf16.msra.mxu0 %v8810_v14  ;;  %v3013_v4 = vpop.f32.mrf.mxu0  ;;  %v9530_v14 = vor.u32 %v12245_v2, %v9529_v1  ;;  %v12236_v58 = vld [vmem:[#allocation3 + $0x15a0] sm:$0xf0]  ;;  %v9302_v62 = vor.u32 %v12188_v54, %v9301_v51  ;;  %v9385_v2 = vld [vmem:[#allocation3 + $0x1214] sm:$0xf]  ;;  %v12319_v54 = vld [vmem:[#allocation3 + $0x824] sm:$0xf0] }
 0x17a   :  { %v12185_v1 = vld [vmem:[#allocation3 + $0xf40] sm:$0xf0] }
 0x17b   :  { %3232 = vmatpush.bf16.msra.mxu1 %v8906_v18  ;;  %3245 = vmatpush.bf16.msra.mxu2 %v9002_v19  ;;  %v3026_v13 = vpop.f32.mrf.mxu1  ;;  %v9517_v19 = vld [vmem:[#allocation3 + $0x1634] sm:$0xf] }
 0x17c   :  { %3258 = vmatpush.bf16.msra.mxu3 %v9098_v24  ;;  %3220 = vmatmul.bf16.vlgmr.msra.gmra.mxu0 %v13045_v21  ;;  %v3027_v18 = vadd.f32 %v3026_v13, %v3013_v4  ;;  %v9326_v24 = vor.u32 %v12194_v15, %v9325_v12  ;;  %v9518_v36 = vor.u32 %v12242_v20, %v9517_v19  ;;  %v9653_v12 = vld [vmem:[#allocation3 + $0x2b8] sm:$0xf]  ;;  %v12277_v13 = vld [vmem:[#allocation3 + $0x2e4] sm:$0xf0] }
 0x17d   :  { %3264 = vmatpush.bf16.msrb.mxu0 %v9278_v25  ;;  %v9422_v25 = vor.u32 %v12218_v17, %v9421_v16  ;;  %v12301_v16 = vld [vmem:[#allocation3 + $0x5e4] sm:$0xf0]  ;;  %v9845_v17 = vld [vmem:[#allocation3 + $0x8b8] sm:$0xf]  ;;  %v9290_v19 = vor.u32 %v12185_v1, %v9289_v0 }
 0x17e   :  { %3246 = vmatmul.bf16.vlgmr.msra.gmra.mxu2 %v13037_v5  ;;  %3233 = vmatmul.bf16.vlgmr.msra.gmra.mxu1 %v13048_v22  ;;  %v12292_v0 = vld [vmem:[#allocation3 + $0x4c4] sm:$0xf0]  ;;  %v9809_v1 = vld [vmem:[#allocation3 + $0x798] sm:$0xf] }
 0x17f   :  { %3277 = vmatpush.bf16.msrb.mxu1 %v9374_v26  ;;  %3290 = vmatpush.bf16.msrb.mxu2 %v9470_v27  ;;  %v9217_v26 = vld [vmem:[#allocation3 + $0xcd4] sm:$0xf]  ;;  %v12167_v27 = vld [vmem:[#allocation3 + $0xd00] sm:$0xf0] }
 0x180   :  { %3303 = vmatpush.bf16.msrb.mxu3 %v9566_v30  ;;  %v12191_v30 = vld [vmem:[#allocation3 + $0x1000] sm:$0xf0] }
 0x181   :  { %3259 = vmatmul.bf16.vlgmr.msra.gmra.mxu3 %v13042_v7  ;;  %3265 = vmatpush.bf16.msrb.mxu0 %v9266_v35  ;;  %v3039_v29 = vpop.f32.mrf.mxu2  ;;  %v12239_v35 = vld [vmem:[#allocation3 + $0x1600] sm:$0xf0]  ;;  %v3015_v44 = vpop.f32.mrf.mxu0  ;;  %v9314_v46 = vor.u32 %v12191_v30, %v9313_v28  ;;  %v9737_v30 = vld [vmem:[#allocation3 + $0x558] sm:$0xf] }
 0x182   :  { %v3040_v32 = vadd.f32 %v3039_v29, %v3027_v18  ;;  %v9506_v53 = vor.u32 %v12239_v35, %v9505_v34  ;;  %v12325_v18 = vld [vmem:[#allocation3 + $0x8e4] sm:$0xf0]  ;;  %v9641_v29 = vld [vmem:[#allocation3 + $0x258] sm:$0xf]  ;;  %v9738_v44 = vor.u32 %v12298_v31, %v9737_v30 }
 0x183   :  { %3278 = vmatpush.bf16.msrb.mxu1 %v9362_v9  ;;  %3291 = vmatpush.bf16.msrb.mxu2 %v9458_v40  ;;  %v9218_v9 = vor.u32 %v12167_v27, %v9217_v26  ;;  %v3028_v52 = vpop.f32.mrf.mxu1  ;;  %v9654_v26 = vor.u32 %v12277_v13, %v9653_v12  ;;  %v9846_v28 = vor.u32 %v12325_v18, %v9845_v17  ;;  %v9929_v34 = vld [vmem:[#allocation3 + $0xb58] sm:$0xf]  ;;  %v12346_v35 = vld [vmem:[#allocation3 + $0xb84] sm:$0xf0] }
 0x184   :  { %3304 = vmatpush.bf16.msrb.mxu3 %v9554_v49  ;;  %v3052_v33 = vpop.f32.mrf.mxu3  ;;  %v9205_v49 = vld [vmem:[#allocation3 + $0xc74] sm:$0xf]  ;;  %v9930_v51 = vor.u32 %v12346_v35, %v9929_v34  ;;  %v12295_v52 = vld [vmem:[#allocation3 + $0x524] sm:$0xf0]  ;;  %v9689_v30 = vld [vmem:[#allocation3 + $0x3d8] sm:$0xf] }
 0x185   :  { %3266 = vmatpush.bf16.msrb.mxu0 %v9254_v55  ;;  %v13121_v40 = vadd.f32 %v3052_v33, %v3040_v32  ;;  %v9397_v55 = vld [vmem:[#allocation3 + $0x1274] sm:$0xf]  ;;  %v9206_v59 = vor.u32 %v12164_v50, %v9205_v49  ;;  %v9833_v32 = vld [vmem:[#allocation3 + $0x858] sm:$0xf]  ;;  %v12322_v33 = vld [vmem:[#allocation3 + $0x884] sm:$0xf0] }
 0x186   :  { %v12271_v49 = vld [vmem:[#allocation3 + $0x224] sm:$0xf0]  ;;  %v9725_v50 = vld [vmem:[#allocation3 + $0x4f8] sm:$0xf] }
 0x187   :  { %3279 = vmatpush.bf16.msrb.mxu1 %v9350_v56  ;;  %3292 = vmatpush.bf16.msrb.mxu2 %v9446_v57  ;;  %v12212_v56 = vld [vmem:[#allocation3 + $0x12a0] sm:$0xf0]  ;;  %v9493_v57 = vld [vmem:[#allocation3 + $0x1574] sm:$0xf]  ;;  %v12289_v18 = vld [vmem:[#allocation3 + $0x464] sm:$0xf0] }
 0x188   :  { %3305 = vmatpush.bf16.msrb.mxu3 %v9542_v61  ;;  %v12161_v61 = vld [vmem:[#allocation3 + $0xc40] sm:$0xf0]  ;;  %v9398_v63 = vor.u32 %v12212_v56, %v9397_v55  ;;  %v9494_v4 = vor.u32 %v12236_v58, %v9493_v57  ;;  %v9917_v55 = vld [vmem:[#allocation3 + $0xaf8] sm:$0xf]  ;;  %v12343_v56 = vld [vmem:[#allocation3 + $0xb24] sm:$0xf0]  ;;  %v9726_v58 = vor.u32 %v12295_v52, %v9725_v50 }
 0x189   :  { %3267 = vmatpush.bf16.msrb.mxu0 %v9242_v3  ;;  %v3041_v3 = vpop.f32.mrf.mxu2  ;;  %v9194_v15 = vor.u32 %v12161_v61, %v9193_v60  ;;  %v9617_v60 = vld [vmem:[#allocation3 + $0x198] sm:$0xf]  ;;  %v12268_v61 = vld [vmem:[#allocation3 + $0x1c4] sm:$0xf0] }
 0x18a   :  { %v9905_v3 = vld [vmem:[#allocation3 + $0xa98] sm:$0xf]  ;;  %v12310_v35 = vld [vmem:[#allocation3 + $0x704] sm:$0xf0] }
 0x18b   :  { %3280 = vmatpush.bf16.msrb.mxu1 %v9338_v6  ;;  %3293 = vmatpush.bf16.msrb.mxu2 %v9434_v8  ;;  %v12209_v6 = vld [vmem:[#allocation3 + $0x1240] sm:$0xf0]  ;;  %v9481_v8 = vld [vmem:[#allocation3 + $0x1514] sm:$0xf]  ;;  %v9785_v34 = vld [vmem:[#allocation3 + $0x6d8] sm:$0xf] }
 0x18c   :  { %3306 = vmatpush.bf16.msrb.mxu3 %v9530_v14  ;;  %v3054_v11 = vpop.f32.mrf.mxu3  ;;  %v9749_v14 = vld [vmem:[#allocation3 + $0x5b8] sm:$0xf]  ;;  %v9386_v20 = vor.u32 %v12209_v6, %v9385_v2  ;;  %v12316_v2 = vld [vmem:[#allocation3 + $0x7c4] sm:$0xf0]  ;;  %v9618_v6 = vor.u32 %v12268_v61, %v9617_v60 }
 0x18d   :  { %3268 = vmatpush.bf16.msrb.mxu0 %v9230_v23  ;;  %v9941_v23 = vld [vmem:[#allocation3 + $0xbb8] sm:$0xf]  ;;  %v9750_v27 = vor.u32 %v12301_v16, %v9749_v14  ;;  %v9810_v11 = vor.u32 %v12316_v2, %v9809_v1  ;;  %v12307_v60 = vld [vmem:[#allocation3 + $0x6a4] sm:$0xf0] }
 0x18e   :  { %v9605_v14 = vld [vmem:[#allocation3 + $0x138] sm:$0xf]  ;;  %v12256_v1 = vld [vmem:[#allocation3 + $0x44] sm:$0xf0] }
 0x18f   :  { %3281 = vmatpush.bf16.msrb.mxu1 %v9326_v24  ;;  %3294 = vmatpush.bf16.msrb.mxu2 %v9422_v25  ;;  %v12349_v24 = vld [vmem:[#allocation3 + $0xbe4] sm:$0xf0]  ;;  %v9482_v25 = vor.u32 %v12233_v10, %v9481_v8  ;;  %v9701_v16 = vld [vmem:[#allocation3 + $0x438] sm:$0xf] }
 0x190   :  { %3307 = vmatpush.bf16.msrb.mxu3 %v9518_v36  ;;  %v12274_v36 = vld [vmem:[#allocation3 + $0x284] sm:$0xf0]  ;;  %v9942_v41 = vor.u32 %v12349_v24, %v9941_v23  ;;  %v9893_v24 = vld [vmem:[#allocation3 + $0xa38] sm:$0xf] }
 0x191   :  { %3269 = vmatpush.bf16.msrb.mxu0 %v9218_v9  ;;  %v9642_v9 = vor.u32 %v12274_v36, %v9641_v29  ;;  %v12262_v36 = vld [vmem:[#allocation3 + $0x104] sm:$0xf0]  ;;  %v9581_v52 = vld [vmem:[#allocation3 + $0x78] sm:$0xf] }
 0x192   :  { %v9869_v61 = vld [vmem:[#allocation3 + $0x978] sm:$0xf] }
 0x193   :  { %3282 = vmatpush.bf16.msrb.mxu1 %v9314_v46  ;;  %3295 = vmatpush.bf16.msrb.mxu2 %v9410_v47  ;;  %v9834_v46 = vor.u32 %v12322_v33, %v9833_v32  ;;  %v9629_v47 = vld [vmem:[#allocation3 + $0x1f8] sm:$0xf]  ;;  %v12286_v33 = vld [vmem:[#allocation3 + $0x404] sm:$0xf0] }
 0x194   :  { %3308 = vmatpush.bf16.msrb.mxu3 %v9506_v53  ;;  %v9821_v53 = vld [vmem:[#allocation3 + $0x7f8] sm:$0xf]  ;;  %v9630_v57 = vor.u32 %v12271_v49, %v9629_v47  ;;  %v9690_v50 = vor.u32 %v12286_v33, %v9689_v30 }
 0x195   :  { %3270 = vmatpush.bf16.msrb.mxu0 %v9206_v59  ;;  %v9822_v59 = vor.u32 %v12319_v54, %v9821_v53  ;;  %v12259_v53 = vld [vmem:[#allocation3 + $0xa4] sm:$0xf0]  ;;  %v9677_v54 = vld [vmem:[#allocation3 + $0x378] sm:$0xf] }
 0x197   :  { %3283 = vmatpush.bf16.msrb.mxu1 %v9302_v62  ;;  %3296 = vmatpush.bf16.msrb.mxu2 %v9398_v63  ;;  %v9713_v62 = vld [vmem:[#allocation3 + $0x498] sm:$0xf]  ;;  %v9918_v63 = vor.u32 %v12343_v56, %v9917_v55 }
 0x198   :  { %3309 = vmatpush.bf16.msrb.mxu3 %v9494_v4  ;;  %v12340_v4 = vld [vmem:[#allocation3 + $0xac4] sm:$0xf0]  ;;  %v9714_v10 = vor.u32 %v12292_v0, %v9713_v62  ;;  %v9569_v0 = vld [vmem:[#allocation3 + $0x18] sm:$0xf] }
 0x199   :  { %3271 = vmatpush.bf16.msrb.mxu0 %v9194_v15  ;;  %v3065_v8 = vpop.f32.mrf.mxu0  ;;  %v12265_v15 = vld [vmem:[#allocation3 + $0x164] sm:$0xf0]  ;;  %v9906_v17 = vor.u32 %v12340_v4, %v9905_v3  ;;  %v9665_v4 = vld [vmem:[#allocation3 + $0x318] sm:$0xf] }
 0x19a   :  { %v3066_v12 = vadd.f32 %v3065_v8, %v13121_v40  ;;  %v9593_v40 = vld [vmem:[#allocation3 + $0xd8] sm:$0xf]  ;;  %v12331_v62 = vld [vmem:[#allocation3 + $0x9a4] sm:$0xf0] }
 0x19b   :  { %3284 = vmatpush.bf16.msrb.mxu1 %v9290_v19  ;;  %3297 = vmatpush.bf16.msrb.mxu2 %v9386_v20  ;;  %v3078_v13 = vpop.f32.mrf.mxu1  ;;  %v9797_v19 = vld [vmem:[#allocation3 + $0x738] sm:$0xf]  ;;  %v12313_v20 = vld [vmem:[#allocation3 + $0x764] sm:$0xf0]  ;;  %v9594_v47 = vor.u32 %v12262_v36, %v9593_v40 }
 0x19c   :  { %3310 = vmatpush.bf16.msrb.mxu3 %v9482_v25  ;;  %3272 = vmatmul.bf16.vlgmr.msrb.gmra.mxu0 %v13060_v42  ;;  %v3079_v23 = vadd.f32 %v3078_v13, %v3066_v12  ;;  %v12337_v25 = vld [vmem:[#allocation3 + $0xa64] sm:$0xf0]  ;;  %v9761_v8 = vld [vmem:[#allocation3 + $0x618] sm:$0xf] }
 0x19d   :  { %4599 = vmatpush.bf16.msra.mxu0 %v9654_v26  ;;  %v9606_v26 = vor.u32 %v12265_v15, %v9605_v14  ;;  %v12304_v12 = vld [vmem:[#allocation3 + $0x644] sm:$0xf0]  ;;  %v9857_v13 = vld [vmem:[#allocation3 + $0x918] sm:$0xf] }
 0x19e   :  { %3298 = vmatmul.bf16.vlgmr.msrb.gmra.mxu2 %v13058_v39  ;;  %3285 = vmatmul.bf16.vlgmr.msrb.gmra.mxu1 %v13064_v45  ;;  %v12328_v14 = vld [vmem:[#allocation3 + $0x944] sm:$0xf0] }
 0x19f   :  { %4612 = vmatpush.bf16.msra.mxu1 %v9750_v27  ;;  %4625 = vmatpush.bf16.msra.mxu2 %v9846_v28  ;;  %v9702_v27 = vor.u32 %v12289_v18, %v9701_v16  ;;  %v9798_v28 = vor.u32 %v12313_v20, %v9797_v19  ;;  %v10037_v16 = vld [vmem:[#allocation3 + $0xeb8] sm:$0xf]  ;;  %v9570_v19 = vor.u32 %v12256_v1, %v9569_v0  ;;  %v12397_v20 = vld [vmem:[#allocation3 + $0x11e4] sm:$0xf0] }
 0x1a0   :  { %4638 = vmatpush.bf16.msra.mxu3 %v9942_v41  ;;  %v9894_v41 = vor.u32 %v12337_v25, %v9893_v24  ;;  %v10133_v18 = vld [vmem:[#allocation3 + $0x11b8] sm:$0xf]  ;;  %v12421_v24 = vld [vmem:[#allocation3 + $0x14e4] sm:$0xf0] }
 0x1a1   :  { %3311 = vmatmul.bf16.vlgmr.msrb.gmra.mxu3 %v13062_v43  ;;  %4600 = vmatpush.bf16.msra.mxu0 %v9642_v9  ;;  %v3091_v29 = vpop.f32.mrf.mxu2  ;;  %v9881_v9 = vld [vmem:[#allocation3 + $0x9d8] sm:$0xf]  ;;  %v3067_v49 = vpop.f32.mrf.mxu0  ;;  %v10134_v36 = vor.u32 %v12397_v20, %v10133_v18  ;;  %v12361_v18 = vld [vmem:[#allocation3 + $0xd64] sm:$0xf0] }
 0x1a2   :  { %v3092_v31 = vadd.f32 %v3091_v29, %v3079_v23  ;;  %v10229_v23 = vld [vmem:[#allocation3 + $0x14b8] sm:$0xf]  ;;  %v9858_v29 = vor.u32 %v12328_v14, %v9857_v13 }
 0x1a3   :  { %4613 = vmatpush.bf16.msra.mxu1 %v9738_v44  ;;  %4626 = vmatpush.bf16.msra.mxu2 %v9834_v46  ;;  %v12334_v44 = vld [vmem:[#allocation3 + $0xa04] sm:$0xf0]  ;;  %v3080_v55 = vpop.f32.mrf.mxu1  ;;  %v10230_v30 = vor.u32 %v12421_v24, %v10229_v23  ;;  %v10001_v1 = vld [vmem:[#allocation3 + $0xd98] sm:$0xf] }
 0x1a4   :  { %4639 = vmatpush.bf16.msra.mxu3 %v9930_v51  ;;  %v3104_v32 = vpop.f32.mrf.mxu3  ;;  %v9786_v51 = vor.u32 %v12310_v35, %v9785_v34  ;;  %v12394_v34 = vld [vmem:[#allocation3 + $0x1184] sm:$0xf0]  ;;  %v10217_v35 = vld [vmem:[#allocation3 + $0x1458] sm:$0xf] }
 0x1a5   :  { %4601 = vmatpush.bf16.msra.mxu0 %v9630_v57  ;;  %v13128_v46 = vadd.f32 %v3104_v32, %v3092_v31  ;;  %v9882_v57 = vor.u32 %v12334_v44, %v9881_v9  ;;  %v12370_v31 = vld [vmem:[#allocation3 + $0xe84] sm:$0xf0]  ;;  %v10121_v32 = vld [vmem:[#allocation3 + $0x1158] sm:$0xf] }
 0x1a6   :  { %v12418_v9 = vld [vmem:[#allocation3 + $0x1484] sm:$0xf0]  ;;  %v10313_v44 = vld [vmem:[#allocation3 + $0x1758] sm:$0xf] }
 0x1a7   :  { %4614 = vmatpush.bf16.msra.mxu1 %v9726_v58  ;;  %4627 = vmatpush.bf16.msra.mxu2 %v9822_v59  ;;  %v3316_v56 = vmax.f32 %v13089_v48, %v13128_v46  ;;  %v12283_v58 = vld [vmem:[#allocation3 + $0x3a4] sm:$0xf0]  ;;  %v9773_v59 = vld [vmem:[#allocation3 + $0x678] sm:$0xf] }
 0x1a8   :  { %4640 = vmatpush.bf16.msra.mxu3 %v9918_v63  ;;  %v9582_v63 = vor.u32 %v12259_v53, %v9581_v52  ;;  %v9678_v2 = vor.u32 %v12283_v58, %v9677_v54  ;;  %v9774_v3 = vor.u32 %v12307_v60, %v9773_v59  ;;  %v10013_v52 = vld [vmem:[#allocation3 + $0xdf8] sm:$0xf]  ;;  %v12367_v53 = vld [vmem:[#allocation3 + $0xe24] sm:$0xf0] }
 0x1a9   :  { %4602 = vmatpush.bf16.msra.mxu0 %v9618_v6  ;;  %v12280_v6 = vld [vmem:[#allocation3 + $0x344] sm:$0xf0]  ;;  %v10109_v54 = vld [vmem:[#allocation3 + $0x10f8] sm:$0xf] }
 0x1aa   :  { %v9666_v25 = vor.u32 %v12280_v6, %v9665_v4  ;;  %v10205_v58 = vld [vmem:[#allocation3 + $0x13f8] sm:$0xf]  ;;  %v12415_v59 = vld [vmem:[#allocation3 + $0x1424] sm:$0xf0] }
 0x1ab   :  { %4615 = vmatpush.bf16.msra.mxu1 %v9714_v10  ;;  %4628 = vmatpush.bf16.msra.mxu2 %v9810_v11  ;;  %v3093_v10 = vpop.f32.mrf.mxu2  ;;  %v9870_v11 = vor.u32 %v12331_v62, %v9869_v61  ;;  %v10301_v60 = vld [vmem:[#allocation3 + $0x16f8] sm:$0xf]  ;;  %v12439_v61 = vld [vmem:[#allocation3 + $0x1724] sm:$0xf0]  ;;  %v10014_v62 = vor.u32 %v12367_v53, %v10013_v52  ;;  %v10206_v0 = vor.u32 %v12415_v59, %v10205_v58 }
 0x1ac   :  { %4641 = vmatpush.bf16.msra.mxu3 %v9906_v17  ;;  %v3106_v15 = vpop.f32.mrf.mxu3  ;;  %v12373_v17 = vld [vmem:[#allocation3 + $0xee4] sm:$0xf0]  ;;  %v10302_v4 = vor.u32 %v12439_v61, %v10301_v60  ;;  %v9965_v58 = vld [vmem:[#allocation3 + $0xc78] sm:$0xf] }
 0x1ad   :  { %4603 = vmatpush.bf16.msra.mxu0 %v9606_v26  ;;  %v9762_v26 = vor.u32 %v12304_v12, %v9761_v8  ;;  %v10038_v40 = vor.u32 %v12373_v17, %v10037_v16  ;;  %v12388_v6 = vld [vmem:[#allocation3 + $0x10c4] sm:$0xf0]  ;;  %v10193_v8 = vld [vmem:[#allocation3 + $0x1398] sm:$0xf] }
 0x1ae   :  { %v12412_v10 = vld [vmem:[#allocation3 + $0x13c4] sm:$0xf0]  ;;  %v9989_v17 = vld [vmem:[#allocation3 + $0xd38] sm:$0xf] }
 0x1af   :  { %4616 = vmatpush.bf16.msra.mxu1 %v9702_v27  ;;  %4629 = vmatpush.bf16.msra.mxu2 %v9798_v28  ;;  %v10325_v27 = vld [vmem:[#allocation3 + $0x17b8] sm:$0xf]  ;;  %v12445_v28 = vld [vmem:[#allocation3 + $0x17e4] sm:$0xf0]  ;;  %v10194_v16 = vor.u32 %v12412_v10, %v10193_v8 }
 0x1b0   :  { %4642 = vmatpush.bf16.msra.mxu3 %v9894_v41  ;;  %v10025_v41 = vld [vmem:[#allocation3 + $0xe58] sm:$0xf]  ;;  %v10326_v33 = vor.u32 %v12445_v28, %v10325_v27  ;;  %v12436_v12 = vld [vmem:[#allocation3 + $0x16c4] sm:$0xf0] }
 0x1b1   :  { %4604 = vmatpush.bf16.msra.mxu0 %v9594_v47  ;;  %v12442_v47 = vld [vmem:[#allocation3 + $0x1784] sm:$0xf0]  ;;  %v10026_v49 = vor.u32 %v12370_v31, %v10025_v41  ;;  %v10277_v28 = vld [vmem:[#allocation3 + $0x1638] sm:$0xf] }
 0x1b2   :  { %v10314_v55 = vor.u32 %v12442_v47, %v10313_v44  ;;  %v12385_v24 = vld [vmem:[#allocation3 + $0x1064] sm:$0xf0]  ;;  %v9977_v41 = vld [vmem:[#allocation3 + $0xcd8] sm:$0xf] }
 0x1b3   :  { %4617 = vmatpush.bf16.msra.mxu1 %v9690_v50  ;;  %4630 = vmatpush.bf16.msra.mxu2 %v9786_v51  ;;  %v10122_v50 = vor.u32 %v12394_v34, %v10121_v32  ;;  %v10218_v51 = vor.u32 %v12418_v9, %v10217_v35  ;;  %v12358_v31 = vld [vmem:[#allocation3 + $0xd04] sm:$0xf0]  ;;  %v10073_v32 = vld [vmem:[#allocation3 + $0xfd8] sm:$0xf] }
 0x1b4   :  { %4643 = vmatpush.bf16.msra.mxu3 %v9882_v57  ;;  %v12391_v57 = vld [vmem:[#allocation3 + $0x1124] sm:$0xf0]  ;;  %v10169_v9 = vld [vmem:[#allocation3 + $0x12d8] sm:$0xf]  ;;  %v9978_v52 = vor.u32 %v12358_v31, %v9977_v41  ;;  %v9943_v41 = vld [vmem:[#allocation3 + $0xbe8] sm:$0xf0] }
 0x1b5   :  { %4605 = vmatpush.bf16.msra.mxu0 %v9582_v63  ;;  %v10110_v63 = vor.u32 %v12391_v57, %v10109_v54  ;;  %v12382_v35 = vld [vmem:[#allocation3 + $0x1004] sm:$0xf0]  ;;  %v10061_v60 = vld [vmem:[#allocation3 + $0xf78] sm:$0xf] }
 0x1b6   :  { %v12406_v44 = vld [vmem:[#allocation3 + $0x1304] sm:$0xf0] }
 0x1b7   :  { %4618 = vmatpush.bf16.msra.mxu1 %v9678_v2  ;;  %4631 = vmatpush.bf16.msra.mxu2 %v9774_v3  ;;  %v12364_v2 = vld [vmem:[#allocation3 + $0xdc4] sm:$0xf0]  ;;  %v10097_v3 = vld [vmem:[#allocation3 + $0x1098] sm:$0xf]  ;;  %v10170_v57 = vor.u32 %v12406_v44, %v10169_v9  ;;  %v9643_v9 = vld [vmem:[#allocation3 + $0x288] sm:$0xf0] }
 0x1b8   :  { %4644 = vmatpush.bf16.msra.mxu3 %v9870_v11  ;;  %v10289_v11 = vld [vmem:[#allocation3 + $0x1698] sm:$0xf]  ;;  %v10002_v13 = vor.u32 %v12364_v2, %v10001_v1  ;;  %v10098_v15 = vor.u32 %v12388_v6, %v10097_v3  ;;  %v12355_v59 = vld [vmem:[#allocation3 + $0xca4] sm:$0xf0]  ;;  %v12297_v44 = vld [vmem:[#allocation3 + $0x55c] sm:$0xf] }
 0x1b9   :  { %4606 = vmatpush.bf16.msra.mxu0 %v9570_v19  ;;  %v3117_v14 = vpop.f32.mrf.mxu0  ;;  %v10085_v19 = vld [vmem:[#allocation3 + $0x1038] sm:$0xf]  ;;  %v10290_v23 = vor.u32 %v12436_v12, %v10289_v11  ;;  %v12403_v1 = vld [vmem:[#allocation3 + $0x12a4] sm:$0xf0] }
 0x1ba   :  { %v10253_v2 = vld [vmem:[#allocation3 + $0x1578] sm:$0xf]  ;;  %v12427_v3 = vld [vmem:[#allocation3 + $0x15a4] sm:$0xf0] }
 0x1bb   :  { %4619 = vmatpush.bf16.msra.mxu1 %v9666_v25  ;;  %4632 = vmatpush.bf16.msra.mxu2 %v9762_v26  ;;  %v3130_v20 = vpop.f32.mrf.mxu1  ;;  %v10181_v25 = vld [vmem:[#allocation3 + $0x1338] sm:$0xf]  ;;  %v12409_v26 = vld [vmem:[#allocation3 + $0x1364] sm:$0xf0] }
 0x1bc   :  { %4645 = vmatpush.bf16.msra.mxu3 %v9858_v29  ;;  %4607 = vmatmul.bf16.vlgmr.msra.gmra.mxu0 %v13045_v21  ;;  %v3131_v27 = vadd.f32 %v3130_v20, %v3117_v14  ;;  %v12433_v29 = vld [vmem:[#allocation3 + $0x1664] sm:$0xf0]  ;;  %v9953_v6 = vld [vmem:[#allocation3 + $0xc18] sm:$0xf] }
 0x1bd   :  { %4651 = vmatpush.bf16.msrb.mxu0 %v10038_v40  ;;  %v9990_v40 = vor.u32 %v12361_v18, %v9989_v17  ;;  %v10278_v34 = vor.u32 %v12433_v29, %v10277_v28  ;;  %v12352_v8 = vld [vmem:[#allocation3 + $0xc44] sm:$0xf0]  ;;  %v10049_v12 = vld [vmem:[#allocation3 + $0xf18] sm:$0xf]  ;;  %v12324_v28 = vld [vmem:[#allocation3 + $0x8bc] sm:$0xf] }
 0x1be   :  { %4633 = vmatmul.bf16.vlgmr.msra.gmra.mxu2 %v13037_v5  ;;  %4620 = vmatmul.bf16.vlgmr.msra.gmra.mxu1 %v13048_v22  ;;  %v10145_v14 = vld [vmem:[#allocation3 + $0x1218] sm:$0xf]  ;;  %v12400_v17 = vld [vmem:[#allocation3 + $0x1244] sm:$0xf0]  ;;  %v9847_v29 = vld [vmem:[#allocation3 + $0x8e8] sm:$0xf0] }
 0x1bf   :  { %4664 = vmatpush.bf16.msrb.mxu1 %v10134_v36  ;;  %4677 = vmatpush.bf16.msrb.mxu2 %v10230_v30  ;;  %v10086_v36 = vor.u32 %v12385_v24, %v10085_v19  ;;  %v10182_v30 = vor.u32 %v12409_v26, %v10181_v25  ;;  %v10241_v18 = vld [vmem:[#allocation3 + $0x1518] sm:$0xf]  ;;  %v12424_v19 = vld [vmem:[#allocation3 + $0x1544] sm:$0xf0]  ;;  %v9655_v24 = vld [vmem:[#allocation3 + $0x2e8] sm:$0xf0]  ;;  %v9954_v26 = vor.u32 %v12352_v8, %v9953_v6 }
 0x1c0   :  { %4690 = vmatpush.bf16.msrb.mxu3 %v10326_v33  ;;  %v12300_v25 = vld [vmem:[#allocation3 + $0x5bc] sm:$0xf]  ;;  %v10242_v31 = vor.u32 %v12424_v19, %v10241_v18  ;;  %v9907_v18 = vld [vmem:[#allocation3 + $0xac8] sm:$0xf0] }
 0x1c1   :  { %4646 = vmatmul.bf16.vlgmr.msra.gmra.mxu3 %v13042_v7  ;;  %4652 = vmatpush.bf16.msrb.mxu0 %v10026_v49  ;;  %v3143_v33 = vpop.f32.mrf.mxu2  ;;  %v3119_v54 = vpop.f32.mrf.mxu0 }
 0x1c2   :  { %v3144_v47 = vadd.f32 %v3143_v33, %v3131_v27  ;;  %v9751_v27 = vld [vmem:[#allocation3 + $0x5e8] sm:$0xf0] }
 0x1c3   :  { %4665 = vmatpush.bf16.msrb.mxu1 %v10122_v50  ;;  %4678 = vmatpush.bf16.msrb.mxu2 %v10218_v51  ;;  %v10265_v50 = vld [vmem:[#allocation3 + $0x15d8] sm:$0xf]  ;;  %v12430_v51 = vld [vmem:[#allocation3 + $0x1604] sm:$0xf0]  ;;  %v3132_v61 = vpop.f32.mrf.mxu1  ;;  %v9754_v33 = vor.u32 %v12300_v25, %v9751_v27  ;;  %v9931_v54 = vld [vmem:[#allocation3 + $0xb88] sm:$0xf0] }
 0x1c4   :  { %4691 = vmatpush.bf16.msrb.mxu3 %v10314_v55  ;;  %v3156_v49 = vpop.f32.mrf.mxu3  ;;  %v10074_v55 = vor.u32 %v12382_v35, %v10073_v32  ;;  %v12273_v35 = vld [vmem:[#allocation3 + $0x25c] sm:$0xf] }
 0x1c5   :  { %4653 = vmatpush.bf16.msrb.mxu0 %v10014_v62  ;;  %v13136_v53 = vadd.f32 %v3156_v49, %v3144_v47  ;;  %v10266_v62 = vor.u32 %v12430_v51, %v10265_v50  ;;  %v9739_v49 = vld [vmem:[#allocation3 + $0x588] sm:$0xf0]  ;;  %v12321_v50 = vld [vmem:[#allocation3 + $0x85c] sm:$0xf] }
 0x1c6   :  { %v9835_v51 = vld [vmem:[#allocation3 + $0x888] sm:$0xf0]  ;;  %v12294_v61 = vld [vmem:[#allocation3 + $0x4fc] sm:$0xf] }
 0x1c7   :  { %4666 = vmatpush.bf16.msrb.mxu1 %v10110_v63  ;;  %4679 = vmatpush.bf16.msrb.mxu2 %v10206_v0  ;;  %v12379_v63 = vld [vmem:[#allocation3 + $0xfa4] sm:$0xf0]  ;;  %v10157_v0 = vld [vmem:[#allocation3 + $0x1278] sm:$0xf]  ;;  %v12264_v27 = vld [vmem:[#allocation3 + $0x13c] sm:$0xf] }
 0x1c8   :  { %4692 = vmatpush.bf16.msrb.mxu3 %v10302_v4  ;;  %v9966_v4 = vor.u32 %v12355_v59, %v9965_v58  ;;  %v10062_v10 = vor.u32 %v12379_v63, %v10061_v60  ;;  %v10158_v11 = vor.u32 %v12403_v1, %v10157_v0  ;;  %v9838_v58 = vor.u32 %v12321_v50, %v9835_v51  ;;  %v12270_v59 = vld [vmem:[#allocation3 + $0x1fc] sm:$0xf]  ;;  %v9631_v60 = vld [vmem:[#allocation3 + $0x228] sm:$0xf0] }
 0x1c9   :  { %4654 = vmatpush.bf16.msrb.mxu0 %v10002_v13  ;;  %v12376_v13 = vld [vmem:[#allocation3 + $0xf44] sm:$0xf0]  ;;  %v9727_v63 = vld [vmem:[#allocation3 + $0x528] sm:$0xf0]  ;;  %v12318_v0 = vld [vmem:[#allocation3 + $0x7fc] sm:$0xf] }
 0x1ca   :  { %v9823_v1 = vld [vmem:[#allocation3 + $0x828] sm:$0xf0]  ;;  %v9730_v6 = vor.u32 %v12294_v61, %v9727_v63 }
 0x1cb   :  { %4667 = vmatpush.bf16.msrb.mxu1 %v10098_v15  ;;  %4680 = vmatpush.bf16.msrb.mxu2 %v10194_v16  ;;  %v3145_v15 = vpop.f32.mrf.mxu2  ;;  %v10254_v16 = vor.u32 %v12427_v3, %v10253_v2  ;;  %v12342_v2 = vld [vmem:[#allocation3 + $0xafc] sm:$0xf]  ;;  %v9919_v3 = vld [vmem:[#allocation3 + $0xb28] sm:$0xf0]  ;;  %v9826_v8 = vor.u32 %v12318_v0, %v9823_v1 }
 0x1cc   :  { %4693 = vmatpush.bf16.msrb.mxu3 %v10290_v23  ;;  %v3158_v20 = vpop.f32.mrf.mxu3  ;;  %v12276_v23 = vld [vmem:[#allocation3 + $0x2bc] sm:$0xf] }
 0x1cd   :  { %4655 = vmatpush.bf16.msrb.mxu0 %v9990_v40  ;;  %v10050_v40 = vor.u32 %v12376_v13, %v10049_v12  ;;  %v9658_v32 = vor.u32 %v12276_v23, %v9655_v24  ;;  %v12291_v12 = vld [vmem:[#allocation3 + $0x49c] sm:$0xf]  ;;  %v9922_v13 = vor.u32 %v12342_v2, %v9919_v3  ;;  %v9583_v2 = vld [vmem:[#allocation3 + $0xa8] sm:$0xf0] }
 0x1ce   :  { %v12315_v15 = vld [vmem:[#allocation3 + $0x79c] sm:$0xf] }
 0x1cf   :  { %4668 = vmatpush.bf16.msrb.mxu1 %v10086_v36  ;;  %4681 = vmatpush.bf16.msrb.mxu2 %v10182_v30  ;;  %v10146_v36 = vor.u32 %v12400_v17, %v10145_v14  ;;  %v12348_v30 = vld [vmem:[#allocation3 + $0xbbc] sm:$0xf]  ;;  %v9715_v14 = vld [vmem:[#allocation3 + $0x4c8] sm:$0xf0] }
 0x1d0   :  { %4694 = vmatpush.bf16.msrb.mxu3 %v10278_v34  ;;  %v9850_v34 = vor.u32 %v12324_v28, %v9847_v29  ;;  %v9946_v47 = vor.u32 %v12348_v30, %v9943_v41  ;;  %v12339_v17 = vld [vmem:[#allocation3 + $0xa9c] sm:$0xf]  ;;  %v9718_v23 = vor.u32 %v12291_v12, %v9715_v14  ;;  %v9607_v28 = vld [vmem:[#allocation3 + $0x168] sm:$0xf0] }
 0x1d1   :  { %4656 = vmatpush.bf16.msrb.mxu0 %v9978_v52  ;;  %v12345_v52 = vld [vmem:[#allocation3 + $0xb5c] sm:$0xf]  ;;  %v9799_v41 = vld [vmem:[#allocation3 + $0x768] sm:$0xf0] }
 0x1d2   :  { %v12288_v29 = vld [vmem:[#allocation3 + $0x43c] sm:$0xf]  ;;  %v9775_v12 = vld [vmem:[#allocation3 + $0x6a8] sm:$0xf0] }
 0x1d3   :  { %4669 = vmatpush.bf16.msrb.mxu1 %v10074_v55  ;;  %4682 = vmatpush.bf16.msrb.mxu2 %v10170_v57  ;;  %v9646_v55 = vor.u32 %v12273_v35, %v9643_v9  ;;  %v9742_v57 = vor.u32 %v12297_v44, %v9739_v49  ;;  %v12312_v30 = vld [vmem:[#allocation3 + $0x73c] sm:$0xf]  ;;  %v9871_v14 = vld [vmem:[#allocation3 + $0x9a8] sm:$0xf0] }
 0x1d4   :  { %4695 = vmatpush.bf16.msrb.mxu3 %v10266_v62  ;;  %v9934_v62 = vor.u32 %v12345_v52, %v9931_v54  ;;  %v9802_v9 = vor.u32 %v12312_v30, %v9799_v41  ;;  %v12285_v49 = vld [vmem:[#allocation3 + $0x3dc] sm:$0xf]  ;;  %v9691_v54 = vld [vmem:[#allocation3 + $0x408] sm:$0xf0] }
 0x1d5   :  { %4657 = vmatpush.bf16.msrb.mxu0 %v9966_v4  ;;  %v9634_v4 = vor.u32 %v12270_v59, %v9631_v60  ;;  %v9883_v59 = vld [vmem:[#allocation3 + $0xa08] sm:$0xf0]  ;;  %v9694_v63 = vor.u32 %v12285_v49, %v9691_v54  ;;  %v12258_v1 = vld [vmem:[#allocation3 + $0x7c] sm:$0xf] }
 0x1d6   :  { %v12282_v3 = vld [vmem:[#allocation3 + $0x37c] sm:$0xf]  ;;  %v10039_v30 = vld [vmem:[#allocation3 + $0xee8] sm:$0xf0] }
 0x1d7   :  { %4670 = vmatpush.bf16.msrb.mxu1 %v10062_v10  ;;  %4683 = vmatpush.bf16.msrb.mxu2 %v10158_v11  ;;  %v12267_v10 = vld [vmem:[#allocation3 + $0x19c] sm:$0xf]  ;;  %v9619_v11 = vld [vmem:[#allocation3 + $0x1c8] sm:$0xf0] }
 0x1d8   :  { %4696 = vmatpush.bf16.msrb.mxu3 %v10254_v16  ;;  %v9811_v16 = vld [vmem:[#allocation3 + $0x7c8] sm:$0xf0]  ;;  %v9622_v19 = vor.u32 %v12267_v10, %v9619_v11  ;;  %v12306_v11 = vld [vmem:[#allocation3 + $0x67c] sm:$0xf] }
 0x1d9   :  { %4658 = vmatpush.bf16.msrb.mxu0 %v9954_v26  ;;  %v3169_v20 = vpop.f32.mrf.mxu0  ;;  %v9814_v24 = vor.u32 %v12315_v15, %v9811_v16  ;;  %v9679_v10 = vld [vmem:[#allocation3 + $0x3a8] sm:$0xf0]  ;;  %v9586_v15 = vor.u32 %v12258_v1, %v9583_v2  ;;  %v12255_v16 = vld [vmem:[#allocation3 + $0x1c] sm:$0xf] }
 0x1da   :  { %v3170_v25 = vadd.f32 %v3169_v20, %v13136_v53  ;;  %v12261_v53 = vld [vmem:[#allocation3 + $0xdc] sm:$0xf]  ;;  %v10027_v54 = vld [vmem:[#allocation3 + $0xe88] sm:$0xf0] }
 0x1db   :  { %4671 = vmatpush.bf16.msrb.mxu1 %v10050_v40  ;;  %4684 = vmatpush.bf16.msrb.mxu2 %v10146_v36  ;;  %v3182_v26 = vpop.f32.mrf.mxu1  ;;  %v9910_v40 = vor.u32 %v12339_v17, %v9907_v18  ;;  %v9703_v36 = vld [vmem:[#allocation3 + $0x468] sm:$0xf0]  ;;  %v9682_v18 = vor.u32 %v12282_v3, %v9679_v10  ;;  %v12279_v20 = vld [vmem:[#allocation3 + $0x31c] sm:$0xf] }
 0x1dc   :  { %4697 = vmatpush.bf16.msrb.mxu3 %v10242_v31  ;;  %4659 = vmatmul.bf16.vlgmr.msrb.gmra.mxu0 %v13060_v42  ;;  %v3183_v31 = vadd.f32 %v3182_v26, %v3170_v25  ;;  %v9706_v35 = vor.u32 %v12288_v29, %v9703_v36  ;;  %v9571_v17 = vld [vmem:[#allocation3 + $0x48] sm:$0xf0]  ;;  %v12372_v36 = vld [vmem:[#allocation3 + $0xebc] sm:$0xf] }
 0x1dd   :  { %4703 = vmatpush.bf16.msra.mxu0 %v9658_v32  ;;  %v12336_v32 = vld [vmem:[#allocation3 + $0xa3c] sm:$0xf]  ;;  %v9859_v29 = vld [vmem:[#allocation3 + $0x948] sm:$0xf0]  ;;  %v10042_v49 = vor.u32 %v12372_v36, %v10039_v30 }
 0x1de   :  { %4685 = vmatmul.bf16.vlgmr.msrb.gmra.mxu2 %v13058_v39  ;;  %4672 = vmatmul.bf16.vlgmr.msrb.gmra.mxu1 %v13064_v45  ;;  %v12396_v41 = vld [vmem:[#allocation3 + $0x11bc] sm:$0xf] }
 0x1df   :  { %4716 = vmatpush.bf16.msra.mxu1 %v9754_v33  ;;  %4729 = vmatpush.bf16.msra.mxu2 %v9850_v34  ;;  %v9895_v33 = vld [vmem:[#allocation3 + $0xa68] sm:$0xf0]  ;;  %v9610_v34 = vor.u32 %v12264_v27, %v9607_v28  ;;  %v12327_v28 = vld [vmem:[#allocation3 + $0x91c] sm:$0xf] }
 0x1e0   :  { %4742 = vmatpush.bf16.msra.mxu3 %v9946_v47  ;;  %v9595_v47 = vld [vmem:[#allocation3 + $0x108] sm:$0xf0]  ;;  %v9898_v50 = vor.u32 %v12336_v32, %v9895_v33  ;;  %v12420_v33 = vld [vmem:[#allocation3 + $0x14bc] sm:$0xf] }
 0x1e1   :  { %4698 = vmatmul.bf16.vlgmr.msrb.gmra.mxu3 %v13062_v43  ;;  %4704 = vmatpush.bf16.msra.mxu0 %v9646_v55  ;;  %v3195_v44 = vpop.f32.mrf.mxu2  ;;  %v12309_v55 = vld [vmem:[#allocation3 + $0x6dc] sm:$0xf]  ;;  %v9598_v61 = vor.u32 %v12261_v53, %v9595_v47  ;;  %v9763_v27 = vld [vmem:[#allocation3 + $0x648] sm:$0xf0]  ;;  %v9862_v47 = vor.u32 %v12327_v28, %v9859_v29 }
 0x1e2   :  { %v3196_v51 = vadd.f32 %v3195_v44, %v3183_v31  ;;  %v9574_v31 = vor.u32 %v12255_v16, %v9571_v17  ;;  %v10135_v32 = vld [vmem:[#allocation3 + $0x11e8] sm:$0xf0]  ;;  %v12444_v44 = vld [vmem:[#allocation3 + $0x17bc] sm:$0xf] }
 0x1e3   :  { %4717 = vmatpush.bf16.msra.mxu1 %v9742_v57  ;;  %4730 = vmatpush.bf16.msra.mxu2 %v9838_v58  ;;  %v9787_v57 = vld [vmem:[#allocation3 + $0x708] sm:$0xf0]  ;;  %v12333_v58 = vld [vmem:[#allocation3 + $0x9dc] sm:$0xf] }
 0x1e4   :  { %4743 = vmatpush.bf16.msra.mxu3 %v9934_v62  ;;  %v3208_v52 = vpop.f32.mrf.mxu3  ;;  %v3171_v62 = vpop.f32.mrf.mxu0  ;;  %v9790_v0 = vor.u32 %v12309_v55, %v9787_v57  ;;  %v10327_v53 = vld [vmem:[#allocation3 + $0x17e8] sm:$0xf0]  ;;  %v12393_v55 = vld [vmem:[#allocation3 + $0x115c] sm:$0xf] }
 0x1e5   :  { %4705 = vmatpush.bf16.msra.mxu0 %v9634_v4  ;;  %v13143_v60 = vadd.f32 %v3208_v52, %v3196_v51  ;;  %v3184_v4 = vpop.f32.mrf.mxu1  ;;  %v12369_v52 = vld [vmem:[#allocation3 + $0xe5c] sm:$0xf]  ;;  %v10330_v57 = vor.u32 %v12444_v44, %v10327_v53  ;;  %v10291_v29 = vld [vmem:[#allocation3 + $0x16c8] sm:$0xf0] }
 0x1e6   :  { %v12441_v62 = vld [vmem:[#allocation3 + $0x175c] sm:$0xf]  ;;  %v10015_v4 = vld [vmem:[#allocation3 + $0xe28] sm:$0xf0] }
 0x1e7   :  { %4718 = vmatpush.bf16.msra.mxu1 %v9730_v6  ;;  %4731 = vmatpush.bf16.msra.mxu2 %v9826_v8  ;;  %v3317_v6 = vmax.f32 %v13102_v38, %v13143_v60  ;;  %v9886_v8 = vor.u32 %v12333_v58, %v9883_v59  ;;  %v10123_v58 = vld [vmem:[#allocation3 + $0x1188] sm:$0xf0]  ;;  %v12417_v59 = vld [vmem:[#allocation3 + $0x145c] sm:$0xf] }
 0x1e8   :  { %4744 = vmatpush.bf16.msra.mxu3 %v9922_v13  ;;  %v12330_v13 = vld [vmem:[#allocation3 + $0x97c] sm:$0xf]  ;;  %v10126_v1 = vor.u32 %v12393_v55, %v10123_v58  ;;  %v10183_v53 = vld [vmem:[#allocation3 + $0x1368] sm:$0xf0] }
 0x1e9   :  { %4706 = vmatpush.bf16.msra.mxu0 %v9622_v19  ;;  %v9778_v19 = vor.u32 %v12306_v11, %v9775_v12  ;;  %v3197_v25 = vpop.f32.mrf.mxu2  ;;  %v9874_v26 = vor.u32 %v12330_v13, %v9871_v14  ;;  %v12366_v3 = vld [vmem:[#allocation3 + $0xdfc] sm:$0xf]  ;;  %v10111_v11 = vld [vmem:[#allocation3 + $0x1128] sm:$0xf0] }
 0x1ea   :  { %v12414_v12 = vld [vmem:[#allocation3 + $0x13fc] sm:$0xf]  ;;  %v10207_v13 = vld [vmem:[#allocation3 + $0x1428] sm:$0xf0]  ;;  %v10018_v16 = vor.u32 %v12366_v3, %v10015_v4 }
 0x1eb   :  { %4719 = vmatpush.bf16.msra.mxu1 %v9718_v23  ;;  %4732 = vmatpush.bf16.msra.mxu2 %v9814_v24  ;;  %v9667_v23 = vld [vmem:[#allocation3 + $0x348] sm:$0xf0]  ;;  %v12303_v24 = vld [vmem:[#allocation3 + $0x61c] sm:$0xf] }
 0x1ec   :  { %4745 = vmatpush.bf16.msra.mxu3 %v9910_v40  ;;  %v3210_v40 = vpop.f32.mrf.mxu3  ;;  %v12438_v14 = vld [vmem:[#allocation3 + $0x16fc] sm:$0xf]  ;;  %v10099_v25 = vld [vmem:[#allocation3 + $0x10c8] sm:$0xf0] }
 0x1ed   :  { %4707 = vmatpush.bf16.msra.mxu0 %v9610_v34  ;;  %v10231_v34 = vld [vmem:[#allocation3 + $0x14e8] sm:$0xf0]  ;;  %v12435_v28 = vld [vmem:[#allocation3 + $0x169c] sm:$0xf] }
 0x1ee   :  { %v10234_v51 = vor.u32 %v12420_v33, %v10231_v34  ;;  %v12384_v33 = vld [vmem:[#allocation3 + $0x103c] sm:$0xf]  ;;  %v10267_v4 = vld [vmem:[#allocation3 + $0x1608] sm:$0xf0] }
 0x1ef   :  { %4720 = vmatpush.bf16.msra.mxu1 %v9706_v35  ;;  %4733 = vmatpush.bf16.msra.mxu2 %v9802_v9  ;;  %v9670_v35 = vor.u32 %v12279_v20, %v9667_v23  ;;  %v9766_v9 = vor.u32 %v12303_v24, %v9763_v27  ;;  %v10003_v20 = vld [vmem:[#allocation3 + $0xdc8] sm:$0xf0]  ;;  %v12387_v23 = vld [vmem:[#allocation3 + $0x109c] sm:$0xf] }
 0x1f0   :  { %4746 = vmatpush.bf16.msra.mxu3 %v9898_v50  ;;  %v10138_v50 = vor.u32 %v12396_v41, %v10135_v32  ;;  %v10195_v27 = vld [vmem:[#allocation3 + $0x13c8] sm:$0xf0]  ;;  %v10102_v30 = vor.u32 %v12387_v23, %v10099_v25  ;;  %v12408_v44 = vld [vmem:[#allocation3 + $0x133c] sm:$0xf] }
 0x1f1   :  { %4708 = vmatpush.bf16.msra.mxu0 %v9598_v61  ;;  %v10219_v61 = vld [vmem:[#allocation3 + $0x1488] sm:$0xf0]  ;;  %v12357_v55 = vld [vmem:[#allocation3 + $0xcdc] sm:$0xf] }
 0x1f2   :  { %v10222_v2 = vor.u32 %v12417_v59, %v10219_v61  ;;  %v9991_v32 = vld [vmem:[#allocation3 + $0xd68] sm:$0xf0]  ;;  %v12381_v58 = vld [vmem:[#allocation3 + $0xfdc] sm:$0xf] }
 0x1f3   :  { %4721 = vmatpush.bf16.msra.mxu1 %v9694_v63  ;;  %4734 = vmatpush.bf16.msra.mxu2 %v9790_v0  ;;  %v10315_v63 = vld [vmem:[#allocation3 + $0x1788] sm:$0xf0]  ;;  %v10030_v0 = vor.u32 %v12369_v52, %v10027_v54  ;;  %v10186_v54 = vor.u32 %v12408_v44, %v10183_v53  ;;  %v12429_v3 = vld [vmem:[#allocation3 + $0x15dc] sm:$0xf]  ;;  %v9661_v44 = vld [vmem:[#allocation3 + $0x2c0] sm:$0xf] }
 0x1f4   :  { %4747 = vmatpush.bf16.msra.mxu3 %v9886_v8  ;;  %v12390_v8 = vld [vmem:[#allocation3 + $0x10fc] sm:$0xf]  ;;  %v10318_v10 = vor.u32 %v12441_v62, %v10315_v63  ;;  %v10075_v62 = vld [vmem:[#allocation3 + $0x1008] sm:$0xf0]  ;;  %v12278_v53 = vld [vmem:[#allocation3 + $0x2ec] sm:$0xf0] }
 0x1f5   :  { %4709 = vmatpush.bf16.msra.mxu0 %v9586_v15  ;;  %v10303_v15 = vld [vmem:[#allocation3 + $0x1728] sm:$0xf0]  ;;  %v10114_v17 = vor.u32 %v12390_v8, %v10111_v11  ;;  %v12405_v63 = vld [vmem:[#allocation3 + $0x12dc] sm:$0xf] }
 0x1f6   :  { %v10306_v24 = vor.u32 %v12438_v14, %v10303_v15  ;;  %v12354_v14 = vld [vmem:[#allocation3 + $0xc7c] sm:$0xf]  ;;  %v9967_v15 = vld [vmem:[#allocation3 + $0xca8] sm:$0xf0] }
 0x1f7   :  { %4722 = vmatpush.bf16.msra.mxu1 %v9682_v18  ;;  %4735 = vmatpush.bf16.msra.mxu2 %v9778_v19  ;;  %v10210_v18 = vor.u32 %v12414_v12, %v10207_v13  ;;  %v12363_v19 = vld [vmem:[#allocation3 + $0xd9c] sm:$0xf]  ;;  %v10078_v12 = vor.u32 %v12381_v58, %v10075_v62  ;;  %v10159_v23 = vld [vmem:[#allocation3 + $0x12a8] sm:$0xf0]  ;;  %v12350_v58 = vld [vmem:[#allocation3 + $0xbec] sm:$0xf0] }
 0x1f8   :  { %4748 = vmatpush.bf16.msra.mxu3 %v9874_v26  ;;  %v12411_v26 = vld [vmem:[#allocation3 + $0x139c] sm:$0xf]  ;;  %v10006_v40 = vor.u32 %v12363_v19, %v10003_v20  ;;  %v10063_v19 = vld [vmem:[#allocation3 + $0xfa8] sm:$0xf0] }
 0x1f9   :  { %4710 = vmatpush.bf16.msra.mxu0 %v9574_v31  ;;  %v3221_v36 = vpop.f32.mrf.mxu0  ;;  %v10198_v41 = vor.u32 %v12411_v26, %v10195_v27  ;;  %v12360_v31 = vld [vmem:[#allocation3 + $0xd3c] sm:$0xf]  ;;  %v10255_v25 = vld [vmem:[#allocation3 + $0x15a8] sm:$0xf0]  ;;  %v9970_v26 = vor.u32 %v12354_v14, %v9967_v15 }
 0x1fa   :  { %v12402_v20 = vld [vmem:[#allocation3 + $0x127c] sm:$0xf] }
 0x1fb   :  { %4723 = vmatpush.bf16.msra.mxu1 %v9670_v35  ;;  %4736 = vmatpush.bf16.msra.mxu2 %v9766_v9  ;;  %v3234_v34 = vpop.f32.mrf.mxu1  ;;  %v10294_v35 = vor.u32 %v12435_v28, %v10291_v29  ;;  %v10087_v9 = vld [vmem:[#allocation3 + $0x1068] sm:$0xf0]  ;;  %v12351_v27 = vld [vmem:[#allocation3 + $0xc1c] sm:$0xf] }
 0x1fc   :  { %4749 = vmatpush.bf16.msra.mxu3 %v9862_v47  ;;  %4711 = vmatmul.bf16.vlgmr.msra.gmra.mxu0 %v13045_v21  ;;  %v3235_v47 = vadd.f32 %v3234_v34, %v3221_v36  ;;  %v10090_v52 = vor.u32 %v12384_v33, %v10087_v9  ;;  %v9955_v28 = vld [vmem:[#allocation3 + $0xc48] sm:$0xf0]  ;;  %v12375_v36 = vld [vmem:[#allocation3 + $0xf1c] sm:$0xf] }
 0x1fd   :  { %4755 = vmatpush.bf16.msrb.mxu0 %v10042_v49  ;;  %v12432_v49 = vld [vmem:[#allocation3 + $0x163c] sm:$0xf]  ;;  %v10147_v33 = vld [vmem:[#allocation3 + $0x1248] sm:$0xf0] }
 0x1fe   :  { %4737 = vmatmul.bf16.vlgmr.msra.gmra.mxu2 %v13037_v5  ;;  %4724 = vmatmul.bf16.vlgmr.msra.gmra.mxu1 %v13048_v22  ;;  %v12423_v34 = vld [vmem:[#allocation3 + $0x151c] sm:$0xf] }
 0x1ff   :  { %4768 = vmatpush.bf16.msrb.mxu1 %v10138_v50  ;;  %4781 = vmatpush.bf16.msrb.mxu2 %v10234_v51  ;;  %v10279_v50 = vld [vmem:[#allocation3 + $0x1668] sm:$0xf0]  ;;  %v9994_v51 = vor.u32 %v12360_v31, %v9991_v32 }
 0x200   :  { %4794 = vmatpush.bf16.msrb.mxu3 %v10330_v57  ;;  %v9979_v57 = vld [vmem:[#allocation3 + $0xd08] sm:$0xf0]  ;;  %v10282_v61 = vor.u32 %v12432_v49, %v10279_v50  ;;  %v9958_v49 = vor.u32 %v12351_v27, %v9955_v28  ;;  %v12302_v50 = vld [vmem:[#allocation3 + $0x5ec] sm:$0xf0] }
 0x201   :  { %4750 = vmatmul.bf16.vlgmr.msra.gmra.mxu3 %v13042_v7  ;;  %4756 = vmatpush.bf16.msrb.mxu0 %v10030_v0  ;;  %v3247_v59 = vpop.f32.mrf.mxu2  ;;  %v10171_v0 = vld [vmem:[#allocation3 + $0x1308] sm:$0xf0]  ;;  %v9982_v8 = vor.u32 %v12357_v55, %v9979_v57  ;;  %v3223_v11 = vpop.f32.mrf.mxu0  ;;  %v9949_v57 = vld [vmem:[#allocation3 + $0xbc0] sm:$0xf]  ;;  %v12344_v27 = vld [vmem:[#allocation3 + $0xb2c] sm:$0xf0] }
 0x202   :  { %v10174_v13 = vor.u32 %v12405_v63, %v10171_v0  ;;  %v9649_v0 = vld [vmem:[#allocation3 + $0x260] sm:$0xf]  ;;  %v12323_v11 = vld [vmem:[#allocation3 + $0x88c] sm:$0xf0] }
 0x203   :  { %4769 = vmatpush.bf16.msrb.mxu1 %v10126_v1  ;;  %4782 = vmatpush.bf16.msrb.mxu2 %v10222_v2  ;;  %v3248_v1 = vadd.f32 %v3247_v59, %v3235_v47  ;;  %v9757_v47 = vld [vmem:[#allocation3 + $0x5c0] sm:$0xf] }
 0x204   :  { %4795 = vmatpush.bf16.msrb.mxu3 %v10318_v10  ;;  %v3260_v2 = vpop.f32.mrf.mxu3  ;;  %v9758_v62 = vor.u32 %v12302_v50, %v9757_v47 }
 0x205   :  { %4757 = vmatpush.bf16.msrb.mxu0 %v10018_v16  ;;  %v13151_v10 = vadd.f32 %v3260_v2, %v3248_v1  ;;  %v12378_v16 = vld [vmem:[#allocation3 + $0xf7c] sm:$0xf]  ;;  %v12275_v1 = vld [vmem:[#allocation3 + $0x28c] sm:$0xf0]  ;;  %v9745_v2 = vld [vmem:[#allocation3 + $0x560] sm:$0xf] }
 0x206   :  { %v10066_v29 = vor.u32 %v12378_v16, %v10063_v19  ;;  %v9650_v14 = vor.u32 %v12275_v1, %v9649_v0  ;;  %v9733_v19 = vld [vmem:[#allocation3 + $0x500] sm:$0xf]  ;;  %v12338_v0 = vld [vmem:[#allocation3 + $0xa6c] sm:$0xf0] }
 0x207   :  { %4770 = vmatpush.bf16.msrb.mxu1 %v10114_v17  ;;  %4783 = vmatpush.bf16.msrb.mxu2 %v10210_v18  ;;  %v3236_v17 = vpop.f32.mrf.mxu1  ;;  %v10270_v18 = vor.u32 %v12429_v3, %v10267_v4  ;;  %v9950_v3 = vor.u32 %v12350_v58, %v9949_v57  ;;  %v12299_v4 = vld [vmem:[#allocation3 + $0x58c] sm:$0xf0] }
 0x208   :  { %4796 = vmatpush.bf16.msrb.mxu3 %v10306_v24  ;;  %v12426_v24 = vld [vmem:[#allocation3 + $0x157c] sm:$0xf]  ;;  %v9746_v15 = vor.u32 %v12299_v4, %v9745_v2  ;;  %v9637_v17 = vld [vmem:[#allocation3 + $0x200] sm:$0xf]  ;;  %v12290_v58 = vld [vmem:[#allocation3 + $0x46c] sm:$0xf0] }
 0x209   :  { %4758 = vmatpush.bf16.msrb.mxu0 %v10006_v40  ;;  %v10162_v40 = vor.u32 %v12402_v20, %v10159_v23  ;;  %v3249_v31 = vpop.f32.mrf.mxu2  ;;  %v10258_v32 = vor.u32 %v12426_v24, %v10255_v25  ;;  %v12296_v23 = vld [vmem:[#allocation3 + $0x52c] sm:$0xf0]  ;;  %v9829_v24 = vld [vmem:[#allocation3 + $0x800] sm:$0xf] }
 0x20a   :  { %v12320_v25 = vld [vmem:[#allocation3 + $0x82c] sm:$0xf0] }
 0x20b   :  { %4771 = vmatpush.bf16.msrb.mxu1 %v10102_v30  ;;  %4784 = vmatpush.bf16.msrb.mxu2 %v10198_v41  ;;  %v10051_v30 = vld [vmem:[#allocation3 + $0xf48] sm:$0xf0]  ;;  %v12399_v41 = vld [vmem:[#allocation3 + $0x121c] sm:$0xf] }
 0x20c   :  { %4797 = vmatpush.bf16.msrb.mxu3 %v10294_v35  ;;  %v10243_v35 = vld [vmem:[#allocation3 + $0x1548] sm:$0xf0]  ;;  %v3262_v9 = vpop.f32.mrf.mxu3  ;;  %v10150_v55 = vor.u32 %v12399_v41, %v10147_v33  ;;  %v9721_v41 = vld [vmem:[#allocation3 + $0x4a0] sm:$0xf] }
 0x20d   :  { %4759 = vmatpush.bf16.msrb.mxu0 %v9994_v51  ;;  %v9853_v51 = vld [vmem:[#allocation3 + $0x8c0] sm:$0xf]  ;;  %v10246_v59 = vor.u32 %v12423_v34, %v10243_v35  ;;  %v12317_v34 = vld [vmem:[#allocation3 + $0x7cc] sm:$0xf0] }
 0x20e   :  { %v9817_v33 = vld [vmem:[#allocation3 + $0x7a0] sm:$0xf]  ;;  %v12341_v9 = vld [vmem:[#allocation3 + $0xacc] sm:$0xf0] }
 0x20f   :  { %4772 = vmatpush.bf16.msrb.mxu1 %v10090_v52  ;;  %4785 = vmatpush.bf16.msrb.mxu2 %v10186_v54  ;;  %v12326_v52 = vld [vmem:[#allocation3 + $0x8ec] sm:$0xf0]  ;;  %v10054_v54 = vor.u32 %v12375_v36, %v10051_v30  ;;  %v9625_v36 = vld [vmem:[#allocation3 + $0x1a0] sm:$0xf] }
 0x210   :  { %4798 = vmatpush.bf16.msrb.mxu3 %v10282_v61  ;;  %v9662_v61 = vor.u32 %v12278_v53, %v9661_v44  ;;  %v9854_v63 = vor.u32 %v12326_v52, %v9853_v51  ;;  %v12269_v30 = vld [vmem:[#allocation3 + $0x1cc] sm:$0xf0]  ;;  %v9913_v35 = vld [vmem:[#allocation3 + $0xaa0] sm:$0xf] }
 0x211   :  { %4760 = vmatpush.bf16.msrb.mxu0 %v9982_v8  ;;  %v9841_v8 = vld [vmem:[#allocation3 + $0x860] sm:$0xf]  ;;  %v9626_v44 = vor.u32 %v12269_v30, %v9625_v36  ;;  %v9914_v57 = vor.u32 %v12341_v9, %v9913_v35 }
 0x212   :  { %v9842_v16 = vor.u32 %v12323_v11, %v9841_v8  ;;  %v9613_v52 = vld [vmem:[#allocation3 + $0x140] sm:$0xf]  ;;  %v12263_v8 = vld [vmem:[#allocation3 + $0x10c] sm:$0xf0] }
 0x213   :  { %4773 = vmatpush.bf16.msrb.mxu1 %v10078_v12  ;;  %4786 = vmatpush.bf16.msrb.mxu2 %v10174_v13  ;;  %v9937_v12 = vld [vmem:[#allocation3 + $0xb60] sm:$0xf]  ;;  %v12347_v13 = vld [vmem:[#allocation3 + $0xb8c] sm:$0xf0] }
 0x214   :  { %4799 = vmatpush.bf16.msrb.mxu3 %v10270_v18  ;;  %v12272_v18 = vld [vmem:[#allocation3 + $0x22c] sm:$0xf0]  ;;  %v9938_v20 = vor.u32 %v12347_v13, %v9937_v12  ;;  %v9697_v11 = vld [vmem:[#allocation3 + $0x3e0] sm:$0xf] }
 0x215   :  { %4761 = vmatpush.bf16.msrb.mxu0 %v9970_v26  ;;  %v9925_v26 = vld [vmem:[#allocation3 + $0xb00] sm:$0xf]  ;;  %v9638_v28 = vor.u32 %v12272_v18, %v9637_v17  ;;  %v12311_v17 = vld [vmem:[#allocation3 + $0x70c] sm:$0xf0] }
 0x216   :  { %v9926_v31 = vor.u32 %v12344_v27, %v9925_v26  ;;  %v9889_v18 = vld [vmem:[#allocation3 + $0x9e0] sm:$0xf] }
 0x217   :  { %4774 = vmatpush.bf16.msrb.mxu1 %v10066_v29  ;;  %4787 = vmatpush.bf16.msrb.mxu2 %v10162_v40  ;;  %v9734_v29 = vor.u32 %v12296_v23, %v9733_v19  ;;  %v9830_v40 = vor.u32 %v12320_v25, %v9829_v24  ;;  %v12335_v19 = vld [vmem:[#allocation3 + $0xa0c] sm:$0xf0]  ;;  %v9589_v27 = vld [vmem:[#allocation3 + $0x80] sm:$0xf] }
 0x218   :  { %4800 = vmatpush.bf16.msrb.mxu3 %v10258_v32  ;;  %v12293_v32 = vld [vmem:[#allocation3 + $0x4cc] sm:$0xf0]  ;;  %v9890_v30 = vor.u32 %v12335_v19, %v9889_v18  ;;  %v9577_v9 = vld [vmem:[#allocation3 + $0x20] sm:$0xf] }
 0x219   :  { %4762 = vmatpush.bf16.msrb.mxu0 %v9958_v49  ;;  %v3273_v53 = vpop.f32.mrf.mxu0  ;;  %v9722_v47 = vor.u32 %v12293_v32, %v9721_v41  ;;  %v9818_v49 = vor.u32 %v12317_v34, %v9817_v33  ;;  %v12284_v41 = vld [vmem:[#allocation3 + $0x3ac] sm:$0xf0]  ;;  %v9877_v33 = vld [vmem:[#allocation3 + $0x980] sm:$0xf] }
 0x21a   :  { %v3274_v50 = vadd.f32 %v3273_v53, %v13151_v10  ;;  %v9601_v10 = vld [vmem:[#allocation3 + $0xe0] sm:$0xf]  ;;  %v12308_v32 = vld [vmem:[#allocation3 + $0x6ac] sm:$0xf0] }
 0x21b   :  { %4775 = vmatpush.bf16.msrb.mxu1 %v10054_v54  ;;  %4788 = vmatpush.bf16.msrb.mxu2 %v10150_v55  ;;  %v3286_v51 = vpop.f32.mrf.mxu1  ;;  %v12266_v54 = vld [vmem:[#allocation3 + $0x16c] sm:$0xf0]  ;;  %v9709_v55 = vld [vmem:[#allocation3 + $0x440] sm:$0xf]  ;;  %v9602_v23 = vor.u32 %v12263_v8, %v9601_v10 }
 0x21c   :  { %4801 = vmatpush.bf16.msrb.mxu3 %v10246_v59  ;;  %4763 = vmatmul.bf16.vlgmr.msrb.gmra.mxu0 %v13060_v42  ;;  %v9805_v59 = vld [vmem:[#allocation3 + $0x740] sm:$0xf]  ;;  %v9614_v1 = vor.u32 %v12266_v54, %v9613_v52  ;;  %v9710_v2 = vor.u32 %v12290_v58, %v9709_v55  ;;  %v12332_v34 = vld [vmem:[#allocation3 + $0x9ac] sm:$0xf0] }
 0x21d   :  { %4807 = vmatpush.bf16.msra.mxu0 %v9662_v61  ;;  %v12314_v61 = vld [vmem:[#allocation3 + $0x76c] sm:$0xf0]  ;;  %v9878_v54 = vor.u32 %v12332_v34, %v9877_v33  ;;  %v10333_v8 = vld [vmem:[#allocation3 + $0x17c0] sm:$0xf] }
 0x21e   :  { %4789 = vmatmul.bf16.vlgmr.msrb.gmra.mxu2 %v13058_v39  ;;  %4776 = vmatmul.bf16.vlgmr.msrb.gmra.mxu1 %v13064_v45  ;;  %v12305_v55 = vld [vmem:[#allocation3 + $0x64c] sm:$0xf0]  ;;  %v10129_v18 = vld [vmem:[#allocation3 + $0x1160] sm:$0xf] }
 0x21f   :  { %4820 = vmatpush.bf16.msra.mxu1 %v9758_v62  ;;  %4833 = vmatpush.bf16.msra.mxu2 %v9854_v63  ;;  %v3287_v62 = vadd.f32 %v3286_v51, %v3274_v50  ;;  %v9901_v63 = vld [vmem:[#allocation3 + $0xa40] sm:$0xf]  ;;  %v12281_v50 = vld [vmem:[#allocation3 + $0x34c] sm:$0xf0] }
 0x220   :  { %4846 = vmatpush.bf16.msra.mxu3 %v9950_v3  ;;  %v9806_v3 = vor.u32 %v12314_v61, %v9805_v59  ;;  %v9902_v12 = vor.u32 %v12338_v0, %v9901_v63  ;;  %v9769_v51 = vld [vmem:[#allocation3 + $0x620] sm:$0xf]  ;;  %v12329_v58 = vld [vmem:[#allocation3 + $0x94c] sm:$0xf0] }
 0x221   :  { %4802 = vmatmul.bf16.vlgmr.msrb.gmra.mxu3 %v13062_v43  ;;  %4808 = vmatpush.bf16.msra.mxu0 %v9650_v14  ;;  %v3299_v4 = vpop.f32.mrf.mxu2  ;;  %v3275_v24 = vpop.f32.mrf.mxu0  ;;  %v10045_v61 = vld [vmem:[#allocation3 + $0xec0] sm:$0xf]  ;;  %v9770_v10 = vor.u32 %v12305_v55, %v9769_v51  ;;  %v12392_v33 = vld [vmem:[#allocation3 + $0x112c] sm:$0xf0] }
 0x222   :  { %v3300_v13 = vadd.f32 %v3299_v4, %v3287_v62  ;;  %v12374_v62 = vld [vmem:[#allocation3 + $0xeec] sm:$0xf0]  ;;  %v10141_v63 = vld [vmem:[#allocation3 + $0x11c0] sm:$0xf] }
 0x223   :  { %4821 = vmatpush.bf16.msra.mxu1 %v9746_v15  ;;  %4834 = vmatpush.bf16.msra.mxu2 %v9842_v16  ;;  %v12287_v15 = vld [vmem:[#allocation3 + $0x40c] sm:$0xf0]  ;;  %v9793_v16 = vld [vmem:[#allocation3 + $0x6e0] sm:$0xf] }
 0x224   :  { %4847 = vmatpush.bf16.msra.mxu3 %v9938_v20  ;;  %v3312_v14 = vpop.f32.mrf.mxu3  ;;  %v9698_v25 = vor.u32 %v12287_v15, %v9697_v11  ;;  %v9794_v26 = vor.u32 %v12311_v17, %v9793_v16  ;;  %v12446_v11 = vld [vmem:[#allocation3 + $0x17ec] sm:$0xf0]  ;;  %v10033_v16 = vld [vmem:[#allocation3 + $0xe60] sm:$0xf] }
 0x225   :  { %4809 = vmatpush.bf16.msra.mxu0 %v9638_v28  ;;  %v13158_v20 = vadd.f32 %v3312_v14, %v3300_v13  ;;  %v12260_v28 = vld [vmem:[#allocation3 + $0xac] sm:$0xf0]  ;;  %v10046_v13 = vor.u32 %v12374_v62, %v10045_v61  ;;  %v10334_v19 = vor.u32 %v12446_v11, %v10333_v8  ;;  %v10225_v24 = vld [vmem:[#allocation3 + $0x1460] sm:$0xf] }
 0x226   :  { %v9590_v35 = vor.u32 %v12260_v28, %v9589_v27  ;;  %v12371_v17 = vld [vmem:[#allocation3 + $0xe8c] sm:$0xf0]  ;;  %v10213_v34 = vld [vmem:[#allocation3 + $0x1400] sm:$0xf] }
 0x227   :  { %4822 = vmatpush.bf16.msra.mxu1 %v9734_v29  ;;  %4835 = vmatpush.bf16.msra.mxu2 %v9830_v40  ;;  %v9685_v29 = vld [vmem:[#allocation3 + $0x380] sm:$0xf]  ;;  %v3288_v40 = vpop.f32.mrf.mxu1  ;;  %v3318_v36 = vmax.f32 %v13115_v37, %v13158_v20  ;;  %v12443_v27 = vld [vmem:[#allocation3 + $0x178c] sm:$0xf0]  ;;  %v10034_v28 = vor.u32 %v12371_v17, %v10033_v16 }
 0x228   :  { %4848 = vmatpush.bf16.msra.mxu3 %v9926_v31  ;;  %v9781_v31 = vld [vmem:[#allocation3 + $0x680] sm:$0xf]  ;;  %v9686_v53 = vor.u32 %v12284_v41, %v9685_v29  ;;  %v12368_v41 = vld [vmem:[#allocation3 + $0xe2c] sm:$0xf0] }
 0x229   :  { %4810 = vmatpush.bf16.msra.mxu0 %v9626_v44  ;;  %v12257_v44 = vld [vmem:[#allocation3 + $0x4c] sm:$0xf0]  ;;  %v3301_v52 = vpop.f32.mrf.mxu2 }
 0x22a   :  { %v9578_v0 = vor.u32 %v12257_v44, %v9577_v9  ;;  %v10309_v9 = vld [vmem:[#allocation3 + $0x1700] sm:$0xf]  ;;  %v12440_v44 = vld [vmem:[#allocation3 + $0x172c] sm:$0xf0] }
 0x22b   :  { %4823 = vmatpush.bf16.msra.mxu1 %v9722_v47  ;;  %4836 = vmatpush.bf16.msra.mxu2 %v9818_v49  ;;  %v9782_v47 = vor.u32 %v12308_v32, %v9781_v31  ;;  %v9673_v49 = vld [vmem:[#allocation3 + $0x320] sm:$0xf]  ;;  %v12365_v51 = vld [vmem:[#allocation3 + $0xdcc] sm:$0xf0] }
 0x22c   :  { %4849 = vmatpush.bf16.msra.mxu3 %v9914_v57  ;;  %v9865_v57 = vld [vmem:[#allocation3 + $0x920] sm:$0xf]  ;;  %v3314_v59 = vpop.f32.mrf.mxu3  ;;  %v9674_v4 = vor.u32 %v12281_v50, %v9673_v49  ;;  %v12389_v55 = vld [vmem:[#allocation3 + $0x10cc] sm:$0xf0] }
 0x22d   :  { %4811 = vmatpush.bf16.msra.mxu0 %v9614_v1  ;;  %v12398_v1 = vld [vmem:[#allocation3 + $0x11ec] sm:$0xf0]  ;;  %v10117_v31 = vld [vmem:[#allocation3 + $0x1100] sm:$0xf] }
 0x22e   :  { %v10142_v14 = vor.u32 %v12398_v1, %v10141_v63  ;;  %v10009_v50 = vld [vmem:[#allocation3 + $0xda0] sm:$0xf]  ;;  %v12437_v61 = vld [vmem:[#allocation3 + $0x16cc] sm:$0xf0] }
 0x22f   :  { %4824 = vmatpush.bf16.msra.mxu1 %v9710_v2  ;;  %4837 = vmatpush.bf16.msra.mxu2 %v9806_v3  ;;  %v10237_v2 = vld [vmem:[#allocation3 + $0x14c0] sm:$0xf]  ;;  %v12422_v3 = vld [vmem:[#allocation3 + $0x14ec] sm:$0xf0]  ;;  %v10010_v62 = vor.u32 %v12365_v51, %v10009_v50 }
 0x230   :  { %4850 = vmatpush.bf16.msra.mxu3 %v9902_v12  ;;  %v9866_v12 = vor.u32 %v12329_v58, %v9865_v57  ;;  %v10238_v15 = vor.u32 %v12422_v3, %v10237_v2  ;;  %v10105_v52 = vld [vmem:[#allocation3 + $0x10a0] sm:$0xf]  ;;  %v12413_v58 = vld [vmem:[#allocation3 + $0x13cc] sm:$0xf0] }
 0x231   :  { %4812 = vmatpush.bf16.msra.mxu0 %v9602_v23  ;;  %v12395_v23 = vld [vmem:[#allocation3 + $0x118c] sm:$0xf0]  ;;  %v10201_v57 = vld [vmem:[#allocation3 + $0x13a0] sm:$0xf] }
 0x232   :  { %v10130_v29 = vor.u32 %v12395_v23, %v10129_v18  ;;  %v10297_v59 = vld [vmem:[#allocation3 + $0x16a0] sm:$0xf]  ;;  %v10202_v1 = vor.u32 %v12413_v58, %v10201_v57  ;;  %v12362_v3 = vld [vmem:[#allocation3 + $0xd6c] sm:$0xf0] }
 0x233   :  { %4825 = vmatpush.bf16.msra.mxu1 %v9698_v25  ;;  %4838 = vmatpush.bf16.msra.mxu2 %v9794_v26  ;;  %v12419_v25 = vld [vmem:[#allocation3 + $0x148c] sm:$0xf0]  ;;  %v10321_v26 = vld [vmem:[#allocation3 + $0x1760] sm:$0xf]  ;;  %v10298_v8 = vor.u32 %v12437_v61, %v10297_v59 }
 0x234   :  { %4851 = vmatpush.bf16.msra.mxu3 %v9890_v30  ;;  %v10226_v40 = vor.u32 %v12419_v25, %v10225_v24  ;;  %v10021_v30 = vld [vmem:[#allocation3 + $0xe00] sm:$0xf]  ;;  %v10322_v32 = vor.u32 %v12443_v27, %v10321_v26  ;;  %v12386_v11 = vld [vmem:[#allocation3 + $0x106c] sm:$0xf0] }
 0x235   :  { %4813 = vmatpush.bf16.msra.mxu0 %v9590_v35  ;;  %v12416_v35 = vld [vmem:[#allocation3 + $0x142c] sm:$0xf0]  ;;  %v9997_v2 = vld [vmem:[#allocation3 + $0xd40] sm:$0xf] }
 0x236   :  { %v10214_v49 = vor.u32 %v12416_v35, %v10213_v34  ;;  %v12434_v16 = vld [vmem:[#allocation3 + $0x166c] sm:$0xf0]  ;;  %v9998_v17 = vor.u32 %v12362_v3, %v9997_v2  ;;  %v9985_v23 = vld [vmem:[#allocation3 + $0xce0] sm:$0xf] }
 0x237   :  { %4826 = vmatpush.bf16.msra.mxu1 %v9686_v53  ;;  %4839 = vmatpush.bf16.msra.mxu2 %v9782_v47  ;;  %v10022_v53 = vor.u32 %v12368_v41, %v10021_v30  ;;  %v10118_v47 = vor.u32 %v12392_v33, %v10117_v31  ;;  %v12359_v24 = vld [vmem:[#allocation3 + $0xd0c] sm:$0xf0]  ;;  %v10081_v25 = vld [vmem:[#allocation3 + $0xfe0] sm:$0xf] }
 0x238   :  { %4852 = vmatpush.bf16.msra.mxu3 %v9878_v54  ;;  %v10310_v54 = vor.u32 %v12440_v44, %v10309_v9  ;;  %v10273_v31 = vld [vmem:[#allocation3 + $0x15e0] sm:$0xf]  ;;  %v9986_v33 = vor.u32 %v12359_v24, %v9985_v23  ;;  %v12428_v58 = vld [vmem:[#allocation3 + $0x15ac] sm:$0xf0]  ;;  %v12517_v23 = vld [vmem:[#allocation3 + $0x8f0] sm:$0xf0] }
 0x239   :  { %4814 = vmatpush.bf16.msra.mxu0 %v9578_v0  ;;  %v4608_v63 = vpop.f32.mrf.mxu0  ;;  %v10106_v0 = vor.u32 %v12389_v55, %v10105_v52  ;;  %v12380_v52 = vld [vmem:[#allocation3 + $0xfac] sm:$0xf0]  ;;  %v10261_v57 = vld [vmem:[#allocation3 + $0x1580] sm:$0xf] }
 0x23a   :  { %v12404_v55 = vld [vmem:[#allocation3 + $0x12ac] sm:$0xf0]  ;;  %v9961_v61 = vld [vmem:[#allocation3 + $0xc20] sm:$0xf] }
 0x23b   :  { %4827 = vmatpush.bf16.msra.mxu1 %v9674_v4  ;;  %4840 = vmatpush.bf16.msra.mxu2 %v9770_v10  ;;  %v10093_v4 = vld [vmem:[#allocation3 + $0x1040] sm:$0xf]  ;;  %v4621_v10 = vpop.f32.mrf.mxu1  ;;  %v12377_v2 = vld [vmem:[#allocation3 + $0xf4c] sm:$0xf0] }
 0x23c   :  { %4853 = vmatpush.bf16.msra.mxu3 %v9866_v12  ;;  %4815 = vmatmul.bf16.vlgmr.msra.gmra.mxu0 %v13045_v21  ;;  %v10189_v12 = vld [vmem:[#allocation3 + $0x1340] sm:$0xf]  ;;  %v10094_v18 = vor.u32 %v12386_v11, %v10093_v4 }
 0x23d   :  { %4859 = vmatpush.bf16.msrb.mxu0 %v10046_v13  ;;  %v12410_v13 = vld [vmem:[#allocation3 + $0x136c] sm:$0xf0]  ;;  %v10153_v3 = vld [vmem:[#allocation3 + $0x1220] sm:$0xf] }
 0x23e   :  { %4841 = vmatmul.bf16.vlgmr.msra.gmra.mxu2 %v13037_v5  ;;  %4828 = vmatmul.bf16.vlgmr.msra.gmra.mxu1 %v13048_v22  ;;  %v10249_v11 = vld [vmem:[#allocation3 + $0x1520] sm:$0xf] }
 0x23f   :  { %4872 = vmatpush.bf16.msrb.mxu1 %v10142_v14  ;;  %4885 = vmatpush.bf16.msrb.mxu2 %v10238_v15  ;;  %v4622_v14 = vadd.f32 %v4621_v10, %v4608_v63  ;;  %v10285_v15 = vld [vmem:[#allocation3 + $0x1640] sm:$0xf]  ;;  %v10262_v10 = vor.u32 %v12428_v58, %v10261_v57  ;;  %v12487_v58 = vld [vmem:[#allocation3 + $0x530] sm:$0xf0] }
 0x240   :  { %4898 = vmatpush.bf16.msrb.mxu3 %v10334_v19  ;;  %v10190_v19 = vor.u32 %v12410_v13, %v10189_v12  ;;  %v10286_v27 = vor.u32 %v12434_v16, %v10285_v15  ;;  %v12425_v12 = vld [vmem:[#allocation3 + $0x154c] sm:$0xf0]  ;;  %v12469_v15 = vld [vmem:[#allocation3 + $0x2f0] sm:$0xf0]  ;;  %v10517_v16 = vld [vmem:[#allocation3 + $0x5c4] sm:$0xf] }
 0x241   :  { %4854 = vmatmul.bf16.vlgmr.msra.gmra.mxu3 %v13042_v7  ;;  %4860 = vmatpush.bf16.msrb.mxu0 %v10034_v28  ;;  %v4634_v26 = vpop.f32.mrf.mxu2  ;;  %v12383_v28 = vld [vmem:[#allocation3 + $0x100c] sm:$0xf0]  ;;  %v4610_v35 = vpop.f32.mrf.mxu0 }
 0x242   :  { %v4635_v30 = vadd.f32 %v4634_v26, %v4622_v14  ;;  %v10082_v9 = vor.u32 %v12383_v28, %v10081_v25  ;;  %v10421_v14 = vld [vmem:[#allocation3 + $0x2c4] sm:$0xf]  ;;  %v10250_v28 = vor.u32 %v12425_v12, %v10249_v11  ;;  %v12490_v35 = vld [vmem:[#allocation3 + $0x590] sm:$0xf0] }
 0x243   :  { %4873 = vmatpush.bf16.msrb.mxu1 %v10130_v29  ;;  %4886 = vmatpush.bf16.msrb.mxu2 %v10226_v40  ;;  %v10177_v29 = vld [vmem:[#allocation3 + $0x12e0] sm:$0xf]  ;;  %v12407_v40 = vld [vmem:[#allocation3 + $0x130c] sm:$0xf0]  ;;  %v4623_v50 = vpop.f32.mrf.mxu1  ;;  %v10709_v26 = vld [vmem:[#allocation3 + $0xbc4] sm:$0xf] }
 0x244   :  { %4899 = vmatpush.bf16.msrb.mxu3 %v10322_v32  ;;  %v4647_v41 = vpop.f32.mrf.mxu3  ;;  %v12431_v32 = vld [vmem:[#allocation3 + $0x160c] sm:$0xf0]  ;;  %v10178_v44 = vor.u32 %v12407_v40, %v10177_v29  ;;  %v10422_v29 = vor.u32 %v12469_v15, %v10421_v14  ;;  %v12484_v11 = vld [vmem:[#allocation3 + $0x4d0] sm:$0xf0]  ;;  %v10577_v12 = vld [vmem:[#allocation3 + $0x7a4] sm:$0xf] }
 0x245   :  { %4861 = vmatpush.bf16.msrb.mxu0 %v10022_v53  ;;  %v13166_v34 = vadd.f32 %v4647_v41, %v4635_v30  ;;  %v9973_v53 = vld [vmem:[#allocation3 + $0xc80] sm:$0xf]  ;;  %v10274_v51 = vor.u32 %v12431_v32, %v10273_v31  ;;  %v10409_v41 = vld [vmem:[#allocation3 + $0x264] sm:$0xf]  ;;  %v12466_v31 = vld [vmem:[#allocation3 + $0x290] sm:$0xf0] }
 0x246   :  { %v10505_v32 = vld [vmem:[#allocation3 + $0x564] sm:$0xf]  ;;  %v12532_v15 = vld [vmem:[#allocation3 + $0xad0] sm:$0xf0] }
 0x247   :  { %4874 = vmatpush.bf16.msrb.mxu1 %v10118_v47  ;;  %4887 = vmatpush.bf16.msrb.mxu2 %v10214_v49  ;;  %v12356_v47 = vld [vmem:[#allocation3 + $0xcac] sm:$0xf0]  ;;  %v10069_v49 = vld [vmem:[#allocation3 + $0xf80] sm:$0xf]  ;;  %v10506_v50 = vor.u32 %v12490_v35, %v10505_v32  ;;  %v10673_v14 = vld [vmem:[#allocation3 + $0xaa4] sm:$0xf] }
 0x248   :  { %4900 = vmatpush.bf16.msrb.mxu3 %v10310_v54  ;;  %v10165_v54 = vld [vmem:[#allocation3 + $0x1280] sm:$0xf]  ;;  %v9974_v59 = vor.u32 %v12356_v47, %v9973_v53  ;;  %v10070_v63 = vor.u32 %v12380_v52, %v10069_v49  ;;  %v10697_v53 = vld [vmem:[#allocation3 + $0xb64] sm:$0xf]  ;;  %v12538_v47 = vld [vmem:[#allocation3 + $0xb90] sm:$0xf0]  ;;  %v10410_v49 = vor.u32 %v12466_v31, %v10409_v41 }
 0x249   :  { %4862 = vmatpush.bf16.msrb.mxu0 %v10010_v62  ;;  %v12353_v62 = vld [vmem:[#allocation3 + $0xc4c] sm:$0xf0]  ;;  %v4636_v4 = vpop.f32.mrf.mxu2  ;;  %v10397_v52 = vld [vmem:[#allocation3 + $0x204] sm:$0xf]  ;;  %v10698_v57 = vor.u32 %v12538_v47, %v10697_v53  ;;  %v12529_v32 = vld [vmem:[#allocation3 + $0xa70] sm:$0xf0] }
 0x24a   :  { %v12460_v4 = vld [vmem:[#allocation3 + $0x1d0] sm:$0xf0]  ;;  %v10661_v31 = vld [vmem:[#allocation3 + $0xa44] sm:$0xf] }
 0x24b   :  { %4875 = vmatpush.bf16.msrb.mxu1 %v10106_v0  ;;  %4888 = vmatpush.bf16.msrb.mxu2 %v10202_v1  ;;  %v10166_v0 = vor.u32 %v12404_v55, %v10165_v54  ;;  %v10057_v1 = vld [vmem:[#allocation3 + $0xf20] sm:$0xf]  ;;  %v12463_v54 = vld [vmem:[#allocation3 + $0x230] sm:$0xf0]  ;;  %v10493_v55 = vld [vmem:[#allocation3 + $0x504] sm:$0xf] }
 0x24c   :  { %4901 = vmatpush.bf16.msrb.mxu3 %v10298_v8  ;;  %v12401_v8 = vld [vmem:[#allocation3 + $0x124c] sm:$0xf0]  ;;  %v4649_v13 = vpop.f32.mrf.mxu3  ;;  %v10058_v24 = vor.u32 %v12377_v2, %v10057_v1  ;;  %v10494_v1 = vor.u32 %v12487_v58, %v10493_v55  ;;  %v12454_v53 = vld [vmem:[#allocation3 + $0x110] sm:$0xf0]  ;;  %v10457_v47 = vld [vmem:[#allocation3 + $0x3e4] sm:$0xf] }
 0x24d   :  { %4863 = vmatpush.bf16.msrb.mxu0 %v9998_v17  ;;  %v9962_v17 = vor.u32 %v12353_v62, %v9961_v61  ;;  %v10154_v25 = vor.u32 %v12401_v8, %v10153_v3  ;;  %v12511_v61 = vld [vmem:[#allocation3 + $0x830] sm:$0xf0]  ;;  %v10685_v62 = vld [vmem:[#allocation3 + $0xb04] sm:$0xf] }
 0x24e   :  { %v10385_v3 = vld [vmem:[#allocation3 + $0x1a4] sm:$0xf]  ;;  %v12508_v13 = vld [vmem:[#allocation3 + $0x7d0] sm:$0xf0] }
 0x24f   :  { %4876 = vmatpush.bf16.msrb.mxu1 %v10094_v18  ;;  %4889 = vmatpush.bf16.msrb.mxu2 %v10190_v19  ;;  %v12493_v18 = vld [vmem:[#allocation3 + $0x5f0] sm:$0xf0]  ;;  %v10613_v19 = vld [vmem:[#allocation3 + $0x8c4] sm:$0xf] }
 0x250   :  { %4902 = vmatpush.bf16.msrb.mxu3 %v10286_v27  ;;  %v12541_v27 = vld [vmem:[#allocation3 + $0xbf0] sm:$0xf0]  ;;  %v10518_v40 = vor.u32 %v12493_v18, %v10517_v16  ;;  %v10614_v30 = vor.u32 %v12517_v23, %v10613_v19  ;;  %v10386_v16 = vor.u32 %v12460_v4, %v10385_v3  ;;  %v10578_v19 = vor.u32 %v12508_v13, %v10577_v12  ;;  %v10445_v3 = vld [vmem:[#allocation3 + $0x384] sm:$0xf] }
 0x251   :  { %4864 = vmatpush.bf16.msrb.mxu0 %v9986_v33  ;;  %v10710_v33 = vor.u32 %v12541_v27, %v10709_v26  ;;  %v12457_v26 = vld [vmem:[#allocation3 + $0x170] sm:$0xf0]  ;;  %v10469_v27 = vld [vmem:[#allocation3 + $0x444] sm:$0xf] }
 0x252   :  { %v12502_v55 = vld [vmem:[#allocation3 + $0x710] sm:$0xf0]  ;;  %v10541_v12 = vld [vmem:[#allocation3 + $0x684] sm:$0xf] }
 0x253   :  { %4877 = vmatpush.bf16.msrb.mxu1 %v10082_v9  ;;  %4890 = vmatpush.bf16.msrb.mxu2 %v10178_v44  ;;  %v10601_v9 = vld [vmem:[#allocation3 + $0x864] sm:$0xf]  ;;  %v12514_v44 = vld [vmem:[#allocation3 + $0x890] sm:$0xf0] }
 0x254   :  { %4903 = vmatpush.bf16.msrb.mxu3 %v10274_v51  ;;  %v10602_v51 = vor.u32 %v12514_v44, %v10601_v9  ;;  %v12526_v58 = vld [vmem:[#allocation3 + $0xa10] sm:$0xf0] }
 0x255   :  { %4865 = vmatpush.bf16.msrb.mxu0 %v9974_v59  ;;  %v10589_v59 = vld [vmem:[#allocation3 + $0x804] sm:$0xf]  ;;  %v12499_v13 = vld [vmem:[#allocation3 + $0x6b0] sm:$0xf0] }
 0x256   :  { %v10590_v2 = vor.u32 %v12511_v61, %v10589_v59 }
 0x257   :  { %4878 = vmatpush.bf16.msrb.mxu1 %v10070_v63  ;;  %4891 = vmatpush.bf16.msrb.mxu2 %v10166_v0  ;;  %v12535_v63 = vld [vmem:[#allocation3 + $0xb30] sm:$0xf0]  ;;  %v10398_v0 = vor.u32 %v12463_v54, %v10397_v52  ;;  %v10553_v54 = vld [vmem:[#allocation3 + $0x6e4] sm:$0xf] }
 0x258   :  { %4904 = vmatpush.bf16.msrb.mxu3 %v10262_v10  ;;  %v10481_v10 = vld [vmem:[#allocation3 + $0x4a4] sm:$0xf]  ;;  %v10686_v8 = vor.u32 %v12535_v63, %v10685_v62  ;;  %v12478_v52 = vld [vmem:[#allocation3 + $0x410] sm:$0xf0] }
 0x259   :  { %4866 = vmatpush.bf16.msrb.mxu0 %v9962_v17  ;;  %v4660_v17 = vpop.f32.mrf.mxu0  ;;  %v10482_v18 = vor.u32 %v12484_v11, %v10481_v10  ;;  %v10458_v63 = vor.u32 %v12478_v52, %v10457_v47  ;;  %v12475_v11 = vld [vmem:[#allocation3 + $0x3b0] sm:$0xf0]  ;;  %v10793_v52 = vld [vmem:[#allocation3 + $0xe64] sm:$0xf] }
 0x25a   :  { %v4661_v23 = vadd.f32 %v4660_v17, %v13166_v34  ;;  %v10361_v34 = vld [vmem:[#allocation3 + $0xe4] sm:$0xf] }
 0x25b   :  { %4879 = vmatpush.bf16.msrb.mxu1 %v10058_v24  ;;  %4892 = vmatpush.bf16.msrb.mxu2 %v10154_v25  ;;  %v4673_v24 = vpop.f32.mrf.mxu1  ;;  %v10373_v25 = vld [vmem:[#allocation3 + $0x144] sm:$0xf]  ;;  %v10362_v61 = vor.u32 %v12454_v53, %v10361_v34  ;;  %v12637_v53 = vld [vmem:[#allocation3 + $0x17f0] sm:$0xf0] }
 0x25c   :  { %4905 = vmatpush.bf16.msrb.mxu3 %v10250_v28  ;;  %4867 = vmatmul.bf16.vlgmr.msrb.gmra.mxu0 %v13060_v42  ;;  %v10674_v28 = vor.u32 %v12532_v15, %v10673_v14  ;;  %v4674_v41 = vadd.f32 %v4673_v24, %v4661_v23  ;;  %v10637_v14 = vld [vmem:[#allocation3 + $0x984] sm:$0xf]  ;;  %v12523_v15 = vld [vmem:[#allocation3 + $0x9b0] sm:$0xf0]  ;;  %v10542_v23 = vor.u32 %v12499_v13, %v10541_v12 }
 0x25d   :  { %6194 = vmatpush.bf16.msra.mxu0 %v10422_v29  ;;  %v12481_v29 = vld [vmem:[#allocation3 + $0x470] sm:$0xf0]  ;;  %v10337_v17 = vld [vmem:[#allocation3 + $0x24] sm:$0xf]  ;;  %v10638_v46 = vor.u32 %v12523_v15, %v10637_v14 }
 0x25e   :  { %4893 = vmatmul.bf16.vlgmr.msrb.gmra.mxu2 %v13058_v39  ;;  %4880 = vmatmul.bf16.vlgmr.msrb.gmra.mxu1 %v13064_v45  ;;  %v10470_v35 = vor.u32 %v12481_v29, %v10469_v27  ;;  %v10433_v24 = vld [vmem:[#allocation3 + $0x324] sm:$0xf]  ;;  %v12583_v12 = vld [vmem:[#allocation3 + $0x1130] sm:$0xf0] }
 0x25f   :  { %6207 = vmatpush.bf16.msra.mxu1 %v10518_v40  ;;  %6220 = vmatpush.bf16.msra.mxu2 %v10614_v30  ;;  %v10565_v40 = vld [vmem:[#allocation3 + $0x744] sm:$0xf]  ;;  %v12505_v30 = vld [vmem:[#allocation3 + $0x770] sm:$0xf0] }
 0x260   :  { %6233 = vmatpush.bf16.msra.mxu3 %v10710_v33  ;;  %v10374_v33 = vor.u32 %v12457_v26, %v10373_v25  ;;  %v10566_v9 = vor.u32 %v12505_v30, %v10565_v40  ;;  %v12472_v25 = vld [vmem:[#allocation3 + $0x350] sm:$0xf0]  ;;  %v10529_v26 = vld [vmem:[#allocation3 + $0x624] sm:$0xf] }
 0x261   :  { %4906 = vmatmul.bf16.vlgmr.msrb.gmra.mxu3 %v13062_v43  ;;  %6195 = vmatpush.bf16.msra.mxu0 %v10410_v49  ;;  %v4686_v44 = vpop.f32.mrf.mxu2  ;;  %v10662_v49 = vor.u32 %v12529_v32, %v10661_v31  ;;  %v4662_v62 = vpop.f32.mrf.mxu0  ;;  %v10625_v27 = vld [vmem:[#allocation3 + $0x924] sm:$0xf]  ;;  %v12565_v30 = vld [vmem:[#allocation3 + $0xef0] sm:$0xf0] }
 0x262   :  { %v10805_v40 = vld [vmem:[#allocation3 + $0xec4] sm:$0xf]  ;;  %v12589_v32 = vld [vmem:[#allocation3 + $0x11f0] sm:$0xf0] }
 0x263   :  { %6208 = vmatpush.bf16.msra.mxu1 %v10506_v50  ;;  %6221 = vmatpush.bf16.msra.mxu2 %v10602_v51  ;;  %v4687_v50 = vadd.f32 %v4686_v44, %v4674_v41  ;;  %v4675_v4 = vpop.f32.mrf.mxu1  ;;  %v10901_v41 = vld [vmem:[#allocation3 + $0x11c4] sm:$0xf]  ;;  %v12607_v14 = vld [vmem:[#allocation3 + $0x1430] sm:$0xf0] }
 0x264   :  { %6234 = vmatpush.bf16.msra.mxu3 %v10698_v57  ;;  %v4699_v51 = vpop.f32.mrf.mxu3  ;;  %v10649_v57 = vld [vmem:[#allocation3 + $0x9e4] sm:$0xf]  ;;  %v12559_v4 = vld [vmem:[#allocation3 + $0xe30] sm:$0xf0] }
 0x265   :  { %6196 = vmatpush.bf16.msra.mxu0 %v10398_v0  ;;  %v4700_v59 = vadd.f32 %v4699_v51, %v4687_v50  ;;  %v10554_v0 = vor.u32 %v12502_v55, %v10553_v54  ;;  %v11093_v34 = vld [vmem:[#allocation3 + $0x17c4] sm:$0xf]  ;;  %v10902_v50 = vor.u32 %v12589_v32, %v10901_v41  ;;  %v12562_v54 = vld [vmem:[#allocation3 + $0xe90] sm:$0xf0] }
 0x266   :  { %v10889_v55 = vld [vmem:[#allocation3 + $0x1164] sm:$0xf]  ;;  %v12553_v32 = vld [vmem:[#allocation3 + $0xd70] sm:$0xf0] }
 0x267   :  { %6209 = vmatpush.bf16.msra.mxu1 %v10494_v1  ;;  %6222 = vmatpush.bf16.msra.mxu2 %v10590_v2  ;;  %v10349_v1 = vld [vmem:[#allocation3 + $0x84] sm:$0xf]  ;;  %v12451_v2 = vld [vmem:[#allocation3 + $0xb0] sm:$0xf0]  ;;  %v13176_v10 = vmax.f32 %v3316_v56, %v4700_v59 }
 0x268   :  { %6235 = vmatpush.bf16.msra.mxu3 %v10686_v8  ;;  %v10650_v8 = vor.u32 %v12526_v58, %v10649_v57  ;;  %v12496_v56 = vld [vmem:[#allocation3 + $0x650] sm:$0xf0]  ;;  %v11094_v57 = vor.u32 %v12637_v53, %v11093_v34  ;;  %v10985_v59 = vld [vmem:[#allocation3 + $0x1464] sm:$0xf] }
 0x269   :  { %6197 = vmatpush.bf16.msra.mxu0 %v10386_v16  ;;  %v10350_v16 = vor.u32 %v12451_v2, %v10349_v1  ;;  %v4688_v48 = vpop.f32.mrf.mxu2  ;;  %v10530_v44 = vor.u32 %v12496_v56, %v10529_v26  ;;  %v12586_v58 = vld [vmem:[#allocation3 + $0x1190] sm:$0xf0]  ;;  %v11081_v62 = vld [vmem:[#allocation3 + $0x1764] sm:$0xf] }
 0x26a   :  { %v10890_v1 = vor.u32 %v12586_v58, %v10889_v55  ;;  %v10973_v13 = vld [vmem:[#allocation3 + $0x1404] sm:$0xf]  ;;  %v12580_v48 = vld [vmem:[#allocation3 + $0x10d0] sm:$0xf0] }
 0x26b   :  { %6210 = vmatpush.bf16.msra.mxu1 %v10482_v18  ;;  %6223 = vmatpush.bf16.msra.mxu2 %v10578_v19  ;;  %v12448_v18 = vld [vmem:[#allocation3 + $0x50] sm:$0xf0]  ;;  %v10446_v19 = vor.u32 %v12475_v11, %v10445_v3  ;;  %v10781_v3 = vld [vmem:[#allocation3 + $0xe04] sm:$0xf] }
 0x26c   :  { %6236 = vmatpush.bf16.msra.mxu3 %v10674_v28  ;;  %v12520_v28 = vld [vmem:[#allocation3 + $0x950] sm:$0xf0]  ;;  %v4701_v29 = vpop.f32.mrf.mxu3  ;;  %v10338_v31 = vor.u32 %v12448_v18, %v10337_v17  ;;  %v11069_v15 = vld [vmem:[#allocation3 + $0x1704] sm:$0xf]  ;;  %v10782_v17 = vor.u32 %v12559_v4, %v10781_v3 }
 0x26d   :  { %6198 = vmatpush.bf16.msra.mxu0 %v10374_v33  ;;  %v10997_v33 = vld [vmem:[#allocation3 + $0x14c4] sm:$0xf]  ;;  %v10626_v47 = vor.u32 %v12520_v28, %v10625_v27  ;;  %v12604_v56 = vld [vmem:[#allocation3 + $0x13d0] sm:$0xf0] }
 0x26e   :  { %v11057_v27 = vld [vmem:[#allocation3 + $0x16a4] sm:$0xf]  ;;  %v12628_v28 = vld [vmem:[#allocation3 + $0x16d0] sm:$0xf0] }
 0x26f   :  { %6211 = vmatpush.bf16.msra.mxu1 %v10470_v35  ;;  %6224 = vmatpush.bf16.msra.mxu2 %v10566_v9  ;;  %v12613_v35 = vld [vmem:[#allocation3 + $0x14f0] sm:$0xf0]  ;;  %v10434_v9 = vor.u32 %v12472_v25, %v10433_v24  ;;  %v10865_v25 = vld [vmem:[#allocation3 + $0x10a4] sm:$0xf] }
 0x270   :  { %6237 = vmatpush.bf16.msra.mxu3 %v10662_v49  ;;  %v10806_v49 = vor.u32 %v12565_v30, %v10805_v40  ;;  %v10998_v51 = vor.u32 %v12613_v35, %v10997_v33  ;;  %v12556_v24 = vld [vmem:[#allocation3 + $0xdd0] sm:$0xf0]  ;;  %v10866_v30 = vor.u32 %v12580_v48, %v10865_v25  ;;  %v10853_v33 = vld [vmem:[#allocation3 + $0x1044] sm:$0xf] }
 0x271   :  { %6199 = vmatpush.bf16.msra.mxu0 %v10362_v61  ;;  %v12610_v61 = vld [vmem:[#allocation3 + $0x1490] sm:$0xf0]  ;;  %v10949_v34 = vld [vmem:[#allocation3 + $0x1344] sm:$0xf] }
 0x272   :  { %v10986_v2 = vor.u32 %v12610_v61, %v10985_v59  ;;  %v12601_v53 = vld [vmem:[#allocation3 + $0x1370] sm:$0xf0]  ;;  %v10745_v55 = vld [vmem:[#allocation3 + $0xce4] sm:$0xf] }
 0x273   :  { %6212 = vmatpush.bf16.msra.mxu1 %v10458_v63  ;;  %6225 = vmatpush.bf16.msra.mxu2 %v10554_v0  ;;  %v12634_v63 = vld [vmem:[#allocation3 + $0x1790] sm:$0xf0]  ;;  %v10794_v0 = vor.u32 %v12562_v54, %v10793_v52  ;;  %v10950_v54 = vor.u32 %v12601_v53, %v10949_v34  ;;  %v10841_v58 = vld [vmem:[#allocation3 + $0xfe4] sm:$0xf]  ;;  %v12468_v34 = vld [vmem:[#allocation3 + $0x2c8] sm:$0xf] }
 0x274   :  { %6238 = vmatpush.bf16.msra.mxu3 %v10650_v8  ;;  %v10877_v8 = vld [vmem:[#allocation3 + $0x1104] sm:$0xf]  ;;  %v11082_v11 = vor.u32 %v12634_v63, %v11081_v62  ;;  %v12574_v62 = vld [vmem:[#allocation3 + $0x1010] sm:$0xf0]  ;;  %v10423_v53 = vld [vmem:[#allocation3 + $0x2f4] sm:$0xf0] }
 0x275   :  { %6200 = vmatpush.bf16.msra.mxu0 %v10350_v16  ;;  %v12631_v16 = vld [vmem:[#allocation3 + $0x1730] sm:$0xf0]  ;;  %v10878_v18 = vor.u32 %v12583_v12, %v10877_v8  ;;  %v10937_v63 = vld [vmem:[#allocation3 + $0x12e4] sm:$0xf] }
 0x276   :  { %v11070_v26 = vor.u32 %v12631_v16, %v11069_v15  ;;  %v11033_v3 = vld [vmem:[#allocation3 + $0x15e4] sm:$0xf]  ;;  %v12622_v4 = vld [vmem:[#allocation3 + $0x1610] sm:$0xf0] }
 0x277   :  { %6213 = vmatpush.bf16.msra.mxu1 %v10446_v19  ;;  %6226 = vmatpush.bf16.msra.mxu2 %v10542_v23  ;;  %v10974_v19 = vor.u32 %v12607_v14, %v10973_v13  ;;  %v10769_v23 = vld [vmem:[#allocation3 + $0xda4] sm:$0xf]  ;;  %v10842_v13 = vor.u32 %v12574_v62, %v10841_v58  ;;  %v12547_v16 = vld [vmem:[#allocation3 + $0xcb0] sm:$0xf0]  ;;  %v10711_v58 = vld [vmem:[#allocation3 + $0xbf4] sm:$0xf0] }
 0x278   :  { %6239 = vmatpush.bf16.msra.mxu3 %v10638_v46  ;;  %v10961_v46 = vld [vmem:[#allocation3 + $0x13a4] sm:$0xf]  ;;  %v10770_v29 = vor.u32 %v12556_v24, %v10769_v23  ;;  %v12571_v23 = vld [vmem:[#allocation3 + $0xfb0] sm:$0xf0] }
 0x279   :  { %6201 = vmatpush.bf16.msra.mxu0 %v10338_v31  ;;  %v4712_v40 = vpop.f32.mrf.mxu0  ;;  %v10962_v41 = vor.u32 %v12604_v56, %v10961_v46  ;;  %v10757_v31 = vld [vmem:[#allocation3 + $0xd44] sm:$0xf]  ;;  %v12595_v25 = vld [vmem:[#allocation3 + $0x12b0] sm:$0xf0] }
 0x27a   :  { %v10733_v15 = vld [vmem:[#allocation3 + $0xc84] sm:$0xf]  ;;  %v12619_v48 = vld [vmem:[#allocation3 + $0x15b0] sm:$0xf0] }
 0x27b   :  { %6214 = vmatpush.bf16.msra.mxu1 %v10434_v9  ;;  %6227 = vmatpush.bf16.msra.mxu2 %v10530_v44  ;;  %v4725_v35 = vpop.f32.mrf.mxu1  ;;  %v11058_v9 = vor.u32 %v12628_v28, %v11057_v27  ;;  %v12577_v44 = vld [vmem:[#allocation3 + $0x1070] sm:$0xf0]  ;;  %v10925_v24 = vld [vmem:[#allocation3 + $0x1284] sm:$0xf]  ;;  %v10734_v46 = vor.u32 %v12547_v16, %v10733_v15 }
 0x27c   :  { %6240 = vmatpush.bf16.msra.mxu3 %v10626_v47  ;;  %6202 = vmatmul.bf16.vlgmr.msra.gmra.mxu0 %v13045_v21  ;;  %v4726_v47 = vadd.f32 %v4725_v35, %v4712_v40  ;;  %v10854_v52 = vor.u32 %v12577_v44, %v10853_v33  ;;  %v10721_v56 = vld [vmem:[#allocation3 + $0xc24] sm:$0xf]  ;;  %v12544_v27 = vld [vmem:[#allocation3 + $0xc50] sm:$0xf0] }
 0x27d   :  { %6246 = vmatpush.bf16.msrb.mxu0 %v10806_v49  ;;  %v11045_v49 = vld [vmem:[#allocation3 + $0x1644] sm:$0xf]  ;;  %v12592_v33 = vld [vmem:[#allocation3 + $0x1250] sm:$0xf0] }
 0x27e   :  { %6228 = vmatmul.bf16.vlgmr.msra.gmra.mxu2 %v13037_v5  ;;  %6215 = vmatmul.bf16.vlgmr.msra.gmra.mxu1 %v13048_v22  ;;  %v10817_v40 = vld [vmem:[#allocation3 + $0xf24] sm:$0xf] }
 0x27f   :  { %6259 = vmatpush.bf16.msrb.mxu1 %v10902_v50  ;;  %6272 = vmatpush.bf16.msrb.mxu2 %v10998_v51  ;;  %v12625_v50 = vld [vmem:[#allocation3 + $0x1670] sm:$0xf0]  ;;  %v10758_v51 = vor.u32 %v12553_v32, %v10757_v31  ;;  %v11009_v35 = vld [vmem:[#allocation3 + $0x1524] sm:$0xf] }
 0x280   :  { %6285 = vmatpush.bf16.msrb.mxu3 %v11094_v57  ;;  %v12550_v57 = vld [vmem:[#allocation3 + $0xd10] sm:$0xf0]  ;;  %v11046_v61 = vor.u32 %v12625_v50, %v11045_v49  ;;  %v10722_v49 = vor.u32 %v12544_v27, %v10721_v56  ;;  %v10519_v50 = vld [vmem:[#allocation3 + $0x5f4] sm:$0xf0] }
 0x281   :  { %6241 = vmatmul.bf16.vlgmr.msra.gmra.mxu3 %v13042_v7  ;;  %6247 = vmatpush.bf16.msrb.mxu0 %v10794_v0  ;;  %v4738_v59 = vpop.f32.mrf.mxu2  ;;  %v12598_v0 = vld [vmem:[#allocation3 + $0x1310] sm:$0xf0]  ;;  %v10746_v8 = vor.u32 %v12550_v57, %v10745_v55  ;;  %v4714_v12 = vpop.f32.mrf.mxu0  ;;  %v12540_v57 = vld [vmem:[#allocation3 + $0xbc8] sm:$0xf]  ;;  %v10687_v56 = vld [vmem:[#allocation3 + $0xb34] sm:$0xf0] }
 0x282   :  { %v10938_v14 = vor.u32 %v12598_v0, %v10937_v63  ;;  %v12465_v0 = vld [vmem:[#allocation3 + $0x268] sm:$0xf]  ;;  %v10603_v12 = vld [vmem:[#allocation3 + $0x894] sm:$0xf0] }
 0x283   :  { %6260 = vmatpush.bf16.msrb.mxu1 %v10890_v1  ;;  %6273 = vmatpush.bf16.msrb.mxu2 %v10986_v2  ;;  %v4739_v1 = vadd.f32 %v4738_v59, %v4726_v47  ;;  %v12492_v47 = vld [vmem:[#allocation3 + $0x5c8] sm:$0xf] }
 0x284   :  { %6286 = vmatpush.bf16.msrb.mxu3 %v11082_v11  ;;  %v4751_v2 = vpop.f32.mrf.mxu3  ;;  %v10522_v62 = vor.u32 %v12492_v47, %v10519_v50 }
 0x285   :  { %6248 = vmatpush.bf16.msrb.mxu0 %v10782_v17  ;;  %v13182_v11 = vadd.f32 %v4751_v2, %v4739_v1  ;;  %v10829_v17 = vld [vmem:[#allocation3 + $0xf84] sm:$0xf]  ;;  %v10411_v1 = vld [vmem:[#allocation3 + $0x294] sm:$0xf0]  ;;  %v12489_v2 = vld [vmem:[#allocation3 + $0x568] sm:$0xf] }
 0x286   :  { %v10830_v28 = vor.u32 %v12571_v23, %v10829_v17  ;;  %v10414_v15 = vor.u32 %v12465_v0, %v10411_v1  ;;  %v12486_v23 = vld [vmem:[#allocation3 + $0x508] sm:$0xf]  ;;  %v10663_v0 = vld [vmem:[#allocation3 + $0xa74] sm:$0xf0] }
 0x287   :  { %6261 = vmatpush.bf16.msrb.mxu1 %v10878_v18  ;;  %6274 = vmatpush.bf16.msrb.mxu2 %v10974_v19  ;;  %v4727_v18 = vpop.f32.mrf.mxu1  ;;  %v11034_v19 = vor.u32 %v12622_v4, %v11033_v3  ;;  %v10714_v3 = vor.u32 %v12540_v57, %v10711_v58  ;;  %v10507_v4 = vld [vmem:[#allocation3 + $0x594] sm:$0xf0] }
 0x288   :  { %6287 = vmatpush.bf16.msrb.mxu3 %v11070_v26  ;;  %v11021_v26 = vld [vmem:[#allocation3 + $0x1584] sm:$0xf]  ;;  %v10510_v16 = vor.u32 %v12489_v2, %v10507_v4  ;;  %v12462_v18 = vld [vmem:[#allocation3 + $0x208] sm:$0xf]  ;;  %v10471_v58 = vld [vmem:[#allocation3 + $0x474] sm:$0xf0] }
 0x289   :  { %6249 = vmatpush.bf16.msrb.mxu0 %v10770_v29  ;;  %v10926_v29 = vor.u32 %v12595_v25, %v10925_v24  ;;  %v4740_v31 = vpop.f32.mrf.mxu2  ;;  %v11022_v32 = vor.u32 %v12619_v48, %v11021_v26  ;;  %v10495_v25 = vld [vmem:[#allocation3 + $0x534] sm:$0xf0]  ;;  %v12510_v26 = vld [vmem:[#allocation3 + $0x808] sm:$0xf] }
 0x28a   :  { %v10591_v48 = vld [vmem:[#allocation3 + $0x834] sm:$0xf0] }
 0x28b   :  { %6262 = vmatpush.bf16.msrb.mxu1 %v10866_v30  ;;  %6275 = vmatpush.bf16.msrb.mxu2 %v10962_v41  ;;  %v12568_v30 = vld [vmem:[#allocation3 + $0xf50] sm:$0xf0]  ;;  %v10913_v41 = vld [vmem:[#allocation3 + $0x1224] sm:$0xf] }
 0x28c   :  { %6288 = vmatpush.bf16.msrb.mxu3 %v11058_v9  ;;  %v12616_v9 = vld [vmem:[#allocation3 + $0x1550] sm:$0xf0]  ;;  %v4753_v44 = vpop.f32.mrf.mxu3  ;;  %v10914_v55 = vor.u32 %v12592_v33, %v10913_v41  ;;  %v12483_v41 = vld [vmem:[#allocation3 + $0x4a8] sm:$0xf] }
 0x28d   :  { %6250 = vmatpush.bf16.msrb.mxu0 %v10758_v51  ;;  %v12516_v51 = vld [vmem:[#allocation3 + $0x8c8] sm:$0xf]  ;;  %v11010_v59 = vor.u32 %v12616_v9, %v11009_v35  ;;  %v10579_v35 = vld [vmem:[#allocation3 + $0x7d4] sm:$0xf0] }
 0x28e   :  { %v12507_v33 = vld [vmem:[#allocation3 + $0x7a8] sm:$0xf]  ;;  %v10675_v44 = vld [vmem:[#allocation3 + $0xad4] sm:$0xf0] }
 0x28f   :  { %6263 = vmatpush.bf16.msrb.mxu1 %v10854_v52  ;;  %6276 = vmatpush.bf16.msrb.mxu2 %v10950_v54  ;;  %v10615_v52 = vld [vmem:[#allocation3 + $0x8f4] sm:$0xf0]  ;;  %v10818_v54 = vor.u32 %v12568_v30, %v10817_v40  ;;  %v12459_v40 = vld [vmem:[#allocation3 + $0x1a8] sm:$0xf] }
 0x290   :  { %6289 = vmatpush.bf16.msrb.mxu3 %v11046_v61  ;;  %v10426_v61 = vor.u32 %v12468_v34, %v10423_v53  ;;  %v10618_v63 = vor.u32 %v12516_v51, %v10615_v52  ;;  %v10387_v30 = vld [vmem:[#allocation3 + $0x1d4] sm:$0xf0]  ;;  %v12531_v9 = vld [vmem:[#allocation3 + $0xaa8] sm:$0xf] }
 0x291   :  { %6251 = vmatpush.bf16.msrb.mxu0 %v10746_v8  ;;  %v12513_v8 = vld [vmem:[#allocation3 + $0x868] sm:$0xf]  ;;  %v10390_v34 = vor.u32 %v12459_v40, %v10387_v30  ;;  %v10678_v57 = vor.u32 %v12531_v9, %v10675_v44 }
 0x292   :  { %v10606_v17 = vor.u32 %v12513_v8, %v10603_v12  ;;  %v12456_v52 = vld [vmem:[#allocation3 + $0x148] sm:$0xf]  ;;  %v10363_v8 = vld [vmem:[#allocation3 + $0x114] sm:$0xf0] }
 0x293   :  { %6264 = vmatpush.bf16.msrb.mxu1 %v10842_v13  ;;  %6277 = vmatpush.bf16.msrb.mxu2 %v10938_v14  ;;  %v12537_v13 = vld [vmem:[#allocation3 + $0xb68] sm:$0xf]  ;;  %v10699_v14 = vld [vmem:[#allocation3 + $0xb94] sm:$0xf0] }
 0x294   :  { %6290 = vmatpush.bf16.msrb.mxu3 %v11034_v19  ;;  %v10399_v19 = vld [vmem:[#allocation3 + $0x234] sm:$0xf0]  ;;  %v10702_v24 = vor.u32 %v12537_v13, %v10699_v14  ;;  %v12477_v12 = vld [vmem:[#allocation3 + $0x3e8] sm:$0xf] }
 0x295   :  { %6252 = vmatpush.bf16.msrb.mxu0 %v10734_v46  ;;  %v12534_v46 = vld [vmem:[#allocation3 + $0xb08] sm:$0xf]  ;;  %v10402_v27 = vor.u32 %v12462_v18, %v10399_v19  ;;  %v10555_v18 = vld [vmem:[#allocation3 + $0x714] sm:$0xf0] }
 0x296   :  { %v10690_v31 = vor.u32 %v12534_v46, %v10687_v56  ;;  %v12525_v19 = vld [vmem:[#allocation3 + $0x9e8] sm:$0xf] }
 0x297   :  { %6265 = vmatpush.bf16.msrb.mxu1 %v10830_v28  ;;  %6278 = vmatpush.bf16.msrb.mxu2 %v10926_v29  ;;  %v10498_v28 = vor.u32 %v12486_v23, %v10495_v25  ;;  %v10594_v29 = vor.u32 %v12510_v26, %v10591_v48  ;;  %v10651_v23 = vld [vmem:[#allocation3 + $0xa14] sm:$0xf0]  ;;  %v12450_v56 = vld [vmem:[#allocation3 + $0x88] sm:$0xf] }
 0x298   :  { %6291 = vmatpush.bf16.msrb.mxu3 %v11022_v32  ;;  %v10483_v32 = vld [vmem:[#allocation3 + $0x4d4] sm:$0xf0]  ;;  %v10654_v30 = vor.u32 %v12525_v19, %v10651_v23  ;;  %v12447_v44 = vld [vmem:[#allocation3 + $0x28] sm:$0xf] }
 0x299   :  { %6253 = vmatpush.bf16.msrb.mxu0 %v10722_v49  ;;  %v4764_v53 = vpop.f32.mrf.mxu0  ;;  %v10486_v47 = vor.u32 %v12483_v41, %v10483_v32  ;;  %v10582_v49 = vor.u32 %v12507_v33, %v10579_v35  ;;  %v10447_v41 = vld [vmem:[#allocation3 + $0x3b4] sm:$0xf0]  ;;  %v12522_v33 = vld [vmem:[#allocation3 + $0x988] sm:$0xf] }
 0x29a   :  { %v4765_v50 = vadd.f32 %v4764_v53, %v13182_v11  ;;  %v12453_v11 = vld [vmem:[#allocation3 + $0xe8] sm:$0xf]  ;;  %v10543_v32 = vld [vmem:[#allocation3 + $0x6b4] sm:$0xf0] }
 0x29b   :  { %6266 = vmatpush.bf16.msrb.mxu1 %v10818_v54  ;;  %6279 = vmatpush.bf16.msrb.mxu2 %v10914_v55  ;;  %v4777_v51 = vpop.f32.mrf.mxu1  ;;  %v10375_v54 = vld [vmem:[#allocation3 + $0x174] sm:$0xf0]  ;;  %v12480_v55 = vld [vmem:[#allocation3 + $0x448] sm:$0xf]  ;;  %v10366_v25 = vor.u32 %v12453_v11, %v10363_v8 }
 0x29c   :  { %6292 = vmatpush.bf16.msrb.mxu3 %v11010_v59  ;;  %6254 = vmatmul.bf16.vlgmr.msrb.gmra.mxu0 %v13060_v42  ;;  %v12504_v59 = vld [vmem:[#allocation3 + $0x748] sm:$0xf]  ;;  %v10378_v1 = vor.u32 %v12456_v52, %v10375_v54  ;;  %v10474_v2 = vor.u32 %v12480_v55, %v10471_v58  ;;  %v10639_v35 = vld [vmem:[#allocation3 + $0x9b4] sm:$0xf0] }
 0x29d   :  { %6298 = vmatpush.bf16.msra.mxu0 %v10426_v61  ;;  %v10567_v61 = vld [vmem:[#allocation3 + $0x774] sm:$0xf0]  ;;  %v10642_v60 = vor.u32 %v12522_v33, %v10639_v35  ;;  %v12519_v52 = vld [vmem:[#allocation3 + $0x928] sm:$0xf] }
 0x29e   :  { %6280 = vmatmul.bf16.vlgmr.msrb.gmra.mxu2 %v13058_v39  ;;  %6267 = vmatmul.bf16.vlgmr.msrb.gmra.mxu1 %v13064_v45  ;;  %v10627_v54 = vld [vmem:[#allocation3 + $0x954] sm:$0xf0]  ;;  %v12609_v19 = vld [vmem:[#allocation3 + $0x1468] sm:$0xf] }
 0x29f   :  { %6311 = vmatpush.bf16.msra.mxu1 %v10522_v62  ;;  %6324 = vmatpush.bf16.msra.mxu2 %v10618_v63  ;;  %v4778_v62 = vadd.f32 %v4777_v51, %v4765_v50  ;;  %v12528_v63 = vld [vmem:[#allocation3 + $0xa48] sm:$0xf]  ;;  %v10435_v50 = vld [vmem:[#allocation3 + $0x354] sm:$0xf0]  ;;  %v10630_v11 = vor.u32 %v12519_v52, %v10627_v54 }
 0x2a0   :  { %6337 = vmatpush.bf16.msra.mxu3 %v10714_v3  ;;  %v10570_v3 = vor.u32 %v12504_v59, %v10567_v61  ;;  %v10666_v13 = vor.u32 %v12528_v63, %v10663_v0  ;;  %v12495_v51 = vld [vmem:[#allocation3 + $0x628] sm:$0xf]  ;;  %v10807_v58 = vld [vmem:[#allocation3 + $0xef4] sm:$0xf0] }
 0x2a1   :  { %6293 = vmatmul.bf16.vlgmr.msrb.gmra.mxu3 %v13062_v43  ;;  %6299 = vmatpush.bf16.msra.mxu0 %v10414_v15  ;;  %v4790_v4 = vpop.f32.mrf.mxu2  ;;  %v4766_v26 = vpop.f32.mrf.mxu0  ;;  %v12588_v59 = vld [vmem:[#allocation3 + $0x11c8] sm:$0xf]  ;;  %v10999_v0 = vld [vmem:[#allocation3 + $0x14f4] sm:$0xf0] }
 0x2a2   :  { %v4791_v14 = vadd.f32 %v4790_v4, %v4778_v62  ;;  %v10903_v62 = vld [vmem:[#allocation3 + $0x11f4] sm:$0xf0]  ;;  %v12612_v63 = vld [vmem:[#allocation3 + $0x14c8] sm:$0xf] }
 0x2a3   :  { %6312 = vmatpush.bf16.msra.mxu1 %v10510_v16  ;;  %6325 = vmatpush.bf16.msra.mxu2 %v10606_v17  ;;  %v10459_v16 = vld [vmem:[#allocation3 + $0x414] sm:$0xf0]  ;;  %v12501_v17 = vld [vmem:[#allocation3 + $0x6e8] sm:$0xf] }
 0x2a4   :  { %6338 = vmatpush.bf16.msra.mxu3 %v10702_v24  ;;  %v4803_v15 = vpop.f32.mrf.mxu3  ;;  %v10462_v48 = vor.u32 %v12477_v12, %v10459_v16  ;;  %v10558_v46 = vor.u32 %v12501_v17, %v10555_v18  ;;  %v11095_v4 = vld [vmem:[#allocation3 + $0x17f4] sm:$0xf0]  ;;  %v10906_v12 = vor.u32 %v12588_v59, %v10903_v62  ;;  %v12585_v16 = vld [vmem:[#allocation3 + $0x1168] sm:$0xf] }
 0x2a5   :  { %6300 = vmatpush.bf16.msra.mxu0 %v10402_v27  ;;  %v4804_v24 = vadd.f32 %v4803_v15, %v4791_v14  ;;  %v10351_v27 = vld [vmem:[#allocation3 + $0xb4] sm:$0xf0]  ;;  %v12561_v14 = vld [vmem:[#allocation3 + $0xe68] sm:$0xf] }
 0x2a6   :  { %v10354_v9 = vor.u32 %v12450_v56, %v10351_v27  ;;  %v10795_v15 = vld [vmem:[#allocation3 + $0xe94] sm:$0xf0]  ;;  %v12558_v56 = vld [vmem:[#allocation3 + $0xe08] sm:$0xf] }
 0x2a7   :  { %6313 = vmatpush.bf16.msra.mxu1 %v10498_v28  ;;  %6326 = vmatpush.bf16.msra.mxu2 %v10594_v29  ;;  %v12474_v28 = vld [vmem:[#allocation3 + $0x388] sm:$0xf]  ;;  %v4779_v29 = vpop.f32.mrf.mxu1  ;;  %v13192_v40 = vmax.f32 %v3317_v6, %v4804_v24  ;;  %v10531_v6 = vld [vmem:[#allocation3 + $0x654] sm:$0xf0]  ;;  %v10798_v26 = vor.u32 %v12561_v14, %v10795_v15 }
 0x2a8   :  { %6339 = vmatpush.bf16.msra.mxu3 %v10690_v31  ;;  %v12498_v31 = vld [vmem:[#allocation3 + $0x688] sm:$0xf]  ;;  %v10450_v53 = vor.u32 %v12474_v28, %v10447_v41  ;;  %v10891_v18 = vld [vmem:[#allocation3 + $0x1194] sm:$0xf0] }
 0x2a9   :  { %6301 = vmatpush.bf16.msra.mxu0 %v10390_v34  ;;  %v10339_v34 = vld [vmem:[#allocation3 + $0x54] sm:$0xf0]  ;;  %v4792_v38 = vpop.f32.mrf.mxu2  ;;  %v12633_v24 = vld [vmem:[#allocation3 + $0x1768] sm:$0xf] }
 0x2aa   :  { %v10342_v61 = vor.u32 %v12447_v44, %v10339_v34  ;;  %v10987_v23 = vld [vmem:[#allocation3 + $0x1494] sm:$0xf0]  ;;  %v12582_v28 = vld [vmem:[#allocation3 + $0x1108] sm:$0xf] }
 0x2ab   :  { %6314 = vmatpush.bf16.msra.mxu1 %v10486_v47  ;;  %6327 = vmatpush.bf16.msra.mxu2 %v10582_v49  ;;  %v10546_v47 = vor.u32 %v12498_v31, %v10543_v32  ;;  %v12471_v49 = vld [vmem:[#allocation3 + $0x328] sm:$0xf]  ;;  %v10783_v27 = vld [vmem:[#allocation3 + $0xe34] sm:$0xf0] }
 0x2ac   :  { %6340 = vmatpush.bf16.msra.mxu3 %v10678_v57  ;;  %v4805_v55 = vpop.f32.mrf.mxu3  ;;  %v12564_v57 = vld [vmem:[#allocation3 + $0xec8] sm:$0xf]  ;;  %v10975_v31 = vld [vmem:[#allocation3 + $0x1434] sm:$0xf0]  ;;  %v10786_v35 = vor.u32 %v12558_v56, %v10783_v27 }
 0x2ad   :  { %6302 = vmatpush.bf16.msra.mxu0 %v10378_v1  ;;  %v10438_v1 = vor.u32 %v12471_v49, %v10435_v50  ;;  %v10810_v8 = vor.u32 %v12564_v57, %v10807_v58  ;;  %v12606_v41 = vld [vmem:[#allocation3 + $0x1408] sm:$0xf]  ;;  %v11071_v33 = vld [vmem:[#allocation3 + $0x1734] sm:$0xf0] }
 0x2ae   :  { %v12630_v32 = vld [vmem:[#allocation3 + $0x1708] sm:$0xf]  ;;  %v10978_v44 = vor.u32 %v12606_v41, %v10975_v31  ;;  %v10867_v50 = vld [vmem:[#allocation3 + $0x10d4] sm:$0xf0] }
 0x2af   :  { %6315 = vmatpush.bf16.msra.mxu1 %v10474_v2  ;;  %6328 = vmatpush.bf16.msra.mxu2 %v10570_v3  ;;  %v10534_v2 = vor.u32 %v12495_v51, %v10531_v6  ;;  %v12636_v3 = vld [vmem:[#allocation3 + $0x17c8] sm:$0xf]  ;;  %v11074_v49 = vor.u32 %v12630_v32, %v11071_v33  ;;  %v10963_v38 = vld [vmem:[#allocation3 + $0x13d4] sm:$0xf0] }
 0x2b0   :  { %6341 = vmatpush.bf16.msra.mxu3 %v10666_v13  ;;  %v11002_v13 = vor.u32 %v12612_v63, %v10999_v0  ;;  %v11098_v17 = vor.u32 %v12636_v3, %v11095_v4  ;;  %v12555_v34 = vld [vmem:[#allocation3 + $0xda8] sm:$0xf]  ;;  %v11059_v6 = vld [vmem:[#allocation3 + $0x16d4] sm:$0xf0] }
 0x2b1   :  { %6303 = vmatpush.bf16.msra.mxu0 %v10366_v25  ;;  %v11083_v25 = vld [vmem:[#allocation3 + $0x1794] sm:$0xf0]  ;;  %v12603_v51 = vld [vmem:[#allocation3 + $0x13a8] sm:$0xf] }
 0x2b2   :  { %v11086_v29 = vor.u32 %v12633_v24, %v11083_v25  ;;  %v10966_v57 = vor.u32 %v12603_v51, %v10963_v38  ;;  %v12552_v58 = vld [vmem:[#allocation3 + $0xd48] sm:$0xf]  ;;  %v10759_v59 = vld [vmem:[#allocation3 + $0xd74] sm:$0xf0] }
 0x2b3   :  { %6316 = vmatpush.bf16.msra.mxu1 %v10462_v48  ;;  %6329 = vmatpush.bf16.msra.mxu2 %v10558_v46  ;;  %v10894_v48 = vor.u32 %v12585_v16, %v10891_v18  ;;  %v10990_v46 = vor.u32 %v12609_v19, %v10987_v23  ;;  %v10855_v0 = vld [vmem:[#allocation3 + $0x1074] sm:$0xf0]  ;;  %v12624_v4 = vld [vmem:[#allocation3 + $0x1648] sm:$0xf] }
 0x2b4   :  { %6342 = vmatpush.bf16.msra.mxu3 %v10654_v30  ;;  %v10879_v30 = vld [vmem:[#allocation3 + $0x1134] sm:$0xf0]  ;;  %v12549_v14 = vld [vmem:[#allocation3 + $0xce8] sm:$0xf] }
 0x2b5   :  { %6304 = vmatpush.bf16.msra.mxu0 %v10354_v9  ;;  %v10882_v9 = vor.u32 %v12582_v28, %v10879_v30  ;;  %v10747_v15 = vld [vmem:[#allocation3 + $0xd14] sm:$0xf0]  ;;  %v12573_v16 = vld [vmem:[#allocation3 + $0xfe8] sm:$0xf] }
 0x2b6   :  { %v10843_v19 = vld [vmem:[#allocation3 + $0x1014] sm:$0xf0]  ;;  %v12597_v23 = vld [vmem:[#allocation3 + $0x12e8] sm:$0xf]  ;;  %v10750_v56 = vor.u32 %v12549_v14, %v10747_v15  ;;  %v12542_v14 = vld [vmem:[#allocation3 + $0xbf8] sm:$0xf0] }
 0x2b7   :  { %6317 = vmatpush.bf16.msra.mxu1 %v10450_v53  ;;  %6330 = vmatpush.bf16.msra.mxu2 %v10546_v47  ;;  %v10771_v53 = vld [vmem:[#allocation3 + $0xdd4] sm:$0xf0]  ;;  %v12579_v47 = vld [vmem:[#allocation3 + $0x10a8] sm:$0xf] }
 0x2b8   :  { %6343 = vmatpush.bf16.msra.mxu3 %v10642_v60  ;;  %v12627_v60 = vld [vmem:[#allocation3 + $0x16a8] sm:$0xf]  ;;  %v10774_v52 = vor.u32 %v12555_v34, %v10771_v53  ;;  %v10870_v55 = vor.u32 %v12579_v47, %v10867_v50  ;;  %v10939_v24 = vld [vmem:[#allocation3 + $0x1314] sm:$0xf0] }
 0x2b9   :  { %6305 = vmatpush.bf16.msra.mxu0 %v10342_v61  ;;  %v4816_v54 = vpop.f32.mrf.mxu0  ;;  %v12576_v61 = vld [vmem:[#allocation3 + $0x1048] sm:$0xf]  ;;  %v11062_v63 = vor.u32 %v12627_v60, %v11059_v6  ;;  %v10942_v30 = vor.u32 %v12597_v23, %v10939_v24  ;;  %v10735_v31 = vld [vmem:[#allocation3 + $0xcb4] sm:$0xf0]  ;;  %v12467_v23 = vld [vmem:[#allocation3 + $0x298] sm:$0xf0] }
 0x2ba   :  { %v12546_v41 = vld [vmem:[#allocation3 + $0xc88] sm:$0xf]  ;;  %v10927_v34 = vld [vmem:[#allocation3 + $0x12b4] sm:$0xf0]  ;;  %v10513_v24 = vld [vmem:[#allocation3 + $0x56c] sm:$0xf] }
 0x2bb   :  { %6318 = vmatpush.bf16.msra.mxu1 %v10438_v1  ;;  %6331 = vmatpush.bf16.msra.mxu2 %v10534_v2  ;;  %v4829_v62 = vpop.f32.mrf.mxu1  ;;  %v12600_v1 = vld [vmem:[#allocation3 + $0x1348] sm:$0xf]  ;;  %v10951_v2 = vld [vmem:[#allocation3 + $0x1374] sm:$0xf0] }
 0x2bc   :  { %6344 = vmatpush.bf16.msra.mxu3 %v10630_v11  ;;  %6306 = vmatmul.bf16.vlgmr.msra.gmra.mxu0 %v13045_v21  ;;  %v4830_v3 = vadd.f32 %v4829_v62, %v4816_v54  ;;  %v11047_v11 = vld [vmem:[#allocation3 + $0x1674] sm:$0xf0]  ;;  %v12570_v32 = vld [vmem:[#allocation3 + $0xf88] sm:$0xf] }
 0x2bd   :  { %6350 = vmatpush.bf16.msrb.mxu0 %v10810_v8  ;;  %v10762_v8 = vor.u32 %v12552_v58, %v10759_v59  ;;  %v11050_v18 = vor.u32 %v12624_v4, %v11047_v11  ;;  %v12618_v53 = vld [vmem:[#allocation3 + $0x1588] sm:$0xf]  ;;  %v11023_v47 = vld [vmem:[#allocation3 + $0x15b4] sm:$0xf0]  ;;  %v10621_v4 = vld [vmem:[#allocation3 + $0x8cc] sm:$0xf] }
 0x2be   :  { %6332 = vmatmul.bf16.vlgmr.msra.gmra.mxu2 %v13037_v5  ;;  %6319 = vmatmul.bf16.vlgmr.msra.gmra.mxu1 %v13048_v22  ;;  %v12543_v50 = vld [vmem:[#allocation3 + $0xc28] sm:$0xf]  ;;  %v10723_v51 = vld [vmem:[#allocation3 + $0xc54] sm:$0xf0]  ;;  %v12518_v11 = vld [vmem:[#allocation3 + $0x8f8] sm:$0xf0] }
 0x2bf   :  { %6363 = vmatpush.bf16.msrb.mxu1 %v10906_v12  ;;  %6376 = vmatpush.bf16.msrb.mxu2 %v11002_v13  ;;  %v10858_v12 = vor.u32 %v12576_v61, %v10855_v0  ;;  %v10954_v13 = vor.u32 %v12600_v1, %v10951_v2  ;;  %v12567_v6 = vld [vmem:[#allocation3 + $0xf28] sm:$0xf]  ;;  %v10915_v58 = vld [vmem:[#allocation3 + $0x1254] sm:$0xf0]  ;;  %v12470_v0 = vld [vmem:[#allocation3 + $0x2f8] sm:$0xf0]  ;;  %v10726_v2 = vor.u32 %v12543_v50, %v10723_v51 }
 0x2c0   :  { %6389 = vmatpush.bf16.msrb.mxu3 %v11098_v17  ;;  %v12591_v54 = vld [vmem:[#allocation3 + $0x1228] sm:$0xf]  ;;  %v11011_v61 = vld [vmem:[#allocation3 + $0x1554] sm:$0xf0]  ;;  %v10525_v1 = vld [vmem:[#allocation3 + $0x5cc] sm:$0xf] }
 0x2c1   :  { %6345 = vmatmul.bf16.vlgmr.msra.gmra.mxu3 %v13042_v7  ;;  %6351 = vmatpush.bf16.msrb.mxu0 %v10798_v26  ;;  %v4842_v17 = vpop.f32.mrf.mxu2  ;;  %v4818_v28 = vpop.f32.mrf.mxu0  ;;  %v12615_v59 = vld [vmem:[#allocation3 + $0x1528] sm:$0xf] }
 0x2c2   :  { %v4843_v25 = vadd.f32 %v4842_v17, %v4830_v3  ;;  %v12494_v3 = vld [vmem:[#allocation3 + $0x5f8] sm:$0xf0]  ;;  %v11014_v15 = vor.u32 %v12615_v59, %v11011_v61 }
 0x2c3   :  { %6364 = vmatpush.bf16.msrb.mxu1 %v10894_v48  ;;  %6377 = vmatpush.bf16.msrb.mxu2 %v10990_v46  ;;  %v12621_v48 = vld [vmem:[#allocation3 + $0x15e8] sm:$0xf]  ;;  %v11035_v46 = vld [vmem:[#allocation3 + $0x1614] sm:$0xf0]  ;;  %v4831_v33 = vpop.f32.mrf.mxu1  ;;  %v10526_v17 = vor.u32 %v12494_v3, %v10525_v1  ;;  %v12539_v28 = vld [vmem:[#allocation3 + $0xb98] sm:$0xf0] }
 0x2c4   :  { %6390 = vmatpush.bf16.msrb.mxu3 %v11086_v29  ;;  %v4855_v26 = vpop.f32.mrf.mxu3  ;;  %v10846_v29 = vor.u32 %v12573_v16, %v10843_v19  ;;  %v10417_v19 = vld [vmem:[#allocation3 + $0x26c] sm:$0xf]  ;;  %v12533_v59 = vld [vmem:[#allocation3 + $0xad8] sm:$0xf0] }
 0x2c5   :  { %6352 = vmatpush.bf16.msrb.mxu0 %v10786_v35  ;;  %v13198_v27 = vadd.f32 %v4855_v26, %v4843_v25  ;;  %v11038_v35 = vor.u32 %v12621_v48, %v11035_v46  ;;  %v12491_v26 = vld [vmem:[#allocation3 + $0x598] sm:$0xf0]  ;;  %v10609_v48 = vld [vmem:[#allocation3 + $0x86c] sm:$0xf] }
 0x2c6   :  { %v12515_v46 = vld [vmem:[#allocation3 + $0x898] sm:$0xf0]  ;;  %v10501_v33 = vld [vmem:[#allocation3 + $0x50c] sm:$0xf] }
 0x2c7   :  { %6365 = vmatpush.bf16.msrb.mxu1 %v10882_v9  ;;  %6378 = vmatpush.bf16.msrb.mxu2 %v10978_v44  ;;  %v10831_v9 = vld [vmem:[#allocation3 + $0xfb4] sm:$0xf0]  ;;  %v12594_v44 = vld [vmem:[#allocation3 + $0x1288] sm:$0xf]  ;;  %v10381_v3 = vld [vmem:[#allocation3 + $0x14c] sm:$0xf] }
 0x2c8   :  { %6391 = vmatpush.bf16.msrb.mxu3 %v11074_v49  ;;  %v10738_v49 = vor.u32 %v12546_v41, %v10735_v31  ;;  %v10834_v38 = vor.u32 %v12570_v32, %v10831_v9  ;;  %v10930_v60 = vor.u32 %v12594_v44, %v10927_v34  ;;  %v10610_v41 = vor.u32 %v12515_v46, %v10609_v48  ;;  %v10405_v31 = vld [vmem:[#allocation3 + $0x20c] sm:$0xf]  ;;  %v12464_v32 = vld [vmem:[#allocation3 + $0x238] sm:$0xf0] }
 0x2c9   :  { %6353 = vmatpush.bf16.msrb.mxu0 %v10774_v52  ;;  %v10819_v52 = vld [vmem:[#allocation3 + $0xf54] sm:$0xf0]  ;;  %v12488_v9 = vld [vmem:[#allocation3 + $0x538] sm:$0xf0]  ;;  %v10597_v44 = vld [vmem:[#allocation3 + $0x80c] sm:$0xf] }
 0x2ca   :  { %v12512_v34 = vld [vmem:[#allocation3 + $0x838] sm:$0xf0]  ;;  %v10502_v50 = vor.u32 %v12488_v9, %v10501_v33 }
 0x2cb   :  { %6366 = vmatpush.bf16.msrb.mxu1 %v10870_v55  ;;  %6379 = vmatpush.bf16.msrb.mxu2 %v10966_v57  ;;  %v4844_v55 = vpop.f32.mrf.mxu2  ;;  %v11026_v57 = vor.u32 %v12618_v53, %v11023_v47  ;;  %v10693_v53 = vld [vmem:[#allocation3 + $0xb0c] sm:$0xf]  ;;  %v12536_v47 = vld [vmem:[#allocation3 + $0xb38] sm:$0xf0]  ;;  %v10598_v51 = vor.u32 %v12512_v34, %v10597_v44 }
 0x2cc   :  { %6392 = vmatpush.bf16.msrb.mxu3 %v11062_v63  ;;  %v4857_v62 = vpop.f32.mrf.mxu3  ;;  %v10429_v63 = vld [vmem:[#allocation3 + $0x2cc] sm:$0xf] }
 0x2cd   :  { %6354 = vmatpush.bf16.msrb.mxu0 %v10762_v8  ;;  %v10822_v8 = vor.u32 %v12567_v6, %v10819_v52  ;;  %v10430_v16 = vor.u32 %v12470_v0, %v10429_v63  ;;  %v10489_v6 = vld [vmem:[#allocation3 + $0x4ac] sm:$0xf]  ;;  %v10694_v52 = vor.u32 %v12536_v47, %v10693_v53  ;;  %v12452_v53 = vld [vmem:[#allocation3 + $0xb8] sm:$0xf0] }
 0x2ce   :  { %v10585_v55 = vld [vmem:[#allocation3 + $0x7ac] sm:$0xf] }
 0x2cf   :  { %6367 = vmatpush.bf16.msrb.mxu1 %v10858_v12  ;;  %6380 = vmatpush.bf16.msrb.mxu2 %v10954_v13  ;;  %v10918_v12 = vor.u32 %v12591_v54, %v10915_v58  ;;  %v10717_v13 = vld [vmem:[#allocation3 + $0xbcc] sm:$0xf]  ;;  %v12485_v54 = vld [vmem:[#allocation3 + $0x4d8] sm:$0xf0] }
 0x2d0   :  { %6393 = vmatpush.bf16.msrb.mxu3 %v11050_v18  ;;  %v10622_v18 = vor.u32 %v12518_v11, %v10621_v4  ;;  %v10718_v25 = vor.u32 %v12542_v14, %v10717_v13  ;;  %v10681_v58 = vld [vmem:[#allocation3 + $0xaac] sm:$0xf]  ;;  %v10490_v63 = vor.u32 %v12485_v54, %v10489_v6  ;;  %v12458_v4 = vld [vmem:[#allocation3 + $0x178] sm:$0xf0] }
 0x2d1   :  { %6355 = vmatpush.bf16.msrb.mxu0 %v10750_v56  ;;  %v10705_v56 = vld [vmem:[#allocation3 + $0xb6c] sm:$0xf]  ;;  %v12506_v14 = vld [vmem:[#allocation3 + $0x778] sm:$0xf0] }
 0x2d2   :  { %v10477_v11 = vld [vmem:[#allocation3 + $0x44c] sm:$0xf]  ;;  %v12500_v6 = vld [vmem:[#allocation3 + $0x6b8] sm:$0xf0] }
 0x2d3   :  { %6368 = vmatpush.bf16.msrb.mxu1 %v10846_v29  ;;  %6381 = vmatpush.bf16.msrb.mxu2 %v10942_v30  ;;  %v10418_v29 = vor.u32 %v12467_v23, %v10417_v19  ;;  %v10514_v30 = vor.u32 %v12491_v26, %v10513_v24  ;;  %v10573_v13 = vld [vmem:[#allocation3 + $0x74c] sm:$0xf]  ;;  %v12524_v54 = vld [vmem:[#allocation3 + $0x9b8] sm:$0xf0] }
 0x2d4   :  { %6394 = vmatpush.bf16.msrb.mxu3 %v11038_v35  ;;  %v10706_v35 = vor.u32 %v12539_v28, %v10705_v56  ;;  %v10574_v23 = vor.u32 %v12506_v14, %v10573_v13  ;;  %v10465_v26 = vld [vmem:[#allocation3 + $0x3ec] sm:$0xf]  ;;  %v12479_v28 = vld [vmem:[#allocation3 + $0x418] sm:$0xf0] }
 0x2d5   :  { %6356 = vmatpush.bf16.msrb.mxu0 %v10738_v49  ;;  %v10406_v49 = vor.u32 %v12464_v32, %v10405_v31  ;;  %v12527_v31 = vld [vmem:[#allocation3 + $0xa18] sm:$0xf0]  ;;  %v10466_v9 = vor.u32 %v12479_v28, %v10465_v26  ;;  %v10357_v34 = vld [vmem:[#allocation3 + $0x8c] sm:$0xf] }
 0x2d6   :  { %v10453_v47 = vld [vmem:[#allocation3 + $0x38c] sm:$0xf]  ;;  %v12590_v13 = vld [vmem:[#allocation3 + $0x11f8] sm:$0xf0] }
 0x2d7   :  { %6369 = vmatpush.bf16.msrb.mxu1 %v10834_v38  ;;  %6382 = vmatpush.bf16.msrb.mxu2 %v10930_v60  ;;  %v10393_v38 = vld [vmem:[#allocation3 + $0x1ac] sm:$0xf]  ;;  %v12461_v60 = vld [vmem:[#allocation3 + $0x1d8] sm:$0xf0] }
 0x2d8   :  { %6395 = vmatpush.bf16.msrb.mxu3 %v11026_v57  ;;  %v12509_v57 = vld [vmem:[#allocation3 + $0x7d8] sm:$0xf0]  ;;  %v10394_v61 = vor.u32 %v12461_v60, %v10393_v38  ;;  %v10549_v60 = vld [vmem:[#allocation3 + $0x68c] sm:$0xf] }
 0x2d9   :  { %6357 = vmatpush.bf16.msrb.mxu0 %v10726_v2  ;;  %v4868_v62 = vpop.f32.mrf.mxu0  ;;  %v10586_v0 = vor.u32 %v12509_v57, %v10585_v55  ;;  %v12476_v38 = vld [vmem:[#allocation3 + $0x3b8] sm:$0xf0]  ;;  %v10358_v55 = vor.u32 %v12452_v53, %v10357_v34  ;;  %v10345_v57 = vld [vmem:[#allocation3 + $0x2c] sm:$0xf] }
 0x2da   :  { %v4869_v1 = vadd.f32 %v4868_v62, %v13198_v27  ;;  %v10369_v27 = vld [vmem:[#allocation3 + $0xec] sm:$0xf]  ;;  %v12587_v28 = vld [vmem:[#allocation3 + $0x1198] sm:$0xf0] }
 0x2db   :  { %6370 = vmatpush.bf16.msrb.mxu1 %v10822_v8  ;;  %6383 = vmatpush.bf16.msrb.mxu2 %v10918_v12  ;;  %v4881_v2 = vpop.f32.mrf.mxu1  ;;  %v10682_v8 = vor.u32 %v12533_v59, %v10681_v58  ;;  %v12482_v12 = vld [vmem:[#allocation3 + $0x478] sm:$0xf0]  ;;  %v10454_v59 = vor.u32 %v12476_v38, %v10453_v47  ;;  %v10441_v62 = vld [vmem:[#allocation3 + $0x32c] sm:$0xf] }
 0x2dc   :  { %6396 = vmatpush.bf16.msrb.mxu3 %v11014_v15  ;;  %6358 = vmatmul.bf16.vlgmr.msrb.gmra.mxu0 %v13060_v42  ;;  %v4882_v15 = vadd.f32 %v4881_v2, %v4869_v1  ;;  %v10478_v19 = vor.u32 %v12482_v12, %v10477_v11  ;;  %v12449_v58 = vld [vmem:[#allocation3 + $0x58] sm:$0xf0]  ;;  %v10633_v1 = vld [vmem:[#allocation3 + $0x92c] sm:$0xf] }
 0x2dd   :  { %6402 = vmatpush.bf16.msra.mxu0 %v10430_v16  ;;  %v10669_v16 = vld [vmem:[#allocation3 + $0xa4c] sm:$0xf]  ;;  %v12521_v2 = vld [vmem:[#allocation3 + $0x958] sm:$0xf0]  ;;  %v10346_v12 = vor.u32 %v12449_v58, %v10345_v57 }
 0x2de   :  { %6384 = vmatmul.bf16.vlgmr.msrb.gmra.mxu2 %v13058_v39  ;;  %6371 = vmatmul.bf16.vlgmr.msrb.gmra.mxu1 %v13064_v45  ;;  %v12566_v11 = vld [vmem:[#allocation3 + $0xef8] sm:$0xf0]  ;;  %v11005_v14 = vld [vmem:[#allocation3 + $0x14cc] sm:$0xf] }
 0x2df   :  { %6415 = vmatpush.bf16.msra.mxu1 %v10526_v17  ;;  %6428 = vmatpush.bf16.msra.mxu2 %v10622_v18  ;;  %v12530_v17 = vld [vmem:[#allocation3 + $0xa78] sm:$0xf0]  ;;  %v10382_v18 = vor.u32 %v12458_v4, %v10381_v3  ;;  %v10813_v4 = vld [vmem:[#allocation3 + $0xecc] sm:$0xf] }
 0x2e0   :  { %6441 = vmatpush.bf16.msra.mxu3 %v10718_v25  ;;  %v12455_v25 = vld [vmem:[#allocation3 + $0x118] sm:$0xf0]  ;;  %v10670_v48 = vor.u32 %v12530_v17, %v10669_v16  ;;  %v10801_v26 = vld [vmem:[#allocation3 + $0xe6c] sm:$0xf] }
 0x2e1   :  { %6397 = vmatmul.bf16.vlgmr.msrb.gmra.mxu3 %v13062_v43  ;;  %6403 = vmatpush.bf16.msra.mxu0 %v10418_v29  ;;  %v4894_v24 = vpop.f32.mrf.mxu2  ;;  %v10561_v29 = vld [vmem:[#allocation3 + $0x6ec] sm:$0xf]  ;;  %v10370_v33 = vor.u32 %v12455_v25, %v10369_v27  ;;  %v12584_v47 = vld [vmem:[#allocation3 + $0x1138] sm:$0xf0] }
 0x2e2   :  { %v4895_v46 = vadd.f32 %v4894_v24, %v4882_v15  ;;  %v12614_v15 = vld [vmem:[#allocation3 + $0x14f8] sm:$0xf0]  ;;  %v10814_v24 = vor.u32 %v12566_v11, %v10813_v4  ;;  %v10885_v34 = vld [vmem:[#allocation3 + $0x110c] sm:$0xf] }
 0x2e3   :  { %6416 = vmatpush.bf16.msra.mxu1 %v10514_v30  ;;  %6429 = vmatpush.bf16.msra.mxu2 %v10610_v41  ;;  %v12503_v30 = vld [vmem:[#allocation3 + $0x718] sm:$0xf0]  ;;  %v10657_v41 = vld [vmem:[#allocation3 + $0x9ec] sm:$0xf]  ;;  %v11006_v25 = vor.u32 %v12614_v15, %v11005_v14 }
 0x2e4   :  { %6442 = vmatpush.bf16.msra.mxu3 %v10706_v35  ;;  %v4907_v56 = vpop.f32.mrf.mxu3  ;;  %v4870_v35 = vpop.f32.mrf.mxu0  ;;  %v10562_v44 = vor.u32 %v12503_v30, %v10561_v29  ;;  %v10993_v29 = vld [vmem:[#allocation3 + $0x146c] sm:$0xf]  ;;  %v12611_v30 = vld [vmem:[#allocation3 + $0x1498] sm:$0xf0] }
 0x2e5   :  { %6404 = vmatpush.bf16.msra.mxu0 %v10406_v49  ;;  %v4908_v32 = vadd.f32 %v4907_v56, %v4895_v46  ;;  %v4883_v49 = vpop.f32.mrf.mxu1  ;;  %v10897_v46 = vld [vmem:[#allocation3 + $0x116c] sm:$0xf]  ;;  %v10994_v35 = vor.u32 %v12611_v30, %v10993_v29  ;;  %v12557_v57 = vld [vmem:[#allocation3 + $0xdd8] sm:$0xf0] }
 0x2e6   :  { %v10981_v49 = vld [vmem:[#allocation3 + $0x140c] sm:$0xf]  ;;  %v12578_v4 = vld [vmem:[#allocation3 + $0x1078] sm:$0xf0] }
 0x2e7   :  { %6417 = vmatpush.bf16.msra.mxu1 %v10502_v50  ;;  %6430 = vmatpush.bf16.msra.mxu2 %v10598_v51  ;;  %v13208_v50 = vmax.f32 %v3318_v36, %v4908_v32  ;;  %v10658_v51 = vor.u32 %v12527_v31, %v10657_v41  ;;  %v12497_v36 = vld [vmem:[#allocation3 + $0x658] sm:$0xf0]  ;;  %v11089_v41 = vld [vmem:[#allocation3 + $0x176c] sm:$0xf] }
 0x2e8   :  { %6443 = vmatpush.bf16.msra.mxu3 %v10694_v52  ;;  %v10645_v52 = vld [vmem:[#allocation3 + $0x98c] sm:$0xf]  ;;  %v12635_v31 = vld [vmem:[#allocation3 + $0x1798] sm:$0xf0] }
 0x2e9   :  { %6405 = vmatpush.bf16.msra.mxu0 %v10394_v61  ;;  %v10550_v61 = vor.u32 %v12500_v6, %v10549_v60  ;;  %v4896_v37 = vpop.f32.mrf.mxu2  ;;  %v10646_v20 = vor.u32 %v12524_v54, %v10645_v52  ;;  %v11090_v53 = vor.u32 %v12635_v31, %v11089_v41  ;;  %v11077_v38 = vld [vmem:[#allocation3 + $0x170c] sm:$0xf]  ;;  %v12632_v60 = vld [vmem:[#allocation3 + $0x1738] sm:$0xf0]  ;;  %v10886_v52 = vor.u32 %v12584_v47, %v10885_v34 }
 0x2ea   :  { %v11078_v58 = vor.u32 %v12632_v60, %v11077_v38  ;;  %v10957_v11 = vld [vmem:[#allocation3 + $0x134c] sm:$0xf] }
 0x2eb   :  { %6418 = vmatpush.bf16.msra.mxu1 %v10490_v63  ;;  %6431 = vmatpush.bf16.msra.mxu2 %v10586_v0  ;;  %v12473_v63 = vld [vmem:[#allocation3 + $0x358] sm:$0xf0]  ;;  %v10537_v0 = vld [vmem:[#allocation3 + $0x62c] sm:$0xf] }
 0x2ec   :  { %6444 = vmatpush.bf16.msra.mxu3 %v10682_v8  ;;  %v4909_v3 = vpop.f32.mrf.mxu3  ;;  %v10909_v8 = vld [vmem:[#allocation3 + $0x11cc] sm:$0xf]  ;;  %v10442_v16 = vor.u32 %v12473_v63, %v10441_v62  ;;  %v10538_v17 = vor.u32 %v12497_v36, %v10537_v0  ;;  %v12605_v62 = vld [vmem:[#allocation3 + $0x13d8] sm:$0xf0] }
 0x2ed   :  { %6406 = vmatpush.bf16.msra.mxu0 %v10382_v18  ;;  %v11101_v18 = vld [vmem:[#allocation3 + $0x17cc] sm:$0xf]  ;;  %v10910_v27 = vor.u32 %v12590_v13, %v10909_v8  ;;  %v12554_v36 = vld [vmem:[#allocation3 + $0xd78] sm:$0xf0] }
 0x2ee   :  { %v11065_v63 = vld [vmem:[#allocation3 + $0x16ac] sm:$0xf]  ;;  %v12602_v8 = vld [vmem:[#allocation3 + $0x1378] sm:$0xf0] }
 0x2ef   :  { %6419 = vmatpush.bf16.msra.mxu1 %v10478_v19  ;;  %6432 = vmatpush.bf16.msra.mxu2 %v10574_v23  ;;  %v12638_v19 = vld [vmem:[#allocation3 + $0x17f8] sm:$0xf0]  ;;  %v10634_v23 = vor.u32 %v12521_v2, %v10633_v1  ;;  %v10861_v1 = vld [vmem:[#allocation3 + $0x104c] sm:$0xf] }
 0x2f0   :  { %6445 = vmatpush.bf16.msra.mxu3 %v10670_v48  ;;  %v12563_v48 = vld [vmem:[#allocation3 + $0xe98] sm:$0xf0]  ;;  %v11102_v56 = vor.u32 %v12638_v19, %v11101_v18  ;;  %v10862_v15 = vor.u32 %v12578_v4, %v10861_v1  ;;  %v10849_v19 = vld [vmem:[#allocation3 + $0xfec] sm:$0xf] }
 0x2f1   :  { %6407 = vmatpush.bf16.msra.mxu0 %v10370_v33  ;;  %v10802_v32 = vor.u32 %v12563_v48, %v10801_v26  ;;  %v10898_v33 = vor.u32 %v12587_v28, %v10897_v46  ;;  %v12626_v13 = vld [vmem:[#allocation3 + $0x1678] sm:$0xf0]  ;;  %v11041_v46 = vld [vmem:[#allocation3 + $0x15ec] sm:$0xf] }
 0x2f2   :  { %v12551_v18 = vld [vmem:[#allocation3 + $0xd18] sm:$0xf0]  ;;  %v10741_v31 = vld [vmem:[#allocation3 + $0xc8c] sm:$0xf] }
 0x2f3   :  { %6420 = vmatpush.bf16.msra.mxu1 %v10466_v9  ;;  %6433 = vmatpush.bf16.msra.mxu2 %v10562_v44  ;;  %v10789_v9 = vld [vmem:[#allocation3 + $0xe0c] sm:$0xf]  ;;  %v12560_v44 = vld [vmem:[#allocation3 + $0xe38] sm:$0xf0] }
 0x2f4   :  { %6446 = vmatpush.bf16.msra.mxu3 %v10658_v51  ;;  %v12608_v51 = vld [vmem:[#allocation3 + $0x1438] sm:$0xf0]  ;;  %v10790_v6 = vor.u32 %v12560_v44, %v10789_v9  ;;  %v10933_v34 = vld [vmem:[#allocation3 + $0x128c] sm:$0xf] }
 0x2f5   :  { %6408 = vmatpush.bf16.msra.mxu0 %v10358_v55  ;;  %v10982_v54 = vor.u32 %v12608_v51, %v10981_v49  ;;  %v10777_v55 = vld [vmem:[#allocation3 + $0xdac] sm:$0xf]  ;;  %v12599_v26 = vld [vmem:[#allocation3 + $0x1318] sm:$0xf0] }
 0x2f6   :  { %v12572_v44 = vld [vmem:[#allocation3 + $0xfb8] sm:$0xf0]  ;;  %v11029_v47 = vld [vmem:[#allocation3 + $0x158c] sm:$0xf] }
 0x2f7   :  { %6421 = vmatpush.bf16.msra.mxu1 %v10454_v59  ;;  %6434 = vmatpush.bf16.msra.mxu2 %v10550_v61  ;;  %v12581_v59 = vld [vmem:[#allocation3 + $0x10d8] sm:$0xf0]  ;;  %v10969_v61 = vld [vmem:[#allocation3 + $0x13ac] sm:$0xf] }
 0x2f8   :  { %6447 = vmatpush.bf16.msra.mxu3 %v10646_v20  ;;  %v10970_v37 = vor.u32 %v12605_v62, %v10969_v61  ;;  %v10765_v20 = vld [vmem:[#allocation3 + $0xd4c] sm:$0xf]  ;;  %v12620_v49 = vld [vmem:[#allocation3 + $0x15b8] sm:$0xf0] }
 0x2f9   :  { %6409 = vmatpush.bf16.msra.mxu0 %v10346_v12  ;;  %v13214_v0 = vpop.f32.mrf.mxu0  ;;  %v11053_v12 = vld [vmem:[#allocation3 + $0x164c] sm:$0xf]  ;;  %v10766_v14 = vor.u32 %v12554_v36, %v10765_v20  ;;  %v11163_v20 = vld [vmem:[#allocation7 + $0x1e0] sm:$0xf0] }
 0x2fa   :  { %v10729_v38 = vld [vmem:[#allocation3 + $0xc2c] sm:$0xf] }
 0x2fb   :  { %6422 = vmatpush.bf16.msra.mxu1 %v10442_v16  ;;  %6435 = vmatpush.bf16.msra.mxu2 %v10538_v17  ;;  %v13216_v2 = vpop.f32.mrf.mxu1  ;;  %v10958_v16 = vor.u32 %v12602_v8, %v10957_v11  ;;  %v10753_v17 = vld [vmem:[#allocation3 + $0xcec] sm:$0xf] }
 0x2fc   :  { %6448 = vmatpush.bf16.msra.mxu3 %v10634_v23  ;;  %6410 = vmatmul.bf16.vlgmr.msra.gmra.mxu0 %v13045_v21  ;;  %v12629_v21 = vld [vmem:[#allocation3 + $0x16d8] sm:$0xf0]  ;;  %v10754_v28 = vor.u32 %v12551_v18, %v10753_v17  ;;  %v11017_v61 = vld [vmem:[#allocation3 + $0x152c] sm:$0xf]  ;;  %v6217_v11 = vadd.f32 %v13216_v2, %v13214_v0  ;;  %v12649_v0 = vld [vmem:[#allocation7 + $0x144] sm:$0xf] }
 0x2fd   :  { %6454 = vmatpush.bf16.msrb.mxu0 %v10814_v24  ;;  %v11066_v3 = vor.u32 %v12629_v21, %v11065_v63  ;;  %v11054_v24 = vor.u32 %v12626_v13, %v11053_v12  ;;  %v12617_v63 = vld [vmem:[#allocation3 + $0x1558] sm:$0xf0]  ;;  %v11161_v21 = vld [vmem:[#allocation7 + $0x1c0] sm:$0xf]  ;;  %v11147_v2 = vld [vmem:[#allocation7 + $0x160] sm:$0xf0] }
 0x2fe   :  { %6436 = vmatmul.bf16.vlgmr.msra.gmra.mxu2 %v13037_v5  ;;  %6423 = vmatmul.bf16.vlgmr.msra.gmra.mxu1 %v13048_v22  ;;  %v10873_v5 = vld [vmem:[#allocation3 + $0x10ac] sm:$0xf]  ;;  %v11153_v12 = vld [vmem:[#allocation7 + $0x180] sm:$0xf] }
 0x2ff   :  { %6467 = vmatpush.bf16.msrb.mxu1 %v10910_v27  ;;  %6480 = vmatpush.bf16.msrb.mxu2 %v11006_v25  ;;  %v10874_v22 = vor.u32 %v12581_v59, %v10873_v5  ;;  %v12575_v27 = vld [vmem:[#allocation3 + $0x1018] sm:$0xf0]  ;;  %v10945_v25 = vld [vmem:[#allocation3 + $0x12ec] sm:$0xf]  ;;  %v11030_v5 = vor.u32 %v12620_v49, %v11029_v47  ;;  %v12652_v13 = vld [vmem:[#allocation7 + $0x19c] sm:$0xf0] }
 0x300   :  { %6493 = vmatpush.bf16.msrb.mxu3 %v11102_v56  ;;  %v12623_v56 = vld [vmem:[#allocation3 + $0x1618] sm:$0xf0]  ;;  %v10850_v30 = vor.u32 %v12575_v27, %v10849_v19  ;;  %v10946_v41 = vor.u32 %v12599_v26, %v10945_v25  ;;  %v11145_v19 = vld [vmem:[#allocation7 + $0x140] sm:$0xf]  ;;  %v11150_v26 = vor.u32 %v12649_v0, %v11147_v2  ;;  %v12669_v0 = vld [vmem:[#allocation7 + $0x3c4] sm:$0xf] }
 0x301   :  { %6449 = vmatmul.bf16.vlgmr.msra.gmra.mxu3 %v13042_v7  ;;  %6455 = vmatpush.bf16.msrb.mxu0 %v10802_v32  ;;  %v10778_v7 = vor.u32 %v12557_v57, %v10777_v55  ;;  %v13218_v23 = vpop.f32.mrf.mxu2  ;;  %v6205_v29 = vpop.f32.mrf.mxu0  ;;  %v12548_v32 = vld [vmem:[#allocation3 + $0xcb8] sm:$0xf0]  ;;  %v11042_v9 = vor.u32 %v12623_v56, %v11041_v46  ;;  %v12648_v46 = vld [vmem:[#allocation7 + $0x11c] sm:$0xf0]  ;;  %v11139_v56 = vld [vmem:[#allocation7 + $0x120] sm:$0xf0] }
 0x302   :  { %v10742_v51 = vor.u32 %v12548_v32, %v10741_v31  ;;  %v12569_v55 = vld [vmem:[#allocation3 + $0xf58] sm:$0xf0]  ;;  %v6230_v17 = vadd.f32 %v13218_v23, %v6217_v11  ;;  %v11137_v23 = vld [vmem:[#allocation7 + $0x100] sm:$0xf]  ;;  %v11227_v2 = vld [vmem:[#allocation7 + $0x3e0] sm:$0xf0] }
 0x303   :  { %6468 = vmatpush.bf16.msrb.mxu1 %v10898_v33  ;;  %6481 = vmatpush.bf16.msrb.mxu2 %v10994_v35  ;;  %v10837_v33 = vld [vmem:[#allocation3 + $0xf8c] sm:$0xf]  ;;  %v6218_v35 = vpop.f32.mrf.mxu1  ;;  %v12593_v59 = vld [vmem:[#allocation3 + $0x1258] sm:$0xf0]  ;;  %v12646_v32 = vld [vmem:[#allocation7 + $0xdc] sm:$0xf0] }
 0x304   :  { %6494 = vmatpush.bf16.msrb.mxu3 %v11090_v53  ;;  %v13220_v48 = vpop.f32.mrf.mxu3  ;;  %v12596_v53 = vld [vmem:[#allocation3 + $0x12b8] sm:$0xf0]  ;;  %v10838_v60 = vor.u32 %v12572_v44, %v10837_v33  ;;  %v12645_v35 = vld [vmem:[#allocation7 + $0xc4] sm:$0xf]  ;;  %v11121_v49 = vld [vmem:[#allocation7 + $0x80] sm:$0xf] }
 0x305   :  { %6456 = vmatpush.bf16.msrb.mxu0 %v10790_v6  ;;  %v10934_v6 = vor.u32 %v12596_v53, %v10933_v34  ;;  %v6243_v25 = vadd.f32 %v13220_v48, %v6230_v17  ;;  %v11131_v48 = vld [vmem:[#allocation7 + $0xe0] sm:$0xf0]  ;;  %v13230_v34 = vld [vmem:[#allocation5] sm:$0x7] }
 0x306   :  { %v11134_v53 = vor.u32 %v12645_v35, %v11131_v48 }
 0x307   :  { %6469 = vmatpush.bf16.msrb.mxu1 %v10886_v52  ;;  %6482 = vmatpush.bf16.msrb.mxu2 %v10982_v54  ;;  %v12545_v52 = vld [vmem:[#allocation3 + $0xc58] sm:$0xf0]  ;;  %v10825_v54 = vld [vmem:[#allocation3 + $0xf2c] sm:$0xf] }
 0x308   :  { %6495 = vmatpush.bf16.msrb.mxu3 %v11078_v58  ;;  %v10921_v58 = vld [vmem:[#allocation3 + $0x122c] sm:$0xf]  ;;  %v10826_v36 = vor.u32 %v12569_v55, %v10825_v54  ;;  %v11217_v54 = vld [vmem:[#allocation7 + $0x380] sm:$0xf] }
 0x309   :  { %6457 = vmatpush.bf16.msrb.mxu0 %v10778_v7  ;;  %v6231_v57 = vpop.f32.mrf.mxu2  ;;  %v12654_v7 = vld [vmem:[#allocation7 + $0x1dc] sm:$0xf0]  ;;  %v10922_v1 = vor.u32 %v12593_v59, %v10921_v58  ;;  %v6511_v58 = vperm.slane %v13230_v34, 0 }
 0x30a   :  { %v11162_v4 = vor.u32 %v12654_v7, %v11161_v21  ;;  %v12668_v55 = vld [vmem:[#allocation7 + $0x39c] sm:$0xf0] }
 0x30b   :  { %6470 = vmatpush.bf16.msrb.mxu1 %v10874_v22  ;;  %6483 = vmatpush.bf16.msrb.mxu2 %v10970_v37  ;;  %v10730_v22 = vor.u32 %v12545_v52, %v10729_v38  ;;  %v12653_v37 = vld [vmem:[#allocation7 + $0x1c4] sm:$0xf]  ;;  %v11218_v57 = vor.u32 %v12668_v55, %v11217_v54  ;;  %v11113_v7 = vld [vmem:[#allocation7 + $0x40] sm:$0xf] }
 0x30c   :  { %6496 = vmatpush.bf16.msrb.mxu3 %v11066_v3  ;;  %v6244_v62 = vpop.f32.mrf.mxu3  ;;  %v11018_v3 = vor.u32 %v12617_v63, %v11017_v61  ;;  %v11166_v8 = vor.u32 %v12653_v37, %v11163_v20  ;;  %v12643_v38 = vld [vmem:[#allocation7 + $0x84] sm:$0xf]  ;;  %v12666_v63 = vld [vmem:[#allocation7 + $0x35c] sm:$0xf0] }
 0x30d   :  { %6458 = vmatpush.bf16.msrb.mxu0 %v10766_v14  ;;  %v12651_v14 = vld [vmem:[#allocation7 + $0x184] sm:$0xf]  ;;  %v11209_v62 = vld [vmem:[#allocation7 + $0x340] sm:$0xf] }
 0x30e   :  { %v11123_v52 = vld [vmem:[#allocation7 + $0xa0] sm:$0xf0]  ;;  %v11210_v20 = vor.u32 %v12666_v63, %v11209_v62  ;;  %v11185_v63 = vld [vmem:[#allocation7 + $0x280] sm:$0xf] }
 0x30f   :  { %6471 = vmatpush.bf16.msrb.mxu1 %v10862_v15  ;;  %6484 = vmatpush.bf16.msrb.mxu2 %v10958_v16  ;;  %v11155_v15 = vld [vmem:[#allocation7 + $0x1a0] sm:$0xf0]  ;;  %v11154_v16 = vor.u32 %v12652_v13, %v11153_v12  ;;  %v11126_v21 = vor.u32 %v12643_v38, %v11123_v52  ;;  %v12664_v12 = vld [vmem:[#allocation7 + $0x31c] sm:$0xf0] }
 0x310   :  { %6497 = vmatpush.bf16.msrb.mxu3 %v11054_v24  ;;  %v11158_v18 = vor.u32 %v12651_v14, %v11155_v15  ;;  %v12650_v24 = vld [vmem:[#allocation7 + $0x15c] sm:$0xf0]  ;;  %v12661_v54 = vld [vmem:[#allocation7 + $0x2c4] sm:$0xf] }
 0x311   :  { %6459 = vmatpush.bf16.msrb.mxu0 %v10754_v28  ;;  %v11146_v27 = vor.u32 %v12650_v24, %v11145_v19  ;;  %v11138_v28 = vor.u32 %v12648_v46, %v11137_v23  ;;  %v11105_v14 = vld [vmem:[#allocation7] sm:$0xf]  ;;  %v11107_v19 = vld [vmem:[#allocation7 + $0x20] sm:$0xf0]  ;;  %v11230_v46 = vor.u32 %v12669_v0, %v11227_v2 }
 0x312   :  { %v12640_v15 = vld [vmem:[#allocation7 + $0x1c] sm:$0xf0] }
 0x313   :  { %6472 = vmatpush.bf16.msrb.mxu1 %v10850_v30  ;;  %6485 = vmatpush.bf16.msrb.mxu2 %v10946_v41  ;;  %v12670_v30 = vld [vmem:[#allocation7 + $0x3dc] sm:$0xf0] }
 0x314   :  { %6498 = vmatpush.bf16.msrb.mxu3 %v11042_v9  ;;  %v12662_v52 = vld [vmem:[#allocation7 + $0x2dc] sm:$0xf0] }
 0x315   :  { %6460 = vmatpush.bf16.msrb.mxu0 %v10742_v51  ;;  %v12644_v51 = vld [vmem:[#allocation7 + $0x9c] sm:$0xf0] }
 0x316   :  { %v11122_v59 = vor.u32 %v12644_v51, %v11121_v49  ;;  %v11169_v2 = vld [vmem:[#allocation7 + $0x200] sm:$0xf] }
 0x317   :  { %6473 = vmatpush.bf16.msrb.mxu1 %v10838_v60  ;;  %6486 = vmatpush.bf16.msrb.mxu2 %v10934_v6 }
 0x318   :  { %6499 = vmatpush.bf16.msrb.mxu3 %v11030_v5 }
 0x319   :  { %6461 = vmatpush.bf16.msrb.mxu0 %v10730_v22  ;;  %v6255_v29 = vpop.f32.mrf.mxu0  ;;  %v12642_v22 = vld [vmem:[#allocation7 + $0x5c] sm:$0xf0] }
 0x31a   :  { %v6256_v41 = vadd.f32 %v6255_v29, %v6243_v25  ;;  %v11114_v11 = vor.u32 %v12642_v22, %v11113_v7  ;;  %v12718_v25 = vld [vmem:[#allocation7 + $0x3e4] sm:$0xf0]  ;;  %v12659_v7 = vld [vmem:[#allocation7 + $0x284] sm:$0xf] }
 0x31b   :  { %6474 = vmatpush.bf16.msrb.mxu1 %v10826_v36  ;;  %6487 = vmatpush.bf16.msrb.mxu2 %v10922_v1  ;;  %v6268_v31 = vpop.f32.mrf.mxu1  ;;  %v12641_v1 = vld [vmem:[#allocation7 + $0x44] sm:$0xf] }
 0x31c   :  { %6500 = vmatpush.bf16.msrb.mxu3 %v11018_v3  ;;  %6462 = vmatmul.bf16.vlgmr.msrb.gmra.mxu0 %v13060_v42  ;;  %v12647_v42 = vld [vmem:[#allocation7 + $0x104] sm:$0xf]  ;;  %v6269_v9 = vadd.f32 %v6268_v31, %v6256_v41 }
 0x31d   :  { %6814 = vmatpush.bf16.msra.mxu0 %v11162_v4  ;;  %v11115_v3 = vld [vmem:[#allocation7 + $0x60] sm:$0xf0] }
 0x31e   :  { %6475 = vmatmul.bf16.vlgmr.msrb.gmra.mxu1 %v13064_v45  ;;  %6488 = vmatmul.bf16.vlgmr.msrb.gmra.mxu2 %v13058_v39  ;;  %v11225_v45 = vld [vmem:[#allocation7 + $0x3c0] sm:$0xf]  ;;  %v11142_v39 = vor.u32 %v12647_v42, %v11139_v56  ;;  %v11118_v13 = vor.u32 %v12641_v1, %v11115_v3  ;;  %v12667_v56 = vld [vmem:[#allocation7 + $0x384] sm:$0xf]  ;;  %v12708_v1 = vld [vmem:[#allocation7 + $0x2a4] sm:$0xf0] }
 0x31f   :  { %6501 = vmatmul.bf16.vlgmr.msrb.gmra.mxu3 %v13062_v43  ;;  %v11129_v43 = vld [vmem:[#allocation7 + $0xc0] sm:$0xf]  ;;  %v11226_v33 = vor.u32 %v12670_v30, %v11225_v45  ;;  %v11409_v45 = vld [vmem:[#allocation7 + $0x388] sm:$0xf]  ;;  %v12665_v31 = vld [vmem:[#allocation7 + $0x344] sm:$0xf] }
 0x320   :  { %6853 = vmatpush.bf16.msra.mxu3 %v11166_v8  ;;  %v11130_v44 = vor.u32 %v12646_v32, %v11129_v43  ;;  %v11201_v8 = vld [vmem:[#allocation7 + $0x300] sm:$0xf]  ;;  %v12716_v30 = vld [vmem:[#allocation7 + $0x3a4] sm:$0xf0]  ;;  %v11211_v43 = vld [vmem:[#allocation7 + $0x360] sm:$0xf0] }
 0x321   :  { %6815 = vmatpush.bf16.msra.mxu0 %v11154_v16  ;;  %6827 = vmatpush.bf16.msra.mxu1 %v11226_v33  ;;  %v6281_v47 = vpop.f32.mrf.mxu2  ;;  %v6257_v61 = vpop.f32.mrf.mxu0  ;;  %v12639_v16 = vld [vmem:[#allocation7 + $0x4] sm:$0xf]  ;;  %v11410_v41 = vor.u32 %v12716_v30, %v11409_v45  ;;  %v11401_v32 = vld [vmem:[#allocation7 + $0x348] sm:$0xf]  ;;  %v11214_v35 = vor.u32 %v12665_v31, %v11211_v43  ;;  %v11289_v45 = vld [vmem:[#allocation7 + $0x5c0] sm:$0xf] }
 0x322   :  { %v6282_v60 = vadd.f32 %v6281_v47, %v6269_v9  ;;  %v11110_v23 = vor.u32 %v12639_v16, %v11107_v19  ;;  %v12714_v33 = vld [vmem:[#allocation7 + $0x364] sm:$0xf0]  ;;  %v12663_v9 = vld [vmem:[#allocation7 + $0x304] sm:$0xf]  ;;  %v12686_v30 = vld [vmem:[#allocation7 + $0x5dc] sm:$0xf0] }
 0x323   :  { %v6270_v37 = vpop.f32.mrf.mxu1  ;;  %v11402_v48 = vor.u32 %v12714_v33, %v11401_v32  ;;  %v12712_v47 = vld [vmem:[#allocation7 + $0x324] sm:$0xf0]  ;;  %v11179_v16 = vld [vmem:[#allocation7 + $0x260] sm:$0xf0] }
 0x324   :  { %6854 = vmatpush.bf16.msra.mxu3 %v11158_v18  ;;  %v6294_v6 = vpop.f32.mrf.mxu3  ;;  %v11202_v18 = vor.u32 %v12664_v12, %v11201_v8  ;;  %v11177_v12 = vld [vmem:[#allocation7 + $0x240] sm:$0xf]  ;;  %v11291_v31 = vld [vmem:[#allocation7 + $0x5e0] sm:$0xf0]  ;;  %v11481_v43 = vld [vmem:[#allocation7 + $0x5c8] sm:$0xf] }
 0x325   :  { %6816 = vmatpush.bf16.msra.mxu0 %v11146_v27  ;;  %v6295_v5 = vadd.f32 %v6294_v6, %v6282_v60  ;;  %6828 = vmatpush.bf16.msra.mxu1 %v11218_v57  ;;  %v11417_v27 = vld [vmem:[#allocation7 + $0x3c8] sm:$0xf]  ;;  %v11193_v6 = vld [vmem:[#allocation7 + $0x2c0] sm:$0xf]  ;;  %v11195_v57 = vld [vmem:[#allocation7 + $0x2e0] sm:$0xf0] }
 0x326   :  { %v11418_v42 = vor.u32 %v12718_v25, %v11417_v27  ;;  %v11194_v55 = vor.u32 %v12662_v52, %v11193_v6  ;;  %v12655_v27 = vld [vmem:[#allocation7 + $0x204] sm:$0xf]  ;;  %v12734_v32 = vld [vmem:[#allocation7 + $0x5e4] sm:$0xf0] }
 0x327   :  { %v6506_v36 = vmax.f32 %v13176_v10, %v6295_v5  ;;  %v11385_v5 = vld [vmem:[#allocation7 + $0x2c8] sm:$0xf]  ;;  %v11283_v6 = vld [vmem:[#allocation7 + $0x5a0] sm:$0xf0] }
 0x328   :  { %6855 = vmatpush.bf16.msra.mxu3 %v11150_v26  ;;  %v11106_v26 = vor.u32 %v12640_v15, %v11105_v14  ;;  %v12657_v14 = vld [vmem:[#allocation7 + $0x244] sm:$0xf] }
 0x329   :  { %6817 = vmatpush.bf16.msra.mxu0 %v11138_v28  ;;  %v6517_v4 = vadd.f32 %v6511_v58, %v6506_v36  ;;  %v6283_v17 = vpop.f32.mrf.mxu2  ;;  %6829 = vmatpush.bf16.msra.mxu1 %v11210_v20  ;;  %v11219_v28 = vld [vmem:[#allocation7 + $0x3a0] sm:$0xf0]  ;;  %v12710_v58 = vld [vmem:[#allocation7 + $0x2e4] sm:$0xf0]  ;;  %v11182_v19 = vor.u32 %v12657_v14, %v11179_v16 }
 0x32a   :  { %v11386_v61 = vor.u32 %v12710_v58, %v11385_v5  ;;  %v11187_v20 = vld [vmem:[#allocation7 + $0x2a0] sm:$0xf0]  ;;  %v11377_v36 = vld [vmem:[#allocation7 + $0x288] sm:$0xf]  ;;  %v12731_v5 = vld [vmem:[#allocation7 + $0x58c] sm:$0xf] }
 0x32b   :  { %v6520_v10 = vmax.f32 %v6517_v4, 0.0  ;;  %v11190_v3 = vor.u32 %v12659_v7, %v11187_v20  ;;  %v11369_v17 = vld [vmem:[#allocation7 + $0x248] sm:$0xf]  ;;  %v12679_v14 = vld [vmem:[#allocation7 + $0x504] sm:$0xf] }
 0x32c   :  { %6856 = vmatpush.bf16.msra.mxu3 %v11142_v39  ;;  %v6296_v24 = vpop.f32.mrf.mxu3  ;;  %v11222_v39 = vor.u32 %v12667_v56, %v11219_v28  ;;  %v11465_v7 = vld [vmem:[#allocation7 + $0x548] sm:$0xf] }
 0x32d   :  { %6818 = vmatpush.bf16.msra.mxu0 %v11130_v44  ;;  %6830 = vmatpush.bf16.msra.mxu1 %v11202_v18  ;;  %v13234_v29 = vpack.c.bf16 %v6520_v10, %v6520_v10  ;;  %v11203_v44 = vld [vmem:[#allocation7 + $0x320] sm:$0xf0]  ;;  %v12706_v18 = vld [vmem:[#allocation7 + $0x264] sm:$0xf0]  ;;  %v12656_v10 = vld [vmem:[#allocation7 + $0x21c] sm:$0xf0] }
 0x32e   :  { %v11206_v49 = vor.u32 %v12663_v9, %v11203_v44  ;;  %v11370_v24 = vor.u32 %v12706_v18, %v11369_v17  ;;  %v11483_v9 = vld [vmem:[#allocation7 + $0x5e8] sm:$0xf0]  ;;  %v11281_v44 = vld [vmem:[#allocation7 + $0x580] sm:$0xf]  ;;  %v11457_v16 = vld [vmem:[#allocation7 + $0x508] sm:$0xf] }
 0x32f   :  { %v12728_v17 = vld [vmem:[#allocation7 + $0x524] sm:$0xf0]  ;;  %v12727_v18 = vld [vmem:[#allocation7 + $0x50c] sm:$0xf] }
 0x330   :  { %6857 = vmatpush.bf16.msra.mxu3 %v11134_v53  ;;  %v11393_v53 = vld [vmem:[#allocation7 + $0x308] sm:$0xf] }
 0x331   :  { %6819 = vmatpush.bf16.msra.mxu0 %v11122_v59  ;;  %v11394_v38 = vor.u32 %v12712_v47, %v11393_v53  ;;  %v11198_v59 = vor.u32 %v12661_v54, %v11195_v57  ;;  %6831 = vmatpush.bf16.msra.mxu1 %v11194_v55  ;;  %v11473_v55 = vld [vmem:[#allocation7 + $0x588] sm:$0xf] }
 0x332   :  { %v12732_v57 = vld [vmem:[#allocation7 + $0x5a4] sm:$0xf0] }
 0x333   :  { %v11474_v58 = vor.u32 %v12732_v57, %v11473_v55  ;;  %v6512_v55 = vperm.slane %v13230_v34, 1 }
 0x334   :  { %6858 = vmatpush.bf16.msra.mxu3 %v11126_v21  ;;  %v12660_v21 = vld [vmem:[#allocation7 + $0x29c] sm:$0xf0] }
 0x335   :  { %6820 = vmatpush.bf16.msra.mxu0 %v11114_v11  ;;  %v11186_v37 = vor.u32 %v12660_v21, %v11185_v63  ;;  %v11378_v11 = vor.u32 %v12708_v1, %v11377_v36  ;;  %v12682_v63 = vld [vmem:[#allocation7 + $0x55c] sm:$0xf0]  ;;  %v11275_v21 = vld [vmem:[#allocation7 + $0x560] sm:$0xf0]  ;;  %v12730_v36 = vld [vmem:[#allocation7 + $0x564] sm:$0xf0] }
 0x336   :  { %v12729_v1 = vld [vmem:[#allocation7 + $0x54c] sm:$0xf] }
 0x337   :  { %6832 = vmatpush.bf16.msra.mxu1 %v11186_v37 }
 0x338   :  { %6859 = vmatpush.bf16.msra.mxu3 %v11118_v13  ;;  %v12658_v13 = vld [vmem:[#allocation7 + $0x25c] sm:$0xf0] }
 0x339   :  { %6821 = vmatpush.bf16.msra.mxu0 %v11106_v26  ;;  %v13238_v51 = vpop.f32.mrf.mxu0  ;;  %v11178_v15 = vor.u32 %v12658_v13, %v11177_v12  ;;  %v11170_v26 = vor.u32 %v12656_v10, %v11169_v2  ;;  %v11466_v12 = vor.u32 %v12730_v36, %v11465_v7  ;;  %v11257_v2 = vld [vmem:[#allocation7 + $0x4c0] sm:$0xf]  ;;  %v11435_v36 = vld [vmem:[#allocation7 + $0x468] sm:$0xf0] }
 0x33a   :  { %v12678_v10 = vld [vmem:[#allocation7 + $0x4dc] sm:$0xf0] }
 0x33b   :  { %v13240_v60 = vpop.f32.mrf.mxu1  ;;  %6833 = vmatpush.bf16.msra.mxu1 %v11178_v15  ;;  %v11267_v15 = vld [vmem:[#allocation7 + $0x520] sm:$0xf0] }
 0x33c   :  { %6860 = vmatpush.bf16.msra.mxu3 %v11110_v23  ;;  %6822 = vmatmul.bf16.vlgmr.msra.gmra.mxu0 %v13234_v29  ;;  %v11171_v23 = vld [vmem:[#allocation7 + $0x220] sm:$0xf0]  ;;  %v6321_v53 = vadd.f32 %v13240_v60, %v13238_v51 }
 0x33d   :  { %6866 = vmatpush.bf16.msrb.mxu0 %v11230_v46  ;;  %v11361_v46 = vld [vmem:[#allocation7 + $0x208] sm:$0xf]  ;;  %v11174_v56 = vor.u32 %v12655_v27, %v11171_v23  ;;  %v12681_v60 = vld [vmem:[#allocation7 + $0x544] sm:$0xf]  ;;  %v11458_v27 = vor.u32 %v12728_v17, %v11457_v16 }
 0x33e   :  { %v11259_v23 = vld [vmem:[#allocation7 + $0x4e0] sm:$0xf0]  ;;  %v11425_v17 = vld [vmem:[#allocation7 + $0x408] sm:$0xf] }
 0x33f   :  { %6861 = vmatmul.bf16.vlgmr.msra.gmra.mxu3 %v13234_v29  ;;  %6834 = vmatpush.bf16.msra.mxu1 %v11170_v26  ;;  %v12677_v26 = vld [vmem:[#allocation7 + $0x4c4] sm:$0xf] }
 0x340   :  { %7193 = vmatpush.bf16.msrb.mxu3 %v11418_v42  ;;  %v12704_v42 = vld [vmem:[#allocation7 + $0x224] sm:$0xf0]  ;;  %v11235_v16 = vld [vmem:[#allocation7 + $0x420] sm:$0xf0] }
 0x341   :  { %6867 = vmatpush.bf16.msrb.mxu0 %v11222_v39  ;;  %v13242_v62 = vpop.f32.mrf.mxu2  ;;  %v6309_v4 = vpop.f32.mrf.mxu0  ;;  %v11362_v28 = vor.u32 %v12704_v42, %v11361_v46  ;;  %v12685_v39 = vld [vmem:[#allocation7 + $0x5c4] sm:$0xf]  ;;  %v11449_v46 = vld [vmem:[#allocation7 + $0x4c8] sm:$0xf] }
 0x342   :  { %v11294_v33 = vor.u32 %v12685_v39, %v11291_v31  ;;  %v6334_v37 = vadd.f32 %v13242_v62, %v6321_v53  ;;  %v11278_v4 = vor.u32 %v12681_v60, %v11275_v21  ;;  %v11249_v31 = vld [vmem:[#allocation7 + $0x480] sm:$0xf]  ;;  %v12724_v53 = vld [vmem:[#allocation7 + $0x4a4] sm:$0xf0] }
 0x343   :  { %v6322_v8 = vpop.f32.mrf.mxu1  ;;  %v11433_v60 = vld [vmem:[#allocation7 + $0x448] sm:$0xf] }
 0x344   :  { %7194 = vmatpush.bf16.msrb.mxu3 %v11410_v41  ;;  %v13244_v22 = vpop.f32.mrf.mxu3  ;;  %v11290_v41 = vor.u32 %v12686_v30, %v11289_v45  ;;  %6879 = vmatpush.bf16.msrb.mxu1 %v11294_v33  ;;  %v12680_v8 = vld [vmem:[#allocation7 + $0x51c] sm:$0xf0]  ;;  %v11451_v45 = vld [vmem:[#allocation7 + $0x4e8] sm:$0xf0] }
 0x345   :  { %6868 = vmatpush.bf16.msrb.mxu0 %v11214_v35  ;;  %v11482_v35 = vor.u32 %v12734_v32, %v11481_v43  ;;  %v6347_v62 = vadd.f32 %v13244_v22, %v6334_v37  ;;  %v11258_v22 = vor.u32 %v12678_v10, %v11257_v2  ;;  %v12676_v43 = vld [vmem:[#allocation7 + $0x49c] sm:$0xf0]  ;;  %v12722_v37 = vld [vmem:[#allocation7 + $0x464] sm:$0xf0] }
 0x346   :  { %6840 = vmatpush.bf16.msra.mxu2 %v11290_v41  ;;  %v11262_v41 = vor.u32 %v12677_v26, %v11259_v23  ;;  %v11353_v10 = vld [vmem:[#allocation7 + $0x1c8] sm:$0xf]  ;;  %v11355_v23 = vld [vmem:[#allocation7 + $0x1e8] sm:$0xf0] }
 0x348   :  { %7195 = vmatpush.bf16.msrb.mxu3 %v11402_v48  ;;  %v12733_v48 = vld [vmem:[#allocation7 + $0x5cc] sm:$0xf] }
 0x349   :  { %6869 = vmatpush.bf16.msrb.mxu0 %v11206_v49  ;;  %v6335_v0 = vpop.f32.mrf.mxu2  ;;  %v11486_v47 = vor.u32 %v12733_v48, %v11483_v9  ;;  %v12684_v49 = vld [vmem:[#allocation7 + $0x59c] sm:$0xf0]  ;;  %v12675_v48 = vld [vmem:[#allocation7 + $0x484] sm:$0xf] }
 0x34a   :  { %v11282_v52 = vor.u32 %v12684_v49, %v11281_v44  ;;  %v11270_v0 = vor.u32 %v12679_v14, %v11267_v15  ;;  %v11251_v9 = vld [vmem:[#allocation7 + $0x4a0] sm:$0xf0]  ;;  %v11441_v44 = vld [vmem:[#allocation7 + $0x488] sm:$0xf]  ;;  %v11443_v49 = vld [vmem:[#allocation7 + $0x4a8] sm:$0xf0] }
 0x34b   :  { %v11254_v57 = vor.u32 %v12675_v48, %v11251_v9  ;;  %v12671_v15 = vld [vmem:[#allocation7 + $0x404] sm:$0xf]  ;;  %v12699_v48 = vld [vmem:[#allocation7 + $0x18c] sm:$0xf] }
 0x34c   :  { %7196 = vmatpush.bf16.msrb.mxu3 %v11394_v38  ;;  %v6348_v25 = vpop.f32.mrf.mxu3  ;;  %v12683_v38 = vld [vmem:[#allocation7 + $0x584] sm:$0xf]  ;;  %6841 = vmatpush.bf16.msra.mxu2 %v11282_v52  ;;  %v11347_v9 = vld [vmem:[#allocation7 + $0x1a8] sm:$0xf0] }
 0x34d   :  { %6870 = vmatpush.bf16.msrb.mxu0 %v11198_v59  ;;  %v11286_v54 = vor.u32 %v12683_v38, %v11283_v6  ;;  %v11475_v59 = vld [vmem:[#allocation7 + $0x5a8] sm:$0xf0]  ;;  %v11250_v6 = vor.u32 %v12676_v43, %v11249_v31  ;;  %v11345_v43 = vld [vmem:[#allocation7 + $0x188] sm:$0xf] }
 0x34e   :  { %v11478_v51 = vor.u32 %v12731_v5, %v11475_v59  ;;  %v11241_v5 = vld [vmem:[#allocation7 + $0x440] sm:$0xf]  ;;  %v11442_v59 = vor.u32 %v12724_v53, %v11441_v44  ;;  %v11537_v44 = vld [vmem:[#allocation7 + $0x190] sm:$0xf] }
 0x34f   :  { %6880 = vmatpush.bf16.msrb.mxu1 %v11286_v54  ;;  %v12748_v53 = vld [vmem:[#allocation7 + $0x1ac] sm:$0xf0] }
 0x350   :  { %7197 = vmatpush.bf16.msrb.mxu3 %v11386_v61  ;;  %v11273_v61 = vld [vmem:[#allocation7 + $0x540] sm:$0xf] }
 0x351   :  { %6871 = vmatpush.bf16.msrb.mxu0 %v11190_v3  ;;  %v11274_v20 = vor.u32 %v12682_v63, %v11273_v61  ;;  %v11467_v3 = vld [vmem:[#allocation7 + $0x568] sm:$0xf0]  ;;  %v12673_v63 = vld [vmem:[#allocation7 + $0x444] sm:$0xf] }
 0x352   :  { %v11470_v13 = vor.u32 %v12729_v1, %v11467_v3 }
 0x353   :  { %6842 = vmatpush.bf16.msra.mxu2 %v11274_v20  ;;  %6881 = vmatpush.bf16.msrb.mxu1 %v11278_v4  ;;  %v12721_v20 = vld [vmem:[#allocation7 + $0x44c] sm:$0xf] }
 0x354   :  { %7198 = vmatpush.bf16.msrb.mxu3 %v11378_v11  ;;  %v11265_v11 = vld [vmem:[#allocation7 + $0x500] sm:$0xf]  ;;  %v11438_v14 = vor.u32 %v12721_v20, %v11435_v36  ;;  %v11329_v20 = vld [vmem:[#allocation7 + $0x108] sm:$0xf] }
 0x355   :  { %6872 = vmatpush.bf16.msrb.mxu0 %v11182_v19  ;;  %v11459_v19 = vld [vmem:[#allocation7 + $0x528] sm:$0xf0]  ;;  %v12696_v36 = vld [vmem:[#allocation7 + $0x124] sm:$0xf0] }
 0x356   :  { %v11462_v25 = vor.u32 %v12727_v18, %v11459_v19  ;;  %v12720_v19 = vld [vmem:[#allocation7 + $0x424] sm:$0xf0] }
 0x357   :  { %6882 = vmatpush.bf16.msrb.mxu1 %v11270_v0 }
 0x358   :  { %7199 = vmatpush.bf16.msrb.mxu3 %v11370_v24  ;;  %v11266_v24 = vor.u32 %v12680_v8, %v11265_v11  ;;  %v11233_v8 = vld [vmem:[#allocation7 + $0x400] sm:$0xf] }
 0x359   :  { %6873 = vmatpush.bf16.msrb.mxu0 %v11174_v56  ;;  %v6359_v42 = vpop.f32.mrf.mxu0  ;;  %v12726_v56 = vld [vmem:[#allocation7 + $0x4e4] sm:$0xf0] }
 0x35a   :  { %v6360_v30 = vadd.f32 %v6359_v42, %v6347_v62  ;;  %6843 = vmatpush.bf16.msra.mxu2 %v11266_v24  ;;  %v11450_v33 = vor.u32 %v12726_v56, %v11449_v46  ;;  %v12719_v62 = vld [vmem:[#allocation7 + $0x40c] sm:$0xf]  ;;  %v11545_v46 = vld [vmem:[#allocation7 + $0x1d0] sm:$0xf]  ;;  %v11238_v42 = vor.u32 %v12671_v15, %v11235_v16 }
 0x35b   :  { %v6372_v39 = vpop.f32.mrf.mxu1  ;;  %6883 = vmatpush.bf16.msrb.mxu1 %v11262_v41  ;;  %v11427_v24 = vld [vmem:[#allocation7 + $0x428] sm:$0xf0]  ;;  %v12750_v56 = vld [vmem:[#allocation7 + $0x1ec] sm:$0xf0] }
 0x35c   :  { %7200 = vmatpush.bf16.msrb.mxu3 %v11362_v28  ;;  %v12725_v28 = vld [vmem:[#allocation7 + $0x4cc] sm:$0xf]  ;;  %v6373_v32 = vadd.f32 %v6372_v39, %v6360_v30  ;;  %v11426_v39 = vor.u32 %v12720_v19, %v11425_v17  ;;  %v11321_v19 = vld [vmem:[#allocation7 + $0xc8] sm:$0xf] }
 0x35d   :  { %7206 = vmatpush.bf16.msra.mxu0 %v11482_v35  ;;  %v11454_v35 = vor.u32 %v12725_v28, %v11451_v45  ;;  %v12749_v28 = vld [vmem:[#allocation7 + $0x1d4] sm:$0xf] }
 0x35e   :  { %6844 = vmatpush.bf16.msra.mxu2 %v11258_v22  ;;  %v11547_v45 = vld [vmem:[#allocation7 + $0x1f0] sm:$0xf0]  ;;  %v11430_v22 = vor.u32 %v12719_v62, %v11427_v24  ;;  %v12694_v62 = vld [vmem:[#allocation7 + $0xe4] sm:$0xf0]  ;;  %v12693_v24 = vld [vmem:[#allocation7 + $0xcc] sm:$0xf] }
 0x35f   :  { %6884 = vmatpush.bf16.msrb.mxu1 %v11254_v57 }
 0x360   :  { %7245 = vmatpush.bf16.msra.mxu3 %v11486_v47  ;;  %v12723_v47 = vld [vmem:[#allocation7 + $0x48c] sm:$0xf] }
 0x361   :  { %7207 = vmatpush.bf16.msra.mxu0 %v11474_v58  ;;  %v6385_v38 = vpop.f32.mrf.mxu2  ;;  %v12674_v58 = vld [vmem:[#allocation7 + $0x45c] sm:$0xf0]  ;;  %v11446_v61 = vor.u32 %v12723_v47, %v11443_v49  ;;  %v6361_v7 = vpop.f32.mrf.mxu0  ;;  %v12747_v47 = vld [vmem:[#allocation7 + $0x194] sm:$0xf] }
 0x362   :  { %v6386_v52 = vadd.f32 %v6385_v38, %v6373_v32  ;;  %6845 = vmatpush.bf16.msra.mxu2 %v11250_v6  ;;  %v11242_v3 = vor.u32 %v12674_v58, %v11241_v5  ;;  %v12700_v32 = vld [vmem:[#allocation7 + $0x1a4] sm:$0xf0]  ;;  %v11539_v49 = vld [vmem:[#allocation7 + $0x1b0] sm:$0xf0]  ;;  %v11350_v6 = vor.u32 %v12699_v48, %v11347_v9  ;;  %v12697_v5 = vld [vmem:[#allocation7 + $0x14c] sm:$0xf] }
 0x363   :  { %v6374_v1 = vpop.f32.mrf.mxu1  ;;  %v11346_v38 = vor.u32 %v12700_v32, %v11345_v43  ;;  %v11542_v57 = vor.u32 %v12747_v47, %v11539_v49  ;;  %v11339_v58 = vld [vmem:[#allocation7 + $0x168] sm:$0xf0]  ;;  %v11305_v47 = vld [vmem:[#allocation7 + $0x48] sm:$0xf] }
 0x364   :  { %7246 = vmatpush.bf16.msra.mxu3 %v11478_v51  ;;  %v6398_v54 = vpop.f32.mrf.mxu3  ;;  %v11243_v51 = vld [vmem:[#allocation7 + $0x460] sm:$0xf0]  ;;  %v12695_v1 = vld [vmem:[#allocation7 + $0x10c] sm:$0xf]  ;;  %v12690_v49 = vld [vmem:[#allocation7 + $0x64] sm:$0xf0] }
 0x365   :  { %7208 = vmatpush.bf16.msra.mxu0 %v11466_v12  ;;  %v6399_v21 = vadd.f32 %v6398_v54, %v6386_v52  ;;  %v11246_v11 = vor.u32 %v12673_v63, %v11243_v51  ;;  %v12672_v12 = vld [vmem:[#allocation7 + $0x41c] sm:$0xf0]  ;;  %v11337_v52 = vld [vmem:[#allocation7 + $0x148] sm:$0xf]  ;;  %v12745_v63 = vld [vmem:[#allocation7 + $0x154] sm:$0xf] }
 0x366   :  { %6846 = vmatpush.bf16.msra.mxu2 %v11242_v3  ;;  %v11234_v2 = vor.u32 %v12672_v12, %v11233_v8  ;;  %v12698_v54 = vld [vmem:[#allocation7 + $0x164] sm:$0xf0]  ;;  %v11531_v51 = vld [vmem:[#allocation7 + $0x170] sm:$0xf0]  ;;  %v11331_v3 = vld [vmem:[#allocation7 + $0x128] sm:$0xf0]  ;;  %v11330_v8 = vor.u32 %v12696_v36, %v11329_v20 }
 0x367   :  { %v6507_v4 = vmax.f32 %v13192_v40, %v6399_v21  ;;  %v12702_v40 = vld [vmem:[#allocation7 + $0x1e4] sm:$0xf0]  ;;  %6885 = vmatpush.bf16.msrb.mxu1 %v11246_v11  ;;  %v11342_v21 = vor.u32 %v12697_v5, %v11339_v58  ;;  %v12744_v11 = vld [vmem:[#allocation7 + $0x12c] sm:$0xf0]  ;;  %v11334_v12 = vor.u32 %v12695_v1, %v11331_v3  ;;  %v12737_v5 = vld [vmem:[#allocation7 + $0x54] sm:$0xf] }
 0x368   :  { %7247 = vmatpush.bf16.msra.mxu3 %v11470_v13  ;;  %v11434_v13 = vor.u32 %v12722_v37, %v11433_v60  ;;  %v11354_v41 = vor.u32 %v12702_v40, %v11353_v10  ;;  %v11338_v60 = vor.u32 %v12698_v54, %v11337_v52  ;;  %v11534_v37 = vor.u32 %v12745_v63, %v11531_v51  ;;  %v12742_v10 = vld [vmem:[#allocation7 + $0xec] sm:$0xf0]  ;;  %v11499_v58 = vld [vmem:[#allocation7 + $0x70] sm:$0xf0]  ;;  %v11297_v51 = vld [vmem:[#allocation7 + $0x8] sm:$0xf] }
 0x369   :  { %7209 = vmatpush.bf16.msra.mxu0 %v11458_v27  ;;  %v6518_v18 = vadd.f32 %v6512_v55, %v6507_v4  ;;  %v6387_v0 = vpop.f32.mrf.mxu2  ;;  %v12701_v27 = vld [vmem:[#allocation7 + $0x1cc] sm:$0xf]  ;;  %v11538_v55 = vor.u32 %v12748_v53, %v11537_v44  ;;  %v11521_v4 = vld [vmem:[#allocation7 + $0x110] sm:$0xf]  ;;  %v11322_v40 = vor.u32 %v12694_v62, %v11321_v19 }
 0x36a   :  { %6847 = vmatpush.bf16.msra.mxu2 %v11234_v2  ;;  %v11358_v31 = vor.u32 %v12701_v27, %v11355_v23  ;;  %v11522_v16 = vor.u32 %v12744_v11, %v11521_v4  ;;  %v11323_v0 = vld [vmem:[#allocation7 + $0xe8] sm:$0xf0]  ;;  %v11513_v2 = vld [vmem:[#allocation7 + $0xd0] sm:$0xf]  ;;  %v12735_v4 = vld [vmem:[#allocation7 + $0x14] sm:$0xf] }
 0x36b   :  { %6886 = vmatpush.bf16.msrb.mxu1 %v11238_v42  ;;  %v11326_v27 = vor.u32 %v12693_v24, %v11323_v0  ;;  %v11514_v23 = vor.u32 %v12742_v10, %v11513_v2  ;;  %v11497_v52 = vld [vmem:[#allocation7 + $0x50] sm:$0xf]  ;;  %v11491_v11 = vld [vmem:[#allocation7 + $0x30] sm:$0xf0] }
 0x36c   :  { %7248 = vmatpush.bf16.msra.mxu3 %v11462_v25  ;;  %v6521_v25 = vmax.f32 %v6518_v18, 0.0  ;;  %v6400_v26 = vpop.f32.mrf.mxu3  ;;  %v12738_v54 = vld [vmem:[#allocation7 + $0x6c] sm:$0xf0] }
 0x36d   :  { %7210 = vmatpush.bf16.msra.mxu0 %v11450_v33  ;;  %v11546_v33 = vor.u32 %v12750_v56, %v11545_v46  ;;  %v11515_v26 = vld [vmem:[#allocation7 + $0xf0] sm:$0xf0]  ;;  %v11313_v56 = vld [vmem:[#allocation7 + $0x88] sm:$0xf]  ;;  %v11489_v20 = vld [vmem:[#allocation7 + $0x10] sm:$0xf] }
 0x36e   :  { %v13252_v30 = vpack.c.bf16 %v6521_v25, %v6521_v25  ;;  %7180 = vmatpush.bf16.msrb.mxu2 %v11354_v41  ;;  %v12741_v25 = vld [vmem:[#allocation7 + $0xd4] sm:$0xf]  ;;  %v11505_v41 = vld [vmem:[#allocation7 + $0x90] sm:$0xf] }
 0x36f   :  { %v11518_v46 = vor.u32 %v12741_v25, %v11515_v26  ;;  %v12736_v36 = vld [vmem:[#allocation7 + $0x2c] sm:$0xf0]  ;;  %v6513_v26 = vperm.slane %v13230_v34, 2  ;;  %v11411_v34 = vld [vmem:[#allocation7 + $0x3a8] sm:$0xf0] }
 0x370   :  { %7249 = vmatpush.bf16.msra.mxu3 %v11454_v35  ;;  %6835 = vmatmul.bf16.vlgmr.msra.gmra.mxu1 %v13252_v30  ;;  %v11550_v35 = vor.u32 %v12749_v28, %v11547_v45  ;;  %v12692_v28 = vld [vmem:[#allocation7 + $0xa4] sm:$0xf0]  ;;  %v12691_v45 = vld [vmem:[#allocation7 + $0x8c] sm:$0xf] }
 0x371   :  { %7211 = vmatpush.bf16.msra.mxu0 %v11442_v59  ;;  %7201 = vmatmul.bf16.vlgmr.msrb.gmra.mxu3 %v13252_v30  ;;  %v11529_v59 = vld [vmem:[#allocation7 + $0x150] sm:$0xf]  ;;  %v11314_v43 = vor.u32 %v12692_v28, %v11313_v56 }
 0x372   :  { %6874 = vmatmul.bf16.vlgmr.msrb.gmra.mxu0 %v13252_v30  ;;  %7219 = vmatpush.bf16.msra.mxu1 %v11358_v31  ;;  %v12740_v31 = vld [vmem:[#allocation7 + $0xac] sm:$0xf0] }
 0x373   :  { %7181 = vmatpush.bf16.msrb.mxu2 %v11346_v38  ;;  %v11506_v9 = vor.u32 %v12740_v31, %v11505_v41  ;;  %v12689_v38 = vld [vmem:[#allocation7 + $0x4c] sm:$0xf]  ;;  %v11609_v56 = vld [vmem:[#allocation7 + $0x3d0] sm:$0xf]  ;;  %v11801_v31 = vld [vmem:[#allocation7 + $0x3d8] sm:$0xf] }
 0x374   :  { %7250 = vmatpush.bf16.msra.mxu3 %v11446_v61  ;;  %v12746_v61 = vld [vmem:[#allocation7 + $0x16c] sm:$0xf0] }
 0x375   :  { %7212 = vmatpush.bf16.msra.mxu0 %v11434_v13  ;;  %v11530_v7 = vor.u32 %v12746_v61, %v11529_v59  ;;  %v12743_v13 = vld [vmem:[#allocation7 + $0x114] sm:$0xf]  ;;  %v11498_v59 = vor.u32 %v12738_v54, %v11497_v52  ;;  %v11502_v61 = vor.u32 %v12737_v5, %v11499_v58  ;;  %v12766_v28 = vld [vmem:[#allocation7 + $0x3ec] sm:$0xf0] }
 0x376   :  { %7220 = vmatpush.bf16.msra.mxu1 %v11350_v6  ;;  %v11307_v6 = vld [vmem:[#allocation7 + $0x68] sm:$0xf0] }
 0x377   :  { %7182 = vmatpush.bf16.msrb.mxu2 %v11338_v60  ;;  %v12688_v60 = vld [vmem:[#allocation7 + $0x24] sm:$0xf0] }
 0x378   :  { %7251 = vmatpush.bf16.msra.mxu3 %v11438_v14  ;;  %v11523_v14 = vld [vmem:[#allocation7 + $0x130] sm:$0xf0]  ;;  %v11298_v1 = vor.u32 %v12688_v60, %v11297_v51  ;;  %v11785_v60 = vld [vmem:[#allocation7 + $0x358] sm:$0xf] }
 0x379   :  { %7213 = vmatpush.bf16.msra.mxu0 %v11426_v39  ;;  %v13257_v15 = vpop.f32.mrf.mxu0  ;;  %v11526_v17 = vor.u32 %v12743_v13, %v11523_v14  ;;  %v11595_v51 = vld [vmem:[#allocation7 + $0x370] sm:$0xf0] }
 0x37a   :  { %7221 = vmatpush.bf16.msra.mxu1 %v11342_v21  ;;  %v12687_v21 = vld [vmem:[#allocation7 + $0xc] sm:$0xf] }
 0x37b   :  { %v13259_v18 = vpop.f32.mrf.mxu1  ;;  %7183 = vmatpush.bf16.msrb.mxu2 %v11330_v8  ;;  %v11490_v8 = vor.u32 %v12736_v36, %v11489_v20  ;;  %v12711_v20 = vld [vmem:[#allocation7 + $0x30c] sm:$0xf] }
 0x37c   :  { %7252 = vmatpush.bf16.msra.mxu3 %v11430_v22  ;;  %v11315_v22 = vld [vmem:[#allocation7 + $0xa8] sm:$0xf0]  ;;  %v6425_v13 = vadd.f32 %v13259_v18, %v13257_v15 }
 0x37d   :  { %7548 = vmatpush.bf16.msrb.mxu0 %v11546_v33  ;;  %v11318_v32 = vor.u32 %v12691_v45, %v11315_v22  ;;  %v12739_v33 = vld [vmem:[#allocation7 + $0x94] sm:$0xf]  ;;  %v12717_v15 = vld [vmem:[#allocation7 + $0x3cc] sm:$0xf] }
 0x37e   :  { %7222 = vmatpush.bf16.msra.mxu1 %v11334_v12  ;;  %v11494_v12 = vor.u32 %v12735_v4, %v11491_v11  ;;  %v11419_v18 = vld [vmem:[#allocation7 + $0x3e8] sm:$0xf0]  ;;  %v12765_v45 = vld [vmem:[#allocation7 + $0x3d4] sm:$0xf]  ;;  %v11585_v4 = vld [vmem:[#allocation7 + $0x310] sm:$0xf] }
 0x37f   :  { %7184 = vmatpush.bf16.msrb.mxu2 %v11322_v40  ;;  %v11395_v36 = vld [vmem:[#allocation7 + $0x328] sm:$0xf0]  ;;  %v12760_v11 = vld [vmem:[#allocation7 + $0x32c] sm:$0xf0] }
 0x380   :  { %7587 = vmatpush.bf16.msrb.mxu3 %v11550_v35  ;;  %v11507_v35 = vld [vmem:[#allocation7 + $0xb0] sm:$0xf0] }
 0x381   :  { %7549 = vmatpush.bf16.msrb.mxu0 %v11538_v55  ;;  %v6437_v42 = vpop.f32.mrf.mxu2  ;;  %v6413_v48 = vpop.f32.mrf.mxu0  ;;  %v11510_v44 = vor.u32 %v12739_v33, %v11507_v35  ;;  %v11306_v55 = vor.u32 %v12690_v49, %v11305_v47  ;;  %v11610_v35 = vor.u32 %v12766_v28, %v11609_v56  ;;  %v12763_v47 = vld [vmem:[#allocation7 + $0x394] sm:$0xf]  ;;  %v11379_v56 = vld [vmem:[#allocation7 + $0x2a8] sm:$0xf0] }
 0x382   :  { %7223 = vmatpush.bf16.msra.mxu1 %v11326_v27  ;;  %v6438_v14 = vadd.f32 %v6437_v42, %v6425_v13  ;;  %v12715_v48 = vld [vmem:[#allocation7 + $0x38c] sm:$0xf]  ;;  %v11603_v49 = vld [vmem:[#allocation7 + $0x3b0] sm:$0xf0]  ;;  %v11777_v13 = vld [vmem:[#allocation7 + $0x318] sm:$0xf] }
 0x383   :  { %v6426_v53 = vpop.f32.mrf.mxu1  ;;  %7185 = vmatpush.bf16.msrb.mxu2 %v11314_v43  ;;  %v12814_v43 = vld [vmem:[#allocation7 + $0x3f4] sm:$0xf0]  ;;  %v11414_v52 = vor.u32 %v12715_v48, %v11411_v34  ;;  %v11606_v5 = vor.u32 %v12763_v47, %v11603_v49  ;;  %v11561_v47 = vld [vmem:[#allocation7 + $0x250] sm:$0xf] }
 0x384   :  { %7588 = vmatpush.bf16.msrb.mxu3 %v11542_v57  ;;  %v6450_v39 = vpop.f32.mrf.mxu3  ;;  %v11310_v57 = vor.u32 %v12689_v38, %v11307_v6  ;;  %v12764_v53 = vld [vmem:[#allocation7 + $0x3ac] sm:$0xf0]  ;;  %v11793_v38 = vld [vmem:[#allocation7 + $0x398] sm:$0xf] }
 0x385   :  { %7550 = vmatpush.bf16.msrb.mxu0 %v11530_v7  ;;  %v12812_v6 = vld [vmem:[#allocation7 + $0x3b4] sm:$0xf0]  ;;  %v12754_v49 = vld [vmem:[#allocation7 + $0x26c] sm:$0xf0] }
 0x386   :  { %7224 = vmatpush.bf16.msra.mxu1 %v11318_v32  ;;  %v11422_v32 = vor.u32 %v12717_v15, %v11419_v18  ;;  %v11794_v58 = vor.u32 %v12812_v6, %v11793_v38  ;;  %v12707_v18 = vld [vmem:[#allocation7 + $0x28c] sm:$0xf]  ;;  %v12753_v38 = vld [vmem:[#allocation7 + $0x254] sm:$0xf] }
 0x387   :  { %7186 = vmatpush.bf16.msrb.mxu2 %v11306_v55  ;;  %v12713_v55 = vld [vmem:[#allocation7 + $0x34c] sm:$0xf]  ;;  %v11563_v6 = vld [vmem:[#allocation7 + $0x270] sm:$0xf0] }
 0x388   :  { %7589 = vmatpush.bf16.msrb.mxu3 %v11534_v37  ;;  %v11299_v37 = vld [vmem:[#allocation7 + $0x28] sm:$0xf0] }
 0x389   :  { %7551 = vmatpush.bf16.msrb.mxu0 %v11522_v16  ;;  %v6439_v63 = vpop.f32.mrf.mxu2  ;;  %v11302_v3 = vor.u32 %v12687_v21, %v11299_v37  ;;  %v6451_v16 = vadd.f32 %v6450_v39, %v6438_v14  ;;  %v11611_v39 = vld [vmem:[#allocation7 + $0x3f0] sm:$0xf0]  ;;  %v12810_v21 = vld [vmem:[#allocation7 + $0x374] sm:$0xf0] }
 0x38a   :  { %7225 = vmatpush.bf16.msra.mxu1 %v11310_v57  ;;  %v11403_v57 = vld [vmem:[#allocation7 + $0x368] sm:$0xf0]  ;;  %v12761_v63 = vld [vmem:[#allocation7 + $0x354] sm:$0xf]  ;;  %v12808_v14 = vld [vmem:[#allocation7 + $0x334] sm:$0xf0] }
 0x38b   :  { %7187 = vmatpush.bf16.msrb.mxu2 %v11298_v1  ;;  %v11598_v1 = vor.u32 %v12761_v63, %v11595_v51  ;;  %v12751_v63 = vld [vmem:[#allocation7 + $0x214] sm:$0xf]  ;;  %v11566_v51 = vor.u32 %v12753_v38, %v11563_v6 }
 0x38c   :  { %7590 = vmatpush.bf16.msrb.mxu3 %v11526_v17  ;;  %v6452_v7 = vpop.f32.mrf.mxu3  ;;  %v11651_v6 = vld [vmem:[#allocation7 + $0x530] sm:$0xf0] }
 0x38d   :  { %7552 = vmatpush.bf16.msrb.mxu0 %v11514_v23  ;;  %v11406_v7 = vor.u32 %v12713_v55, %v11403_v57  ;;  %v12703_v57 = vld [vmem:[#allocation7 + $0x20c] sm:$0xf] }
 0x38e   :  { %7226 = vmatpush.bf16.msra.mxu1 %v11302_v3  ;;  %v11786_v3 = vor.u32 %v12810_v21, %v11785_v60  ;;  %v11555_v21 = vld [vmem:[#allocation7 + $0x230] sm:$0xf0] }
 0x390   :  { %7591 = vmatpush.bf16.msrb.mxu3 %v11518_v46 }
 0x391   :  { %7553 = vmatpush.bf16.msrb.mxu0 %v11506_v9  ;;  %v11614_v9 = vor.u32 %v12765_v45, %v11611_v39  ;;  %v11569_v45 = vld [vmem:[#allocation7 + $0x290] sm:$0xf] }
 0x392   :  { %v12756_v39 = vld [vmem:[#allocation7 + $0x2ac] sm:$0xf0] }
 0x393   :  { %v11570_v34 = vor.u32 %v12756_v39, %v11569_v45  ;;  %v11657_v45 = vld [vmem:[#allocation7 + $0x550] sm:$0xf] }
 0x394   :  { %7592 = vmatpush.bf16.msrb.mxu3 %v11510_v44  ;;  %v11601_v44 = vld [vmem:[#allocation7 + $0x390] sm:$0xf] }
 0x395   :  { %7554 = vmatpush.bf16.msrb.mxu0 %v11498_v59  ;;  %v11602_v54 = vor.u32 %v12764_v53, %v11601_v44  ;;  %v11593_v59 = vld [vmem:[#allocation7 + $0x350] sm:$0xf] }
 0x396   :  { %v12778_v39 = vld [vmem:[#allocation7 + $0x56c] sm:$0xf0] }
 0x398   :  { %7593 = vmatpush.bf16.msrb.mxu3 %v11502_v61  ;;  %v12762_v61 = vld [vmem:[#allocation7 + $0x36c] sm:$0xf0] }
 0x399   :  { %7555 = vmatpush.bf16.msrb.mxu0 %v11490_v8  ;;  %v6463_v17 = vpop.f32.mrf.mxu0  ;;  %v11594_v37 = vor.u32 %v12762_v61, %v11593_v59  ;;  %v12759_v8 = vld [vmem:[#allocation7 + $0x314] sm:$0xf]  ;;  %v11553_v59 = vld [vmem:[#allocation7 + $0x210] sm:$0xf] }
 0x39a   :  { %v6464_v62 = vadd.f32 %v6463_v17, %v6451_v16  ;;  %v11398_v16 = vor.u32 %v12711_v20, %v11395_v36  ;;  %v12752_v61 = vld [vmem:[#allocation7 + $0x22c] sm:$0xf0]  ;;  %v11745_v20 = vld [vmem:[#allocation7 + $0x218] sm:$0xf] }
 0x39b   :  { %v6476_v19 = vpop.f32.mrf.mxu1  ;;  %v12800_v36 = vld [vmem:[#allocation7 + $0x234] sm:$0xf0] }
 0x39c   :  { %7594 = vmatpush.bf16.msrb.mxu3 %v11494_v12  ;;  %v6477_v24 = vadd.f32 %v6476_v19, %v6464_v62  ;;  %v11587_v12 = vld [vmem:[#allocation7 + $0x330] sm:$0xf0]  ;;  %v11586_v19 = vor.u32 %v12760_v11, %v11585_v4  ;;  %v12709_v62 = vld [vmem:[#allocation7 + $0x2cc] sm:$0xf] }
 0x39d   :  { %v11675_v11 = vld [vmem:[#allocation7 + $0x5f0] sm:$0xf0] }
 0x3a1   :  { %v6489_v0 = vpop.f32.mrf.mxu2  ;;  %v6465_v40 = vpop.f32.mrf.mxu0 }
 0x3a2   :  { %v6490_v2 = vadd.f32 %v6489_v0, %v6477_v24  ;;  %v6502_v10 = vpop.f32.mrf.mxu3  ;;  %v11387_v24 = vld [vmem:[#allocation7 + $0x2e8] sm:$0xf0]  ;;  %v11590_v0 = vor.u32 %v12759_v8, %v11587_v12  ;;  %v12758_v40 = vld [vmem:[#allocation7 + $0x2ec] sm:$0xf0]  ;;  %v11865_v8 = vld [vmem:[#allocation7 + $0x5d8] sm:$0xf] }
 0x3a3   :  { %v6478_v27 = vpop.f32.mrf.mxu1  ;;  %v12830_v12 = vld [vmem:[#allocation7 + $0x5f4] sm:$0xf0] }
 0x3a4   :  { %v6503_v25 = vadd.f32 %v6502_v10, %v6490_v2  ;;  %v11778_v2 = vor.u32 %v12808_v14, %v11777_v13  ;;  %v11577_v10 = vld [vmem:[#allocation7 + $0x2d0] sm:$0xf]  ;;  %v12757_v27 = vld [vmem:[#allocation7 + $0x2d4] sm:$0xf]  ;;  %v11554_v13 = vor.u32 %v12752_v61, %v11553_v59 }
 0x3a5   :  { %v11578_v15 = vor.u32 %v12758_v40, %v11577_v10  ;;  %v11665_v10 = vld [vmem:[#allocation7 + $0x590] sm:$0xf] }
 0x3a6   :  { %v6508_v23 = vmax.f32 %v13208_v50, %v6503_v25  ;;  %v11802_v50 = vor.u32 %v12814_v43, %v11801_v31  ;;  %v11579_v25 = vld [vmem:[#allocation7 + $0x2f0] sm:$0xf0]  ;;  %v11761_v31 = vld [vmem:[#allocation7 + $0x298] sm:$0xf]  ;;  %v12780_v40 = vld [vmem:[#allocation7 + $0x5ac] sm:$0xf0] }
 0x3a7   :  { %v12804_v43 = vld [vmem:[#allocation7 + $0x2b4] sm:$0xf0]  ;;  %v11641_v61 = vld [vmem:[#allocation7 + $0x4d0] sm:$0xf] }
 0x3a8   :  { %v6519_v46 = vadd.f32 %v6513_v26, %v6508_v23  ;;  %v11769_v26 = vld [vmem:[#allocation7 + $0x2d8] sm:$0xf]  ;;  %v11762_v53 = vor.u32 %v12804_v43, %v11761_v31  ;;  %v11659_v31 = vld [vmem:[#allocation7 + $0x570] sm:$0xf0] }
 0x3a9   :  { %v6491_v42 = vpop.f32.mrf.mxu2  ;;  %v12806_v23 = vld [vmem:[#allocation7 + $0x2f4] sm:$0xf0] }
 0x3aa   :  { %v6522_v22 = vmax.f32 %v6519_v46, 0.0  ;;  %v6504_v41 = vpop.f32.mrf.mxu3  ;;  %v11390_v46 = vor.u32 %v12709_v62, %v11387_v24  ;;  %v11582_v42 = vor.u32 %v12757_v27, %v11579_v25  ;;  %v11770_v28 = vor.u32 %v12806_v23, %v11769_v26  ;;  %v12779_v27 = vld [vmem:[#allocation7 + $0x594] sm:$0xf]  ;;  %v11857_v23 = vld [vmem:[#allocation7 + $0x598] sm:$0xf] }
 0x3ab   :  { %v11571_v41 = vld [vmem:[#allocation7 + $0x2b0] sm:$0xf0]  ;;  %v11558_v62 = vor.u32 %v12751_v63, %v11555_v21  ;;  %v11746_v24 = vor.u32 %v12800_v36, %v11745_v20  ;;  %v11849_v43 = vld [vmem:[#allocation7 + $0x558] sm:$0xf]  ;;  %v12774_v63 = vld [vmem:[#allocation7 + $0x4ec] sm:$0xf0] }
 0x3ac   :  { %v13265_v33 = vpack.c.bf16 %v6522_v22, %v6522_v22  ;;  %v12755_v22 = vld [vmem:[#allocation7 + $0x294] sm:$0xf]  ;;  %v12821_v20 = vld [vmem:[#allocation7 + $0x4dc] sm:$0xf] }
 0x3ad   :  { %v11574_v44 = vor.u32 %v12755_v22, %v11571_v41  ;;  %v11667_v26 = vld [vmem:[#allocation7 + $0x5b0] sm:$0xf0]  ;;  %v11835_v36 = vld [vmem:[#allocation7 + $0x4f8] sm:$0xf0] }
 0x3ae   :  { %6848 = vmatmul.bf16.vlgmr.msra.gmra.mxu2 %v13265_v33  ;;  %6887 = vmatmul.bf16.vlgmr.msrb.gmra.mxu1 %v13265_v33  ;;  %v12777_v22 = vld [vmem:[#allocation7 + $0x554] sm:$0xf] }
 0x3af   :  { %7214 = vmatmul.bf16.vlgmr.msra.gmra.mxu0 %v13265_v33  ;;  %7232 = vmatpush.bf16.msra.mxu2 %v11422_v32  ;;  %v11643_v21 = vld [vmem:[#allocation7 + $0x4f0] sm:$0xf0] }
 0x3b0   :  { %7253 = vmatmul.bf16.vlgmr.msra.gmra.mxu3 %v13265_v33  ;;  %7561 = vmatpush.bf16.msrb.mxu1 %v11610_v35  ;;  %v11382_v35 = vor.u32 %v12707_v18, %v11379_v56  ;;  %v11859_v18 = vld [vmem:[#allocation7 + $0x5b8] sm:$0xf0]  ;;  %v11666_v56 = vor.u32 %v12780_v40, %v11665_v10  ;;  %v11625_v40 = vld [vmem:[#allocation7 + $0x450] sm:$0xf] }
 0x3b1   :  { %7600 = vmatpush.bf16.msra.mxu0 %v11614_v9  ;;  %7929 = vmatpush.bf16.msra.mxu3 %v11802_v50  ;;  %v12705_v9 = vld [vmem:[#allocation7 + $0x24c] sm:$0xf] }
 0x3b2   :  { %v11371_v50 = vld [vmem:[#allocation7 + $0x268] sm:$0xf0] }
 0x3b3   :  { %7233 = vmatpush.bf16.msra.mxu2 %v11414_v52  ;;  %v11753_v52 = vld [vmem:[#allocation7 + $0x258] sm:$0xf]  ;;  %v11374_v55 = vor.u32 %v12705_v9, %v11371_v50  ;;  %v11658_v9 = vor.u32 %v12778_v39, %v11657_v45  ;;  %v11662_v50 = vor.u32 %v12777_v22, %v11659_v31  ;;  %v12768_v22 = vld [vmem:[#allocation7 + $0x42c] sm:$0xf0]  ;;  %v11619_v31 = vld [vmem:[#allocation7 + $0x430] sm:$0xf0] }
 0x3b4   :  { %7562 = vmatpush.bf16.msrb.mxu1 %v11602_v54  ;;  %v12802_v54 = vld [vmem:[#allocation7 + $0x274] sm:$0xf0] }
 0x3b5   :  { %7601 = vmatpush.bf16.msra.mxu0 %v11606_v5  ;;  %7930 = vmatpush.bf16.msra.mxu3 %v11794_v58  ;;  %v11363_v5 = vld [vmem:[#allocation7 + $0x228] sm:$0xf0]  ;;  %v11562_v58 = vor.u32 %v12754_v49, %v11561_v47  ;;  %v11754_v60 = vor.u32 %v12802_v54, %v11753_v52  ;;  %v12776_v47 = vld [vmem:[#allocation7 + $0x52c] sm:$0xf0]  ;;  %v12775_v49 = vld [vmem:[#allocation7 + $0x514] sm:$0xf] }
 0x3b6   :  { %v11366_v4 = vor.u32 %v12703_v57, %v11363_v5  ;;  %v11841_v52 = vld [vmem:[#allocation7 + $0x518] sm:$0xf]  ;;  %v11843_v57 = vld [vmem:[#allocation7 + $0x538] sm:$0xf0] }
 0x3b7   :  { %7234 = vmatpush.bf16.msra.mxu2 %v11406_v7  ;;  %v11673_v7 = vld [vmem:[#allocation7 + $0x5d0] sm:$0xf]  ;;  %v12824_v54 = vld [vmem:[#allocation7 + $0x534] sm:$0xf0] }
 0x3b8   :  { %7563 = vmatpush.bf16.msrb.mxu1 %v11594_v37  ;;  %v12782_v37 = vld [vmem:[#allocation7 + $0x5ec] sm:$0xf0]  ;;  %v11842_v59 = vor.u32 %v12824_v54, %v11841_v52 }
 0x3b9   :  { %v13271_v17 = vpop.f32.mrf.mxu0  ;;  %7602 = vmatpush.bf16.msra.mxu0 %v11598_v1  ;;  %7931 = vmatpush.bf16.msra.mxu3 %v11786_v3  ;;  %v12781_v1 = vld [vmem:[#allocation7 + $0x5d4] sm:$0xf]  ;;  %v11674_v14 = vor.u32 %v12782_v37, %v11673_v7  ;;  %v11833_v7 = vld [vmem:[#allocation7 + $0x4d8] sm:$0xf] }
 0x3ba   :  { %v12822_v37 = vld [vmem:[#allocation7 + $0x4f4] sm:$0xf0] }
 0x3bb   :  { %7235 = vmatpush.bf16.msra.mxu2 %v11398_v16  ;;  %v12829_v16 = vld [vmem:[#allocation7 + $0x5dc] sm:$0xf] }
 0x3bc   :  { %7564 = vmatpush.bf16.msrb.mxu1 %v11586_v19  ;;  %v11867_v19 = vld [vmem:[#allocation7 + $0x5f8] sm:$0xf0] }
 0x3bd   :  { %7603 = vmatpush.bf16.msra.mxu0 %v11590_v0  ;;  %7932 = vmatpush.bf16.msra.mxu3 %v11778_v2  ;;  %v11678_v0 = vor.u32 %v12781_v1, %v11675_v11  ;;  %v11866_v2 = vor.u32 %v12830_v12, %v11865_v8  ;;  %v11870_v25 = vor.u32 %v12829_v16, %v11867_v19  ;;  %v11633_v11 = vld [vmem:[#allocation7 + $0x490] sm:$0xf]  ;;  %v12771_v12 = vld [vmem:[#allocation7 + $0x494] sm:$0xf]  ;;  %v11825_v16 = vld [vmem:[#allocation7 + $0x498] sm:$0xf] }
 0x3be   :  { %7188 = vmatmul.bf16.vlgmr.msrb.gmra.mxu2 %v13234_v29  ;;  %7227 = vmatmul.bf16.vlgmr.msra.gmra.mxu1 %v13234_v29  ;;  %v11642_v1 = vor.u32 %v12774_v63, %v11641_v61  ;;  %v12772_v8 = vld [vmem:[#allocation7 + $0x4ac] sm:$0xf0]  ;;  %v12820_v19 = vld [vmem:[#allocation7 + $0x4b4] sm:$0xf0] }
 0x3bf   :  { %7236 = vmatpush.bf16.msra.mxu2 %v11390_v46  ;;  %7556 = vmatmul.bf16.vlgmr.msrb.gmra.mxu0 %v13234_v29  ;;  %v12828_v46 = vld [vmem:[#allocation7 + $0x5b4] sm:$0xf0]  ;;  %v11826_v10 = vor.u32 %v12820_v19, %v11825_v16 }
 0x3c0   :  { %7565 = vmatpush.bf16.msrb.mxu1 %v11578_v15  ;;  %7595 = vmatmul.bf16.vlgmr.msrb.gmra.mxu3 %v13234_v29  ;;  %v12827_v15 = vld [vmem:[#allocation7 + $0x59c] sm:$0xf]  ;;  %v11705_v16 = vld [vmem:[#allocation7 + $0xd8] sm:$0xf] }
 0x3c1   :  { %v6825_v48 = vpop.f32.mrf.mxu0  ;;  %7604 = vmatpush.bf16.msra.mxu0 %v11582_v42  ;;  %7933 = vmatpush.bf16.msra.mxu3 %v11770_v28  ;;  %v11670_v42 = vor.u32 %v12779_v27, %v11667_v26  ;;  %v11858_v28 = vor.u32 %v12828_v46, %v11857_v23  ;;  %v11862_v41 = vor.u32 %v12827_v15, %v11859_v18  ;;  %v12770_v27 = vld [vmem:[#allocation7 + $0x46c] sm:$0xf0]  ;;  %v11627_v23 = vld [vmem:[#allocation7 + $0x470] sm:$0xf0]  ;;  %v11817_v46 = vld [vmem:[#allocation7 + $0x458] sm:$0xf] }
 0x3c2   :  { %v13275_v32 = vpop.f32.mrf.mxu3  ;;  %v12825_v48 = vld [vmem:[#allocation7 + $0x55c] sm:$0xf]  ;;  %v12818_v15 = vld [vmem:[#allocation7 + $0x474] sm:$0xf0] }
 0x3c3   :  { %7237 = vmatpush.bf16.msra.mxu2 %v11382_v35  ;;  %v12826_v35 = vld [vmem:[#allocation7 + $0x574] sm:$0xf0]  ;;  %v12817_v18 = vld [vmem:[#allocation7 + $0x45c] sm:$0xf]  ;;  %v11818_v39 = vor.u32 %v12818_v15, %v11817_v46 }
 0x3c4   :  { %7566 = vmatpush.bf16.msrb.mxu1 %v11570_v34  ;;  %v11851_v34 = vld [vmem:[#allocation7 + $0x578] sm:$0xf0]  ;;  %v12790_v19 = vld [vmem:[#allocation7 + $0xf4] sm:$0xf0] }
 0x3c5   :  { %7605 = vmatpush.bf16.msra.mxu0 %v11574_v44  ;;  %7934 = vmatpush.bf16.msra.mxu3 %v11762_v53  ;;  %v11850_v44 = vor.u32 %v12826_v35, %v11849_v43  ;;  %v11649_v53 = vld [vmem:[#allocation7 + $0x510] sm:$0xf]  ;;  %v11854_v38 = vor.u32 %v12825_v48, %v11851_v34  ;;  %v11809_v35 = vld [vmem:[#allocation7 + $0x418] sm:$0xf]  ;;  %v12815_v34 = vld [vmem:[#allocation7 + $0x41c] sm:$0xf] }
 0x3c6   :  { %v11650_v5 = vor.u32 %v12776_v47, %v11649_v53  ;;  %v12816_v48 = vld [vmem:[#allocation7 + $0x434] sm:$0xf0]  ;;  %v12797_v47 = vld [vmem:[#allocation7 + $0x1dc] sm:$0xf] }
 0x3c7   :  { %7238 = vmatpush.bf16.msra.mxu2 %v11374_v55  ;;  %v12823_v55 = vld [vmem:[#allocation7 + $0x51c] sm:$0xf]  ;;  %v11689_v15 = vld [vmem:[#allocation7 + $0x58] sm:$0xf] }
 0x3c8   :  { %7567 = vmatpush.bf16.msrb.mxu1 %v11562_v58  ;;  %v11654_v58 = vor.u32 %v12775_v49, %v11651_v6  ;;  %v11739_v49 = vld [vmem:[#allocation7 + $0x1f8] sm:$0xf0]  ;;  %v11810_v6 = vor.u32 %v12816_v48, %v11809_v35 }
 0x3c9   :  { %7606 = vmatpush.bf16.msra.mxu0 %v11566_v51  ;;  %7935 = vmatpush.bf16.msra.mxu3 %v11754_v60  ;;  %v12773_v51 = vld [vmem:[#allocation7 + $0x4d4] sm:$0xf]  ;;  %v11846_v60 = vor.u32 %v12823_v55, %v11843_v57  ;;  %v11742_v55 = vor.u32 %v12797_v47, %v11739_v49  ;;  %v11729_v57 = vld [vmem:[#allocation7 + $0x198] sm:$0xf]  ;;  %v12813_v35 = vld [vmem:[#allocation7 + $0x3dc] sm:$0xf] }
 0x3ca   :  { %v6864_v3 = vpop.f32.mrf.mxu3  ;;  %v11803_v48 = vld [vmem:[#allocation7 + $0x3f8] sm:$0xf0] }
 0x3cb   :  { %7239 = vmatpush.bf16.msra.mxu2 %v11366_v4  ;;  %v11646_v3 = vor.u32 %v12773_v51, %v11643_v21  ;;  %v11834_v4 = vor.u32 %v12822_v37, %v11833_v7  ;;  %v11721_v51 = vld [vmem:[#allocation7 + $0x158] sm:$0xf]  ;;  %v12793_v21 = vld [vmem:[#allocation7 + $0x15c] sm:$0xf] }
 0x3cc   :  { %7568 = vmatpush.bf16.msrb.mxu1 %v11554_v13  ;;  %v11838_v13 = vor.u32 %v12821_v20, %v11835_v36  ;;  %v11723_v7 = vld [vmem:[#allocation7 + $0x178] sm:$0xf0] }
 0x3cd   :  { %7607 = vmatpush.bf16.msra.mxu0 %v11558_v62  ;;  %7936 = vmatpush.bf16.msra.mxu3 %v11746_v24  ;;  %v12819_v62 = vld [vmem:[#allocation7 + $0x49c] sm:$0xf] }
 0x3ce   :  { %7240 = vmatmul.bf16.vlgmr.msra.gmra.mxu2 %v13252_v30  ;;  %v11827_v24 = vld [vmem:[#allocation7 + $0x4b8] sm:$0xf0] }
 0x3cf   :  { %7574 = vmatpush.bf16.msrb.mxu2 %v11674_v14  ;;  %7569 = vmatmul.bf16.vlgmr.msrb.gmra.mxu1 %v13252_v30  ;;  %v11635_v14 = vld [vmem:[#allocation7 + $0x4b0] sm:$0xf0]  ;;  %v11830_v26 = vor.u32 %v12819_v62, %v11827_v24  ;;  %v12789_v62 = vld [vmem:[#allocation7 + $0xdc] sm:$0xf] }
 0x3d0   :  { %7613 = vmatpush.bf16.msra.mxu1 %v11678_v0  ;;  %7608 = vmatmul.bf16.vlgmr.msra.gmra.mxu0 %v13252_v30  ;;  %v11634_v0 = vor.u32 %v12772_v8, %v11633_v11  ;;  %v11713_v11 = vld [vmem:[#allocation7 + $0x118] sm:$0xf]  ;;  %v11707_v24 = vld [vmem:[#allocation7 + $0xf8] sm:$0xf0] }
 0x3d1   :  { %7942 = vmatpush.bf16.msrb.mxu0 %v11866_v2  ;;  %7981 = vmatpush.bf16.msrb.mxu3 %v11870_v25  ;;  %v11638_v2 = vor.u32 %v12771_v12, %v11635_v14  ;;  %v12769_v25 = vld [vmem:[#allocation7 + $0x454] sm:$0xf]  ;;  %v12792_v8 = vld [vmem:[#allocation7 + $0x134] sm:$0xf0]  ;;  %v12791_v12 = vld [vmem:[#allocation7 + $0x11c] sm:$0xf] }
 0x3d2   :  { %7937 = vmatmul.bf16.vlgmr.msra.gmra.mxu3 %v13252_v30  ;;  %v11630_v45 = vor.u32 %v12769_v25, %v11627_v23  ;;  %v11714_v14 = vor.u32 %v12792_v8, %v11713_v11  ;;  %v12787_v25 = vld [vmem:[#allocation7 + $0x9c] sm:$0xf] }
 0x3d3   :  { %7575 = vmatpush.bf16.msrb.mxu2 %v11666_v56  ;;  %v11819_v56 = vld [vmem:[#allocation7 + $0x478] sm:$0xf0] }
 0x3d4   :  { %7614 = vmatpush.bf16.msra.mxu1 %v11670_v42  ;;  %v11626_v42 = vor.u32 %v12770_v27, %v11625_v40  ;;  %v11822_v43 = vor.u32 %v12817_v18, %v11819_v56  ;;  %v11697_v40 = vld [vmem:[#allocation7 + $0x98] sm:$0xf]  ;;  %v12785_v56 = vld [vmem:[#allocation7 + $0x5c] sm:$0xf] }
 0x3d5   :  { %7943 = vmatpush.bf16.msrb.mxu0 %v11858_v28  ;;  %7982 = vmatpush.bf16.msrb.mxu3 %v11862_v41  ;;  %v11617_v28 = vld [vmem:[#allocation7 + $0x410] sm:$0xf]  ;;  %v12767_v41 = vld [vmem:[#allocation7 + $0x414] sm:$0xf]  ;;  %v12788_v27 = vld [vmem:[#allocation7 + $0xb4] sm:$0xf0] }
 0x3d6   :  { %v11618_v53 = vor.u32 %v12768_v22, %v11617_v28  ;;  %v11698_v23 = vor.u32 %v12788_v27, %v11697_v40  ;;  %v12786_v18 = vld [vmem:[#allocation7 + $0x74] sm:$0xf0]  ;;  %v12809_v49 = vld [vmem:[#allocation7 + $0x35c] sm:$0xf] }
 0x3d7   :  { %7576 = vmatpush.bf16.msrb.mxu2 %v11658_v9  ;;  %v11811_v9 = vld [vmem:[#allocation7 + $0x438] sm:$0xf0]  ;;  %v11681_v22 = vld [vmem:[#allocation7 + $0x18] sm:$0xf] }
 0x3d8   :  { %7615 = vmatpush.bf16.msra.mxu1 %v11662_v50  ;;  %v11737_v50 = vld [vmem:[#allocation7 + $0x1d8] sm:$0xf]  ;;  %v11814_v52 = vor.u32 %v12815_v34, %v11811_v9 }
 0x3d9   :  { %7944 = vmatpush.bf16.msrb.mxu0 %v11850_v44  ;;  %7983 = vmatpush.bf16.msrb.mxu3 %v11854_v38  ;;  %v12798_v44 = vld [vmem:[#allocation7 + $0x1f4] sm:$0xf0]  ;;  %v11622_v38 = vor.u32 %v12767_v41, %v11619_v31  ;;  %v12783_v31 = vld [vmem:[#allocation7 + $0x1c] sm:$0xf] }
 0x3da   :  { %v11738_v54 = vor.u32 %v12798_v44, %v11737_v50  ;;  %v12784_v41 = vld [vmem:[#allocation7 + $0x34] sm:$0xf0]  ;;  %v11806_v50 = vor.u32 %v12813_v35, %v11803_v48  ;;  %v12811_v44 = vld [vmem:[#allocation7 + $0x39c] sm:$0xf] }
 0x3db   :  { %7577 = vmatpush.bf16.msrb.mxu2 %v11650_v5  ;;  %v12796_v5 = vld [vmem:[#allocation7 + $0x1b4] sm:$0xf0]  ;;  %v11682_v34 = vor.u32 %v12784_v41, %v11681_v22 }
 0x3dc   :  { %7616 = vmatpush.bf16.msra.mxu1 %v11654_v58  ;;  %v12795_v58 = vld [vmem:[#allocation7 + $0x19c] sm:$0xf]  ;;  %v11730_v61 = vor.u32 %v12796_v5, %v11729_v57 }
 0x3dd   :  { %7945 = vmatpush.bf16.msrb.mxu0 %v11842_v59  ;;  %7984 = vmatpush.bf16.msrb.mxu3 %v11846_v60  ;;  %v11731_v59 = vld [vmem:[#allocation7 + $0x1b8] sm:$0xf0]  ;;  %v12794_v60 = vld [vmem:[#allocation7 + $0x174] sm:$0xf0] }
 0x3de   :  { %v11734_v63 = vor.u32 %v12795_v58, %v11731_v59  ;;  %v11722_v37 = vor.u32 %v12794_v60, %v11721_v51  ;;  %v12805_v57 = vld [vmem:[#allocation7 + $0x2dc] sm:$0xf] }
 0x3df   :  { %7578 = vmatpush.bf16.msrb.mxu2 %v11642_v1  ;;  %v11726_v1 = vor.u32 %v12793_v21, %v11723_v7  ;;  %v11771_v5 = vld [vmem:[#allocation7 + $0x2f8] sm:$0xf0] }
 0x3e0   :  { %7617 = vmatpush.bf16.msra.mxu1 %v11646_v3  ;;  %v11774_v58 = vor.u32 %v12805_v57, %v11771_v5  ;;  %v12803_v59 = vld [vmem:[#allocation7 + $0x29c] sm:$0xf]  ;;  %v7996_v5 = vld [vmem:[#allocation8] sm:$0x3] }
 0x3e1   :  { %7946 = vmatpush.bf16.msrb.mxu0 %v11834_v4  ;;  %7985 = vmatpush.bf16.msrb.mxu3 %v11838_v13  ;;  %v11715_v13 = vld [vmem:[#allocation7 + $0x138] sm:$0xf0] }
 0x3e2   :  { %v12801_v51 = vld [vmem:[#allocation7 + $0x25c] sm:$0xf] }
 0x3e3   :  { %7579 = vmatpush.bf16.msrb.mxu2 %v11634_v0  ;;  %v11755_v60 = vld [vmem:[#allocation7 + $0x278] sm:$0xf0] }
 0x3e4   :  { %7618 = vmatpush.bf16.msra.mxu1 %v11638_v2  ;;  %v11758_v21 = vor.u32 %v12801_v51, %v11755_v60  ;;  %v12799_v7 = vld [vmem:[#allocation7 + $0x21c] sm:$0xf]  ;;  %v7999_v51 = vperm.slane %v7996_v5, 1 }
 0x3e5   :  { %7947 = vmatpush.bf16.msrb.mxu0 %v11826_v10  ;;  %7986 = vmatpush.bf16.msrb.mxu3 %v11830_v26  ;;  %v11699_v26 = vld [vmem:[#allocation7 + $0xb8] sm:$0xf0] }
 0x3e6   :  { %v11702_v46 = vor.u32 %v12787_v25, %v11699_v26 }
 0x3e7   :  { %7580 = vmatpush.bf16.msrb.mxu2 %v11626_v42  ;;  %v11691_v42 = vld [vmem:[#allocation7 + $0x78] sm:$0xf0] }
 0x3e8   :  { %7619 = vmatpush.bf16.msra.mxu1 %v11630_v45  ;;  %v11690_v45 = vor.u32 %v12786_v18, %v11689_v15 }
 0x3e9   :  { %7948 = vmatpush.bf16.msrb.mxu0 %v11818_v39  ;;  %7987 = vmatpush.bf16.msrb.mxu3 %v11822_v43  ;;  %v11694_v39 = vor.u32 %v12785_v56, %v11691_v42  ;;  %v11683_v43 = vld [vmem:[#allocation7 + $0x38] sm:$0xf0] }
 0x3ea   :  { %v11686_v9 = vor.u32 %v12783_v31, %v11683_v43 }
 0x3eb   :  { %7581 = vmatpush.bf16.msrb.mxu2 %v11618_v53  ;;  %v11795_v53 = vld [vmem:[#allocation7 + $0x3b8] sm:$0xf0] }
 0x3ec   :  { %7620 = vmatpush.bf16.msra.mxu1 %v11622_v38  ;;  %v11798_v47 = vor.u32 %v12811_v44, %v11795_v53  ;;  %v11787_v38 = vld [vmem:[#allocation7 + $0x378] sm:$0xf0] }
 0x3ed   :  { %7949 = vmatpush.bf16.msrb.mxu0 %v11810_v6  ;;  %7988 = vmatpush.bf16.msrb.mxu3 %v11814_v52  ;;  %v6836_v20 = vpop.f32.mrf.mxu1  ;;  %v11790_v6 = vor.u32 %v12809_v49, %v11787_v38  ;;  %v12807_v52 = vld [vmem:[#allocation7 + $0x31c] sm:$0xf] }
 0x3ee   :  { %7582 = vmatmul.bf16.vlgmr.msrb.gmra.mxu2 %v13265_v33  ;;  %v13288_v3 = vadd.f32 %v6836_v20, %v13271_v17  ;;  %v11706_v17 = vor.u32 %v12790_v19, %v11705_v16 }
 0x3ef   :  { %7916 = vmatpush.bf16.msra.mxu2 %v11738_v54  ;;  %7621 = vmatmul.bf16.vlgmr.msra.gmra.mxu1 %v13265_v33  ;;  %v6875_v36 = vpop.f32.mrf.mxu0  ;;  %v11779_v54 = vld [vmem:[#allocation7 + $0x338] sm:$0xf0] }
 0x3f0   :  { %7955 = vmatpush.bf16.msrb.mxu1 %v11742_v55  ;;  %7950 = vmatmul.bf16.vlgmr.msrb.gmra.mxu0 %v13265_v33  ;;  %v13291_v4 = vadd.f32 %v6875_v36, %v13275_v32  ;;  %v11710_v32 = vor.u32 %v12789_v62, %v11707_v24  ;;  %v11782_v55 = vor.u32 %v12807_v52, %v11779_v54 }
 0x3f1   :  { %7989 = vmatmul.bf16.vlgmr.msrb.gmra.mxu3 %v13265_v33  ;;  %v11718_v33 = vor.u32 %v12791_v12, %v11715_v13 }
 0x3f3   :  { %7917 = vmatpush.bf16.msra.mxu2 %v11730_v61  ;;  %v11763_v61 = vld [vmem:[#allocation7 + $0x2b8] sm:$0xf0] }
 0x3f4   :  { %7956 = vmatpush.bf16.msrb.mxu1 %v11734_v63  ;;  %v13293_v0 = vpop.f32.mrf.mxu3  ;;  %v11766_v63 = vor.u32 %v12803_v59, %v11763_v61 }
 0x3f5   :  { %v6838_v2 = vpop.f32.mrf.mxu1 }
 0x3f7   :  { %7918 = vmatpush.bf16.msra.mxu2 %v11722_v37  ;;  %v6877_v10 = vpop.f32.mrf.mxu0 }
 0x3f8   :  { %7957 = vmatpush.bf16.msrb.mxu1 %v11726_v1 }
 0x3fb   :  { %7919 = vmatpush.bf16.msra.mxu2 %v11714_v14 }
 0x3fc   :  { %7958 = vmatpush.bf16.msrb.mxu1 %v11718_v33  ;;  %v7204_v28 = vpop.f32.mrf.mxu3 }
 0x3ff   :  { %7920 = vmatpush.bf16.msra.mxu2 %v11706_v17 }
 0x400   :  { %7959 = vmatpush.bf16.msrb.mxu1 %v11710_v32 }
 0x403   :  { %7921 = vmatpush.bf16.msra.mxu2 %v11698_v23 }
 0x404   :  { %7960 = vmatpush.bf16.msrb.mxu1 %v11702_v46 }
 0x407   :  { %7922 = vmatpush.bf16.msra.mxu2 %v11690_v45 }
 0x408   :  { %7961 = vmatpush.bf16.msrb.mxu1 %v11694_v39 }
 0x40b   :  { %7923 = vmatpush.bf16.msra.mxu2 %v11682_v34 }
 0x40c   :  { %7962 = vmatpush.bf16.msrb.mxu1 %v11686_v9 }
 0x40e   :  { %7924 = vmatmul.bf16.vlgmr.msra.gmra.mxu2 %v13234_v29 }
 0x40f   :  { %7968 = vmatpush.bf16.msrb.mxu2 %v11806_v50  ;;  %7963 = vmatmul.bf16.vlgmr.msrb.gmra.mxu1 %v13234_v29  ;;  %v11747_v29 = vld [vmem:[#allocation7 + $0x238] sm:$0xf0] }
 0x410   :  { %v11750_v37 = vor.u32 %v12799_v7, %v11747_v29 }
 0x413   :  { %7969 = vmatpush.bf16.msrb.mxu2 %v11798_v47 }
 0x417   :  { %7970 = vmatpush.bf16.msrb.mxu2 %v11790_v6 }
 0x41b   :  { %7971 = vmatpush.bf16.msrb.mxu2 %v11782_v55 }
 0x41f   :  { %7972 = vmatpush.bf16.msrb.mxu2 %v11774_v58  ;;  %v7998_v58 = vperm.slane %v7996_v5, 0 }
 0x423   :  { %7973 = vmatpush.bf16.msrb.mxu2 %v11766_v63 }
 0x427   :  { %7974 = vmatpush.bf16.msrb.mxu2 %v11758_v21  ;;  %v8006_v21 = vld [vmem:[#allocation10] sm:$0x3] }
 0x42b   :  { %7975 = vmatpush.bf16.msrb.mxu2 %v11750_v37  ;;  %v6888_v20 = vpop.f32.mrf.mxu1 }
 0x42c   :  { %v6889_v36 = vadd.f32 %v6888_v20, %v13291_v4  ;;  %v7215_v1 = vpop.f32.mrf.mxu0  ;;  %v8008_v20 = vperm.slane %v8006_v21, 0 }
 0x42e   :  { %7976 = vmatmul.bf16.vlgmr.msrb.gmra.mxu2 %v13252_v30 }
 0x431   :  { %v6849_v11 = vpop.f32.mrf.mxu2 }
 0x432   :  { %v6850_v8 = vadd.f32 %v6849_v11, %v13288_v3 }
 0x433   :  { %v7254_v12 = vpop.f32.mrf.mxu3  ;;  %v6890_v13 = vpop.f32.mrf.mxu1 }
 0x434   :  { %v7217_v14 = vpop.f32.mrf.mxu0 }
 0x435   :  { %v12840_v14 = vld [vmem:[#allocation2] ss:$0 sm:$0xff] }
 0x439   :  { %v6851_v33 = vpop.f32.mrf.mxu2 }
 0x43b   :  { %v7256_v16 = vpop.f32.mrf.mxu3  ;;  %v7228_v19 = vpop.f32.mrf.mxu1 }
 0x43c   :  { %v7557_v62 = vpop.f32.mrf.mxu0 }
 0x441   :  { %v7189_v24 = vpop.f32.mrf.mxu2 }
 0x442   :  { %v7203_v17 = vadd.f32 %v13293_v0, %v7189_v24 }
 0x443   :  { %v7596_v2 = vpop.f32.mrf.mxu3  ;;  %v7230_v10 = vpop.f32.mrf.mxu1 }
 0x444   :  { %v7216_v30 = vadd.f32 %v7215_v1, %v7203_v17  ;;  %v7559_v32 = vpop.f32.mrf.mxu0 }
 0x446   :  { %v7258_v40 = vmax.f32 %v6850_v8, %v7216_v30 }
 0x449   :  { %v7191_v4 = vpop.f32.mrf.mxu2 }
 0x44b   :  { %v7598_v27 = vpop.f32.mrf.mxu3 }
 0x44c   :  { %v7570_v25 = vpop.f32.mrf.mxu1 }
 0x44d   :  { %v7609_v26 = vpop.f32.mrf.mxu0  ;;  %v7571_v3 = vadd.f32 %v7570_v25, %v7557_v62 }
 0x44e   :  { %v7610_v23 = vadd.f32 %v7609_v26, %v7596_v2 }
 0x451   :  { %v7241_v46 = vpop.f32.mrf.mxu2 }
 0x452   :  { %v7242_v15 = vadd.f32 %v7241_v46, %v7228_v19 }
 0x454   :  { %v7255_v56 = vadd.f32 %v7254_v12, %v7242_v15  ;;  %v7572_v42 = vpop.f32.mrf.mxu1 }
 0x455   :  { %v7938_v18 = vpop.f32.mrf.mxu3  ;;  %v7611_v28 = vpop.f32.mrf.mxu0 }
 0x456   :  { %v7259_v45 = vmax.f32 %v6889_v36, %v7255_v56  ;;  %v8009_v36 = vperm.slane %v8006_v21, 1 }
 0x459   :  { %v7243_v39 = vpop.f32.mrf.mxu2 }
 0x45d   :  { %v7940_v0 = vpop.f32.mrf.mxu3 }
 0x46c   :  { %v7622_v22 = vpop.f32.mrf.mxu1 }
 0x46d   :  { %v7951_v41 = vpop.f32.mrf.mxu0  ;;  %v7623_v31 = vadd.f32 %v7622_v22, %v7610_v23 }
 0x46f   :  { %v7627_v43 = vmax.f32 %v7259_v45, %v7623_v31 }
 0x471   :  { %v7583_v35 = vpop.f32.mrf.mxu2 }
 0x472   :  { %v7584_v48 = vadd.f32 %v7583_v35, %v7571_v3 }
 0x474   :  { %v7990_v34 = vpop.f32.mrf.mxu3  ;;  %v7626_v9 = vmax.f32 %v7258_v40, %v7584_v48  ;;  %v7624_v50 = vpop.f32.mrf.mxu1 }
 0x475   :  { %v7953_v44 = vpop.f32.mrf.mxu0 }
 0x479   :  { %v7585_v53 = vpop.f32.mrf.mxu2 }
 0x47c   :  { %v7992_v47 = vpop.f32.mrf.mxu3 }
 0x48c   :  { %v7964_v49 = vpop.f32.mrf.mxu1 }
 0x491   :  { %v7925_v38 = vpop.f32.mrf.mxu2 }
 0x492   :  { %v7939_v6 = vadd.f32 %v7938_v18, %v7925_v38 }
 0x494   :  { %v7952_v52 = vadd.f32 %v7951_v41, %v7939_v6  ;;  %v7966_v54 = vpop.f32.mrf.mxu1 }
 0x496   :  { %v7994_v55 = vmax.f32 %v7626_v9, %v7952_v52 }
 0x498   :  { %v8002_v60 = vadd.f32 %v7998_v58, %v7994_v55 }
 0x499   :  { %v7927_v57 = vpop.f32.mrf.mxu2 }
 0x49a   :  { %v8004_v37 = vmax.f32 %v8002_v60, 0.0 }
 0x49c   :  { %v8012_v8 = vmul.f32 %v8008_v20, %v8004_v37 }
 0x4b1   :  { %v7977_v59 = vpop.f32.mrf.mxu2 }
 0x4b2   :  { %v7978_v61 = vadd.f32 %v7977_v59, %v7964_v49 }
 0x4b4   :  { %v7991_v63 = vadd.f32 %v7990_v34, %v7978_v61 }
 0x4b6   :  { %v7995_v7 = vmax.f32 %v7627_v43, %v7991_v63 }
 0x4b8   :  { %v8003_v29 = vadd.f32 %v7999_v51, %v7995_v7 }
 0x4b9   :  { %v7979_v1 = vpop.f32.mrf.mxu2 }
 0x4ba   :  { %v8005_v11 = vmax.f32 %v8003_v29, 0.0 }
 0x4bc   :  { %v8013_v12 = vmul.f32 %v8009_v36, %v8005_v11 }
 0x4be   :  { %v8014_v13 = vadd.f32 %v8013_v12, %v8012_v8 }
 0x4c0   :  { %8015 = vadd.xlane.f32.xlu0 %v8014_v13 }
 0x533   :  { %v8016_v33 = vpop.xlane.xlu0 %8015 }
 0x534   :  { %v8021_v16 = vadd.f32 %v12840_v14, %v8016_v33 }
 0x536   :  { %8023 = vst.msk [vmem:[%s13311_s7] sm:$0xff] %vm8022_vm0, %v8021_v16 }
 0x537   :  { %8028 = vsyncpa [#allocation4], 1 }
 0x538   :  { %8029 = vsyncpa [#allocation6], 1 }
 0x539   :  { %8030 = vsyncpa [#allocation9], 1 }

</bundles_post_ra>
